<compile_context>
chip_gen: v6e
topology: v6e:2x2x1
jax: 0.10.0
libtpu: 0.0.40
codegen_flags: <defaults>
</compile_context>

<pallas_src>
import functools
import math

import jax
import jax.numpy as jnp
from jax.experimental import pallas as pl
from jax.experimental.pallas import tpu as pltpu  # noqa: F401  (TPU backend)

# ---------------- model hyper-parameters (small, consistent with module) ----
VOCAB = 50        # vocab_size
EMBED = 32        # embed_size (d_model)
HEADS = 4         # num_heads
DH = EMBED // HEADS
LAYERS = 2        # num_layers (encoder and decoder)
HIDDEN = 64       # hidden_size (dim_feedforward)
EPS = 1e-5        # PyTorch LayerNorm default eps

SLAB_W = 128      # lane width of both parameter slabs
EMB_ROWS = 64     # vocab rows padded for the one-hot embedding matmul
LOGIT_PAD = 128   # lane-dense padded logits width (sliced back to VOCAB)
FF_PAD = 128      # padded FFN hidden width (ReLU on full 128-lane vregs)


# ----------------------- static parameter-slab layout ------------------------
def _build_layout():
    """Row offsets of every weight matrix / parameter vector inside the slabs."""
    w_layout, v_layout = {}, {}
    w_off, v_off = 0, 0

    def add_w(name, k, n):
        nonlocal w_off
        w_layout[name] = (w_off, k, n)
        w_off += k

    def add_v(name, n):
        nonlocal v_off
        v_layout[name] = (v_off, n)
        v_off += 1

    def add_attn(pfx):
        for nm in ("wq", "wk", "wv", "wo"):
            add_w(pfx + nm, EMBED, EMBED)
        for nm in ("bq", "bk", "bv", "bo"):
            add_v(pfx + nm, EMBED)

    def add_ffn(pfx):
        add_w(pfx + "ff1", EMBED, HIDDEN)   # read full 128-wide (zero padded cols)
        add_w(pfx + "ff2", FF_PAD, EMBED)   # rows HIDDEN..127 stay zero
        add_v(pfx + "bff1", HIDDEN)
        add_v(pfx + "bff2", EMBED)

    for l in range(LAYERS):
        p = f"enc{l}."
        add_attn(p)
        add_ffn(p)
        for nm in ("ln1_g", "ln1_b", "ln2_g", "ln2_b"):
            add_v(p + nm, EMBED)
    for l in range(LAYERS):
        p = f"dec{l}."
        add_attn(p + "sa_")
        add_attn(p + "ca_")
        add_ffn(p)
        for nm in ("ln1_g", "ln1_b", "ln2_g", "ln2_b", "ln3_g", "ln3_b"):
            add_v(p + nm, EMBED)
    add_w("fc_w", EMBED, VOCAB)
    for nm in ("enc_norm_g", "enc_norm_b", "dec_norm_g", "dec_norm_b"):
        add_v(nm, EMBED)
    add_v("fc_b", VOCAB)
    return w_layout, w_off, v_layout, v_off


W_LAYOUT, W_ROWS, V_LAYOUT, V_ROWS = _build_layout()


# ------------------------------ fused kernel --------------------------------
def _transformer_kernel(ids_ref, emb_ref, wslab_ref, bslab_ref, logits_ref,
                        *, B, S, T):
    f32, bf16 = jnp.float32, jnp.bfloat16

    def wmat(name, full=False):
        off, k, n = W_LAYOUT[name]
        m = wslab_ref[pl.ds(off, k), :]            # [k, 128] bf16
        return m if full else m[:, :n]

    def vrow(name, full=False):
        r, n = V_LAYOUT[name]
        row = bslab_ref[pl.ds(r, 1), :]            # [1, 128] f32
        return row if full else row[:, :n]

    def proj(x, wname, bname, full=False):
        return (jnp.dot(x.astype(bf16), wmat(wname, full),
                        preferred_element_type=f32) + vrow(bname, full))

    def layernorm(x, gname, bname):
        mu = jnp.mean(x, axis=-1, keepdims=True)
        d = x - mu
        var = jnp.mean(d * d, axis=-1, keepdims=True)
        return d * jax.lax.rsqrt(var + EPS) * vrow(gname) + vrow(bname)

    def split_heads(x, b, l):
        # [b*l, E] -> [H*b, l, DH]   (z = h*b + batch)
        parts = [x[:, h * DH:(h + 1) * DH].reshape(b, l, DH) for h in range(HEADS)]
        return jnp.concatenate(parts, axis=0)

    def merge_heads(o, b, l):
        # [H*b, l, DH] -> [b*l, E]
        parts = [o[h * b:(h + 1) * b] for h in range(HEADS)]
        return jnp.concatenate(parts, axis=-1).reshape(b * l, EMBED)

    def mha(xq, xkv, pfx, b, lq, lk):
        q = split_heads(proj(xq, pfx + "wq", pfx + "bq"), b, lq)
        k = split_heads(proj(xkv, pfx + "wk", pfx + "bk"), b, lk)
        v = split_heads(proj(xkv, pfx + "wv", pfx + "bv"), b, lk)
        # one batched scores matmul + ONE softmax + one batched PV matmul
        s = jnp.einsum("zqd,zkd->zqk", q.astype(bf16), k.astype(bf16),
                       preferred_element_type=f32) * (1.0 / math.sqrt(DH))
        m = jnp.max(s, axis=-1, keepdims=True)
        p = jnp.exp(s - m)
        p = p * pl.reciprocal(jnp.sum(p, axis=-1, keepdims=True), approx=False)
        o = jnp.einsum("zqk,zkd->zqd", p.astype(bf16), v.astype(bf16),
                       preferred_element_type=f32)
        o = merge_heads(o, b, lq)
        return (jnp.dot(o.astype(bf16), wmat(pfx + "wo"),
                        preferred_element_type=f32) + vrow(pfx + "bo"))

    def ffn(x, pfx):
        h = proj(x, pfx + "ff1", pfx + "bff1", full=True)   # [M, 128], cols>=64 are 0
        h = jnp.maximum(h, 0.0)                             # unmasked full-vreg ReLU
        return (jnp.dot(h.astype(bf16), wmat(pfx + "ff2"),
                        preferred_element_type=f32) + vrow(pfx + "bff2"))

    # ------------ embedding via one-hot matmul (src & tgt tokens at once) ----
    m_all = B * (S + T)
    ids = ids_ref[...]                                                # [m_all, 1]
    iota = jax.lax.broadcasted_iota(jnp.int32, (m_all, EMB_ROWS), 1)
    onehot = (iota == ids).astype(f32)
    emb_all = jnp.dot(onehot, emb_ref[...], preferred_element_type=f32)
    x = emb_all[:B * S]                                               # [B*S, E]
    y = emb_all[B * S:]                                               # [B*T, E]

    # ------------------------------- encoder --------------------------------
    for l in range(LAYERS):                                           # static unroll
        p = f"enc{l}."
        x = layernorm(x + mha(x, x, p, B, S, S), p + "ln1_g", p + "ln1_b")
        x = layernorm(x + ffn(x, p), p + "ln2_g", p + "ln2_b")
    mem = layernorm(x, "enc_norm_g", "enc_norm_b")                    # [B*S, E]

    # ------------------------------- decoder --------------------------------
    for l in range(LAYERS):
        p = f"dec{l}."
        y = layernorm(y + mha(y, y, p + "sa_", B, T, T), p + "ln1_g", p + "ln1_b")
        y = layernorm(y + mha(y, mem, p + "ca_", B, T, S), p + "ln2_g", p + "ln2_b")
        y = layernorm(y + ffn(y, p), p + "ln3_g", p + "ln3_b")
    y = layernorm(y, "dec_norm_g", "dec_norm_b")                      # [B*T, E]

    # --------------------- vocab head (lane-dense, padded) ------------------
    logits_ref[...] = (jnp.dot(y.astype(bf16), wmat("fc_w", full=True),
                               preferred_element_type=f32)
                       + vrow("fc_b", full=True)).astype(logits_ref.dtype)


# ------------------------------ forward wrapper ------------------------------
def transformer_forward(packed, src_ids, tgt_ids):
    B, S = src_ids.shape
    _, T = tgt_ids.shape
    # single id operand: [B*(S+T), 1] int32 (embedding lookup happens in-kernel)
    ids = jnp.concatenate(
        [src_ids.reshape(-1), tgt_ids.reshape(-1)]).astype(jnp.int32).reshape(-1, 1)

    kernel = functools.partial(_transformer_kernel, B=B, S=S, T=T)
    logits_pad = pl.pallas_call(
        kernel,
        out_shape=jax.ShapeDtypeStruct((B * T, LOGIT_PAD), jnp.float32),
    )(ids, packed["emb"], packed["wslab"], packed["bslab"])
    return logits_pad[:, :VOCAB].reshape(B, T, VOCAB)


# ------------------------------- parameters ----------------------------------
def init_params(key):
    """Parameters in PyTorch layout (Linear weights are [out, in])."""
    keys = iter(jax.random.split(key, 256))

    def w(shape, scale=0.02):
        return scale * jax.random.normal(next(keys), shape, jnp.float32)

    def zeros(shape):
        return jnp.zeros(shape, jnp.float32)

    def ones(shape):
        return jnp.ones(shape, jnp.float32)

    def mha_params():
        return dict(in_w=w((3 * EMBED, EMBED)), in_b=zeros((3 * EMBED,)),
                    out_w=w((EMBED, EMBED)), out_b=zeros((EMBED,)))

    def enc_layer():
        return dict(sa=mha_params(),
                    lin1_w=w((HIDDEN, EMBED)), lin1_b=zeros((HIDDEN,)),
                    lin2_w=w((EMBED, HIDDEN)), lin2_b=zeros((EMBED,)),
                    n1_g=ones((EMBED,)), n1_b=zeros((EMBED,)),
                    n2_g=ones((EMBED,)), n2_b=zeros((EMBED,)))

    def dec_layer():
        d = enc_layer()
        d.update(ca=mha_params(), n3_g=ones((EMBED,)), n3_b=zeros((EMBED,)))
        return d

    return dict(
        embedding=w((VOCAB, EMBED), 1.0),
        enc=[enc_layer() for _ in range(LAYERS)],
        dec=[dec_layer() for _ in range(LAYERS)],
        enc_norm_g=ones((EMBED,)), enc_norm_b=zeros((EMBED,)),
        dec_norm_g=ones((EMBED,)), dec_norm_b=zeros((EMBED,)),
        fc_w=w((VOCAB, EMBED)), fc_b=zeros((VOCAB,)),
    )


def pack_params(p):
    """One-time packing: pre-transpose to [in, out], pre-split QKV per head
    group, cast matmul weights to bf16, and place everything into two slabs."""
    wslab = jnp.zeros((W_ROWS, SLAB_W), jnp.bfloat16)
    bslab = jnp.zeros((V_ROWS, SLAB_W), jnp.float32)

    def put_w(slab, name, mat):            # mat: [k, n] in (in, out) layout
        off, _, _ = W_LAYOUT[name]
        kk, nn = mat.shape
        return slab.at[off:off + kk, :nn].set(mat.astype(jnp.bfloat16))

    def put_v(slab, name, vec):
        r, _ = V_LAYOUT[name]
        return slab.at[r, :vec.shape[0]].set(vec.astype(jnp.float32))

    def put_attn(wslab, bslab, pfx, mha):
        in_w, in_b = mha["in_w"], mha["in_b"]            # [3E, E], [3E]
        wq, wk, wv = in_w[:EMBED], in_w[EMBED:2 * EMBED], in_w[2 * EMBED:]
        bq, bk, bv = in_b[:EMBED], in_b[EMBED:2 * EMBED], in_b[2 * EMBED:]
        wslab = put_w(wslab, pfx + "wq", wq.T)
        wslab = put_w(wslab, pfx + "wk", wk.T)
        wslab = put_w(wslab, pfx + "wv", wv.T)
        wslab = put_w(wslab, pfx + "wo", mha["out_w"].T)
        bslab = put_v(bslab, pfx + "bq", bq)
        bslab = put_v(bslab, pfx + "bk", bk)
        bslab = put_v(bslab, pfx + "bv", bv)
        bslab = put_v(bslab, pfx + "bo", mha["out_b"])
        return wslab, bslab

    def put_ffn_ln(wslab, bslab, pfx, layer, ln_names):
        wslab = put_w(wslab, pfx + "ff1", layer["lin1_w"].T)
        wslab = put_w(wslab, pfx + "ff2", layer["lin2_w"].T)   # rows >= HIDDEN stay 0
        bslab = put_v(bslab, pfx + "bff1", layer["lin1_b"])
        bslab = put_v(bslab, pfx + "bff2", layer["lin2_b"])
        for lname, pkey in ln_names:
            bslab = put_v(bslab, pfx + lname, layer[pkey])
        return wslab, bslab

    for l, layer in enumerate(p["enc"]):
        pfx = f"enc{l}."
        wslab, bslab = put_attn(wslab, bslab, pfx, layer["sa"])
        wslab, bslab = put_ffn_ln(wslab, bslab, pfx, layer,
                                  [("ln1_g", "n1_g"), ("ln1_b", "n1_b"),
                                   ("ln2_g", "n2_g"), ("ln2_b", "n2_b")])
    for l, layer in enumerate(p["dec"]):
        pfx = f"dec{l}."
        wslab, bslab = put_attn(wslab, bslab, pfx + "sa_", layer["sa"])
        wslab, bslab = put_attn(wslab, bslab, pfx + "ca_", layer["ca"])
        wslab, bslab = put_ffn_ln(wslab, bslab, pfx, layer,
                                  [("ln1_g", "n1_g"), ("ln1_b", "n1_b"),
                                   ("ln2_g", "n2_g"), ("ln2_b", "n2_b"),
                                   ("ln3_g", "n3_g"), ("ln3_b", "n3_b")])

    wslab = put_w(wslab, "fc_w", p["fc_w"].T)                  # [E, VOCAB], rest 0
    bslab = put_v(bslab, "fc_b", p["fc_b"])
    bslab = put_v(bslab, "enc_norm_g", p["enc_norm_g"])
    bslab = put_v(bslab, "enc_norm_b", p["enc_norm_b"])
    bslab = put_v(bslab, "dec_norm_g", p["dec_norm_g"])
    bslab = put_v(bslab, "dec_norm_b", p["dec_norm_b"])

    # embedding table kept f32 (exact one-hot gather), padded rows are zero
    emb = jnp.zeros((EMB_ROWS, EMBED), jnp.float32).at[:VOCAB].set(p["embedding"])
    return dict(emb=emb, wslab=wslab, bslab=bslab)


# ----------------------------------- main -------------------------------------
if __name__ == "__main__":
    key = jax.random.PRNGKey(0)
    pkey, skey, tkey = jax.random.split(key, 3)

    params = init_params(pkey)
    packed = pack_params(params)          # pre-transpose / split / pad / pack once

    B, SRC_LEN, TGT_LEN = 2, 12, 8
    src_ids = jax.random.randint(skey, (B, SRC_LEN), 0, VOCAB, dtype=jnp.int32)
    tgt_ids = jax.random.randint(tkey, (B, TGT_LEN), 0, VOCAB, dtype=jnp.int32)

    fwd = jax.jit(transformer_forward)
    logits = jax.block_until_ready(fwd(packed, src_ids, tgt_ids))

    assert logits.shape == (B, TGT_LEN, VOCAB)
    assert bool(jnp.all(jnp.isfinite(logits)))
    print("KERNEL_OK")
</pallas_src>

<mosaic_0001>
module attributes {stable_mosaic.version = 11 : i64} {
  func.func @_transformer_kernel(%arg0: memref<40x1xi32, #tpu.memory_space<vmem>>, %arg1: memref<64x32xf32, #tpu.memory_space<vmem>>, %arg2: memref<1440x128xbf16, #tpu.memory_space<vmem>>, %arg3: memref<57x128xf32, #tpu.memory_space<vmem>>, %arg4: memref<16x128xf32, #tpu.memory_space<vmem>>) attributes {dimension_semantics = [], scalar_prefetch = 0 : i64, scratch_operands = 0 : i64, tpu.core_type = #tpu.core_type<tc>} {
    %c0 = arith.constant 0 : index
    %c0_0 = arith.constant 0 : index
    %0 = vector.load %arg0[%c0, %c0_0] : memref<40x1xi32, #tpu.memory_space<vmem>>, vector<40x1xi32>
    %1 = tpu.iota {dimensions = array<i32: 1>} : vector<40x64xi32>
    %2 = vector.broadcast %0 : vector<40x1xi32> to vector<40x64xi32>
    %3 = arith.cmpi eq, %1, %2 : vector<40x64xi32>
    %4 = arith.extui %3 : vector<40x64xi1> to vector<40x64xi32>
    %5 = arith.sitofp %4 : vector<40x64xi32> to vector<40x64xf32>
    %c0_1 = arith.constant 0 : index
    %c0_2 = arith.constant 0 : index
    %6 = vector.load %arg1[%c0_1, %c0_2] : memref<64x32xf32, #tpu.memory_space<vmem>>, vector<64x32xf32>
    %cst = arith.constant dense<0.000000e+00> : vector<40x32xf32>
    %7 = tpu.matmul %5, %6, %cst {dimension_numbers = #tpu.dot_dimension_numbers<[1], [0], [0], [1], [0, 0, 1, 1], [], []>} : vector<40x64xf32>, vector<64x32xf32>, vector<40x32xf32> -> vector<40x32xf32>
    %8 = vector.extract_strided_slice %7 {offsets = [0, 0], sizes = [24, 32], strides = [1, 1]} : vector<40x32xf32> to vector<24x32xf32>
    %9 = vector.extract_strided_slice %7 {offsets = [24, 0], sizes = [16, 32], strides = [1, 1]} : vector<40x32xf32> to vector<16x32xf32>
    %10 = arith.truncf %8 : vector<24x32xf32> to vector<24x32xbf16>
    %c0_3 = arith.constant 0 : index
    %c0_4 = arith.constant 0 : index
    %11 = vector.load %arg2[%c0_3, %c0_4] : memref<1440x128xbf16, #tpu.memory_space<vmem>>, vector<32x128xbf16>
    %12 = vector.extract_strided_slice %11 {offsets = [0, 0], sizes = [32, 32], strides = [1, 1]} : vector<32x128xbf16> to vector<32x32xbf16>
    %cst_5 = arith.constant dense<0.000000e+00> : vector<24x32xf32>
    %13 = tpu.matmul %10, %12, %cst_5 {dimension_numbers = #tpu.dot_dimension_numbers<[1], [0], [0], [1], [0, 0, 1, 1], [], []>} : vector<24x32xbf16>, vector<32x32xbf16>, vector<24x32xf32> -> vector<24x32xf32>
    %c0_6 = arith.constant 0 : index
    %c0_7 = arith.constant 0 : index
    %14 = vector.load %arg3[%c0_6, %c0_7] : memref<57x128xf32, #tpu.memory_space<vmem>>, vector<1x128xf32>
    %15 = vector.extract_strided_slice %14 {offsets = [0, 0], sizes = [1, 32], strides = [1, 1]} : vector<1x128xf32> to vector<1x32xf32>
    %16 = vector.broadcast %15 : vector<1x32xf32> to vector<24x32xf32>
    %17 = arith.addf %13, %16 : vector<24x32xf32>
    %18 = vector.extract_strided_slice %17 {offsets = [0, 0], sizes = [24, 8], strides = [1, 1]} : vector<24x32xf32> to vector<24x8xf32>
    %19 = vector.shape_cast %18 : vector<24x8xf32> to vector<2x12x8xf32>
    %20 = vector.extract_strided_slice %17 {offsets = [0, 8], sizes = [24, 8], strides = [1, 1]} : vector<24x32xf32> to vector<24x8xf32>
    %21 = vector.shape_cast %20 : vector<24x8xf32> to vector<2x12x8xf32>
    %22 = vector.extract_strided_slice %17 {offsets = [0, 16], sizes = [24, 8], strides = [1, 1]} : vector<24x32xf32> to vector<24x8xf32>
    %23 = vector.shape_cast %22 : vector<24x8xf32> to vector<2x12x8xf32>
    %24 = vector.extract_strided_slice %17 {offsets = [0, 24], sizes = [24, 8], strides = [1, 1]} : vector<24x32xf32> to vector<24x8xf32>
    %25 = vector.shape_cast %24 : vector<24x8xf32> to vector<2x12x8xf32>
    %26 = tpu.concatenate %19, %21, %23, %25 in 0 : vector<2x12x8xf32>, vector<2x12x8xf32>, vector<2x12x8xf32>, vector<2x12x8xf32> -> vector<8x12x8xf32>
    %27 = arith.truncf %8 : vector<24x32xf32> to vector<24x32xbf16>
    %c32 = arith.constant 32 : index
    %c0_8 = arith.constant 0 : index
    %28 = vector.load %arg2[%c32, %c0_8] : memref<1440x128xbf16, #tpu.memory_space<vmem>>, vector<32x128xbf16>
    %29 = vector.extract_strided_slice %28 {offsets = [0, 0], sizes = [32, 32], strides = [1, 1]} : vector<32x128xbf16> to vector<32x32xbf16>
    %cst_9 = arith.constant dense<0.000000e+00> : vector<24x32xf32>
    %30 = tpu.matmul %27, %29, %cst_9 {dimension_numbers = #tpu.dot_dimension_numbers<[1], [0], [0], [1], [0, 0, 1, 1], [], []>} : vector<24x32xbf16>, vector<32x32xbf16>, vector<24x32xf32> -> vector<24x32xf32>
    %c1 = arith.constant 1 : index
    %c0_10 = arith.constant 0 : index
    %31 = vector.load %arg3[%c1, %c0_10] : memref<57x128xf32, #tpu.memory_space<vmem>>, vector<1x128xf32>
    %32 = vector.extract_strided_slice %31 {offsets = [0, 0], sizes = [1, 32], strides = [1, 1]} : vector<1x128xf32> to vector<1x32xf32>
    %33 = vector.broadcast %32 : vector<1x32xf32> to vector<24x32xf32>
    %34 = arith.addf %30, %33 : vector<24x32xf32>
    %35 = vector.extract_strided_slice %34 {offsets = [0, 0], sizes = [24, 8], strides = [1, 1]} : vector<24x32xf32> to vector<24x8xf32>
    %36 = vector.shape_cast %35 : vector<24x8xf32> to vector<2x12x8xf32>
    %37 = vector.extract_strided_slice %34 {offsets = [0, 8], sizes = [24, 8], strides = [1, 1]} : vector<24x32xf32> to vector<24x8xf32>
    %38 = vector.shape_cast %37 : vector<24x8xf32> to vector<2x12x8xf32>
    %39 = vector.extract_strided_slice %34 {offsets = [0, 16], sizes = [24, 8], strides = [1, 1]} : vector<24x32xf32> to vector<24x8xf32>
    %40 = vector.shape_cast %39 : vector<24x8xf32> to vector<2x12x8xf32>
    %41 = vector.extract_strided_slice %34 {offsets = [0, 24], sizes = [24, 8], strides = [1, 1]} : vector<24x32xf32> to vector<24x8xf32>
    %42 = vector.shape_cast %41 : vector<24x8xf32> to vector<2x12x8xf32>
    %43 = tpu.concatenate %36, %38, %40, %42 in 0 : vector<2x12x8xf32>, vector<2x12x8xf32>, vector<2x12x8xf32>, vector<2x12x8xf32> -> vector<8x12x8xf32>
    %44 = arith.truncf %8 : vector<24x32xf32> to vector<24x32xbf16>
    %c64 = arith.constant 64 : index
    %c0_11 = arith.constant 0 : index
    %45 = vector.load %arg2[%c64, %c0_11] : memref<1440x128xbf16, #tpu.memory_space<vmem>>, vector<32x128xbf16>
    %46 = vector.extract_strided_slice %45 {offsets = [0, 0], sizes = [32, 32], strides = [1, 1]} : vector<32x128xbf16> to vector<32x32xbf16>
    %cst_12 = arith.constant dense<0.000000e+00> : vector<24x32xf32>
    %47 = tpu.matmul %44, %46, %cst_12 {dimension_numbers = #tpu.dot_dimension_numbers<[1], [0], [0], [1], [0, 0, 1, 1], [], []>} : vector<24x32xbf16>, vector<32x32xbf16>, vector<24x32xf32> -> vector<24x32xf32>
    %c2 = arith.constant 2 : index
    %c0_13 = arith.constant 0 : index
    %48 = vector.load %arg3[%c2, %c0_13] : memref<57x128xf32, #tpu.memory_space<vmem>>, vector<1x128xf32>
    %49 = vector.extract_strided_slice %48 {offsets = [0, 0], sizes = [1, 32], strides = [1, 1]} : vector<1x128xf32> to vector<1x32xf32>
    %50 = vector.broadcast %49 : vector<1x32xf32> to vector<24x32xf32>
    %51 = arith.addf %47, %50 : vector<24x32xf32>
    %52 = vector.extract_strided_slice %51 {offsets = [0, 0], sizes = [24, 8], strides = [1, 1]} : vector<24x32xf32> to vector<24x8xf32>
    %53 = vector.shape_cast %52 : vector<24x8xf32> to vector<2x12x8xf32>
    %54 = vector.extract_strided_slice %51 {offsets = [0, 8], sizes = [24, 8], strides = [1, 1]} : vector<24x32xf32> to vector<24x8xf32>
    %55 = vector.shape_cast %54 : vector<24x8xf32> to vector<2x12x8xf32>
    %56 = vector.extract_strided_slice %51 {offsets = [0, 16], sizes = [24, 8], strides = [1, 1]} : vector<24x32xf32> to vector<24x8xf32>
    %57 = vector.shape_cast %56 : vector<24x8xf32> to vector<2x12x8xf32>
    %58 = vector.extract_strided_slice %51 {offsets = [0, 24], sizes = [24, 8], strides = [1, 1]} : vector<24x32xf32> to vector<24x8xf32>
    %59 = vector.shape_cast %58 : vector<24x8xf32> to vector<2x12x8xf32>
    %60 = tpu.concatenate %53, %55, %57, %59 in 0 : vector<2x12x8xf32>, vector<2x12x8xf32>, vector<2x12x8xf32>, vector<2x12x8xf32> -> vector<8x12x8xf32>
    %61 = arith.truncf %26 : vector<8x12x8xf32> to vector<8x12x8xbf16>
    %62 = arith.truncf %43 : vector<8x12x8xf32> to vector<8x12x8xbf16>
    "tpu.trace_start"() <{level = 10 : i32, message = "zqd,zkd->zqk"}> : () -> ()
    %cst_14 = arith.constant dense<0.000000e+00> : vector<8x12x12xf32>
    %63 = tpu.matmul %61, %62, %cst_14 {dimension_numbers = #tpu.dot_dimension_numbers<[2], [2], [1], [1], [0, 0, 0, 1, 1, 1], [0], [0]>} : vector<8x12x8xbf16>, vector<8x12x8xbf16>, vector<8x12x12xf32> -> vector<8x12x12xf32>
    "tpu.trace_stop"() : () -> ()
    %cst_15 = arith.constant 0.353553385 : f32
    %64 = vector.broadcast %cst_15 : f32 to vector<8x12x12xf32>
    %65 = arith.mulf %63, %64 : vector<8x12x12xf32>
    %cst_16 = arith.constant dense<0xFF800000> : vector<8x12xf32>
    %66 = vector.multi_reduction <maximumf>, %65, %cst_16 [2] : vector<8x12x12xf32> to vector<8x12xf32>
    %67 = vector.shape_cast %66 : vector<8x12xf32> to vector<8x12x1xf32>
    %68 = vector.broadcast %67 : vector<8x12x1xf32> to vector<8x12x12xf32>
    %69 = arith.subf %65, %68 : vector<8x12x12xf32>
    %70 = math.exp %69 : vector<8x12x12xf32>
    %cst_17 = arith.constant dense<0.000000e+00> : vector<8x12xf32>
    %71 = vector.multi_reduction <add>, %70, %cst_17 [2] : vector<8x12x12xf32> to vector<8x12xf32>
    %72 = vector.shape_cast %71 : vector<8x12xf32> to vector<8x12x1xf32>
    %73 = tpu.reciprocal %72 : vector<8x12x1xf32> -> vector<8x12x1xf32>
    %74 = vector.broadcast %73 : vector<8x12x1xf32> to vector<8x12x12xf32>
    %75 = arith.mulf %70, %74 : vector<8x12x12xf32>
    %76 = arith.truncf %75 : vector<8x12x12xf32> to vector<8x12x12xbf16>
    %77 = arith.truncf %60 : vector<8x12x8xf32> to vector<8x12x8xbf16>
    "tpu.trace_start"() <{level = 10 : i32, message = "zqk,zkd->zqd"}> : () -> ()
    %cst_18 = arith.constant dense<0.000000e+00> : vector<8x12x8xf32>
    %78 = tpu.matmul %76, %77, %cst_18 {dimension_numbers = #tpu.dot_dimension_numbers<[2], [1], [1], [2], [0, 0, 0, 1, 1, 2], [0], [0]>} : vector<8x12x12xbf16>, vector<8x12x8xbf16>, vector<8x12x8xf32> -> vector<8x12x8xf32>
    "tpu.trace_stop"() : () -> ()
    %79 = vector.extract_strided_slice %78 {offsets = [0, 0, 0], sizes = [2, 12, 8], strides = [1, 1, 1]} : vector<8x12x8xf32> to vector<2x12x8xf32>
    %80 = vector.extract_strided_slice %78 {offsets = [2, 0, 0], sizes = [2, 12, 8], strides = [1, 1, 1]} : vector<8x12x8xf32> to vector<2x12x8xf32>
    %81 = vector.extract_strided_slice %78 {offsets = [4, 0, 0], sizes = [2, 12, 8], strides = [1, 1, 1]} : vector<8x12x8xf32> to vector<2x12x8xf32>
    %82 = vector.extract_strided_slice %78 {offsets = [6, 0, 0], sizes = [2, 12, 8], strides = [1, 1, 1]} : vector<8x12x8xf32> to vector<2x12x8xf32>
    %83 = tpu.concatenate %79, %80, %81, %82 in 2 : vector<2x12x8xf32>, vector<2x12x8xf32>, vector<2x12x8xf32>, vector<2x12x8xf32> -> vector<2x12x32xf32>
    %84 = vector.shape_cast %83 : vector<2x12x32xf32> to vector<24x32xf32>
    %85 = arith.truncf %84 : vector<24x32xf32> to vector<24x32xbf16>
    %c96 = arith.constant 96 : index
    %c0_19 = arith.constant 0 : index
    %86 = vector.load %arg2[%c96, %c0_19] : memref<1440x128xbf16, #tpu.memory_space<vmem>>, vector<32x128xbf16>
    %87 = vector.extract_strided_slice %86 {offsets = [0, 0], sizes = [32, 32], strides = [1, 1]} : vector<32x128xbf16> to vector<32x32xbf16>
    %cst_20 = arith.constant dense<0.000000e+00> : vector<24x32xf32>
    %88 = tpu.matmul %85, %87, %cst_20 {dimension_numbers = #tpu.dot_dimension_numbers<[1], [0], [0], [1], [0, 0, 1, 1], [], []>} : vector<24x32xbf16>, vector<32x32xbf16>, vector<24x32xf32> -> vector<24x32xf32>
    %c3 = arith.constant 3 : index
    %c0_21 = arith.constant 0 : index
    %89 = vector.load %arg3[%c3, %c0_21] : memref<57x128xf32, #tpu.memory_space<vmem>>, vector<1x128xf32>
    %90 = vector.extract_strided_slice %89 {offsets = [0, 0], sizes = [1, 32], strides = [1, 1]} : vector<1x128xf32> to vector<1x32xf32>
    %91 = vector.broadcast %90 : vector<1x32xf32> to vector<24x32xf32>
    %92 = arith.addf %88, %91 : vector<24x32xf32>
    %93 = arith.addf %8, %92 : vector<24x32xf32>
    %cst_22 = arith.constant dense<0.000000e+00> : vector<24xf32>
    %94 = vector.multi_reduction <add>, %93, %cst_22 [1] : vector<24x32xf32> to vector<24xf32>
    %95 = vector.shape_cast %94 : vector<24xf32> to vector<24x1xf32>
    %cst_23 = arith.constant 3.200000e+01 : f32
    %96 = vector.broadcast %cst_23 : f32 to vector<24x1xf32>
    %97 = arith.divf %95, %96 : vector<24x1xf32>
    %98 = vector.broadcast %97 : vector<24x1xf32> to vector<24x32xf32>
    %99 = arith.subf %93, %98 : vector<24x32xf32>
    %100 = arith.mulf %99, %99 : vector<24x32xf32>
    %cst_24 = arith.constant dense<0.000000e+00> : vector<24xf32>
    %101 = vector.multi_reduction <add>, %100, %cst_24 [1] : vector<24x32xf32> to vector<24xf32>
    %102 = vector.shape_cast %101 : vector<24xf32> to vector<24x1xf32>
    %cst_25 = arith.constant 3.200000e+01 : f32
    %103 = vector.broadcast %cst_25 : f32 to vector<24x1xf32>
    %104 = arith.divf %102, %103 : vector<24x1xf32>
    %cst_26 = arith.constant 9.99999974E-6 : f32
    %105 = vector.broadcast %cst_26 : f32 to vector<24x1xf32>
    %106 = arith.addf %104, %105 : vector<24x1xf32>
    %107 = math.rsqrt %106 : vector<24x1xf32>
    %108 = vector.broadcast %107 : vector<24x1xf32> to vector<24x32xf32>
    %109 = arith.mulf %99, %108 : vector<24x32xf32>
    %c6 = arith.constant 6 : index
    %c0_27 = arith.constant 0 : index
    %110 = vector.load %arg3[%c6, %c0_27] : memref<57x128xf32, #tpu.memory_space<vmem>>, vector<1x128xf32>
    %111 = vector.extract_strided_slice %110 {offsets = [0, 0], sizes = [1, 32], strides = [1, 1]} : vector<1x128xf32> to vector<1x32xf32>
    %112 = vector.broadcast %111 : vector<1x32xf32> to vector<24x32xf32>
    %113 = arith.mulf %109, %112 : vector<24x32xf32>
    %c7 = arith.constant 7 : index
    %c0_28 = arith.constant 0 : index
    %114 = vector.load %arg3[%c7, %c0_28] : memref<57x128xf32, #tpu.memory_space<vmem>>, vector<1x128xf32>
    %115 = vector.extract_strided_slice %114 {offsets = [0, 0], sizes = [1, 32], strides = [1, 1]} : vector<1x128xf32> to vector<1x32xf32>
    %116 = vector.broadcast %115 : vector<1x32xf32> to vector<24x32xf32>
    %117 = arith.addf %113, %116 : vector<24x32xf32>
    %118 = arith.truncf %117 : vector<24x32xf32> to vector<24x32xbf16>
    %c128 = arith.constant 128 : index
    %c0_29 = arith.constant 0 : index
    %119 = vector.load %arg2[%c128, %c0_29] : memref<1440x128xbf16, #tpu.memory_space<vmem>>, vector<32x128xbf16>
    %cst_30 = arith.constant dense<0.000000e+00> : vector<24x128xf32>
    %120 = tpu.matmul %118, %119, %cst_30 {dimension_numbers = #tpu.dot_dimension_numbers<[1], [0], [0], [1], [0, 0, 1, 1], [], []>} : vector<24x32xbf16>, vector<32x128xbf16>, vector<24x128xf32> -> vector<24x128xf32>
    %c4 = arith.constant 4 : index
    %c0_31 = arith.constant 0 : index
    %121 = vector.load %arg3[%c4, %c0_31] : memref<57x128xf32, #tpu.memory_space<vmem>>, vector<1x128xf32>
    %122 = vector.broadcast %121 : vector<1x128xf32> to vector<24x128xf32>
    %123 = arith.addf %120, %122 : vector<24x128xf32>
    %cst_32 = arith.constant 0.000000e+00 : f32
    %124 = vector.broadcast %cst_32 : f32 to vector<24x128xf32>
    %125 = arith.maximumf %123, %124 : vector<24x128xf32>
    %126 = arith.truncf %125 : vector<24x128xf32> to vector<24x128xbf16>
    %c160 = arith.constant 160 : index
    %c0_33 = arith.constant 0 : index
    %127 = vector.load %arg2[%c160, %c0_33] : memref<1440x128xbf16, #tpu.memory_space<vmem>>, vector<128x128xbf16>
    %128 = vector.extract_strided_slice %127 {offsets = [0, 0], sizes = [128, 32], strides = [1, 1]} : vector<128x128xbf16> to vector<128x32xbf16>
    %cst_34 = arith.constant dense<0.000000e+00> : vector<24x32xf32>
    %129 = tpu.matmul %126, %128, %cst_34 {dimension_numbers = #tpu.dot_dimension_numbers<[1], [0], [0], [1], [0, 0, 1, 1], [], []>} : vector<24x128xbf16>, vector<128x32xbf16>, vector<24x32xf32> -> vector<24x32xf32>
    %c5 = arith.constant 5 : index
    %c0_35 = arith.constant 0 : index
    %130 = vector.load %arg3[%c5, %c0_35] : memref<57x128xf32, #tpu.memory_space<vmem>>, vector<1x128xf32>
    %131 = vector.extract_strided_slice %130 {offsets = [0, 0], sizes = [1, 32], strides = [1, 1]} : vector<1x128xf32> to vector<1x32xf32>
    %132 = vector.broadcast %131 : vector<1x32xf32> to vector<24x32xf32>
    %133 = arith.addf %129, %132 : vector<24x32xf32>
    %134 = arith.addf %117, %133 : vector<24x32xf32>
    %cst_36 = arith.constant dense<0.000000e+00> : vector<24xf32>
    %135 = vector.multi_reduction <add>, %134, %cst_36 [1] : vector<24x32xf32> to vector<24xf32>
    %136 = vector.shape_cast %135 : vector<24xf32> to vector<24x1xf32>
    %cst_37 = arith.constant 3.200000e+01 : f32
    %137 = vector.broadcast %cst_37 : f32 to vector<24x1xf32>
    %138 = arith.divf %136, %137 : vector<24x1xf32>
    %139 = vector.broadcast %138 : vector<24x1xf32> to vector<24x32xf32>
    %140 = arith.subf %134, %139 : vector<24x32xf32>
    %141 = arith.mulf %140, %140 : vector<24x32xf32>
    %cst_38 = arith.constant dense<0.000000e+00> : vector<24xf32>
    %142 = vector.multi_reduction <add>, %141, %cst_38 [1] : vector<24x32xf32> to vector<24xf32>
    %143 = vector.shape_cast %142 : vector<24xf32> to vector<24x1xf32>
    %cst_39 = arith.constant 3.200000e+01 : f32
    %144 = vector.broadcast %cst_39 : f32 to vector<24x1xf32>
    %145 = arith.divf %143, %144 : vector<24x1xf32>
    %cst_40 = arith.constant 9.99999974E-6 : f32
    %146 = vector.broadcast %cst_40 : f32 to vector<24x1xf32>
    %147 = arith.addf %145, %146 : vector<24x1xf32>
    %148 = math.rsqrt %147 : vector<24x1xf32>
    %149 = vector.broadcast %148 : vector<24x1xf32> to vector<24x32xf32>
    %150 = arith.mulf %140, %149 : vector<24x32xf32>
    %c8 = arith.constant 8 : index
    %c0_41 = arith.constant 0 : index
    %151 = vector.load %arg3[%c8, %c0_41] : memref<57x128xf32, #tpu.memory_space<vmem>>, vector<1x128xf32>
    %152 = vector.extract_strided_slice %151 {offsets = [0, 0], sizes = [1, 32], strides = [1, 1]} : vector<1x128xf32> to vector<1x32xf32>
    %153 = vector.broadcast %152 : vector<1x32xf32> to vector<24x32xf32>
    %154 = arith.mulf %150, %153 : vector<24x32xf32>
    %c9 = arith.constant 9 : index
    %c0_42 = arith.constant 0 : index
    %155 = vector.load %arg3[%c9, %c0_42] : memref<57x128xf32, #tpu.memory_space<vmem>>, vector<1x128xf32>
    %156 = vector.extract_strided_slice %155 {offsets = [0, 0], sizes = [1, 32], strides = [1, 1]} : vector<1x128xf32> to vector<1x32xf32>
    %157 = vector.broadcast %156 : vector<1x32xf32> to vector<24x32xf32>
    %158 = arith.addf %154, %157 : vector<24x32xf32>
    %159 = arith.truncf %158 : vector<24x32xf32> to vector<24x32xbf16>
    %c288 = arith.constant 288 : index
    %c0_43 = arith.constant 0 : index
    %160 = vector.load %arg2[%c288, %c0_43] : memref<1440x128xbf16, #tpu.memory_space<vmem>>, vector<32x128xbf16>
    %161 = vector.extract_strided_slice %160 {offsets = [0, 0], sizes = [32, 32], strides = [1, 1]} : vector<32x128xbf16> to vector<32x32xbf16>
    %cst_44 = arith.constant dense<0.000000e+00> : vector<24x32xf32>
    %162 = tpu.matmul %159, %161, %cst_44 {dimension_numbers = #tpu.dot_dimension_numbers<[1], [0], [0], [1], [0, 0, 1, 1], [], []>} : vector<24x32xbf16>, vector<32x32xbf16>, vector<24x32xf32> -> vector<24x32xf32>
    %c10 = arith.constant 10 : index
    %c0_45 = arith.constant 0 : index
    %163 = vector.load %arg3[%c10, %c0_45] : memref<57x128xf32, #tpu.memory_space<vmem>>, vector<1x128xf32>
    %164 = vector.extract_strided_slice %163 {offsets = [0, 0], sizes = [1, 32], strides = [1, 1]} : vector<1x128xf32> to vector<1x32xf32>
    %165 = vector.broadcast %164 : vector<1x32xf32> to vector<24x32xf32>
    %166 = arith.addf %162, %165 : vector<24x32xf32>
    %167 = vector.extract_strided_slice %166 {offsets = [0, 0], sizes = [24, 8], strides = [1, 1]} : vector<24x32xf32> to vector<24x8xf32>
    %168 = vector.shape_cast %167 : vector<24x8xf32> to vector<2x12x8xf32>
    %169 = vector.extract_strided_slice %166 {offsets = [0, 8], sizes = [24, 8], strides = [1, 1]} : vector<24x32xf32> to vector<24x8xf32>
    %170 = vector.shape_cast %169 : vector<24x8xf32> to vector<2x12x8xf32>
    %171 = vector.extract_strided_slice %166 {offsets = [0, 16], sizes = [24, 8], strides = [1, 1]} : vector<24x32xf32> to vector<24x8xf32>
    %172 = vector.shape_cast %171 : vector<24x8xf32> to vector<2x12x8xf32>
    %173 = vector.extract_strided_slice %166 {offsets = [0, 24], sizes = [24, 8], strides = [1, 1]} : vector<24x32xf32> to vector<24x8xf32>
    %174 = vector.shape_cast %173 : vector<24x8xf32> to vector<2x12x8xf32>
    %175 = tpu.concatenate %168, %170, %172, %174 in 0 : vector<2x12x8xf32>, vector<2x12x8xf32>, vector<2x12x8xf32>, vector<2x12x8xf32> -> vector<8x12x8xf32>
    %176 = arith.truncf %158 : vector<24x32xf32> to vector<24x32xbf16>
    %c320 = arith.constant 320 : index
    %c0_46 = arith.constant 0 : index
    %177 = vector.load %arg2[%c320, %c0_46] : memref<1440x128xbf16, #tpu.memory_space<vmem>>, vector<32x128xbf16>
    %178 = vector.extract_strided_slice %177 {offsets = [0, 0], sizes = [32, 32], strides = [1, 1]} : vector<32x128xbf16> to vector<32x32xbf16>
    %cst_47 = arith.constant dense<0.000000e+00> : vector<24x32xf32>
    %179 = tpu.matmul %176, %178, %cst_47 {dimension_numbers = #tpu.dot_dimension_numbers<[1], [0], [0], [1], [0, 0, 1, 1], [], []>} : vector<24x32xbf16>, vector<32x32xbf16>, vector<24x32xf32> -> vector<24x32xf32>
    %c11 = arith.constant 11 : index
    %c0_48 = arith.constant 0 : index
    %180 = vector.load %arg3[%c11, %c0_48] : memref<57x128xf32, #tpu.memory_space<vmem>>, vector<1x128xf32>
    %181 = vector.extract_strided_slice %180 {offsets = [0, 0], sizes = [1, 32], strides = [1, 1]} : vector<1x128xf32> to vector<1x32xf32>
    %182 = vector.broadcast %181 : vector<1x32xf32> to vector<24x32xf32>
    %183 = arith.addf %179, %182 : vector<24x32xf32>
    %184 = vector.extract_strided_slice %183 {offsets = [0, 0], sizes = [24, 8], strides = [1, 1]} : vector<24x32xf32> to vector<24x8xf32>
    %185 = vector.shape_cast %184 : vector<24x8xf32> to vector<2x12x8xf32>
    %186 = vector.extract_strided_slice %183 {offsets = [0, 8], sizes = [24, 8], strides = [1, 1]} : vector<24x32xf32> to vector<24x8xf32>
    %187 = vector.shape_cast %186 : vector<24x8xf32> to vector<2x12x8xf32>
    %188 = vector.extract_strided_slice %183 {offsets = [0, 16], sizes = [24, 8], strides = [1, 1]} : vector<24x32xf32> to vector<24x8xf32>
    %189 = vector.shape_cast %188 : vector<24x8xf32> to vector<2x12x8xf32>
    %190 = vector.extract_strided_slice %183 {offsets = [0, 24], sizes = [24, 8], strides = [1, 1]} : vector<24x32xf32> to vector<24x8xf32>
    %191 = vector.shape_cast %190 : vector<24x8xf32> to vector<2x12x8xf32>
    %192 = tpu.concatenate %185, %187, %189, %191 in 0 : vector<2x12x8xf32>, vector<2x12x8xf32>, vector<2x12x8xf32>, vector<2x12x8xf32> -> vector<8x12x8xf32>
    %193 = arith.truncf %158 : vector<24x32xf32> to vector<24x32xbf16>
    %c352 = arith.constant 352 : index
    %c0_49 = arith.constant 0 : index
    %194 = vector.load %arg2[%c352, %c0_49] : memref<1440x128xbf16, #tpu.memory_space<vmem>>, vector<32x128xbf16>
    %195 = vector.extract_strided_slice %194 {offsets = [0, 0], sizes = [32, 32], strides = [1, 1]} : vector<32x128xbf16> to vector<32x32xbf16>
    %cst_50 = arith.constant dense<0.000000e+00> : vector<24x32xf32>
    %196 = tpu.matmul %193, %195, %cst_50 {dimension_numbers = #tpu.dot_dimension_numbers<[1], [0], [0], [1], [0, 0, 1, 1], [], []>} : vector<24x32xbf16>, vector<32x32xbf16>, vector<24x32xf32> -> vector<24x32xf32>
    %c12 = arith.constant 12 : index
    %c0_51 = arith.constant 0 : index
    %197 = vector.load %arg3[%c12, %c0_51] : memref<57x128xf32, #tpu.memory_space<vmem>>, vector<1x128xf32>
    %198 = vector.extract_strided_slice %197 {offsets = [0, 0], sizes = [1, 32], strides = [1, 1]} : vector<1x128xf32> to vector<1x32xf32>
    %199 = vector.broadcast %198 : vector<1x32xf32> to vector<24x32xf32>
    %200 = arith.addf %196, %199 : vector<24x32xf32>
    %201 = vector.extract_strided_slice %200 {offsets = [0, 0], sizes = [24, 8], strides = [1, 1]} : vector<24x32xf32> to vector<24x8xf32>
    %202 = vector.shape_cast %201 : vector<24x8xf32> to vector<2x12x8xf32>
    %203 = vector.extract_strided_slice %200 {offsets = [0, 8], sizes = [24, 8], strides = [1, 1]} : vector<24x32xf32> to vector<24x8xf32>
    %204 = vector.shape_cast %203 : vector<24x8xf32> to vector<2x12x8xf32>
    %205 = vector.extract_strided_slice %200 {offsets = [0, 16], sizes = [24, 8], strides = [1, 1]} : vector<24x32xf32> to vector<24x8xf32>
    %206 = vector.shape_cast %205 : vector<24x8xf32> to vector<2x12x8xf32>
    %207 = vector.extract_strided_slice %200 {offsets = [0, 24], sizes = [24, 8], strides = [1, 1]} : vector<24x32xf32> to vector<24x8xf32>
    %208 = vector.shape_cast %207 : vector<24x8xf32> to vector<2x12x8xf32>
    %209 = tpu.concatenate %202, %204, %206, %208 in 0 : vector<2x12x8xf32>, vector<2x12x8xf32>, vector<2x12x8xf32>, vector<2x12x8xf32> -> vector<8x12x8xf32>
    %210 = arith.truncf %175 : vector<8x12x8xf32> to vector<8x12x8xbf16>
    %211 = arith.truncf %192 : vector<8x12x8xf32> to vector<8x12x8xbf16>
    "tpu.trace_start"() <{level = 10 : i32, message = "zqd,zkd->zqk"}> : () -> ()
    %cst_52 = arith.constant dense<0.000000e+00> : vector<8x12x12xf32>
    %212 = tpu.matmul %210, %211, %cst_52 {dimension_numbers = #tpu.dot_dimension_numbers<[2], [2], [1], [1], [0, 0, 0, 1, 1, 1], [0], [0]>} : vector<8x12x8xbf16>, vector<8x12x8xbf16>, vector<8x12x12xf32> -> vector<8x12x12xf32>
    "tpu.trace_stop"() : () -> ()
    %cst_53 = arith.constant 0.353553385 : f32
    %213 = vector.broadcast %cst_53 : f32 to vector<8x12x12xf32>
    %214 = arith.mulf %212, %213 : vector<8x12x12xf32>
    %cst_54 = arith.constant dense<0xFF800000> : vector<8x12xf32>
    %215 = vector.multi_reduction <maximumf>, %214, %cst_54 [2] : vector<8x12x12xf32> to vector<8x12xf32>
    %216 = vector.shape_cast %215 : vector<8x12xf32> to vector<8x12x1xf32>
    %217 = vector.broadcast %216 : vector<8x12x1xf32> to vector<8x12x12xf32>
    %218 = arith.subf %214, %217 : vector<8x12x12xf32>
    %219 = math.exp %218 : vector<8x12x12xf32>
    %cst_55 = arith.constant dense<0.000000e+00> : vector<8x12xf32>
    %220 = vector.multi_reduction <add>, %219, %cst_55 [2] : vector<8x12x12xf32> to vector<8x12xf32>
    %221 = vector.shape_cast %220 : vector<8x12xf32> to vector<8x12x1xf32>
    %222 = tpu.reciprocal %221 : vector<8x12x1xf32> -> vector<8x12x1xf32>
    %223 = vector.broadcast %222 : vector<8x12x1xf32> to vector<8x12x12xf32>
    %224 = arith.mulf %219, %223 : vector<8x12x12xf32>
    %225 = arith.truncf %224 : vector<8x12x12xf32> to vector<8x12x12xbf16>
    %226 = arith.truncf %209 : vector<8x12x8xf32> to vector<8x12x8xbf16>
    "tpu.trace_start"() <{level = 10 : i32, message = "zqk,zkd->zqd"}> : () -> ()
    %cst_56 = arith.constant dense<0.000000e+00> : vector<8x12x8xf32>
    %227 = tpu.matmul %225, %226, %cst_56 {dimension_numbers = #tpu.dot_dimension_numbers<[2], [1], [1], [2], [0, 0, 0, 1, 1, 2], [0], [0]>} : vector<8x12x12xbf16>, vector<8x12x8xbf16>, vector<8x12x8xf32> -> vector<8x12x8xf32>
    "tpu.trace_stop"() : () -> ()
    %228 = vector.extract_strided_slice %227 {offsets = [0, 0, 0], sizes = [2, 12, 8], strides = [1, 1, 1]} : vector<8x12x8xf32> to vector<2x12x8xf32>
    %229 = vector.extract_strided_slice %227 {offsets = [2, 0, 0], sizes = [2, 12, 8], strides = [1, 1, 1]} : vector<8x12x8xf32> to vector<2x12x8xf32>
    %230 = vector.extract_strided_slice %227 {offsets = [4, 0, 0], sizes = [2, 12, 8], strides = [1, 1, 1]} : vector<8x12x8xf32> to vector<2x12x8xf32>
    %231 = vector.extract_strided_slice %227 {offsets = [6, 0, 0], sizes = [2, 12, 8], strides = [1, 1, 1]} : vector<8x12x8xf32> to vector<2x12x8xf32>
    %232 = tpu.concatenate %228, %229, %230, %231 in 2 : vector<2x12x8xf32>, vector<2x12x8xf32>, vector<2x12x8xf32>, vector<2x12x8xf32> -> vector<2x12x32xf32>
    %233 = vector.shape_cast %232 : vector<2x12x32xf32> to vector<24x32xf32>
    %234 = arith.truncf %233 : vector<24x32xf32> to vector<24x32xbf16>
    %c384 = arith.constant 384 : index
    %c0_57 = arith.constant 0 : index
    %235 = vector.load %arg2[%c384, %c0_57] : memref<1440x128xbf16, #tpu.memory_space<vmem>>, vector<32x128xbf16>
    %236 = vector.extract_strided_slice %235 {offsets = [0, 0], sizes = [32, 32], strides = [1, 1]} : vector<32x128xbf16> to vector<32x32xbf16>
    %cst_58 = arith.constant dense<0.000000e+00> : vector<24x32xf32>
    %237 = tpu.matmul %234, %236, %cst_58 {dimension_numbers = #tpu.dot_dimension_numbers<[1], [0], [0], [1], [0, 0, 1, 1], [], []>} : vector<24x32xbf16>, vector<32x32xbf16>, vector<24x32xf32> -> vector<24x32xf32>
    %c13 = arith.constant 13 : index
    %c0_59 = arith.constant 0 : index
    %238 = vector.load %arg3[%c13, %c0_59] : memref<57x128xf32, #tpu.memory_space<vmem>>, vector<1x128xf32>
    %239 = vector.extract_strided_slice %238 {offsets = [0, 0], sizes = [1, 32], strides = [1, 1]} : vector<1x128xf32> to vector<1x32xf32>
    %240 = vector.broadcast %239 : vector<1x32xf32> to vector<24x32xf32>
    %241 = arith.addf %237, %240 : vector<24x32xf32>
    %242 = arith.addf %158, %241 : vector<24x32xf32>
    %cst_60 = arith.constant dense<0.000000e+00> : vector<24xf32>
    %243 = vector.multi_reduction <add>, %242, %cst_60 [1] : vector<24x32xf32> to vector<24xf32>
    %244 = vector.shape_cast %243 : vector<24xf32> to vector<24x1xf32>
    %cst_61 = arith.constant 3.200000e+01 : f32
    %245 = vector.broadcast %cst_61 : f32 to vector<24x1xf32>
    %246 = arith.divf %244, %245 : vector<24x1xf32>
    %247 = vector.broadcast %246 : vector<24x1xf32> to vector<24x32xf32>
    %248 = arith.subf %242, %247 : vector<24x32xf32>
    %249 = arith.mulf %248, %248 : vector<24x32xf32>
    %cst_62 = arith.constant dense<0.000000e+00> : vector<24xf32>
    %250 = vector.multi_reduction <add>, %249, %cst_62 [1] : vector<24x32xf32> to vector<24xf32>
    %251 = vector.shape_cast %250 : vector<24xf32> to vector<24x1xf32>
    %cst_63 = arith.constant 3.200000e+01 : f32
    %252 = vector.broadcast %cst_63 : f32 to vector<24x1xf32>
    %253 = arith.divf %251, %252 : vector<24x1xf32>
    %cst_64 = arith.constant 9.99999974E-6 : f32
    %254 = vector.broadcast %cst_64 : f32 to vector<24x1xf32>
    %255 = arith.addf %253, %254 : vector<24x1xf32>
    %256 = math.rsqrt %255 : vector<24x1xf32>
    %257 = vector.broadcast %256 : vector<24x1xf32> to vector<24x32xf32>
    %258 = arith.mulf %248, %257 : vector<24x32xf32>
    %c16 = arith.constant 16 : index
    %c0_65 = arith.constant 0 : index
    %259 = vector.load %arg3[%c16, %c0_65] : memref<57x128xf32, #tpu.memory_space<vmem>>, vector<1x128xf32>
    %260 = vector.extract_strided_slice %259 {offsets = [0, 0], sizes = [1, 32], strides = [1, 1]} : vector<1x128xf32> to vector<1x32xf32>
    %261 = vector.broadcast %260 : vector<1x32xf32> to vector<24x32xf32>
    %262 = arith.mulf %258, %261 : vector<24x32xf32>
    %c17 = arith.constant 17 : index
    %c0_66 = arith.constant 0 : index
    %263 = vector.load %arg3[%c17, %c0_66] : memref<57x128xf32, #tpu.memory_space<vmem>>, vector<1x128xf32>
    %264 = vector.extract_strided_slice %263 {offsets = [0, 0], sizes = [1, 32], strides = [1, 1]} : vector<1x128xf32> to vector<1x32xf32>
    %265 = vector.broadcast %264 : vector<1x32xf32> to vector<24x32xf32>
    %266 = arith.addf %262, %265 : vector<24x32xf32>
    %267 = arith.truncf %266 : vector<24x32xf32> to vector<24x32xbf16>
    %c416 = arith.constant 416 : index
    %c0_67 = arith.constant 0 : index
    %268 = vector.load %arg2[%c416, %c0_67] : memref<1440x128xbf16, #tpu.memory_space<vmem>>, vector<32x128xbf16>
    %cst_68 = arith.constant dense<0.000000e+00> : vector<24x128xf32>
    %269 = tpu.matmul %267, %268, %cst_68 {dimension_numbers = #tpu.dot_dimension_numbers<[1], [0], [0], [1], [0, 0, 1, 1], [], []>} : vector<24x32xbf16>, vector<32x128xbf16>, vector<24x128xf32> -> vector<24x128xf32>
    %c14 = arith.constant 14 : index
    %c0_69 = arith.constant 0 : index
    %270 = vector.load %arg3[%c14, %c0_69] : memref<57x128xf32, #tpu.memory_space<vmem>>, vector<1x128xf32>
    %271 = vector.broadcast %270 : vector<1x128xf32> to vector<24x128xf32>
    %272 = arith.addf %269, %271 : vector<24x128xf32>
    %cst_70 = arith.constant 0.000000e+00 : f32
    %273 = vector.broadcast %cst_70 : f32 to vector<24x128xf32>
    %274 = arith.maximumf %272, %273 : vector<24x128xf32>
    %275 = arith.truncf %274 : vector<24x128xf32> to vector<24x128xbf16>
    %c448 = arith.constant 448 : index
    %c0_71 = arith.constant 0 : index
    %276 = vector.load %arg2[%c448, %c0_71] : memref<1440x128xbf16, #tpu.memory_space<vmem>>, vector<128x128xbf16>
    %277 = vector.extract_strided_slice %276 {offsets = [0, 0], sizes = [128, 32], strides = [1, 1]} : vector<128x128xbf16> to vector<128x32xbf16>
    %cst_72 = arith.constant dense<0.000000e+00> : vector<24x32xf32>
    %278 = tpu.matmul %275, %277, %cst_72 {dimension_numbers = #tpu.dot_dimension_numbers<[1], [0], [0], [1], [0, 0, 1, 1], [], []>} : vector<24x128xbf16>, vector<128x32xbf16>, vector<24x32xf32> -> vector<24x32xf32>
    %c15 = arith.constant 15 : index
    %c0_73 = arith.constant 0 : index
    %279 = vector.load %arg3[%c15, %c0_73] : memref<57x128xf32, #tpu.memory_space<vmem>>, vector<1x128xf32>
    %280 = vector.extract_strided_slice %279 {offsets = [0, 0], sizes = [1, 32], strides = [1, 1]} : vector<1x128xf32> to vector<1x32xf32>
    %281 = vector.broadcast %280 : vector<1x32xf32> to vector<24x32xf32>
    %282 = arith.addf %278, %281 : vector<24x32xf32>
    %283 = arith.addf %266, %282 : vector<24x32xf32>
    %cst_74 = arith.constant dense<0.000000e+00> : vector<24xf32>
    %284 = vector.multi_reduction <add>, %283, %cst_74 [1] : vector<24x32xf32> to vector<24xf32>
    %285 = vector.shape_cast %284 : vector<24xf32> to vector<24x1xf32>
    %cst_75 = arith.constant 3.200000e+01 : f32
    %286 = vector.broadcast %cst_75 : f32 to vector<24x1xf32>
    %287 = arith.divf %285, %286 : vector<24x1xf32>
    %288 = vector.broadcast %287 : vector<24x1xf32> to vector<24x32xf32>
    %289 = arith.subf %283, %288 : vector<24x32xf32>
    %290 = arith.mulf %289, %289 : vector<24x32xf32>
    %cst_76 = arith.constant dense<0.000000e+00> : vector<24xf32>
    %291 = vector.multi_reduction <add>, %290, %cst_76 [1] : vector<24x32xf32> to vector<24xf32>
    %292 = vector.shape_cast %291 : vector<24xf32> to vector<24x1xf32>
    %cst_77 = arith.constant 3.200000e+01 : f32
    %293 = vector.broadcast %cst_77 : f32 to vector<24x1xf32>
    %294 = arith.divf %292, %293 : vector<24x1xf32>
    %cst_78 = arith.constant 9.99999974E-6 : f32
    %295 = vector.broadcast %cst_78 : f32 to vector<24x1xf32>
    %296 = arith.addf %294, %295 : vector<24x1xf32>
    %297 = math.rsqrt %296 : vector<24x1xf32>
    %298 = vector.broadcast %297 : vector<24x1xf32> to vector<24x32xf32>
    %299 = arith.mulf %289, %298 : vector<24x32xf32>
    %c18 = arith.constant 18 : index
    %c0_79 = arith.constant 0 : index
    %300 = vector.load %arg3[%c18, %c0_79] : memref<57x128xf32, #tpu.memory_space<vmem>>, vector<1x128xf32>
    %301 = vector.extract_strided_slice %300 {offsets = [0, 0], sizes = [1, 32], strides = [1, 1]} : vector<1x128xf32> to vector<1x32xf32>
    %302 = vector.broadcast %301 : vector<1x32xf32> to vector<24x32xf32>
    %303 = arith.mulf %299, %302 : vector<24x32xf32>
    %c19 = arith.constant 19 : index
    %c0_80 = arith.constant 0 : index
    %304 = vector.load %arg3[%c19, %c0_80] : memref<57x128xf32, #tpu.memory_space<vmem>>, vector<1x128xf32>
    %305 = vector.extract_strided_slice %304 {offsets = [0, 0], sizes = [1, 32], strides = [1, 1]} : vector<1x128xf32> to vector<1x32xf32>
    %306 = vector.broadcast %305 : vector<1x32xf32> to vector<24x32xf32>
    %307 = arith.addf %303, %306 : vector<24x32xf32>
    %cst_81 = arith.constant dense<0.000000e+00> : vector<24xf32>
    %308 = vector.multi_reduction <add>, %307, %cst_81 [1] : vector<24x32xf32> to vector<24xf32>
    %309 = vector.shape_cast %308 : vector<24xf32> to vector<24x1xf32>
    %cst_82 = arith.constant 3.200000e+01 : f32
    %310 = vector.broadcast %cst_82 : f32 to vector<24x1xf32>
    %311 = arith.divf %309, %310 : vector<24x1xf32>
    %312 = vector.broadcast %311 : vector<24x1xf32> to vector<24x32xf32>
    %313 = arith.subf %307, %312 : vector<24x32xf32>
    %314 = arith.mulf %313, %313 : vector<24x32xf32>
    %cst_83 = arith.constant dense<0.000000e+00> : vector<24xf32>
    %315 = vector.multi_reduction <add>, %314, %cst_83 [1] : vector<24x32xf32> to vector<24xf32>
    %316 = vector.shape_cast %315 : vector<24xf32> to vector<24x1xf32>
    %cst_84 = arith.constant 3.200000e+01 : f32
    %317 = vector.broadcast %cst_84 : f32 to vector<24x1xf32>
    %318 = arith.divf %316, %317 : vector<24x1xf32>
    %cst_85 = arith.constant 9.99999974E-6 : f32
    %319 = vector.broadcast %cst_85 : f32 to vector<24x1xf32>
    %320 = arith.addf %318, %319 : vector<24x1xf32>
    %321 = math.rsqrt %320 : vector<24x1xf32>
    %322 = vector.broadcast %321 : vector<24x1xf32> to vector<24x32xf32>
    %323 = arith.mulf %313, %322 : vector<24x32xf32>
    %c52 = arith.constant 52 : index
    %c0_86 = arith.constant 0 : index
    %324 = vector.load %arg3[%c52, %c0_86] : memref<57x128xf32, #tpu.memory_space<vmem>>, vector<1x128xf32>
    %325 = vector.extract_strided_slice %324 {offsets = [0, 0], sizes = [1, 32], strides = [1, 1]} : vector<1x128xf32> to vector<1x32xf32>
    %326 = vector.broadcast %325 : vector<1x32xf32> to vector<24x32xf32>
    %327 = arith.mulf %323, %326 : vector<24x32xf32>
    %c53 = arith.constant 53 : index
    %c0_87 = arith.constant 0 : index
    %328 = vector.load %arg3[%c53, %c0_87] : memref<57x128xf32, #tpu.memory_space<vmem>>, vector<1x128xf32>
    %329 = vector.extract_strided_slice %328 {offsets = [0, 0], sizes = [1, 32], strides = [1, 1]} : vector<1x128xf32> to vector<1x32xf32>
    %330 = vector.broadcast %329 : vector<1x32xf32> to vector<24x32xf32>
    %331 = arith.addf %327, %330 : vector<24x32xf32>
    %332 = arith.truncf %9 : vector<16x32xf32> to vector<16x32xbf16>
    %c576 = arith.constant 576 : index
    %c0_88 = arith.constant 0 : index
    %333 = vector.load %arg2[%c576, %c0_88] : memref<1440x128xbf16, #tpu.memory_space<vmem>>, vector<32x128xbf16>
    %334 = vector.extract_strided_slice %333 {offsets = [0, 0], sizes = [32, 32], strides = [1, 1]} : vector<32x128xbf16> to vector<32x32xbf16>
    %cst_89 = arith.constant dense<0.000000e+00> : vector<16x32xf32>
    %335 = tpu.matmul %332, %334, %cst_89 {dimension_numbers = #tpu.dot_dimension_numbers<[1], [0], [0], [1], [0, 0, 1, 1], [], []>} : vector<16x32xbf16>, vector<32x32xbf16>, vector<16x32xf32> -> vector<16x32xf32>
    %c20 = arith.constant 20 : index
    %c0_90 = arith.constant 0 : index
    %336 = vector.load %arg3[%c20, %c0_90] : memref<57x128xf32, #tpu.memory_space<vmem>>, vector<1x128xf32>
    %337 = vector.extract_strided_slice %336 {offsets = [0, 0], sizes = [1, 32], strides = [1, 1]} : vector<1x128xf32> to vector<1x32xf32>
    %338 = vector.broadcast %337 : vector<1x32xf32> to vector<16x32xf32>
    %339 = arith.addf %335, %338 : vector<16x32xf32>
    %340 = vector.extract_strided_slice %339 {offsets = [0, 0], sizes = [16, 8], strides = [1, 1]} : vector<16x32xf32> to vector<16x8xf32>
    %341 = vector.shape_cast %340 : vector<16x8xf32> to vector<2x8x8xf32>
    %342 = vector.extract_strided_slice %339 {offsets = [0, 8], sizes = [16, 8], strides = [1, 1]} : vector<16x32xf32> to vector<16x8xf32>
    %343 = vector.shape_cast %342 : vector<16x8xf32> to vector<2x8x8xf32>
    %344 = vector.extract_strided_slice %339 {offsets = [0, 16], sizes = [16, 8], strides = [1, 1]} : vector<16x32xf32> to vector<16x8xf32>
    %345 = vector.shape_cast %344 : vector<16x8xf32> to vector<2x8x8xf32>
    %346 = vector.extract_strided_slice %339 {offsets = [0, 24], sizes = [16, 8], strides = [1, 1]} : vector<16x32xf32> to vector<16x8xf32>
    %347 = vector.shape_cast %346 : vector<16x8xf32> to vector<2x8x8xf32>
    %348 = tpu.concatenate %341, %343, %345, %347 in 0 : vector<2x8x8xf32>, vector<2x8x8xf32>, vector<2x8x8xf32>, vector<2x8x8xf32> -> vector<8x8x8xf32>
    %349 = arith.truncf %9 : vector<16x32xf32> to vector<16x32xbf16>
    %c608 = arith.constant 608 : index
    %c0_91 = arith.constant 0 : index
    %350 = vector.load %arg2[%c608, %c0_91] : memref<1440x128xbf16, #tpu.memory_space<vmem>>, vector<32x128xbf16>
    %351 = vector.extract_strided_slice %350 {offsets = [0, 0], sizes = [32, 32], strides = [1, 1]} : vector<32x128xbf16> to vector<32x32xbf16>
    %cst_92 = arith.constant dense<0.000000e+00> : vector<16x32xf32>
    %352 = tpu.matmul %349, %351, %cst_92 {dimension_numbers = #tpu.dot_dimension_numbers<[1], [0], [0], [1], [0, 0, 1, 1], [], []>} : vector<16x32xbf16>, vector<32x32xbf16>, vector<16x32xf32> -> vector<16x32xf32>
    %c21 = arith.constant 21 : index
    %c0_93 = arith.constant 0 : index
    %353 = vector.load %arg3[%c21, %c0_93] : memref<57x128xf32, #tpu.memory_space<vmem>>, vector<1x128xf32>
    %354 = vector.extract_strided_slice %353 {offsets = [0, 0], sizes = [1, 32], strides = [1, 1]} : vector<1x128xf32> to vector<1x32xf32>
    %355 = vector.broadcast %354 : vector<1x32xf32> to vector<16x32xf32>
    %356 = arith.addf %352, %355 : vector<16x32xf32>
    %357 = vector.extract_strided_slice %356 {offsets = [0, 0], sizes = [16, 8], strides = [1, 1]} : vector<16x32xf32> to vector<16x8xf32>
    %358 = vector.shape_cast %357 : vector<16x8xf32> to vector<2x8x8xf32>
    %359 = vector.extract_strided_slice %356 {offsets = [0, 8], sizes = [16, 8], strides = [1, 1]} : vector<16x32xf32> to vector<16x8xf32>
    %360 = vector.shape_cast %359 : vector<16x8xf32> to vector<2x8x8xf32>
    %361 = vector.extract_strided_slice %356 {offsets = [0, 16], sizes = [16, 8], strides = [1, 1]} : vector<16x32xf32> to vector<16x8xf32>
    %362 = vector.shape_cast %361 : vector<16x8xf32> to vector<2x8x8xf32>
    %363 = vector.extract_strided_slice %356 {offsets = [0, 24], sizes = [16, 8], strides = [1, 1]} : vector<16x32xf32> to vector<16x8xf32>
    %364 = vector.shape_cast %363 : vector<16x8xf32> to vector<2x8x8xf32>
    %365 = tpu.concatenate %358, %360, %362, %364 in 0 : vector<2x8x8xf32>, vector<2x8x8xf32>, vector<2x8x8xf32>, vector<2x8x8xf32> -> vector<8x8x8xf32>
    %366 = arith.truncf %9 : vector<16x32xf32> to vector<16x32xbf16>
    %c640 = arith.constant 640 : index
    %c0_94 = arith.constant 0 : index
    %367 = vector.load %arg2[%c640, %c0_94] : memref<1440x128xbf16, #tpu.memory_space<vmem>>, vector<32x128xbf16>
    %368 = vector.extract_strided_slice %367 {offsets = [0, 0], sizes = [32, 32], strides = [1, 1]} : vector<32x128xbf16> to vector<32x32xbf16>
    %cst_95 = arith.constant dense<0.000000e+00> : vector<16x32xf32>
    %369 = tpu.matmul %366, %368, %cst_95 {dimension_numbers = #tpu.dot_dimension_numbers<[1], [0], [0], [1], [0, 0, 1, 1], [], []>} : vector<16x32xbf16>, vector<32x32xbf16>, vector<16x32xf32> -> vector<16x32xf32>
    %c22 = arith.constant 22 : index
    %c0_96 = arith.constant 0 : index
    %370 = vector.load %arg3[%c22, %c0_96] : memref<57x128xf32, #tpu.memory_space<vmem>>, vector<1x128xf32>
    %371 = vector.extract_strided_slice %370 {offsets = [0, 0], sizes = [1, 32], strides = [1, 1]} : vector<1x128xf32> to vector<1x32xf32>
    %372 = vector.broadcast %371 : vector<1x32xf32> to vector<16x32xf32>
    %373 = arith.addf %369, %372 : vector<16x32xf32>
    %374 = vector.extract_strided_slice %373 {offsets = [0, 0], sizes = [16, 8], strides = [1, 1]} : vector<16x32xf32> to vector<16x8xf32>
    %375 = vector.shape_cast %374 : vector<16x8xf32> to vector<2x8x8xf32>
    %376 = vector.extract_strided_slice %373 {offsets = [0, 8], sizes = [16, 8], strides = [1, 1]} : vector<16x32xf32> to vector<16x8xf32>
    %377 = vector.shape_cast %376 : vector<16x8xf32> to vector<2x8x8xf32>
    %378 = vector.extract_strided_slice %373 {offsets = [0, 16], sizes = [16, 8], strides = [1, 1]} : vector<16x32xf32> to vector<16x8xf32>
    %379 = vector.shape_cast %378 : vector<16x8xf32> to vector<2x8x8xf32>
    %380 = vector.extract_strided_slice %373 {offsets = [0, 24], sizes = [16, 8], strides = [1, 1]} : vector<16x32xf32> to vector<16x8xf32>
    %381 = vector.shape_cast %380 : vector<16x8xf32> to vector<2x8x8xf32>
    %382 = tpu.concatenate %375, %377, %379, %381 in 0 : vector<2x8x8xf32>, vector<2x8x8xf32>, vector<2x8x8xf32>, vector<2x8x8xf32> -> vector<8x8x8xf32>
    %383 = arith.truncf %348 : vector<8x8x8xf32> to vector<8x8x8xbf16>
    %384 = arith.truncf %365 : vector<8x8x8xf32> to vector<8x8x8xbf16>
    "tpu.trace_start"() <{level = 10 : i32, message = "zqd,zkd->zqk"}> : () -> ()
    %cst_97 = arith.constant dense<0.000000e+00> : vector<8x8x8xf32>
    %385 = tpu.matmul %383, %384, %cst_97 {dimension_numbers = #tpu.dot_dimension_numbers<[2], [2], [1], [1], [0, 0, 0, 1, 1, 1], [0], [0]>} : vector<8x8x8xbf16>, vector<8x8x8xbf16>, vector<8x8x8xf32> -> vector<8x8x8xf32>
    "tpu.trace_stop"() : () -> ()
    %cst_98 = arith.constant 0.353553385 : f32
    %386 = vector.broadcast %cst_98 : f32 to vector<8x8x8xf32>
    %387 = arith.mulf %385, %386 : vector<8x8x8xf32>
    %cst_99 = arith.constant dense<0xFF800000> : vector<8x8xf32>
    %388 = vector.multi_reduction <maximumf>, %387, %cst_99 [2] : vector<8x8x8xf32> to vector<8x8xf32>
    %389 = vector.shape_cast %388 : vector<8x8xf32> to vector<8x8x1xf32>
    %390 = vector.broadcast %389 : vector<8x8x1xf32> to vector<8x8x8xf32>
    %391 = arith.subf %387, %390 : vector<8x8x8xf32>
    %392 = math.exp %391 : vector<8x8x8xf32>
    %cst_100 = arith.constant dense<0.000000e+00> : vector<8x8xf32>
    %393 = vector.multi_reduction <add>, %392, %cst_100 [2] : vector<8x8x8xf32> to vector<8x8xf32>
    %394 = vector.shape_cast %393 : vector<8x8xf32> to vector<8x8x1xf32>
    %395 = tpu.reciprocal %394 : vector<8x8x1xf32> -> vector<8x8x1xf32>
    %396 = vector.broadcast %395 : vector<8x8x1xf32> to vector<8x8x8xf32>
    %397 = arith.mulf %392, %396 : vector<8x8x8xf32>
    %398 = arith.truncf %397 : vector<8x8x8xf32> to vector<8x8x8xbf16>
    %399 = arith.truncf %382 : vector<8x8x8xf32> to vector<8x8x8xbf16>
    "tpu.trace_start"() <{level = 10 : i32, message = "zqk,zkd->zqd"}> : () -> ()
    %cst_101 = arith.constant dense<0.000000e+00> : vector<8x8x8xf32>
    %400 = tpu.matmul %398, %399, %cst_101 {dimension_numbers = #tpu.dot_dimension_numbers<[2], [1], [1], [2], [0, 0, 0, 1, 1, 2], [0], [0]>} : vector<8x8x8xbf16>, vector<8x8x8xbf16>, vector<8x8x8xf32> -> vector<8x8x8xf32>
    "tpu.trace_stop"() : () -> ()
    %401 = vector.extract_strided_slice %400 {offsets = [0, 0, 0], sizes = [2, 8, 8], strides = [1, 1, 1]} : vector<8x8x8xf32> to vector<2x8x8xf32>
    %402 = vector.extract_strided_slice %400 {offsets = [2, 0, 0], sizes = [2, 8, 8], strides = [1, 1, 1]} : vector<8x8x8xf32> to vector<2x8x8xf32>
    %403 = vector.extract_strided_slice %400 {offsets = [4, 0, 0], sizes = [2, 8, 8], strides = [1, 1, 1]} : vector<8x8x8xf32> to vector<2x8x8xf32>
    %404 = vector.extract_strided_slice %400 {offsets = [6, 0, 0], sizes = [2, 8, 8], strides = [1, 1, 1]} : vector<8x8x8xf32> to vector<2x8x8xf32>
    %405 = tpu.concatenate %401, %402, %403, %404 in 2 : vector<2x8x8xf32>, vector<2x8x8xf32>, vector<2x8x8xf32>, vector<2x8x8xf32> -> vector<2x8x32xf32>
    %406 = vector.shape_cast %405 : vector<2x8x32xf32> to vector<16x32xf32>
    %407 = arith.truncf %406 : vector<16x32xf32> to vector<16x32xbf16>
    %c672 = arith.constant 672 : index
    %c0_102 = arith.constant 0 : index
    %408 = vector.load %arg2[%c672, %c0_102] : memref<1440x128xbf16, #tpu.memory_space<vmem>>, vector<32x128xbf16>
    %409 = vector.extract_strided_slice %408 {offsets = [0, 0], sizes = [32, 32], strides = [1, 1]} : vector<32x128xbf16> to vector<32x32xbf16>
    %cst_103 = arith.constant dense<0.000000e+00> : vector<16x32xf32>
    %410 = tpu.matmul %407, %409, %cst_103 {dimension_numbers = #tpu.dot_dimension_numbers<[1], [0], [0], [1], [0, 0, 1, 1], [], []>} : vector<16x32xbf16>, vector<32x32xbf16>, vector<16x32xf32> -> vector<16x32xf32>
    %c23 = arith.constant 23 : index
    %c0_104 = arith.constant 0 : index
    %411 = vector.load %arg3[%c23, %c0_104] : memref<57x128xf32, #tpu.memory_space<vmem>>, vector<1x128xf32>
    %412 = vector.extract_strided_slice %411 {offsets = [0, 0], sizes = [1, 32], strides = [1, 1]} : vector<1x128xf32> to vector<1x32xf32>
    %413 = vector.broadcast %412 : vector<1x32xf32> to vector<16x32xf32>
    %414 = arith.addf %410, %413 : vector<16x32xf32>
    %415 = arith.addf %9, %414 : vector<16x32xf32>
    %cst_105 = arith.constant dense<0.000000e+00> : vector<16xf32>
    %416 = vector.multi_reduction <add>, %415, %cst_105 [1] : vector<16x32xf32> to vector<16xf32>
    %417 = vector.shape_cast %416 : vector<16xf32> to vector<16x1xf32>
    %cst_106 = arith.constant 3.200000e+01 : f32
    %418 = vector.broadcast %cst_106 : f32 to vector<16x1xf32>
    %419 = arith.divf %417, %418 : vector<16x1xf32>
    %420 = vector.broadcast %419 : vector<16x1xf32> to vector<16x32xf32>
    %421 = arith.subf %415, %420 : vector<16x32xf32>
    %422 = arith.mulf %421, %421 : vector<16x32xf32>
    %cst_107 = arith.constant dense<0.000000e+00> : vector<16xf32>
    %423 = vector.multi_reduction <add>, %422, %cst_107 [1] : vector<16x32xf32> to vector<16xf32>
    %424 = vector.shape_cast %423 : vector<16xf32> to vector<16x1xf32>
    %cst_108 = arith.constant 3.200000e+01 : f32
    %425 = vector.broadcast %cst_108 : f32 to vector<16x1xf32>
    %426 = arith.divf %424, %425 : vector<16x1xf32>
    %cst_109 = arith.constant 9.99999974E-6 : f32
    %427 = vector.broadcast %cst_109 : f32 to vector<16x1xf32>
    %428 = arith.addf %426, %427 : vector<16x1xf32>
    %429 = math.rsqrt %428 : vector<16x1xf32>
    %430 = vector.broadcast %429 : vector<16x1xf32> to vector<16x32xf32>
    %431 = arith.mulf %421, %430 : vector<16x32xf32>
    %c30 = arith.constant 30 : index
    %c0_110 = arith.constant 0 : index
    %432 = vector.load %arg3[%c30, %c0_110] : memref<57x128xf32, #tpu.memory_space<vmem>>, vector<1x128xf32>
    %433 = vector.extract_strided_slice %432 {offsets = [0, 0], sizes = [1, 32], strides = [1, 1]} : vector<1x128xf32> to vector<1x32xf32>
    %434 = vector.broadcast %433 : vector<1x32xf32> to vector<16x32xf32>
    %435 = arith.mulf %431, %434 : vector<16x32xf32>
    %c31 = arith.constant 31 : index
    %c0_111 = arith.constant 0 : index
    %436 = vector.load %arg3[%c31, %c0_111] : memref<57x128xf32, #tpu.memory_space<vmem>>, vector<1x128xf32>
    %437 = vector.extract_strided_slice %436 {offsets = [0, 0], sizes = [1, 32], strides = [1, 1]} : vector<1x128xf32> to vector<1x32xf32>
    %438 = vector.broadcast %437 : vector<1x32xf32> to vector<16x32xf32>
    %439 = arith.addf %435, %438 : vector<16x32xf32>
    %440 = arith.truncf %439 : vector<16x32xf32> to vector<16x32xbf16>
    %c704 = arith.constant 704 : index
    %c0_112 = arith.constant 0 : index
    %441 = vector.load %arg2[%c704, %c0_112] : memref<1440x128xbf16, #tpu.memory_space<vmem>>, vector<32x128xbf16>
    %442 = vector.extract_strided_slice %441 {offsets = [0, 0], sizes = [32, 32], strides = [1, 1]} : vector<32x128xbf16> to vector<32x32xbf16>
    %cst_113 = arith.constant dense<0.000000e+00> : vector<16x32xf32>
    %443 = tpu.matmul %440, %442, %cst_113 {dimension_numbers = #tpu.dot_dimension_numbers<[1], [0], [0], [1], [0, 0, 1, 1], [], []>} : vector<16x32xbf16>, vector<32x32xbf16>, vector<16x32xf32> -> vector<16x32xf32>
    %c24 = arith.constant 24 : index
    %c0_114 = arith.constant 0 : index
    %444 = vector.load %arg3[%c24, %c0_114] : memref<57x128xf32, #tpu.memory_space<vmem>>, vector<1x128xf32>
    %445 = vector.extract_strided_slice %444 {offsets = [0, 0], sizes = [1, 32], strides = [1, 1]} : vector<1x128xf32> to vector<1x32xf32>
    %446 = vector.broadcast %445 : vector<1x32xf32> to vector<16x32xf32>
    %447 = arith.addf %443, %446 : vector<16x32xf32>
    %448 = vector.extract_strided_slice %447 {offsets = [0, 0], sizes = [16, 8], strides = [1, 1]} : vector<16x32xf32> to vector<16x8xf32>
    %449 = vector.shape_cast %448 : vector<16x8xf32> to vector<2x8x8xf32>
    %450 = vector.extract_strided_slice %447 {offsets = [0, 8], sizes = [16, 8], strides = [1, 1]} : vector<16x32xf32> to vector<16x8xf32>
    %451 = vector.shape_cast %450 : vector<16x8xf32> to vector<2x8x8xf32>
    %452 = vector.extract_strided_slice %447 {offsets = [0, 16], sizes = [16, 8], strides = [1, 1]} : vector<16x32xf32> to vector<16x8xf32>
    %453 = vector.shape_cast %452 : vector<16x8xf32> to vector<2x8x8xf32>
    %454 = vector.extract_strided_slice %447 {offsets = [0, 24], sizes = [16, 8], strides = [1, 1]} : vector<16x32xf32> to vector<16x8xf32>
    %455 = vector.shape_cast %454 : vector<16x8xf32> to vector<2x8x8xf32>
    %456 = tpu.concatenate %449, %451, %453, %455 in 0 : vector<2x8x8xf32>, vector<2x8x8xf32>, vector<2x8x8xf32>, vector<2x8x8xf32> -> vector<8x8x8xf32>
    %457 = arith.truncf %331 : vector<24x32xf32> to vector<24x32xbf16>
    %c736 = arith.constant 736 : index
    %c0_115 = arith.constant 0 : index
    %458 = vector.load %arg2[%c736, %c0_115] : memref<1440x128xbf16, #tpu.memory_space<vmem>>, vector<32x128xbf16>
    %459 = vector.extract_strided_slice %458 {offsets = [0, 0], sizes = [32, 32], strides = [1, 1]} : vector<32x128xbf16> to vector<32x32xbf16>
    %cst_116 = arith.constant dense<0.000000e+00> : vector<24x32xf32>
    %460 = tpu.matmul %457, %459, %cst_116 {dimension_numbers = #tpu.dot_dimension_numbers<[1], [0], [0], [1], [0, 0, 1, 1], [], []>} : vector<24x32xbf16>, vector<32x32xbf16>, vector<24x32xf32> -> vector<24x32xf32>
    %c25 = arith.constant 25 : index
    %c0_117 = arith.constant 0 : index
    %461 = vector.load %arg3[%c25, %c0_117] : memref<57x128xf32, #tpu.memory_space<vmem>>, vector<1x128xf32>
    %462 = vector.extract_strided_slice %461 {offsets = [0, 0], sizes = [1, 32], strides = [1, 1]} : vector<1x128xf32> to vector<1x32xf32>
    %463 = vector.broadcast %462 : vector<1x32xf32> to vector<24x32xf32>
    %464 = arith.addf %460, %463 : vector<24x32xf32>
    %465 = vector.extract_strided_slice %464 {offsets = [0, 0], sizes = [24, 8], strides = [1, 1]} : vector<24x32xf32> to vector<24x8xf32>
    %466 = vector.shape_cast %465 : vector<24x8xf32> to vector<2x12x8xf32>
    %467 = vector.extract_strided_slice %464 {offsets = [0, 8], sizes = [24, 8], strides = [1, 1]} : vector<24x32xf32> to vector<24x8xf32>
    %468 = vector.shape_cast %467 : vector<24x8xf32> to vector<2x12x8xf32>
    %469 = vector.extract_strided_slice %464 {offsets = [0, 16], sizes = [24, 8], strides = [1, 1]} : vector<24x32xf32> to vector<24x8xf32>
    %470 = vector.shape_cast %469 : vector<24x8xf32> to vector<2x12x8xf32>
    %471 = vector.extract_strided_slice %464 {offsets = [0, 24], sizes = [24, 8], strides = [1, 1]} : vector<24x32xf32> to vector<24x8xf32>
    %472 = vector.shape_cast %471 : vector<24x8xf32> to vector<2x12x8xf32>
    %473 = tpu.concatenate %466, %468, %470, %472 in 0 : vector<2x12x8xf32>, vector<2x12x8xf32>, vector<2x12x8xf32>, vector<2x12x8xf32> -> vector<8x12x8xf32>
    %474 = arith.truncf %331 : vector<24x32xf32> to vector<24x32xbf16>
    %c768 = arith.constant 768 : index
    %c0_118 = arith.constant 0 : index
    %475 = vector.load %arg2[%c768, %c0_118] : memref<1440x128xbf16, #tpu.memory_space<vmem>>, vector<32x128xbf16>
    %476 = vector.extract_strided_slice %475 {offsets = [0, 0], sizes = [32, 32], strides = [1, 1]} : vector<32x128xbf16> to vector<32x32xbf16>
    %cst_119 = arith.constant dense<0.000000e+00> : vector<24x32xf32>
    %477 = tpu.matmul %474, %476, %cst_119 {dimension_numbers = #tpu.dot_dimension_numbers<[1], [0], [0], [1], [0, 0, 1, 1], [], []>} : vector<24x32xbf16>, vector<32x32xbf16>, vector<24x32xf32> -> vector<24x32xf32>
    %c26 = arith.constant 26 : index
    %c0_120 = arith.constant 0 : index
    %478 = vector.load %arg3[%c26, %c0_120] : memref<57x128xf32, #tpu.memory_space<vmem>>, vector<1x128xf32>
    %479 = vector.extract_strided_slice %478 {offsets = [0, 0], sizes = [1, 32], strides = [1, 1]} : vector<1x128xf32> to vector<1x32xf32>
    %480 = vector.broadcast %479 : vector<1x32xf32> to vector<24x32xf32>
    %481 = arith.addf %477, %480 : vector<24x32xf32>
    %482 = vector.extract_strided_slice %481 {offsets = [0, 0], sizes = [24, 8], strides = [1, 1]} : vector<24x32xf32> to vector<24x8xf32>
    %483 = vector.shape_cast %482 : vector<24x8xf32> to vector<2x12x8xf32>
    %484 = vector.extract_strided_slice %481 {offsets = [0, 8], sizes = [24, 8], strides = [1, 1]} : vector<24x32xf32> to vector<24x8xf32>
    %485 = vector.shape_cast %484 : vector<24x8xf32> to vector<2x12x8xf32>
    %486 = vector.extract_strided_slice %481 {offsets = [0, 16], sizes = [24, 8], strides = [1, 1]} : vector<24x32xf32> to vector<24x8xf32>
    %487 = vector.shape_cast %486 : vector<24x8xf32> to vector<2x12x8xf32>
    %488 = vector.extract_strided_slice %481 {offsets = [0, 24], sizes = [24, 8], strides = [1, 1]} : vector<24x32xf32> to vector<24x8xf32>
    %489 = vector.shape_cast %488 : vector<24x8xf32> to vector<2x12x8xf32>
    %490 = tpu.concatenate %483, %485, %487, %489 in 0 : vector<2x12x8xf32>, vector<2x12x8xf32>, vector<2x12x8xf32>, vector<2x12x8xf32> -> vector<8x12x8xf32>
    %491 = arith.truncf %456 : vector<8x8x8xf32> to vector<8x8x8xbf16>
    %492 = arith.truncf %473 : vector<8x12x8xf32> to vector<8x12x8xbf16>
    "tpu.trace_start"() <{level = 10 : i32, message = "zqd,zkd->zqk"}> : () -> ()
    %cst_121 = arith.constant dense<0.000000e+00> : vector<8x8x12xf32>
    %493 = tpu.matmul %491, %492, %cst_121 {dimension_numbers = #tpu.dot_dimension_numbers<[2], [2], [1], [1], [0, 0, 0, 1, 1, 1], [0], [0]>} : vector<8x8x8xbf16>, vector<8x12x8xbf16>, vector<8x8x12xf32> -> vector<8x8x12xf32>
    "tpu.trace_stop"() : () -> ()
    %cst_122 = arith.constant 0.353553385 : f32
    %494 = vector.broadcast %cst_122 : f32 to vector<8x8x12xf32>
    %495 = arith.mulf %493, %494 : vector<8x8x12xf32>
    %cst_123 = arith.constant dense<0xFF800000> : vector<8x8xf32>
    %496 = vector.multi_reduction <maximumf>, %495, %cst_123 [2] : vector<8x8x12xf32> to vector<8x8xf32>
    %497 = vector.shape_cast %496 : vector<8x8xf32> to vector<8x8x1xf32>
    %498 = vector.broadcast %497 : vector<8x8x1xf32> to vector<8x8x12xf32>
    %499 = arith.subf %495, %498 : vector<8x8x12xf32>
    %500 = math.exp %499 : vector<8x8x12xf32>
    %cst_124 = arith.constant dense<0.000000e+00> : vector<8x8xf32>
    %501 = vector.multi_reduction <add>, %500, %cst_124 [2] : vector<8x8x12xf32> to vector<8x8xf32>
    %502 = vector.shape_cast %501 : vector<8x8xf32> to vector<8x8x1xf32>
    %503 = tpu.reciprocal %502 : vector<8x8x1xf32> -> vector<8x8x1xf32>
    %504 = vector.broadcast %503 : vector<8x8x1xf32> to vector<8x8x12xf32>
    %505 = arith.mulf %500, %504 : vector<8x8x12xf32>
    %506 = arith.truncf %505 : vector<8x8x12xf32> to vector<8x8x12xbf16>
    %507 = arith.truncf %490 : vector<8x12x8xf32> to vector<8x12x8xbf16>
    "tpu.trace_start"() <{level = 10 : i32, message = "zqk,zkd->zqd"}> : () -> ()
    %cst_125 = arith.constant dense<0.000000e+00> : vector<8x8x8xf32>
    %508 = tpu.matmul %506, %507, %cst_125 {dimension_numbers = #tpu.dot_dimension_numbers<[2], [1], [1], [2], [0, 0, 0, 1, 1, 2], [0], [0]>} : vector<8x8x12xbf16>, vector<8x12x8xbf16>, vector<8x8x8xf32> -> vector<8x8x8xf32>
    "tpu.trace_stop"() : () -> ()
    %509 = vector.extract_strided_slice %508 {offsets = [0, 0, 0], sizes = [2, 8, 8], strides = [1, 1, 1]} : vector<8x8x8xf32> to vector<2x8x8xf32>
    %510 = vector.extract_strided_slice %508 {offsets = [2, 0, 0], sizes = [2, 8, 8], strides = [1, 1, 1]} : vector<8x8x8xf32> to vector<2x8x8xf32>
    %511 = vector.extract_strided_slice %508 {offsets = [4, 0, 0], sizes = [2, 8, 8], strides = [1, 1, 1]} : vector<8x8x8xf32> to vector<2x8x8xf32>
    %512 = vector.extract_strided_slice %508 {offsets = [6, 0, 0], sizes = [2, 8, 8], strides = [1, 1, 1]} : vector<8x8x8xf32> to vector<2x8x8xf32>
    %513 = tpu.concatenate %509, %510, %511, %512 in 2 : vector<2x8x8xf32>, vector<2x8x8xf32>, vector<2x8x8xf32>, vector<2x8x8xf32> -> vector<2x8x32xf32>
    %514 = vector.shape_cast %513 : vector<2x8x32xf32> to vector<16x32xf32>
    %515 = arith.truncf %514 : vector<16x32xf32> to vector<16x32xbf16>
    %c800 = arith.constant 800 : index
    %c0_126 = arith.constant 0 : index
    %516 = vector.load %arg2[%c800, %c0_126] : memref<1440x128xbf16, #tpu.memory_space<vmem>>, vector<32x128xbf16>
    %517 = vector.extract_strided_slice %516 {offsets = [0, 0], sizes = [32, 32], strides = [1, 1]} : vector<32x128xbf16> to vector<32x32xbf16>
    %cst_127 = arith.constant dense<0.000000e+00> : vector<16x32xf32>
    %518 = tpu.matmul %515, %517, %cst_127 {dimension_numbers = #tpu.dot_dimension_numbers<[1], [0], [0], [1], [0, 0, 1, 1], [], []>} : vector<16x32xbf16>, vector<32x32xbf16>, vector<16x32xf32> -> vector<16x32xf32>
    %c27 = arith.constant 27 : index
    %c0_128 = arith.constant 0 : index
    %519 = vector.load %arg3[%c27, %c0_128] : memref<57x128xf32, #tpu.memory_space<vmem>>, vector<1x128xf32>
    %520 = vector.extract_strided_slice %519 {offsets = [0, 0], sizes = [1, 32], strides = [1, 1]} : vector<1x128xf32> to vector<1x32xf32>
    %521 = vector.broadcast %520 : vector<1x32xf32> to vector<16x32xf32>
    %522 = arith.addf %518, %521 : vector<16x32xf32>
    %523 = arith.addf %439, %522 : vector<16x32xf32>
    %cst_129 = arith.constant dense<0.000000e+00> : vector<16xf32>
    %524 = vector.multi_reduction <add>, %523, %cst_129 [1] : vector<16x32xf32> to vector<16xf32>
    %525 = vector.shape_cast %524 : vector<16xf32> to vector<16x1xf32>
    %cst_130 = arith.constant 3.200000e+01 : f32
    %526 = vector.broadcast %cst_130 : f32 to vector<16x1xf32>
    %527 = arith.divf %525, %526 : vector<16x1xf32>
    %528 = vector.broadcast %527 : vector<16x1xf32> to vector<16x32xf32>
    %529 = arith.subf %523, %528 : vector<16x32xf32>
    %530 = arith.mulf %529, %529 : vector<16x32xf32>
    %cst_131 = arith.constant dense<0.000000e+00> : vector<16xf32>
    %531 = vector.multi_reduction <add>, %530, %cst_131 [1] : vector<16x32xf32> to vector<16xf32>
    %532 = vector.shape_cast %531 : vector<16xf32> to vector<16x1xf32>
    %cst_132 = arith.constant 3.200000e+01 : f32
    %533 = vector.broadcast %cst_132 : f32 to vector<16x1xf32>
    %534 = arith.divf %532, %533 : vector<16x1xf32>
    %cst_133 = arith.constant 9.99999974E-6 : f32
    %535 = vector.broadcast %cst_133 : f32 to vector<16x1xf32>
    %536 = arith.addf %534, %535 : vector<16x1xf32>
    %537 = math.rsqrt %536 : vector<16x1xf32>
    %538 = vector.broadcast %537 : vector<16x1xf32> to vector<16x32xf32>
    %539 = arith.mulf %529, %538 : vector<16x32xf32>
    %c32_134 = arith.constant 32 : index
    %c0_135 = arith.constant 0 : index
    %540 = vector.load %arg3[%c32_134, %c0_135] : memref<57x128xf32, #tpu.memory_space<vmem>>, vector<1x128xf32>
    %541 = vector.extract_strided_slice %540 {offsets = [0, 0], sizes = [1, 32], strides = [1, 1]} : vector<1x128xf32> to vector<1x32xf32>
    %542 = vector.broadcast %541 : vector<1x32xf32> to vector<16x32xf32>
    %543 = arith.mulf %539, %542 : vector<16x32xf32>
    %c33 = arith.constant 33 : index
    %c0_136 = arith.constant 0 : index
    %544 = vector.load %arg3[%c33, %c0_136] : memref<57x128xf32, #tpu.memory_space<vmem>>, vector<1x128xf32>
    %545 = vector.extract_strided_slice %544 {offsets = [0, 0], sizes = [1, 32], strides = [1, 1]} : vector<1x128xf32> to vector<1x32xf32>
    %546 = vector.broadcast %545 : vector<1x32xf32> to vector<16x32xf32>
    %547 = arith.addf %543, %546 : vector<16x32xf32>
    %548 = arith.truncf %547 : vector<16x32xf32> to vector<16x32xbf16>
    %c832 = arith.constant 832 : index
    %c0_137 = arith.constant 0 : index
    %549 = vector.load %arg2[%c832, %c0_137] : memref<1440x128xbf16, #tpu.memory_space<vmem>>, vector<32x128xbf16>
    %cst_138 = arith.constant dense<0.000000e+00> : vector<16x128xf32>
    %550 = tpu.matmul %548, %549, %cst_138 {dimension_numbers = #tpu.dot_dimension_numbers<[1], [0], [0], [1], [0, 0, 1, 1], [], []>} : vector<16x32xbf16>, vector<32x128xbf16>, vector<16x128xf32> -> vector<16x128xf32>
    %c28 = arith.constant 28 : index
    %c0_139 = arith.constant 0 : index
    %551 = vector.load %arg3[%c28, %c0_139] : memref<57x128xf32, #tpu.memory_space<vmem>>, vector<1x128xf32>
    %552 = vector.broadcast %551 : vector<1x128xf32> to vector<16x128xf32>
    %553 = arith.addf %550, %552 : vector<16x128xf32>
    %cst_140 = arith.constant 0.000000e+00 : f32
    %554 = vector.broadcast %cst_140 : f32 to vector<16x128xf32>
    %555 = arith.maximumf %553, %554 : vector<16x128xf32>
    %556 = arith.truncf %555 : vector<16x128xf32> to vector<16x128xbf16>
    %c864 = arith.constant 864 : index
    %c0_141 = arith.constant 0 : index
    %557 = vector.load %arg2[%c864, %c0_141] : memref<1440x128xbf16, #tpu.memory_space<vmem>>, vector<128x128xbf16>
    %558 = vector.extract_strided_slice %557 {offsets = [0, 0], sizes = [128, 32], strides = [1, 1]} : vector<128x128xbf16> to vector<128x32xbf16>
    %cst_142 = arith.constant dense<0.000000e+00> : vector<16x32xf32>
    %559 = tpu.matmul %556, %558, %cst_142 {dimension_numbers = #tpu.dot_dimension_numbers<[1], [0], [0], [1], [0, 0, 1, 1], [], []>} : vector<16x128xbf16>, vector<128x32xbf16>, vector<16x32xf32> -> vector<16x32xf32>
    %c29 = arith.constant 29 : index
    %c0_143 = arith.constant 0 : index
    %560 = vector.load %arg3[%c29, %c0_143] : memref<57x128xf32, #tpu.memory_space<vmem>>, vector<1x128xf32>
    %561 = vector.extract_strided_slice %560 {offsets = [0, 0], sizes = [1, 32], strides = [1, 1]} : vector<1x128xf32> to vector<1x32xf32>
    %562 = vector.broadcast %561 : vector<1x32xf32> to vector<16x32xf32>
    %563 = arith.addf %559, %562 : vector<16x32xf32>
    %564 = arith.addf %547, %563 : vector<16x32xf32>
    %cst_144 = arith.constant dense<0.000000e+00> : vector<16xf32>
    %565 = vector.multi_reduction <add>, %564, %cst_144 [1] : vector<16x32xf32> to vector<16xf32>
    %566 = vector.shape_cast %565 : vector<16xf32> to vector<16x1xf32>
    %cst_145 = arith.constant 3.200000e+01 : f32
    %567 = vector.broadcast %cst_145 : f32 to vector<16x1xf32>
    %568 = arith.divf %566, %567 : vector<16x1xf32>
    %569 = vector.broadcast %568 : vector<16x1xf32> to vector<16x32xf32>
    %570 = arith.subf %564, %569 : vector<16x32xf32>
    %571 = arith.mulf %570, %570 : vector<16x32xf32>
    %cst_146 = arith.constant dense<0.000000e+00> : vector<16xf32>
    %572 = vector.multi_reduction <add>, %571, %cst_146 [1] : vector<16x32xf32> to vector<16xf32>
    %573 = vector.shape_cast %572 : vector<16xf32> to vector<16x1xf32>
    %cst_147 = arith.constant 3.200000e+01 : f32
    %574 = vector.broadcast %cst_147 : f32 to vector<16x1xf32>
    %575 = arith.divf %573, %574 : vector<16x1xf32>
    %cst_148 = arith.constant 9.99999974E-6 : f32
    %576 = vector.broadcast %cst_148 : f32 to vector<16x1xf32>
    %577 = arith.addf %575, %576 : vector<16x1xf32>
    %578 = math.rsqrt %577 : vector<16x1xf32>
    %579 = vector.broadcast %578 : vector<16x1xf32> to vector<16x32xf32>
    %580 = arith.mulf %570, %579 : vector<16x32xf32>
    %c34 = arith.constant 34 : index
    %c0_149 = arith.constant 0 : index
    %581 = vector.load %arg3[%c34, %c0_149] : memref<57x128xf32, #tpu.memory_space<vmem>>, vector<1x128xf32>
    %582 = vector.extract_strided_slice %581 {offsets = [0, 0], sizes = [1, 32], strides = [1, 1]} : vector<1x128xf32> to vector<1x32xf32>
    %583 = vector.broadcast %582 : vector<1x32xf32> to vector<16x32xf32>
    %584 = arith.mulf %580, %583 : vector<16x32xf32>
    %c35 = arith.constant 35 : index
    %c0_150 = arith.constant 0 : index
    %585 = vector.load %arg3[%c35, %c0_150] : memref<57x128xf32, #tpu.memory_space<vmem>>, vector<1x128xf32>
    %586 = vector.extract_strided_slice %585 {offsets = [0, 0], sizes = [1, 32], strides = [1, 1]} : vector<1x128xf32> to vector<1x32xf32>
    %587 = vector.broadcast %586 : vector<1x32xf32> to vector<16x32xf32>
    %588 = arith.addf %584, %587 : vector<16x32xf32>
    %589 = arith.truncf %588 : vector<16x32xf32> to vector<16x32xbf16>
    %c992 = arith.constant 992 : index
    %c0_151 = arith.constant 0 : index
    %590 = vector.load %arg2[%c992, %c0_151] : memref<1440x128xbf16, #tpu.memory_space<vmem>>, vector<32x128xbf16>
    %591 = vector.extract_strided_slice %590 {offsets = [0, 0], sizes = [32, 32], strides = [1, 1]} : vector<32x128xbf16> to vector<32x32xbf16>
    %cst_152 = arith.constant dense<0.000000e+00> : vector<16x32xf32>
    %592 = tpu.matmul %589, %591, %cst_152 {dimension_numbers = #tpu.dot_dimension_numbers<[1], [0], [0], [1], [0, 0, 1, 1], [], []>} : vector<16x32xbf16>, vector<32x32xbf16>, vector<16x32xf32> -> vector<16x32xf32>
    %c36 = arith.constant 36 : index
    %c0_153 = arith.constant 0 : index
    %593 = vector.load %arg3[%c36, %c0_153] : memref<57x128xf32, #tpu.memory_space<vmem>>, vector<1x128xf32>
    %594 = vector.extract_strided_slice %593 {offsets = [0, 0], sizes = [1, 32], strides = [1, 1]} : vector<1x128xf32> to vector<1x32xf32>
    %595 = vector.broadcast %594 : vector<1x32xf32> to vector<16x32xf32>
    %596 = arith.addf %592, %595 : vector<16x32xf32>
    %597 = vector.extract_strided_slice %596 {offsets = [0, 0], sizes = [16, 8], strides = [1, 1]} : vector<16x32xf32> to vector<16x8xf32>
    %598 = vector.shape_cast %597 : vector<16x8xf32> to vector<2x8x8xf32>
    %599 = vector.extract_strided_slice %596 {offsets = [0, 8], sizes = [16, 8], strides = [1, 1]} : vector<16x32xf32> to vector<16x8xf32>
    %600 = vector.shape_cast %599 : vector<16x8xf32> to vector<2x8x8xf32>
    %601 = vector.extract_strided_slice %596 {offsets = [0, 16], sizes = [16, 8], strides = [1, 1]} : vector<16x32xf32> to vector<16x8xf32>
    %602 = vector.shape_cast %601 : vector<16x8xf32> to vector<2x8x8xf32>
    %603 = vector.extract_strided_slice %596 {offsets = [0, 24], sizes = [16, 8], strides = [1, 1]} : vector<16x32xf32> to vector<16x8xf32>
    %604 = vector.shape_cast %603 : vector<16x8xf32> to vector<2x8x8xf32>
    %605 = tpu.concatenate %598, %600, %602, %604 in 0 : vector<2x8x8xf32>, vector<2x8x8xf32>, vector<2x8x8xf32>, vector<2x8x8xf32> -> vector<8x8x8xf32>
    %606 = arith.truncf %588 : vector<16x32xf32> to vector<16x32xbf16>
    %c1024 = arith.constant 1024 : index
    %c0_154 = arith.constant 0 : index
    %607 = vector.load %arg2[%c1024, %c0_154] : memref<1440x128xbf16, #tpu.memory_space<vmem>>, vector<32x128xbf16>
    %608 = vector.extract_strided_slice %607 {offsets = [0, 0], sizes = [32, 32], strides = [1, 1]} : vector<32x128xbf16> to vector<32x32xbf16>
    %cst_155 = arith.constant dense<0.000000e+00> : vector<16x32xf32>
    %609 = tpu.matmul %606, %608, %cst_155 {dimension_numbers = #tpu.dot_dimension_numbers<[1], [0], [0], [1], [0, 0, 1, 1], [], []>} : vector<16x32xbf16>, vector<32x32xbf16>, vector<16x32xf32> -> vector<16x32xf32>
    %c37 = arith.constant 37 : index
    %c0_156 = arith.constant 0 : index
    %610 = vector.load %arg3[%c37, %c0_156] : memref<57x128xf32, #tpu.memory_space<vmem>>, vector<1x128xf32>
    %611 = vector.extract_strided_slice %610 {offsets = [0, 0], sizes = [1, 32], strides = [1, 1]} : vector<1x128xf32> to vector<1x32xf32>
    %612 = vector.broadcast %611 : vector<1x32xf32> to vector<16x32xf32>
    %613 = arith.addf %609, %612 : vector<16x32xf32>
    %614 = vector.extract_strided_slice %613 {offsets = [0, 0], sizes = [16, 8], strides = [1, 1]} : vector<16x32xf32> to vector<16x8xf32>
    %615 = vector.shape_cast %614 : vector<16x8xf32> to vector<2x8x8xf32>
    %616 = vector.extract_strided_slice %613 {offsets = [0, 8], sizes = [16, 8], strides = [1, 1]} : vector<16x32xf32> to vector<16x8xf32>
    %617 = vector.shape_cast %616 : vector<16x8xf32> to vector<2x8x8xf32>
    %618 = vector.extract_strided_slice %613 {offsets = [0, 16], sizes = [16, 8], strides = [1, 1]} : vector<16x32xf32> to vector<16x8xf32>
    %619 = vector.shape_cast %618 : vector<16x8xf32> to vector<2x8x8xf32>
    %620 = vector.extract_strided_slice %613 {offsets = [0, 24], sizes = [16, 8], strides = [1, 1]} : vector<16x32xf32> to vector<16x8xf32>
    %621 = vector.shape_cast %620 : vector<16x8xf32> to vector<2x8x8xf32>
    %622 = tpu.concatenate %615, %617, %619, %621 in 0 : vector<2x8x8xf32>, vector<2x8x8xf32>, vector<2x8x8xf32>, vector<2x8x8xf32> -> vector<8x8x8xf32>
    %623 = arith.truncf %588 : vector<16x32xf32> to vector<16x32xbf16>
    %c1056 = arith.constant 1056 : index
    %c0_157 = arith.constant 0 : index
    %624 = vector.load %arg2[%c1056, %c0_157] : memref<1440x128xbf16, #tpu.memory_space<vmem>>, vector<32x128xbf16>
    %625 = vector.extract_strided_slice %624 {offsets = [0, 0], sizes = [32, 32], strides = [1, 1]} : vector<32x128xbf16> to vector<32x32xbf16>
    %cst_158 = arith.constant dense<0.000000e+00> : vector<16x32xf32>
    %626 = tpu.matmul %623, %625, %cst_158 {dimension_numbers = #tpu.dot_dimension_numbers<[1], [0], [0], [1], [0, 0, 1, 1], [], []>} : vector<16x32xbf16>, vector<32x32xbf16>, vector<16x32xf32> -> vector<16x32xf32>
    %c38 = arith.constant 38 : index
    %c0_159 = arith.constant 0 : index
    %627 = vector.load %arg3[%c38, %c0_159] : memref<57x128xf32, #tpu.memory_space<vmem>>, vector<1x128xf32>
    %628 = vector.extract_strided_slice %627 {offsets = [0, 0], sizes = [1, 32], strides = [1, 1]} : vector<1x128xf32> to vector<1x32xf32>
    %629 = vector.broadcast %628 : vector<1x32xf32> to vector<16x32xf32>
    %630 = arith.addf %626, %629 : vector<16x32xf32>
    %631 = vector.extract_strided_slice %630 {offsets = [0, 0], sizes = [16, 8], strides = [1, 1]} : vector<16x32xf32> to vector<16x8xf32>
    %632 = vector.shape_cast %631 : vector<16x8xf32> to vector<2x8x8xf32>
    %633 = vector.extract_strided_slice %630 {offsets = [0, 8], sizes = [16, 8], strides = [1, 1]} : vector<16x32xf32> to vector<16x8xf32>
    %634 = vector.shape_cast %633 : vector<16x8xf32> to vector<2x8x8xf32>
    %635 = vector.extract_strided_slice %630 {offsets = [0, 16], sizes = [16, 8], strides = [1, 1]} : vector<16x32xf32> to vector<16x8xf32>
    %636 = vector.shape_cast %635 : vector<16x8xf32> to vector<2x8x8xf32>
    %637 = vector.extract_strided_slice %630 {offsets = [0, 24], sizes = [16, 8], strides = [1, 1]} : vector<16x32xf32> to vector<16x8xf32>
    %638 = vector.shape_cast %637 : vector<16x8xf32> to vector<2x8x8xf32>
    %639 = tpu.concatenate %632, %634, %636, %638 in 0 : vector<2x8x8xf32>, vector<2x8x8xf32>, vector<2x8x8xf32>, vector<2x8x8xf32> -> vector<8x8x8xf32>
    %640 = arith.truncf %605 : vector<8x8x8xf32> to vector<8x8x8xbf16>
    %641 = arith.truncf %622 : vector<8x8x8xf32> to vector<8x8x8xbf16>
    "tpu.trace_start"() <{level = 10 : i32, message = "zqd,zkd->zqk"}> : () -> ()
    %cst_160 = arith.constant dense<0.000000e+00> : vector<8x8x8xf32>
    %642 = tpu.matmul %640, %641, %cst_160 {dimension_numbers = #tpu.dot_dimension_numbers<[2], [2], [1], [1], [0, 0, 0, 1, 1, 1], [0], [0]>} : vector<8x8x8xbf16>, vector<8x8x8xbf16>, vector<8x8x8xf32> -> vector<8x8x8xf32>
    "tpu.trace_stop"() : () -> ()
    %cst_161 = arith.constant 0.353553385 : f32
    %643 = vector.broadcast %cst_161 : f32 to vector<8x8x8xf32>
    %644 = arith.mulf %642, %643 : vector<8x8x8xf32>
    %cst_162 = arith.constant dense<0xFF800000> : vector<8x8xf32>
    %645 = vector.multi_reduction <maximumf>, %644, %cst_162 [2] : vector<8x8x8xf32> to vector<8x8xf32>
    %646 = vector.shape_cast %645 : vector<8x8xf32> to vector<8x8x1xf32>
    %647 = vector.broadcast %646 : vector<8x8x1xf32> to vector<8x8x8xf32>
    %648 = arith.subf %644, %647 : vector<8x8x8xf32>
    %649 = math.exp %648 : vector<8x8x8xf32>
    %cst_163 = arith.constant dense<0.000000e+00> : vector<8x8xf32>
    %650 = vector.multi_reduction <add>, %649, %cst_163 [2] : vector<8x8x8xf32> to vector<8x8xf32>
    %651 = vector.shape_cast %650 : vector<8x8xf32> to vector<8x8x1xf32>
    %652 = tpu.reciprocal %651 : vector<8x8x1xf32> -> vector<8x8x1xf32>
    %653 = vector.broadcast %652 : vector<8x8x1xf32> to vector<8x8x8xf32>
    %654 = arith.mulf %649, %653 : vector<8x8x8xf32>
    %655 = arith.truncf %654 : vector<8x8x8xf32> to vector<8x8x8xbf16>
    %656 = arith.truncf %639 : vector<8x8x8xf32> to vector<8x8x8xbf16>
    "tpu.trace_start"() <{level = 10 : i32, message = "zqk,zkd->zqd"}> : () -> ()
    %cst_164 = arith.constant dense<0.000000e+00> : vector<8x8x8xf32>
    %657 = tpu.matmul %655, %656, %cst_164 {dimension_numbers = #tpu.dot_dimension_numbers<[2], [1], [1], [2], [0, 0, 0, 1, 1, 2], [0], [0]>} : vector<8x8x8xbf16>, vector<8x8x8xbf16>, vector<8x8x8xf32> -> vector<8x8x8xf32>
    "tpu.trace_stop"() : () -> ()
    %658 = vector.extract_strided_slice %657 {offsets = [0, 0, 0], sizes = [2, 8, 8], strides = [1, 1, 1]} : vector<8x8x8xf32> to vector<2x8x8xf32>
    %659 = vector.extract_strided_slice %657 {offsets = [2, 0, 0], sizes = [2, 8, 8], strides = [1, 1, 1]} : vector<8x8x8xf32> to vector<2x8x8xf32>
    %660 = vector.extract_strided_slice %657 {offsets = [4, 0, 0], sizes = [2, 8, 8], strides = [1, 1, 1]} : vector<8x8x8xf32> to vector<2x8x8xf32>
    %661 = vector.extract_strided_slice %657 {offsets = [6, 0, 0], sizes = [2, 8, 8], strides = [1, 1, 1]} : vector<8x8x8xf32> to vector<2x8x8xf32>
    %662 = tpu.concatenate %658, %659, %660, %661 in 2 : vector<2x8x8xf32>, vector<2x8x8xf32>, vector<2x8x8xf32>, vector<2x8x8xf32> -> vector<2x8x32xf32>
    %663 = vector.shape_cast %662 : vector<2x8x32xf32> to vector<16x32xf32>
    %664 = arith.truncf %663 : vector<16x32xf32> to vector<16x32xbf16>
    %c1088 = arith.constant 1088 : index
    %c0_165 = arith.constant 0 : index
    %665 = vector.load %arg2[%c1088, %c0_165] : memref<1440x128xbf16, #tpu.memory_space<vmem>>, vector<32x128xbf16>
    %666 = vector.extract_strided_slice %665 {offsets = [0, 0], sizes = [32, 32], strides = [1, 1]} : vector<32x128xbf16> to vector<32x32xbf16>
    %cst_166 = arith.constant dense<0.000000e+00> : vector<16x32xf32>
    %667 = tpu.matmul %664, %666, %cst_166 {dimension_numbers = #tpu.dot_dimension_numbers<[1], [0], [0], [1], [0, 0, 1, 1], [], []>} : vector<16x32xbf16>, vector<32x32xbf16>, vector<16x32xf32> -> vector<16x32xf32>
    %c39 = arith.constant 39 : index
    %c0_167 = arith.constant 0 : index
    %668 = vector.load %arg3[%c39, %c0_167] : memref<57x128xf32, #tpu.memory_space<vmem>>, vector<1x128xf32>
    %669 = vector.extract_strided_slice %668 {offsets = [0, 0], sizes = [1, 32], strides = [1, 1]} : vector<1x128xf32> to vector<1x32xf32>
    %670 = vector.broadcast %669 : vector<1x32xf32> to vector<16x32xf32>
    %671 = arith.addf %667, %670 : vector<16x32xf32>
    %672 = arith.addf %588, %671 : vector<16x32xf32>
    %cst_168 = arith.constant dense<0.000000e+00> : vector<16xf32>
    %673 = vector.multi_reduction <add>, %672, %cst_168 [1] : vector<16x32xf32> to vector<16xf32>
    %674 = vector.shape_cast %673 : vector<16xf32> to vector<16x1xf32>
    %cst_169 = arith.constant 3.200000e+01 : f32
    %675 = vector.broadcast %cst_169 : f32 to vector<16x1xf32>
    %676 = arith.divf %674, %675 : vector<16x1xf32>
    %677 = vector.broadcast %676 : vector<16x1xf32> to vector<16x32xf32>
    %678 = arith.subf %672, %677 : vector<16x32xf32>
    %679 = arith.mulf %678, %678 : vector<16x32xf32>
    %cst_170 = arith.constant dense<0.000000e+00> : vector<16xf32>
    %680 = vector.multi_reduction <add>, %679, %cst_170 [1] : vector<16x32xf32> to vector<16xf32>
    %681 = vector.shape_cast %680 : vector<16xf32> to vector<16x1xf32>
    %cst_171 = arith.constant 3.200000e+01 : f32
    %682 = vector.broadcast %cst_171 : f32 to vector<16x1xf32>
    %683 = arith.divf %681, %682 : vector<16x1xf32>
    %cst_172 = arith.constant 9.99999974E-6 : f32
    %684 = vector.broadcast %cst_172 : f32 to vector<16x1xf32>
    %685 = arith.addf %683, %684 : vector<16x1xf32>
    %686 = math.rsqrt %685 : vector<16x1xf32>
    %687 = vector.broadcast %686 : vector<16x1xf32> to vector<16x32xf32>
    %688 = arith.mulf %678, %687 : vector<16x32xf32>
    %c46 = arith.constant 46 : index
    %c0_173 = arith.constant 0 : index
    %689 = vector.load %arg3[%c46, %c0_173] : memref<57x128xf32, #tpu.memory_space<vmem>>, vector<1x128xf32>
    %690 = vector.extract_strided_slice %689 {offsets = [0, 0], sizes = [1, 32], strides = [1, 1]} : vector<1x128xf32> to vector<1x32xf32>
    %691 = vector.broadcast %690 : vector<1x32xf32> to vector<16x32xf32>
    %692 = arith.mulf %688, %691 : vector<16x32xf32>
    %c47 = arith.constant 47 : index
    %c0_174 = arith.constant 0 : index
    %693 = vector.load %arg3[%c47, %c0_174] : memref<57x128xf32, #tpu.memory_space<vmem>>, vector<1x128xf32>
    %694 = vector.extract_strided_slice %693 {offsets = [0, 0], sizes = [1, 32], strides = [1, 1]} : vector<1x128xf32> to vector<1x32xf32>
    %695 = vector.broadcast %694 : vector<1x32xf32> to vector<16x32xf32>
    %696 = arith.addf %692, %695 : vector<16x32xf32>
    %697 = arith.truncf %696 : vector<16x32xf32> to vector<16x32xbf16>
    %c1120 = arith.constant 1120 : index
    %c0_175 = arith.constant 0 : index
    %698 = vector.load %arg2[%c1120, %c0_175] : memref<1440x128xbf16, #tpu.memory_space<vmem>>, vector<32x128xbf16>
    %699 = vector.extract_strided_slice %698 {offsets = [0, 0], sizes = [32, 32], strides = [1, 1]} : vector<32x128xbf16> to vector<32x32xbf16>
    %cst_176 = arith.constant dense<0.000000e+00> : vector<16x32xf32>
    %700 = tpu.matmul %697, %699, %cst_176 {dimension_numbers = #tpu.dot_dimension_numbers<[1], [0], [0], [1], [0, 0, 1, 1], [], []>} : vector<16x32xbf16>, vector<32x32xbf16>, vector<16x32xf32> -> vector<16x32xf32>
    %c40 = arith.constant 40 : index
    %c0_177 = arith.constant 0 : index
    %701 = vector.load %arg3[%c40, %c0_177] : memref<57x128xf32, #tpu.memory_space<vmem>>, vector<1x128xf32>
    %702 = vector.extract_strided_slice %701 {offsets = [0, 0], sizes = [1, 32], strides = [1, 1]} : vector<1x128xf32> to vector<1x32xf32>
    %703 = vector.broadcast %702 : vector<1x32xf32> to vector<16x32xf32>
    %704 = arith.addf %700, %703 : vector<16x32xf32>
    %705 = vector.extract_strided_slice %704 {offsets = [0, 0], sizes = [16, 8], strides = [1, 1]} : vector<16x32xf32> to vector<16x8xf32>
    %706 = vector.shape_cast %705 : vector<16x8xf32> to vector<2x8x8xf32>
    %707 = vector.extract_strided_slice %704 {offsets = [0, 8], sizes = [16, 8], strides = [1, 1]} : vector<16x32xf32> to vector<16x8xf32>
    %708 = vector.shape_cast %707 : vector<16x8xf32> to vector<2x8x8xf32>
    %709 = vector.extract_strided_slice %704 {offsets = [0, 16], sizes = [16, 8], strides = [1, 1]} : vector<16x32xf32> to vector<16x8xf32>
    %710 = vector.shape_cast %709 : vector<16x8xf32> to vector<2x8x8xf32>
    %711 = vector.extract_strided_slice %704 {offsets = [0, 24], sizes = [16, 8], strides = [1, 1]} : vector<16x32xf32> to vector<16x8xf32>
    %712 = vector.shape_cast %711 : vector<16x8xf32> to vector<2x8x8xf32>
    %713 = tpu.concatenate %706, %708, %710, %712 in 0 : vector<2x8x8xf32>, vector<2x8x8xf32>, vector<2x8x8xf32>, vector<2x8x8xf32> -> vector<8x8x8xf32>
    %714 = arith.truncf %331 : vector<24x32xf32> to vector<24x32xbf16>
    %c1152 = arith.constant 1152 : index
    %c0_178 = arith.constant 0 : index
    %715 = vector.load %arg2[%c1152, %c0_178] : memref<1440x128xbf16, #tpu.memory_space<vmem>>, vector<32x128xbf16>
    %716 = vector.extract_strided_slice %715 {offsets = [0, 0], sizes = [32, 32], strides = [1, 1]} : vector<32x128xbf16> to vector<32x32xbf16>
    %cst_179 = arith.constant dense<0.000000e+00> : vector<24x32xf32>
    %717 = tpu.matmul %714, %716, %cst_179 {dimension_numbers = #tpu.dot_dimension_numbers<[1], [0], [0], [1], [0, 0, 1, 1], [], []>} : vector<24x32xbf16>, vector<32x32xbf16>, vector<24x32xf32> -> vector<24x32xf32>
    %c41 = arith.constant 41 : index
    %c0_180 = arith.constant 0 : index
    %718 = vector.load %arg3[%c41, %c0_180] : memref<57x128xf32, #tpu.memory_space<vmem>>, vector<1x128xf32>
    %719 = vector.extract_strided_slice %718 {offsets = [0, 0], sizes = [1, 32], strides = [1, 1]} : vector<1x128xf32> to vector<1x32xf32>
    %720 = vector.broadcast %719 : vector<1x32xf32> to vector<24x32xf32>
    %721 = arith.addf %717, %720 : vector<24x32xf32>
    %722 = vector.extract_strided_slice %721 {offsets = [0, 0], sizes = [24, 8], strides = [1, 1]} : vector<24x32xf32> to vector<24x8xf32>
    %723 = vector.shape_cast %722 : vector<24x8xf32> to vector<2x12x8xf32>
    %724 = vector.extract_strided_slice %721 {offsets = [0, 8], sizes = [24, 8], strides = [1, 1]} : vector<24x32xf32> to vector<24x8xf32>
    %725 = vector.shape_cast %724 : vector<24x8xf32> to vector<2x12x8xf32>
    %726 = vector.extract_strided_slice %721 {offsets = [0, 16], sizes = [24, 8], strides = [1, 1]} : vector<24x32xf32> to vector<24x8xf32>
    %727 = vector.shape_cast %726 : vector<24x8xf32> to vector<2x12x8xf32>
    %728 = vector.extract_strided_slice %721 {offsets = [0, 24], sizes = [24, 8], strides = [1, 1]} : vector<24x32xf32> to vector<24x8xf32>
    %729 = vector.shape_cast %728 : vector<24x8xf32> to vector<2x12x8xf32>
    %730 = tpu.concatenate %723, %725, %727, %729 in 0 : vector<2x12x8xf32>, vector<2x12x8xf32>, vector<2x12x8xf32>, vector<2x12x8xf32> -> vector<8x12x8xf32>
    %731 = arith.truncf %331 : vector<24x32xf32> to vector<24x32xbf16>
    %c1184 = arith.constant 1184 : index
    %c0_181 = arith.constant 0 : index
    %732 = vector.load %arg2[%c1184, %c0_181] : memref<1440x128xbf16, #tpu.memory_space<vmem>>, vector<32x128xbf16>
    %733 = vector.extract_strided_slice %732 {offsets = [0, 0], sizes = [32, 32], strides = [1, 1]} : vector<32x128xbf16> to vector<32x32xbf16>
    %cst_182 = arith.constant dense<0.000000e+00> : vector<24x32xf32>
    %734 = tpu.matmul %731, %733, %cst_182 {dimension_numbers = #tpu.dot_dimension_numbers<[1], [0], [0], [1], [0, 0, 1, 1], [], []>} : vector<24x32xbf16>, vector<32x32xbf16>, vector<24x32xf32> -> vector<24x32xf32>
    %c42 = arith.constant 42 : index
    %c0_183 = arith.constant 0 : index
    %735 = vector.load %arg3[%c42, %c0_183] : memref<57x128xf32, #tpu.memory_space<vmem>>, vector<1x128xf32>
    %736 = vector.extract_strided_slice %735 {offsets = [0, 0], sizes = [1, 32], strides = [1, 1]} : vector<1x128xf32> to vector<1x32xf32>
    %737 = vector.broadcast %736 : vector<1x32xf32> to vector<24x32xf32>
    %738 = arith.addf %734, %737 : vector<24x32xf32>
    %739 = vector.extract_strided_slice %738 {offsets = [0, 0], sizes = [24, 8], strides = [1, 1]} : vector<24x32xf32> to vector<24x8xf32>
    %740 = vector.shape_cast %739 : vector<24x8xf32> to vector<2x12x8xf32>
    %741 = vector.extract_strided_slice %738 {offsets = [0, 8], sizes = [24, 8], strides = [1, 1]} : vector<24x32xf32> to vector<24x8xf32>
    %742 = vector.shape_cast %741 : vector<24x8xf32> to vector<2x12x8xf32>
    %743 = vector.extract_strided_slice %738 {offsets = [0, 16], sizes = [24, 8], strides = [1, 1]} : vector<24x32xf32> to vector<24x8xf32>
    %744 = vector.shape_cast %743 : vector<24x8xf32> to vector<2x12x8xf32>
    %745 = vector.extract_strided_slice %738 {offsets = [0, 24], sizes = [24, 8], strides = [1, 1]} : vector<24x32xf32> to vector<24x8xf32>
    %746 = vector.shape_cast %745 : vector<24x8xf32> to vector<2x12x8xf32>
    %747 = tpu.concatenate %740, %742, %744, %746 in 0 : vector<2x12x8xf32>, vector<2x12x8xf32>, vector<2x12x8xf32>, vector<2x12x8xf32> -> vector<8x12x8xf32>
    %748 = arith.truncf %713 : vector<8x8x8xf32> to vector<8x8x8xbf16>
    %749 = arith.truncf %730 : vector<8x12x8xf32> to vector<8x12x8xbf16>
    "tpu.trace_start"() <{level = 10 : i32, message = "zqd,zkd->zqk"}> : () -> ()
    %cst_184 = arith.constant dense<0.000000e+00> : vector<8x8x12xf32>
    %750 = tpu.matmul %748, %749, %cst_184 {dimension_numbers = #tpu.dot_dimension_numbers<[2], [2], [1], [1], [0, 0, 0, 1, 1, 1], [0], [0]>} : vector<8x8x8xbf16>, vector<8x12x8xbf16>, vector<8x8x12xf32> -> vector<8x8x12xf32>
    "tpu.trace_stop"() : () -> ()
    %cst_185 = arith.constant 0.353553385 : f32
    %751 = vector.broadcast %cst_185 : f32 to vector<8x8x12xf32>
    %752 = arith.mulf %750, %751 : vector<8x8x12xf32>
    %cst_186 = arith.constant dense<0xFF800000> : vector<8x8xf32>
    %753 = vector.multi_reduction <maximumf>, %752, %cst_186 [2] : vector<8x8x12xf32> to vector<8x8xf32>
    %754 = vector.shape_cast %753 : vector<8x8xf32> to vector<8x8x1xf32>
    %755 = vector.broadcast %754 : vector<8x8x1xf32> to vector<8x8x12xf32>
    %756 = arith.subf %752, %755 : vector<8x8x12xf32>
    %757 = math.exp %756 : vector<8x8x12xf32>
    %cst_187 = arith.constant dense<0.000000e+00> : vector<8x8xf32>
    %758 = vector.multi_reduction <add>, %757, %cst_187 [2] : vector<8x8x12xf32> to vector<8x8xf32>
    %759 = vector.shape_cast %758 : vector<8x8xf32> to vector<8x8x1xf32>
    %760 = tpu.reciprocal %759 : vector<8x8x1xf32> -> vector<8x8x1xf32>
    %761 = vector.broadcast %760 : vector<8x8x1xf32> to vector<8x8x12xf32>
    %762 = arith.mulf %757, %761 : vector<8x8x12xf32>
    %763 = arith.truncf %762 : vector<8x8x12xf32> to vector<8x8x12xbf16>
    %764 = arith.truncf %747 : vector<8x12x8xf32> to vector<8x12x8xbf16>
    "tpu.trace_start"() <{level = 10 : i32, message = "zqk,zkd->zqd"}> : () -> ()
    %cst_188 = arith.constant dense<0.000000e+00> : vector<8x8x8xf32>
    %765 = tpu.matmul %763, %764, %cst_188 {dimension_numbers = #tpu.dot_dimension_numbers<[2], [1], [1], [2], [0, 0, 0, 1, 1, 2], [0], [0]>} : vector<8x8x12xbf16>, vector<8x12x8xbf16>, vector<8x8x8xf32> -> vector<8x8x8xf32>
    "tpu.trace_stop"() : () -> ()
    %766 = vector.extract_strided_slice %765 {offsets = [0, 0, 0], sizes = [2, 8, 8], strides = [1, 1, 1]} : vector<8x8x8xf32> to vector<2x8x8xf32>
    %767 = vector.extract_strided_slice %765 {offsets = [2, 0, 0], sizes = [2, 8, 8], strides = [1, 1, 1]} : vector<8x8x8xf32> to vector<2x8x8xf32>
    %768 = vector.extract_strided_slice %765 {offsets = [4, 0, 0], sizes = [2, 8, 8], strides = [1, 1, 1]} : vector<8x8x8xf32> to vector<2x8x8xf32>
    %769 = vector.extract_strided_slice %765 {offsets = [6, 0, 0], sizes = [2, 8, 8], strides = [1, 1, 1]} : vector<8x8x8xf32> to vector<2x8x8xf32>
    %770 = tpu.concatenate %766, %767, %768, %769 in 2 : vector<2x8x8xf32>, vector<2x8x8xf32>, vector<2x8x8xf32>, vector<2x8x8xf32> -> vector<2x8x32xf32>
    %771 = vector.shape_cast %770 : vector<2x8x32xf32> to vector<16x32xf32>
    %772 = arith.truncf %771 : vector<16x32xf32> to vector<16x32xbf16>
    %c1216 = arith.constant 1216 : index
    %c0_189 = arith.constant 0 : index
    %773 = vector.load %arg2[%c1216, %c0_189] : memref<1440x128xbf16, #tpu.memory_space<vmem>>, vector<32x128xbf16>
    %774 = vector.extract_strided_slice %773 {offsets = [0, 0], sizes = [32, 32], strides = [1, 1]} : vector<32x128xbf16> to vector<32x32xbf16>
    %cst_190 = arith.constant dense<0.000000e+00> : vector<16x32xf32>
    %775 = tpu.matmul %772, %774, %cst_190 {dimension_numbers = #tpu.dot_dimension_numbers<[1], [0], [0], [1], [0, 0, 1, 1], [], []>} : vector<16x32xbf16>, vector<32x32xbf16>, vector<16x32xf32> -> vector<16x32xf32>
    %c43 = arith.constant 43 : index
    %c0_191 = arith.constant 0 : index
    %776 = vector.load %arg3[%c43, %c0_191] : memref<57x128xf32, #tpu.memory_space<vmem>>, vector<1x128xf32>
    %777 = vector.extract_strided_slice %776 {offsets = [0, 0], sizes = [1, 32], strides = [1, 1]} : vector<1x128xf32> to vector<1x32xf32>
    %778 = vector.broadcast %777 : vector<1x32xf32> to vector<16x32xf32>
    %779 = arith.addf %775, %778 : vector<16x32xf32>
    %780 = arith.addf %696, %779 : vector<16x32xf32>
    %cst_192 = arith.constant dense<0.000000e+00> : vector<16xf32>
    %781 = vector.multi_reduction <add>, %780, %cst_192 [1] : vector<16x32xf32> to vector<16xf32>
    %782 = vector.shape_cast %781 : vector<16xf32> to vector<16x1xf32>
    %cst_193 = arith.constant 3.200000e+01 : f32
    %783 = vector.broadcast %cst_193 : f32 to vector<16x1xf32>
    %784 = arith.divf %782, %783 : vector<16x1xf32>
    %785 = vector.broadcast %784 : vector<16x1xf32> to vector<16x32xf32>
    %786 = arith.subf %780, %785 : vector<16x32xf32>
    %787 = arith.mulf %786, %786 : vector<16x32xf32>
    %cst_194 = arith.constant dense<0.000000e+00> : vector<16xf32>
    %788 = vector.multi_reduction <add>, %787, %cst_194 [1] : vector<16x32xf32> to vector<16xf32>
    %789 = vector.shape_cast %788 : vector<16xf32> to vector<16x1xf32>
    %cst_195 = arith.constant 3.200000e+01 : f32
    %790 = vector.broadcast %cst_195 : f32 to vector<16x1xf32>
    %791 = arith.divf %789, %790 : vector<16x1xf32>
    %cst_196 = arith.constant 9.99999974E-6 : f32
    %792 = vector.broadcast %cst_196 : f32 to vector<16x1xf32>
    %793 = arith.addf %791, %792 : vector<16x1xf32>
    %794 = math.rsqrt %793 : vector<16x1xf32>
    %795 = vector.broadcast %794 : vector<16x1xf32> to vector<16x32xf32>
    %796 = arith.mulf %786, %795 : vector<16x32xf32>
    %c48 = arith.constant 48 : index
    %c0_197 = arith.constant 0 : index
    %797 = vector.load %arg3[%c48, %c0_197] : memref<57x128xf32, #tpu.memory_space<vmem>>, vector<1x128xf32>
    %798 = vector.extract_strided_slice %797 {offsets = [0, 0], sizes = [1, 32], strides = [1, 1]} : vector<1x128xf32> to vector<1x32xf32>
    %799 = vector.broadcast %798 : vector<1x32xf32> to vector<16x32xf32>
    %800 = arith.mulf %796, %799 : vector<16x32xf32>
    %c49 = arith.constant 49 : index
    %c0_198 = arith.constant 0 : index
    %801 = vector.load %arg3[%c49, %c0_198] : memref<57x128xf32, #tpu.memory_space<vmem>>, vector<1x128xf32>
    %802 = vector.extract_strided_slice %801 {offsets = [0, 0], sizes = [1, 32], strides = [1, 1]} : vector<1x128xf32> to vector<1x32xf32>
    %803 = vector.broadcast %802 : vector<1x32xf32> to vector<16x32xf32>
    %804 = arith.addf %800, %803 : vector<16x32xf32>
    %805 = arith.truncf %804 : vector<16x32xf32> to vector<16x32xbf16>
    %c1248 = arith.constant 1248 : index
    %c0_199 = arith.constant 0 : index
    %806 = vector.load %arg2[%c1248, %c0_199] : memref<1440x128xbf16, #tpu.memory_space<vmem>>, vector<32x128xbf16>
    %cst_200 = arith.constant dense<0.000000e+00> : vector<16x128xf32>
    %807 = tpu.matmul %805, %806, %cst_200 {dimension_numbers = #tpu.dot_dimension_numbers<[1], [0], [0], [1], [0, 0, 1, 1], [], []>} : vector<16x32xbf16>, vector<32x128xbf16>, vector<16x128xf32> -> vector<16x128xf32>
    %c44 = arith.constant 44 : index
    %c0_201 = arith.constant 0 : index
    %808 = vector.load %arg3[%c44, %c0_201] : memref<57x128xf32, #tpu.memory_space<vmem>>, vector<1x128xf32>
    %809 = vector.broadcast %808 : vector<1x128xf32> to vector<16x128xf32>
    %810 = arith.addf %807, %809 : vector<16x128xf32>
    %cst_202 = arith.constant 0.000000e+00 : f32
    %811 = vector.broadcast %cst_202 : f32 to vector<16x128xf32>
    %812 = arith.maximumf %810, %811 : vector<16x128xf32>
    %813 = arith.truncf %812 : vector<16x128xf32> to vector<16x128xbf16>
    %c1280 = arith.constant 1280 : index
    %c0_203 = arith.constant 0 : index
    %814 = vector.load %arg2[%c1280, %c0_203] : memref<1440x128xbf16, #tpu.memory_space<vmem>>, vector<128x128xbf16>
    %815 = vector.extract_strided_slice %814 {offsets = [0, 0], sizes = [128, 32], strides = [1, 1]} : vector<128x128xbf16> to vector<128x32xbf16>
    %cst_204 = arith.constant dense<0.000000e+00> : vector<16x32xf32>
    %816 = tpu.matmul %813, %815, %cst_204 {dimension_numbers = #tpu.dot_dimension_numbers<[1], [0], [0], [1], [0, 0, 1, 1], [], []>} : vector<16x128xbf16>, vector<128x32xbf16>, vector<16x32xf32> -> vector<16x32xf32>
    %c45 = arith.constant 45 : index
    %c0_205 = arith.constant 0 : index
    %817 = vector.load %arg3[%c45, %c0_205] : memref<57x128xf32, #tpu.memory_space<vmem>>, vector<1x128xf32>
    %818 = vector.extract_strided_slice %817 {offsets = [0, 0], sizes = [1, 32], strides = [1, 1]} : vector<1x128xf32> to vector<1x32xf32>
    %819 = vector.broadcast %818 : vector<1x32xf32> to vector<16x32xf32>
    %820 = arith.addf %816, %819 : vector<16x32xf32>
    %821 = arith.addf %804, %820 : vector<16x32xf32>
    %cst_206 = arith.constant dense<0.000000e+00> : vector<16xf32>
    %822 = vector.multi_reduction <add>, %821, %cst_206 [1] : vector<16x32xf32> to vector<16xf32>
    %823 = vector.shape_cast %822 : vector<16xf32> to vector<16x1xf32>
    %cst_207 = arith.constant 3.200000e+01 : f32
    %824 = vector.broadcast %cst_207 : f32 to vector<16x1xf32>
    %825 = arith.divf %823, %824 : vector<16x1xf32>
    %826 = vector.broadcast %825 : vector<16x1xf32> to vector<16x32xf32>
    %827 = arith.subf %821, %826 : vector<16x32xf32>
    %828 = arith.mulf %827, %827 : vector<16x32xf32>
    %cst_208 = arith.constant dense<0.000000e+00> : vector<16xf32>
    %829 = vector.multi_reduction <add>, %828, %cst_208 [1] : vector<16x32xf32> to vector<16xf32>
    %830 = vector.shape_cast %829 : vector<16xf32> to vector<16x1xf32>
    %cst_209 = arith.constant 3.200000e+01 : f32
    %831 = vector.broadcast %cst_209 : f32 to vector<16x1xf32>
    %832 = arith.divf %830, %831 : vector<16x1xf32>
    %cst_210 = arith.constant 9.99999974E-6 : f32
    %833 = vector.broadcast %cst_210 : f32 to vector<16x1xf32>
    %834 = arith.addf %832, %833 : vector<16x1xf32>
    %835 = math.rsqrt %834 : vector<16x1xf32>
    %836 = vector.broadcast %835 : vector<16x1xf32> to vector<16x32xf32>
    %837 = arith.mulf %827, %836 : vector<16x32xf32>
    %c50 = arith.constant 50 : index
    %c0_211 = arith.constant 0 : index
    %838 = vector.load %arg3[%c50, %c0_211] : memref<57x128xf32, #tpu.memory_space<vmem>>, vector<1x128xf32>
    %839 = vector.extract_strided_slice %838 {offsets = [0, 0], sizes = [1, 32], strides = [1, 1]} : vector<1x128xf32> to vector<1x32xf32>
    %840 = vector.broadcast %839 : vector<1x32xf32> to vector<16x32xf32>
    %841 = arith.mulf %837, %840 : vector<16x32xf32>
    %c51 = arith.constant 51 : index
    %c0_212 = arith.constant 0 : index
    %842 = vector.load %arg3[%c51, %c0_212] : memref<57x128xf32, #tpu.memory_space<vmem>>, vector<1x128xf32>
    %843 = vector.extract_strided_slice %842 {offsets = [0, 0], sizes = [1, 32], strides = [1, 1]} : vector<1x128xf32> to vector<1x32xf32>
    %844 = vector.broadcast %843 : vector<1x32xf32> to vector<16x32xf32>
    %845 = arith.addf %841, %844 : vector<16x32xf32>
    %cst_213 = arith.constant dense<0.000000e+00> : vector<16xf32>
    %846 = vector.multi_reduction <add>, %845, %cst_213 [1] : vector<16x32xf32> to vector<16xf32>
    %847 = vector.shape_cast %846 : vector<16xf32> to vector<16x1xf32>
    %cst_214 = arith.constant 3.200000e+01 : f32
    %848 = vector.broadcast %cst_214 : f32 to vector<16x1xf32>
    %849 = arith.divf %847, %848 : vector<16x1xf32>
    %850 = vector.broadcast %849 : vector<16x1xf32> to vector<16x32xf32>
    %851 = arith.subf %845, %850 : vector<16x32xf32>
    %852 = arith.mulf %851, %851 : vector<16x32xf32>
    %cst_215 = arith.constant dense<0.000000e+00> : vector<16xf32>
    %853 = vector.multi_reduction <add>, %852, %cst_215 [1] : vector<16x32xf32> to vector<16xf32>
    %854 = vector.shape_cast %853 : vector<16xf32> to vector<16x1xf32>
    %cst_216 = arith.constant 3.200000e+01 : f32
    %855 = vector.broadcast %cst_216 : f32 to vector<16x1xf32>
    %856 = arith.divf %854, %855 : vector<16x1xf32>
    %cst_217 = arith.constant 9.99999974E-6 : f32
    %857 = vector.broadcast %cst_217 : f32 to vector<16x1xf32>
    %858 = arith.addf %856, %857 : vector<16x1xf32>
    %859 = math.rsqrt %858 : vector<16x1xf32>
    %860 = vector.broadcast %859 : vector<16x1xf32> to vector<16x32xf32>
    %861 = arith.mulf %851, %860 : vector<16x32xf32>
    %c54 = arith.constant 54 : index
    %c0_218 = arith.constant 0 : index
    %862 = vector.load %arg3[%c54, %c0_218] : memref<57x128xf32, #tpu.memory_space<vmem>>, vector<1x128xf32>
    %863 = vector.extract_strided_slice %862 {offsets = [0, 0], sizes = [1, 32], strides = [1, 1]} : vector<1x128xf32> to vector<1x32xf32>
    %864 = vector.broadcast %863 : vector<1x32xf32> to vector<16x32xf32>
    %865 = arith.mulf %861, %864 : vector<16x32xf32>
    %c55 = arith.constant 55 : index
    %c0_219 = arith.constant 0 : index
    %866 = vector.load %arg3[%c55, %c0_219] : memref<57x128xf32, #tpu.memory_space<vmem>>, vector<1x128xf32>
    %867 = vector.extract_strided_slice %866 {offsets = [0, 0], sizes = [1, 32], strides = [1, 1]} : vector<1x128xf32> to vector<1x32xf32>
    %868 = vector.broadcast %867 : vector<1x32xf32> to vector<16x32xf32>
    %869 = arith.addf %865, %868 : vector<16x32xf32>
    %870 = arith.truncf %869 : vector<16x32xf32> to vector<16x32xbf16>
    %c1408 = arith.constant 1408 : index
    %c0_220 = arith.constant 0 : index
    %871 = vector.load %arg2[%c1408, %c0_220] : memref<1440x128xbf16, #tpu.memory_space<vmem>>, vector<32x128xbf16>
    %cst_221 = arith.constant dense<0.000000e+00> : vector<16x128xf32>
    %872 = tpu.matmul %870, %871, %cst_221 {dimension_numbers = #tpu.dot_dimension_numbers<[1], [0], [0], [1], [0, 0, 1, 1], [], []>} : vector<16x32xbf16>, vector<32x128xbf16>, vector<16x128xf32> -> vector<16x128xf32>
    %c56 = arith.constant 56 : index
    %c0_222 = arith.constant 0 : index
    %873 = vector.load %arg3[%c56, %c0_222] : memref<57x128xf32, #tpu.memory_space<vmem>>, vector<1x128xf32>
    %874 = vector.broadcast %873 : vector<1x128xf32> to vector<16x128xf32>
    %875 = arith.addf %872, %874 : vector<16x128xf32>
    %c0_223 = arith.constant 0 : index
    %c0_224 = arith.constant 0 : index
    %876 = vector.load %arg4[%c0_223, %c0_224] : memref<16x128xf32, #tpu.memory_space<vmem>>, vector<16x128xf32>
    tpu.vector_store %arg4[%c0_223, %c0_224], %875 {strides = array<i32>} : memref<16x128xf32, #tpu.memory_space<vmem>>, vector<16x128xf32>,
    return
  }
}

</mosaic_0001>

<bundles_post_ra>
// kernel: transformer_forward.1
= control target key start
LH: loop header
LB: loop body
LE: loop exit
PB: predicated region body
PF: predicated region fallthrough
CT: control target
= control target key end

     0   :  { %9 = vsyncpa [#allocation3], 0  ;;  %s12055_s15 = smov [#allocation2]   ;;  %s14291_s0 = inlined_call_operand.vmem [shape: s32[40,1], index: 0, kind: input, shape index: {}]   ;;  %s14292_s1 = inlined_call_operand.vmem [shape: f32[64,32], index: 1, kind: input, shape index: {}]   ;;  %s14293_s2 = inlined_call_operand.hbm [shape: bf16[1440,128], index: 2, kind: input, shape index: {}]   ;;  %s14294_s3 = inlined_call_operand.vmem [shape: f32[57,128], index: 3, kind: input, shape index: {}]   ;;  %s14295_s4 = inlined_call_operand.vmem [shape: f32[16,128], index: 4, kind: output, shape index: {}]  }
   0x1   :  { %s19_s16 = sshll.u32 %s12055_s15, 4  ;;  %s20_s16 = int_to_ptr.vmem [resolvable:$true] %s19_s16 }
   0x2   :  { %s12041_s17 = scalar_lea.vmem %s20_s16, 11520  ;;  %p12046_p1 = scmp.lt.s32.totalorder %s20_s16, %s20_s16 }
   0x3   :  { %p12042_p0 = scmp.ne.s32.totalorder %s20_s16, %s12041_s17  ;;  %p12047_p2 = scmp.lt.s32.totalorder %s12041_s17, %s12041_s17 }
   0x5   :  { %p12048_p3 = por %p12047_p2, %p12046_p1 }
   0x7   :  { %p12049_p4 = pnand %p12048_p3, %p12042_p0 }
   0x9   :  { %12052 = shalt.err (!%p12049_p4)
}
   0xa   :  { %s12056_s18 = smov 64   ;;  %s12057_s19 = smov 4  }
   0xb   :  { %25 = dma.hbm_to_vmem [thread:$0]  %s14293_s2, 11520, %s20_s16, [#allocation3], %s12056_s18, %s12056_s18, %s12057_s19  }
   0xc   :  { %12053 = dma.done.wait [#allocation3], 11520  }
   0xd   :  { %12054 = vsyncadd [#allocation3], 4294955776  ;;  %v12058_v0 = vmov 0   ;;  %v12059_v1 = vmov 0.0   ;;  %vm12060_vm0 = vmmov 0   ;;  %v32_v2 = vld [vmem:[%s14291_s0] sm:$0xff]  ;;  %v37_v15 = vlaneseq }
   0xe   :  { %11297 = vset.pattern.permute.xlu0 %v12058_v0  ;;  %11298 = vset.pattern.permute.xlu1 %v12058_v0  ;;  %v34_v3 = vld [vmem:[%s14291_s0 + $0x10] sm:$0xff]  ;;  %v76_v4 = vld [vmem:[%s14292_s1 + $0x38] sm:$0xff]  ;;  %v33_v5 = vld [vmem:[%s14291_s0 + $0x8] sm:$0xff]  ;;  %vm77_vm1 = vcmask 523264   ;;  %vm206_vm7 = vcmask 261120   ;;  %s12061_s21 = smov 120  }
   0xf   :  { %10366 = vmatprep.subr.mxu0 %v12059_v1  ;;  %10382 = vmatprep.mubr.msk.f32.mxu0 %vm12060_vm0, %v12059_v1  ;;  %v35_v6 = vld [vmem:[%s14291_s0 + $0x18] sm:$0xff]  ;;  %v75_v7 = vld [vmem:[%s14292_s1 + $0x30] sm:$0xff]  ;;  %v74_v8 = vld [vmem:[%s14292_s1 + $0x28] sm:$0xff]  ;;  %v38_v16 = vand.u32 127, %v37_v15  ;;  %s12062_s22 = smov 112   ;;  %vm594_vm8 = vcmask 64512  }
  0x10   :  { %40 = vperm.xlu0 %11297, %v32_v2   ;;  %46 = vperm.xlu1 %11298, %v34_v3   ;;  %v36_v9 = vld [vmem:[%s14291_s0 + $0x20] sm:$0xff]  ;;  %v72_v11 = vld [vmem:[%s14292_s1 + $0x18] sm:$0xff]  ;;  %v71_v12 = vld [vmem:[%s14292_s1 + $0x10] sm:$0xff]  ;;  %s12063_s26 = smov 104   ;;  %vm1200_vm9 = vcmask 1045504   ;;  %vm987_vm10 = vcmask 97280  }
  0x11   :  { %10367 = vmatpush3.msra.mxu0 %v76_v4  ;;  %v73_v10 = vld [vmem:[%s14292_s1 + $0x20] sm:$0xff]  ;;  %v70_v13 = vld [vmem:[%s14292_s1 + $0x8] sm:$0xff]  ;;  %v11631_v29 = vld [vmem:[#allocation2 + $0x18] sm:$0xff]   ;;  %vm991_vm11 = vcmask 93184   ;;  %s12064_s27 = smov 8   ;;  %s12065_s28 = smov 16  }
  0x12   :  { %10368 = vmatprep.subr.mxu0 %v12059_v1  ;;  %v69_v14 = vld [vmem:[%s14292_s1] sm:$0xff]  ;;  %v11629_v27 = vld [vmem:[#allocation2 + $0x8] sm:$0xff]   ;;  %v11632_v37 = vld [vmem:[#allocation2 + $0x10] sm:$0xff]   ;;  %s12066_s29 = smov 24   ;;  %vm1626_vm12 = vcmask 130048   ;;  %vm1631_vm13 = vcmask 195584  }
  0x13   :  { %10369 = vmatpush3.msra.mxu0 %v75_v7  ;;  %10397 = vmatprep.subr.bf16.mxu1 %v11629_v27  ;;  %v11630_v28 = vld [vmem:[#allocation2] sm:$0xff]   ;;  %v11633_v40 = vld [vmem:[#allocation2 + $0x28] sm:$0xff]   ;;  %vm4695_vm14 = vcmask 1043456  }
  0x14   :  { %43 = vperm.xlu0 %11297, %v33_v5   ;;  %49 = vperm.xlu1 %11298, %v35_v6   ;;  %v11634_v43 = vld [vmem:[#allocation2 + $0x20] sm:$0xff]  }
  0x15   :  { %10370 = vmatprep.subr.mxu0 %v12059_v1  ;;  %10398 = vmatpush3.bf16.msra.mxu1 %v11629_v27  ;;  %v9736_v45 = vld [vmem:[%s14294_s3] ss:$0 sm:$0xff]  ;;  %v9741_v56 = vld [vmem:[%s14294_s3 + $0x1] ss:$0 sm:$0xff]  ;;  %v9746_v6 = vld [vmem:[%s14294_s3 + $0x2] ss:$0 sm:$0xff] }
  0x16   :  { %10371 = vmatpush3.msra.mxu0 %v74_v8  ;;  %10399 = vmatprep.subr.bf16.mxu1 %v11630_v28 }
  0x17   :  { %10372 = vmatprep.subr.mxu0 %v12059_v1 }
  0x18   :  { %52 = vperm.xlu0 %11297, %v36_v9   ;;  %10373 = vmatpush3.msra.mxu0 %v73_v10 }
  0x19   :  { %10374 = vmatprep.subr.mxu0 %v12059_v1  ;;  %10400 = vmatpush3.bf16.msra.mxu1 %v11630_v28 }
  0x1a   :  { %10375 = vmatpush3.msra.mxu0 %v72_v11  ;;  %10405 = vmatprep.subr.bf16.mxu1 %v11631_v29 }
  0x1b   :  { %10376 = vmatprep.subr.mxu0 %v12059_v1 }
  0x1c   :  { %10377 = vmatpush3.msra.mxu0 %v71_v12 }
  0x1d   :  { %10378 = vmatprep.subr.mxu0 %v12059_v1 }
  0x1e   :  { %10379 = vmatpush3.msra.mxu0 %v70_v13 }
  0x1f   :  { %10380 = vmatprep.subr.mxu0 %v12059_v1 }
  0x20   :  { %10381 = vmatpush3.msra.mxu0 %v69_v14 }
  0x21   :  { %10439 = vmatprep.subr.bf16.mxu0 %v12059_v1 }
  0x8b   :  { %v41_v17 = vpop.permute.xlu0 %40  ;;  %v47_v19 = vpop.permute.xlu1 %46 }
  0x8c   :  { %vm54_vm2 = vcmp.eq.s32.totalorder %v38_v16, %v41_v17  ;;  %vm56_vm3 = vcmp.eq.s32.totalorder %v38_v16, %v47_v19 }
  0x8d   :  { %v9726_v18 = vsel %vm54_vm2, 1.0, %v12059_v1  ;;  %v9728_v22 = vsel %vm56_vm3, 1.0, %v12059_v1 }
  0x8e   :  { %10383 = vmatmul.mubr.msk.f32.vlgmr.msra.gmra.mxu0 %vm77_vm1, %v9726_v18 }
  0x8f   :  { %v44_v20 = vpop.permute.xlu0 %43  ;;  %10385 = vmatprep.mubr.msk.f32.mxu0 %vm12060_vm0, %v12059_v1  ;;  %v50_v23 = vpop.permute.xlu1 %49 }
  0x90   :  { %vm55_vm4 = vcmp.eq.s32.totalorder %v38_v16, %v44_v20  ;;  %vm57_vm5 = vcmp.eq.s32.totalorder %v38_v16, %v50_v23 }
  0x91   :  { %v9727_v21 = vsel %vm55_vm4, 1.0, %v12059_v1  ;;  %v9729_v25 = vsel %vm57_vm5, 1.0, %v12059_v1 }
  0x92   :  { %10386 = vmatmul.mubr.msk.f32.gmra.mxu0 %vm77_vm1, %v9727_v21 }
  0x93   :  { %10388 = vmatprep.mubr.msk.f32.mxu0 %vm12060_vm0, %v12059_v1  ;;  %v53_v24 = vpop.permute.xlu0 %52 }
  0x94   :  { %vm58_vm6 = vcmp.eq.s32.totalorder %v38_v16, %v53_v24 }
  0x95   :  { %v9730_v26 = vsel %vm58_vm6, 1.0, %v12059_v1 }
  0x96   :  { %10389 = vmatmul.mubr.msk.f32.gmra.mxu0 %vm77_vm1, %v9728_v22 }
  0x97   :  { %10391 = vmatprep.mubr.msk.f32.mxu0 %vm12060_vm0, %v12059_v1 }
  0x9a   :  { %10392 = vmatmul.mubr.msk.f32.gmra.mxu0 %vm77_vm1, %v9729_v25 }
  0x9b   :  { %10394 = vmatprep.mubr.msk.f32.mxu0 %vm12060_vm0, %v12059_v1 }
  0x9e   :  { %10395 = vmatmul.mubr.msk.f32.gmra.mxu0 %vm77_vm1, %v9730_v26 }
  0x9f   :  { %10441 = vmatprep.mubr.msk.bf16.mxu0 %vm12060_vm0, %v12059_v1 }
 0x14e   :  { %v12165_v30 = vpop.f32.mrf.mxu0 }
 0x150   :  { %v10384_v31 = vpop.f32.mrf.mxu0 }
 0x152   :  { %v12167_v32 = vpop.f32.mrf.mxu0 }
 0x153   :  { %v183_v33 = vpack.c.bf16 %v12167_v32, %v12165_v30 }
 0x154   :  { %v10387_v34 = vpop.f32.mrf.mxu0 }
 0x155   :  { %10401 = vmatprep.mubr.msk.bf16.mxu1 %vm206_vm7, %v183_v33 }
 0x156   :  { %v12172_v35 = vpop.f32.mrf.mxu0 }
 0x157   :  { %v184_v36 = vpack.c.bf16 %v12172_v35, %v12172_v35 }
 0x158   :  { %v10390_v38 = vpop.f32.mrf.mxu0 }
 0x159   :  { %10402 = vmatmul.mubr.msk.bf16.vlgmr.msra.gmra.mxu1 %vm206_vm7, %v184_v36 }
 0x15a   :  { %v12177_v39 = vpop.f32.mrf.mxu0  ;;  %10406 = vmatpush3.bf16.msra.mxu1 %v11631_v29  ;;  %10409 = vmatprep.mubr.msk.bf16.mxu1 %vm206_vm7, %v183_v33 }
 0x15b   :  { %10407 = vmatprep.subr.bf16.mxu1 %v11632_v37 }
 0x15c   :  { %v10393_v41 = vpop.f32.mrf.mxu0 }
 0x15e   :  { %v12180_v42 = vpop.f32.mrf.mxu0  ;;  %10408 = vmatpush3.bf16.msra.mxu1 %v11632_v37 }
 0x15f   :  { %10413 = vmatprep.subr.bf16.mxu1 %v11633_v40 }
 0x160   :  { %v10396_v44 = vpop.f32.mrf.mxu0 }
 0x161   :  { %10410 = vmatmul.mubr.msk.bf16.vlgmr.msra.gmra.mxu1 %vm206_vm7, %v184_v36 }
 0x162   :  { %10414 = vmatpush3.bf16.msra.mxu1 %v11633_v40  ;;  %10417 = vmatprep.mubr.msk.bf16.mxu1 %vm206_vm7, %v183_v33 }
 0x163   :  { %10415 = vmatprep.subr.bf16.mxu1 %v11634_v43 }
 0x166   :  { %10416 = vmatpush3.bf16.msra.mxu1 %v11634_v43 }
 0x167   :  { %10421 = vmatprep.subr.bf16.mxu1 %v12059_v1 }
 0x169   :  { %10418 = vmatmul.mubr.msk.bf16.vlgmr.msra.gmra.mxu1 %vm206_vm7, %v184_v36 }
 0x16a   :  { %10423 = vmatprep.mubr.msk.bf16.mxu1 %vm12060_vm0, %v12059_v1 }
 0x219   :  { %v10403_v46 = vpop.f32.mrf.mxu1 }
 0x21a   :  { %v12191_v47 = vadd.f32 %v10403_v46, %v9736_v45 }
 0x21b   :  { %v247_v48 = vpop.f32.mrf.mxu1 }
 0x21c   :  { %v12193_v49 = vadd.f32 %v9736_v45, %v247_v48  ;;  %276 = vrot.lane.b32.xlu1 %v12191_v47, %s12061_s21  ;;  %v266_v55 = vcombine.high %v12191_v47, %v12191_v47 }
 0x21d   :  { %v10404_v50 = vpop.f32.mrf.mxu1 }
 0x21e   :  { %268 = vrot.lane.b32.xlu0 %v12193_v49, %s12061_s21  ;;  %v12201_v51 = vcombine.high %v12193_v49, %v12193_v49 }
 0x21f   :  { %v250_v52 = vpop.f32.mrf.mxu1 }
 0x220   :  { %v251_v53 = vadd.f32 %v9736_v45, %v250_v52  ;;  %270 = vrot.lane.b32.xlu1 %v12201_v51, %s12061_s21  ;;  %v546_v15 = vcombine.low %v12193_v49, %v12201_v51 }
 0x221   :  { %v10411_v54 = vpop.f32.mrf.mxu1 }
 0x222   :  { %282 = vrot.lane.b32.xlu0 %v12193_v49, %s12062_s22  ;;  %v12214_v59 = vpack.i.bf16 %v266_v55, %v251_v53  ;;  %v374_v61 = vadd.f32 %v10411_v54, %v9741_v56  ;;  %v265_v2 = vcombine.high %v251_v53, %v251_v53  ;;  %v562_v22 = vpack.c.bf16 %v251_v53, %v546_v15 }
 0x223   :  { %v365_v57 = vpop.f32.mrf.mxu1 }
 0x224   :  { %v366_v58 = vadd.f32 %v9741_v56, %v365_v57  ;;  %284 = vrot.lane.b32.xlu1 %v12201_v51, %s12062_s22  ;;  %v384_v14 = vcombine.high %v374_v61, %v374_v61  ;;  %v547_v26 = vcombine.low %v265_v2, %v12191_v47 }
 0x225   :  { %v10412_v60 = vpop.f32.mrf.mxu1 }
 0x226   :  { %v382_v62 = vcombine.high %v366_v58, %v366_v58  ;;  %11300 = vrot.lane.b32.xlu0 %v12214_v59, %s12061_s21  ;;  %v563_v28 = vpack.c.bf16 %v266_v55, %v547_v26 }
 0x227   :  { %v368_v63 = vpop.f32.mrf.mxu1 }
 0x228   :  { %v369_v0 = vadd.f32 %v9741_v56, %v368_v63  ;;  %394 = vrot.lane.b32.xlu1 %v374_v61, %s12061_s21  ;;  %v570_v3 = vcombine.low %v366_v58, %v382_v62 }
 0x229   :  { %v10419_v4 = vpop.f32.mrf.mxu1 }
 0x22a   :  { %v383_v5 = vcombine.high %v369_v0, %v369_v0  ;;  %274 = vrot.lane.b32.xlu0 %v265_v2, %s12061_s21  ;;  %v586_v7 = vpack.c.bf16 %v369_v0, %v570_v3  ;;  %v12225_v12 = vadd.f32 %v10419_v4, %v9746_v6  ;;  %v11304_v27 = vpack.i.bf16 %v384_v14, %v369_v0 }
 0x22b   :  { %v483_v8 = vpop.f32.mrf.mxu1 }
 0x22c   :  { %v484_v9 = vadd.f32 %v9746_v6, %v483_v8  ;;  %408 = vrot.lane.b32.xlu1 %v374_v61, %s12062_s22  ;;  %v599_v10 = vsel %vm594_vm8, %v586_v7, 0  ;;  %v571_v11 = vcombine.low %v383_v5, %v374_v61  ;;  %v12237_v21 = vcombine.high %v12225_v12, %v12225_v12 }
 0x22d   :  { %v10420_v13 = vpop.f32.mrf.mxu1  ;;  %10422 = vmatpush3.bf16.xpose.msra.mxu1 %v599_v10 }
 0x22e   :  { %386 = vrot.lane.b32.xlu0 %v366_v58, %s12061_s21  ;;  %10427 = vmatprep.subr.bf16.mxu1 %v12059_v1  ;;  %v12231_v16 = vcombine.high %v484_v9, %v484_v9  ;;  %v587_v19 = vpack.c.bf16 %v384_v14, %v571_v11 }
 0x22f   :  { %v486_v17 = vpop.f32.mrf.mxu1 }
 0x230   :  { %v487_v18 = vadd.f32 %v9746_v6, %v486_v17  ;;  %388 = vrot.lane.b32.xlu1 %v382_v62, %s12061_s21  ;;  %v1173_v20 = vcombine.low %v484_v9, %v12231_v16  ;;  %v646_v25 = vsel %vm594_vm8, %v587_v19, 0 }
 0x232   :  { %400 = vrot.lane.b32.xlu0 %v366_v58, %s12062_s22  ;;  %v12240_v23 = vpack.c.bf16 %v487_v18, %v1173_v20  ;;  %v12243_v24 = vpack.i.bf16 %v12237_v21, %v487_v18  ;;  %v12293_v29 = vcombine.high %v487_v18, %v487_v18 }
 0x234   :  { %402 = vrot.lane.b32.xlu1 %v382_v62, %s12062_s22  ;;  %10424 = vmatmul.mubr.msk.bf16.vlgmr.msra.gmra.mxu1 %vm594_vm8, %v562_v22 }
 0x235   :  { %10428 = vmatpush3.bf16.xpose.msra.mxu1 %v646_v25  ;;  %10429 = vmatprep.mubr.msk.bf16.mxu1 %vm12060_vm0, %v12059_v1 }
 0x236   :  { %414 = vrot.lane.b32.xlu0 %v366_v58, %s12063_s26  ;;  %10433 = vmatprep.subr.bf16.mxu1 %v12059_v1 }
 0x238   :  { %416 = vrot.lane.b32.xlu1 %v382_v62, %s12063_s26 }
 0x23a   :  { %392 = vrot.lane.b32.xlu0 %v383_v5, %s12061_s21 }
 0x23c   :  { %11305 = vrot.lane.b32.xlu1 %v11304_v27, %s12061_s21  ;;  %10430 = vmatmul.mubr.msk.bf16.vlgmr.msra.gmra.mxu1 %vm594_vm8, %v563_v28 }
 0x23d   :  { %10435 = vmatprep.mubr.msk.bf16.mxu1 %vm12060_vm0, %v12059_v1 }
 0x23e   :  { %288 = vrot.lane.b32.xlu0 %v265_v2, %s12062_s22 }
 0x240   :  { %11310 = vrot.lane.b32.xlu1 %v11304_v27, %s12062_s22 }
 0x242   :  { %406 = vrot.lane.b32.xlu0 %v383_v5, %s12062_s22 }
 0x244   :  { %290 = vrot.lane.b32.xlu1 %v12191_v47, %s12062_s22 }
 0x246   :  { %11315 = vrot.lane.b32.xlu0 %v12214_v59, %s12062_s22 }
 0x248   :  { %422 = vrot.lane.b32.xlu1 %v374_v61, %s12063_s26 }
 0x24a   :  { %420 = vrot.lane.b32.xlu0 %v383_v5, %s12063_s26 }
 0x24c   :  { %11320 = vrot.lane.b32.xlu1 %v11304_v27, %s12063_s26 }
 0x24e   :  { %296 = vrot.lane.b32.xlu0 %v12193_v49, %s12063_s26 }
 0x250   :  { %298 = vrot.lane.b32.xlu1 %v12201_v51, %s12063_s26 }
 0x252   :  { %302 = vrot.lane.b32.xlu0 %v265_v2, %s12063_s26 }
 0x254   :  { %304 = vrot.lane.b32.xlu1 %v12191_v47, %s12063_s26 }
 0x256   :  { %11325 = vrot.lane.b32.xlu0 %v12214_v59, %s12063_s26 }
 0x258   :  { %526 = vrot.lane.b32.xlu1 %v12225_v12, %s12062_s22 }
 0x25a   :  { %512 = vrot.lane.b32.xlu0 %v12225_v12, %s12061_s21 }
 0x25c   :  { %532 = vrot.lane.b32.xlu1 %v484_v9, %s12063_s26 }
 0x25e   :  { %504 = vrot.lane.b32.xlu0 %v484_v9, %s12061_s21 }
 0x260   :  { %506 = vrot.lane.b32.xlu1 %v12231_v16, %s12061_s21 }
 0x262   :  { %518 = vrot.lane.b32.xlu0 %v484_v9, %s12062_s22 }
 0x264   :  { %520 = vrot.lane.b32.xlu1 %v12231_v16, %s12062_s22 }
 0x266   :  { %11335 = vrot.lane.b32.xlu0 %v12243_v24, %s12062_s22 }
 0x268   :  { %11330 = vrot.lane.b32.xlu1 %v12243_v24, %s12061_s21 }
 0x26a   :  { %524 = vrot.lane.b32.xlu0 %v12293_v29, %s12062_s22 }
 0x26c   :  { %510 = vrot.lane.b32.xlu1 %v12293_v29, %s12061_s21 }
 0x28e   :  { %v277_v31 = vpop.permute.xlu1 %276 }
 0x290   :  { %v269_v33 = vpop.permute.xlu0 %268 }
 0x292   :  { %v271_v34 = vpop.permute.xlu1 %270 }
 0x293   :  { %v548_v7 = vcombine.low %v269_v33, %v271_v34 }
 0x294   :  { %v12299_v36 = vpop.permute.xlu0 %282 }
 0x296   :  { %v12301_v37 = vpop.permute.xlu1 %284 }
 0x297   :  { %v550_v25 = vcombine.low %v12299_v36, %v12301_v37 }
 0x298   :  { %v11301_v38 = vpop.permute.xlu0 %11300 }
 0x299   :  { %v11302_v63 = vunpack.i.l.bf16 %v11301_v38  ;;  %v11303_v8 = vunpack.i.h.bf16 %v11301_v38 }
 0x29a   :  { %v395_v40 = vpop.permute.xlu1 %394 }
 0x29b   :  { %v564_v13 = vpack.c.bf16 %v11302_v63, %v548_v7 }
 0x29c   :  { %v275_v41 = vpop.permute.xlu0 %274 }
 0x29d   :  { %v549_v2 = vcombine.low %v275_v41, %v277_v31 }
 0x29e   :  { %v409_v43 = vpop.permute.xlu1 %408 }
 0x29f   :  { %v565_v14 = vpack.c.bf16 %v11303_v8, %v549_v2 }
 0x2a0   :  { %v387_v44 = vpop.permute.xlu0 %386 }
 0x2a2   :  { %v389_v45 = vpop.permute.xlu1 %388 }
 0x2a3   :  { %v572_v52 = vcombine.low %v387_v44, %v389_v45 }
 0x2a4   :  { %v401_v46 = vpop.permute.xlu0 %400 }
 0x2a6   :  { %v403_v47 = vpop.permute.xlu1 %402 }
 0x2a7   :  { %v574_v3 = vcombine.low %v401_v46, %v403_v47  ;;  %v1174_v47 = vcombine.low %v12293_v29, %v12225_v12 }
 0x2a8   :  { %v415_v48 = vpop.permute.xlu0 %414 }
 0x2aa   :  { %v417_v49 = vpop.permute.xlu1 %416 }
 0x2ab   :  { %v576_v26 = vcombine.low %v415_v48, %v417_v49 }
 0x2ac   :  { %v393_v50 = vpop.permute.xlu0 %392 }
 0x2ad   :  { %v573_v53 = vcombine.low %v393_v50, %v395_v40  ;;  %v1190_v50 = vpack.c.bf16 %v12237_v21, %v1174_v47 }
 0x2ae   :  { %v11306_v51 = vpop.permute.xlu1 %11305 }
 0x2af   :  { %v11308_v54 = vunpack.i.h.bf16 %v11306_v51  ;;  %v11307_v55 = vunpack.i.l.bf16 %v11306_v51 }
 0x2b0   :  { %v289_v56 = vpop.permute.xlu0 %288 }
 0x2b1   :  { %v588_v57 = vpack.c.bf16 %v11307_v55, %v572_v52  ;;  %v589_v58 = vpack.c.bf16 %v11308_v54, %v573_v53 }
 0x2b2   :  { %v11311_v59 = vpop.permute.xlu1 %11310 }
 0x2b3   :  { %v11312_v60 = vunpack.i.l.bf16 %v11311_v59  ;;  %v693_v61 = vsel %vm594_vm8, %v588_v57, 0  ;;  %v740_v62 = vsel %vm594_vm8, %v589_v58, 0  ;;  %v11313_v4 = vunpack.i.h.bf16 %v11311_v59 }
 0x2b4   :  { %10434 = vmatpush3.bf16.xpose.msra.mxu1 %v693_v61  ;;  %10440 = vmatpush3.bf16.xpose.msra.mxu0 %v740_v62  ;;  %v407_v0 = vpop.permute.xlu0 %406  ;;  %v1202_v57 = vsel %vm1200_vm9, %v12240_v23, 0  ;;  %v1249_v58 = vsel %vm1200_vm9, %v1190_v50, 0 }
 0x2b5   :  { %v575_v5 = vcombine.low %v407_v0, %v409_v43  ;;  %10445 = vmatprep.subr.bf16.mxu1 %v12059_v1  ;;  %10451 = vmatprep.subr.bf16.mxu0 %v12059_v1  ;;  %v590_v10 = vpack.c.bf16 %v11312_v60, %v574_v3 }
 0x2b6   :  { %v291_v6 = vpop.permute.xlu1 %290 }
 0x2b7   :  { %v591_v9 = vpack.c.bf16 %v11313_v4, %v575_v5  ;;  %v787_v17 = vsel %vm594_vm8, %v590_v10, 0  ;;  %v551_v28 = vcombine.low %v289_v56, %v291_v6 }
 0x2b8   :  { %v11316_v11 = vpop.permute.xlu0 %11315 }
 0x2b9   :  { %v834_v18 = vsel %vm594_vm8, %v591_v9, 0  ;;  %v11318_v20 = vunpack.i.h.bf16 %v11316_v11  ;;  %v11317_v22 = vunpack.i.l.bf16 %v11316_v11 }
 0x2ba   :  { %v423_v15 = vpop.permute.xlu1 %422 }
 0x2bb   :  { %10436 = vmatmul.mubr.msk.bf16.vlgmr.msra.gmra.mxu1 %vm594_vm8, %v564_v13  ;;  %10442 = vmatmul.mubr.msk.bf16.vlgmr.msra.gmra.mxu0 %vm594_vm8, %v565_v14  ;;  %v567_v40 = vpack.c.bf16 %v11318_v20, %v551_v28  ;;  %v566_v41 = vpack.c.bf16 %v11317_v22, %v550_v25 }
 0x2bc   :  { %v421_v19 = vpop.permute.xlu0 %420  ;;  %10446 = vmatpush3.bf16.xpose.msra.mxu1 %v787_v17  ;;  %10452 = vmatpush3.bf16.xpose.msra.mxu0 %v834_v18 }
 0x2bd   :  { %10447 = vmatprep.mubr.msk.bf16.mxu1 %vm12060_vm0, %v12059_v1  ;;  %10453 = vmatprep.mubr.msk.bf16.mxu0 %vm12060_vm0, %v12059_v1  ;;  %v577_v31 = vcombine.low %v421_v19, %v423_v15 }
 0x2be   :  { %v11321_v27 = vpop.permute.xlu1 %11320  ;;  %10457 = vmatprep.subr.bf16.mxu1 %v12059_v1  ;;  %10463 = vmatprep.subr.bf16.mxu0 %v12059_v1 }
 0x2bf   :  { %v11323_v33 = vunpack.i.h.bf16 %v11321_v27  ;;  %v11322_v34 = vunpack.i.l.bf16 %v11321_v27 }
 0x2c0   :  { %v297_v38 = vpop.permute.xlu0 %296 }
 0x2c1   :  { %v592_v43 = vpack.c.bf16 %v11322_v34, %v576_v26  ;;  %v593_v44 = vpack.c.bf16 %v11323_v33, %v577_v31 }
 0x2c2   :  { %v299_v45 = vpop.permute.xlu1 %298 }
 0x2c3   :  { %10448 = vmatmul.mubr.msk.bf16.vlgmr.msra.gmra.mxu1 %vm594_vm8, %v566_v41  ;;  %10454 = vmatmul.mubr.msk.bf16.vlgmr.msra.gmra.mxu0 %vm594_vm8, %v567_v40  ;;  %v881_v36 = vsel %vm594_vm8, %v592_v43, 0  ;;  %v928_v37 = vsel %vm594_vm8, %v593_v44, 0  ;;  %v552_v51 = vcombine.low %v297_v38, %v299_v45 }
 0x2c4   :  { %v303_v46 = vpop.permute.xlu0 %302  ;;  %10458 = vmatpush3.bf16.xpose.msra.mxu1 %v881_v36  ;;  %10464 = vmatpush3.bf16.xpose.msra.mxu0 %v928_v37 }
 0x2c5   :  { %10459 = vmatprep.mubr.msk.bf16.mxu1 %vm12060_vm0, %v12059_v1  ;;  %10465 = vmatprep.mubr.msk.bf16.mxu0 %vm12060_vm0, %v12059_v1 }
 0x2c6   :  { %v305_v48 = vpop.permute.xlu1 %304  ;;  %10469 = vmatprep.subr.bf16.mxu1 %v12059_v1  ;;  %10475 = vmatprep.subr.bf16.mxu0 %v12059_v1 }
 0x2c7   :  { %v553_v52 = vcombine.low %v303_v46, %v305_v48 }
 0x2c8   :  { %v11326_v49 = vpop.permute.xlu0 %11325 }
 0x2c9   :  { %v11328_v53 = vunpack.i.h.bf16 %v11326_v49  ;;  %v11327_v54 = vunpack.i.l.bf16 %v11326_v49 }
 0x2cb   :  { %v569_v55 = vpack.c.bf16 %v11328_v53, %v553_v52  ;;  %v568_v56 = vpack.c.bf16 %v11327_v54, %v552_v51  ;;  %v12389_v52 = vpop.permute.xlu1 %526 }
 0x2cd   :  { %10460 = vmatmul.mubr.msk.bf16.vlgmr.msra.gmra.mxu1 %vm594_vm8, %v568_v56  ;;  %10466 = vmatmul.mubr.msk.bf16.vlgmr.msra.gmra.mxu0 %vm594_vm8, %v569_v55 }
 0x2ce   :  { %10470 = vmatpush3.bf16.msra.mxu1 %v1202_v57  ;;  %10476 = vmatpush3.bf16.msra.mxu0 %v1249_v58  ;;  %v12395_v58 = vpop.permute.xlu0 %512 }
 0x2cf   :  { %10471 = vmatprep.mubr.msk.bf16.mxu1 %vm12060_vm0, %v12059_v1  ;;  %10481 = vmatprep.subr.bf16.mxu1 %v12059_v1 }
 0x2d0   :  { %10477 = vmatprep.mubr.msk.bf16.mxu0 %vm12060_vm0, %v12059_v1  ;;  %10487 = vmatprep.subr.bf16.mxu0 %v12059_v1 }
 0x2f4   :  { %v635_v21 = vpop.f32.mrf.mxu1 }
 0x2f5   :  { %v12343_v59 = vmul.f32 0.35355338, %v635_v21 }
 0x2f6   :  { %v10425_v60 = vpop.f32.mrf.mxu1 }
 0x2f7   :  { %v988_v23 = vsel %vm987_vm10, %v12343_v59, -inf }
 0x2f8   :  { %989 = vmax.xlane.f32.xlu1 %v988_v23  ;;  %v638_v61 = vpop.f32.mrf.mxu1 }
 0x2f9   :  { %v12347_v62 = vmul.f32 0.35355338, %v638_v61 }
 0x2fa   :  { %v10426_v63 = vpop.f32.mrf.mxu1 }
 0x2fb   :  { %v992_v0 = vsel %vm991_vm11, %v12347_v62, -inf  ;;  %v12401_v63 = vpop.permute.xlu1 %532 }
 0x2fc   :  { %993 = vmax.xlane.f32.xlu0 %v992_v0  ;;  %v682_v2 = vpop.f32.mrf.mxu1 }
 0x2fd   :  { %v12351_v3 = vmul.f32 0.35355338, %v682_v2 }
 0x2fe   :  { %v10431_v4 = vpop.f32.mrf.mxu1 }
 0x2ff   :  { %v995_v5 = vsel %vm987_vm10, %v12351_v3, -inf }
 0x300   :  { %996 = vmax.xlane.f32.xlu0 %v995_v5  ;;  %v685_v6 = vpop.f32.mrf.mxu1 }
 0x301   :  { %v12355_v7 = vmul.f32 0.35355338, %v685_v6 }
 0x302   :  { %v10432_v8 = vpop.f32.mrf.mxu1 }
 0x303   :  { %v998_v9 = vsel %vm991_vm11, %v12355_v7, -inf }
 0x304   :  { %999 = vmax.xlane.f32.xlu1 %v998_v9 }
 0x37b   :  { %v729_v10 = vpop.f32.mrf.mxu1  ;;  %v776_v11 = vpop.f32.mrf.mxu0 }
 0x37c   :  { %v12359_v13 = vmul.f32 0.35355338, %v729_v10  ;;  %v12361_v17 = vmul.f32 0.35355338, %v776_v11  ;;  %v12411_v10 = vpop.permute.xlu0 %504  ;;  %v12413_v11 = vpop.permute.xlu1 %506 }
 0x37d   :  { %v10437_v14 = vpop.f32.mrf.mxu1  ;;  %v10443_v15 = vpop.f32.mrf.mxu0 }
 0x37e   :  { %v1001_v18 = vsel %vm987_vm10, %v12359_v13, -inf  ;;  %v1007_v28 = vsel %vm987_vm10, %v12361_v17, -inf }
 0x37f   :  { %v779_v19 = vpop.f32.mrf.mxu0  ;;  %1002 = vmax.xlane.f32.xlu0 %v1001_v18  ;;  %v732_v20 = vpop.f32.mrf.mxu1 }
 0x380   :  { %v12365_v22 = vmul.f32 0.35355338, %v732_v20  ;;  %v12367_v26 = vmul.f32 0.35355338, %v779_v19  ;;  %v12417_v15 = vpop.permute.xlu0 %518  ;;  %v12419_v18 = vpop.permute.xlu1 %520 }
 0x381   :  { %v10438_v25 = vpop.f32.mrf.mxu1  ;;  %v10444_v27 = vpop.f32.mrf.mxu0 }
 0x382   :  { %v1004_v31 = vsel %vm991_vm11, %v12365_v22, -inf  ;;  %v1010_v44 = vsel %vm991_vm11, %v12367_v26, -inf }
 0x383   :  { %1008 = vmax.xlane.f32.xlu0 %v1007_v28  ;;  %1005 = vmax.xlane.f32.xlu1 %v1004_v31  ;;  %v823_v33 = vpop.f32.mrf.mxu1  ;;  %v870_v34 = vpop.f32.mrf.mxu0 }
 0x384   :  { %v12373_v38 = vmul.f32 0.35355338, %v823_v33  ;;  %v12375_v41 = vmul.f32 0.35355338, %v870_v34  ;;  %v12421_v19 = vpop.permute.xlu0 %11335  ;;  %v12423_v20 = vpop.permute.xlu1 %11330 }
 0x385   :  { %v10449_v40 = vpop.f32.mrf.mxu1  ;;  %v10455_v43 = vpop.f32.mrf.mxu0 }
 0x386   :  { %v1013_v45 = vsel %vm987_vm10, %v12373_v38, -inf  ;;  %v1019_v50 = vsel %vm987_vm10, %v12375_v41, -inf }
 0x387   :  { %1011 = vmax.xlane.f32.xlu1 %v1010_v44  ;;  %1014 = vmax.xlane.f32.xlu0 %v1013_v45  ;;  %v826_v36 = vpop.f32.mrf.mxu1  ;;  %v873_v37 = vpop.f32.mrf.mxu0 }
 0x388   :  { %v12381_v46 = vmul.f32 0.35355338, %v826_v36  ;;  %v12383_v48 = vmul.f32 0.35355338, %v873_v37  ;;  %v12425_v25 = vpop.permute.xlu0 %524  ;;  %v12427_v27 = vpop.permute.xlu1 %510 }
 0x389   :  { %v10450_v47 = vpop.f32.mrf.mxu1  ;;  %v10456_v49 = vpop.f32.mrf.mxu0 }
 0x38a   :  { %v1016_v51 = vsel %vm991_vm11, %v12381_v46, -inf  ;;  %v1022_v56 = vsel %vm991_vm11, %v12383_v48, -inf }
 0x38b   :  { %1020 = vmax.xlane.f32.xlu0 %v1019_v50  ;;  %1017 = vmax.xlane.f32.xlu1 %v1016_v51 }
 0x38c   :  { %v994_v28 = vpop.xlane.xlu0 %993  ;;  %v990_v31 = vpop.xlane.xlu1 %989 }
 0x38d   :  { %v917_v53 = vpop.f32.mrf.mxu1  ;;  %v964_v55 = vpop.f32.mrf.mxu0  ;;  %v1037_v33 = vsub.f32 %v12343_v59, %v990_v31  ;;  %v1038_v40 = vsub.f32 %v12347_v62, %v994_v28 }
 0x38e   :  { %v12391_v54 = vmul.f32 0.35355338, %v917_v53  ;;  %v12397_v21 = vmul.f32 0.35355338, %v964_v55 }
 0x38f   :  { %1023 = vmax.xlane.f32.xlu1 %v1022_v56  ;;  %v10461_v57 = vpop.f32.mrf.mxu1  ;;  %v10467_v60 = vpop.f32.mrf.mxu0  ;;  %v1053_v43 = vmul.f32 1.442695, %v1037_v33  ;;  %v1055_v36 = vmul.f32 1.442695, %v1038_v40 }
 0x390   :  { %v1025_v23 = vsel %vm987_vm10, %v12391_v54, -inf  ;;  %v1031_v8 = vsel %vm987_vm10, %v12397_v21, -inf  ;;  %v997_v34 = vpop.xlane.xlu0 %996  ;;  %v1000_v45 = vpop.xlane.xlu1 %999 }
 0x391   :  { %1026 = vmax.xlane.f32.xlu0 %v1025_v23  ;;  %v920_v61 = vpop.f32.mrf.mxu1  ;;  %v967_v0 = vpop.f32.mrf.mxu0  ;;  %v1039_v44 = vsub.f32 %v12351_v3, %v997_v34  ;;  %11719 = vpow2.f32 %v1053_v43  ;;  %v1040_v47 = vsub.f32 %v12355_v7, %v1000_v45 }
 0x392   :  { %v12403_v2 = vmul.f32 0.35355338, %v920_v61  ;;  %v12405_v5 = vmul.f32 0.35355338, %v967_v0  ;;  %11721 = vpow2.f32 %v1055_v36 }
 0x393   :  { %v10462_v4 = vpop.f32.mrf.mxu1  ;;  %v10468_v6 = vpop.f32.mrf.mxu0  ;;  %v1057_v37 = vmul.f32 1.442695, %v1039_v44 }
 0x394   :  { %v1028_v9 = vsel %vm991_vm11, %v12403_v2, -inf  ;;  %v1034_v14 = vsel %vm991_vm11, %v12405_v5, -inf }
 0x395   :  { %1032 = vmax.xlane.f32.xlu0 %v1031_v8  ;;  %1029 = vmax.xlane.f32.xlu1 %v1028_v9  ;;  %11723 = vpow2.f32 %v1057_v37 }
 0x399   :  { %1035 = vmax.xlane.f32.xlu1 %v1034_v14 }
 0x3aa   :  { %538 = vrot.lane.b32.xlu1 %v12293_v29, %s12063_s26  ;;  %v1059_v29 = vmul.f32 1.442695, %v1040_v47 }
 0x3ab   :  { %534 = vrot.lane.b32.xlu0 %v12231_v16, %s12063_s26  ;;  %v12437_v16 = vpop.eup %11719 }
 0x3ac   :  { %11725 = vpow2.f32 %v1059_v29  ;;  %v12439_v49 = vpop.eup %11721  ;;  %v1085_v59 = vsel %vm987_vm10, %v12437_v16, 0.0 }
 0x3ad   :  { %v12443_v62 = vpop.eup %11723  ;;  %v1088_v7 = vsel %vm991_vm11, %v12439_v49, 0.0 }
 0x3ae   :  { %v1091_v3 = vsel %vm987_vm10, %v12443_v62, 0.0 }
 0x3b9   :  { %v12449_v50 = vpop.eup %11725 }
 0x3ba   :  { %v1094_v51 = vsel %vm991_vm11, %v12449_v50, 0.0 }
 0x3ca   :  { %1086 = vadd.xlane.f32.xlu0 %v1085_v59 }
 0x3ce   :  { %1092 = vadd.xlane.f32.xlu0 %v1091_v3  ;;  %1089 = vadd.xlane.f32.xlu1 %v1088_v7 }
 0x3d2   :  { %1095 = vadd.xlane.f32.xlu1 %v1094_v51 }
 0x408   :  { %v1003_v53 = vpop.xlane.xlu0 %1002 }
 0x409   :  { %v1041_v55 = vsub.f32 %v12359_v13, %v1003_v53 }
 0x40b   :  { %v1061_v56 = vmul.f32 1.442695, %v1041_v55 }
 0x40c   :  { %v1009_v57 = vpop.xlane.xlu0 %1008  ;;  %v1006_v60 = vpop.xlane.xlu1 %1005 }
 0x40d   :  { %11727 = vpow2.f32 %v1061_v56  ;;  %v1043_v23 = vsub.f32 %v12361_v17, %v1009_v57  ;;  %v1042_v61 = vsub.f32 %v12365_v22, %v1006_v60 }
 0x40f   :  { %v1065_v0 = vmul.f32 1.442695, %v1043_v23  ;;  %v1063_v4 = vmul.f32 1.442695, %v1042_v61 }
 0x410   :  { %v1012_v6 = vpop.xlane.xlu1 %1011  ;;  %v1015_v8 = vpop.xlane.xlu0 %1014 }
 0x411   :  { %11729 = vpow2.f32 %v1065_v0  ;;  %v1044_v9 = vsub.f32 %v12367_v26, %v1012_v6  ;;  %v1045_v14 = vsub.f32 %v12373_v38, %v1015_v8 }
 0x412   :  { %11731 = vpow2.f32 %v1063_v4 }
 0x413   :  { %v1067_v28 = vmul.f32 1.442695, %v1044_v9  ;;  %v1069_v13 = vmul.f32 1.442695, %v1045_v14 }
 0x414   :  { %v1021_v31 = vpop.xlane.xlu0 %1020  ;;  %v1018_v33 = vpop.xlane.xlu1 %1017 }
 0x415   :  { %11733 = vpow2.f32 %v1067_v28  ;;  %v1047_v34 = vsub.f32 %v12375_v41, %v1021_v31  ;;  %v1046_v17 = vsub.f32 %v12381_v46, %v1018_v33 }
 0x416   :  { %11735 = vpow2.f32 %v1069_v13 }
 0x417   :  { %v1073_v22 = vmul.f32 1.442695, %v1047_v34  ;;  %v1071_v40 = vmul.f32 1.442695, %v1046_v17 }
 0x418   :  { %v1024_v43 = vpop.xlane.xlu1 %1023 }
 0x419   :  { %11737 = vpow2.f32 %v1073_v22  ;;  %v1048_v44 = vsub.f32 %v12383_v48, %v1024_v43 }
 0x41a   :  { %v12461_v26 = vpop.eup %11727  ;;  %11739 = vpow2.f32 %v1071_v40  ;;  %v1027_v38 = vpop.xlane.xlu0 %1026 }
 0x41b   :  { %v1075_v45 = vmul.f32 1.442695, %v1048_v44  ;;  %v1049_v36 = vsub.f32 %v12391_v54, %v1027_v38  ;;  %v1097_v37 = vsel %vm987_vm10, %v12461_v26, 0.0 }
 0x41c   :  { %1098 = vadd.xlane.f32.xlu0 %v1097_v37 }
 0x41d   :  { %11741 = vpow2.f32 %v1075_v45  ;;  %v1077_v41 = vmul.f32 1.442695, %v1049_v36  ;;  %v11332_v36 = vunpack.i.l.bf16 %v12423_v20 }
 0x41e   :  { %v12466_v46 = vpop.eup %11729  ;;  %v1033_v47 = vpop.xlane.xlu0 %1032 }
 0x41f   :  { %v1030_v29 = vpop.xlane.xlu1 %1029  ;;  %v12468_v59 = vpop.eup %11731  ;;  %11743 = vpow2.f32 %v1077_v41  ;;  %v1051_v48 = vsub.f32 %v12397_v21, %v1033_v47  ;;  %v1103_v54 = vsel %vm987_vm10, %v12466_v46, 0.0 }
 0x420   :  { %v1050_v3 = vsub.f32 %v12403_v2, %v1030_v29  ;;  %1104 = vadd.xlane.f32.xlu0 %v1103_v54  ;;  %v1100_v7 = vsel %vm991_vm11, %v12468_v59, 0.0  ;;  %v11333_v54 = vunpack.i.h.bf16 %v12423_v20 }
 0x421   :  { %v1081_v51 = vmul.f32 1.442695, %v1051_v48  ;;  %1101 = vadd.xlane.f32.xlu1 %v1100_v7 }
 0x422   :  { %v1079_v53 = vmul.f32 1.442695, %v1050_v3  ;;  %v12476_v55 = vpop.eup %11733  ;;  %v12517_v22 = vpop.permute.xlu0 %534 }
 0x423   :  { %v1036_v56 = vpop.xlane.xlu1 %1035  ;;  %v12478_v57 = vpop.eup %11735  ;;  %11745 = vpow2.f32 %v1081_v51  ;;  %v1106_v2 = vsel %vm991_vm11, %v12476_v55, 0.0 }
 0x424   :  { %v1052_v21 = vsub.f32 %v12405_v5, %v1036_v56  ;;  %11747 = vpow2.f32 %v1079_v53  ;;  %v1109_v60 = vsel %vm987_vm10, %v12478_v57, 0.0 }
 0x425   :  { %1110 = vadd.xlane.f32.xlu0 %v1109_v60  ;;  %1107 = vadd.xlane.f32.xlu1 %v1106_v2  ;;  %v11337_v60 = vunpack.i.l.bf16 %v12421_v19 }
 0x426   :  { %v1083_v23 = vmul.f32 1.442695, %v1052_v21  ;;  %v12485_v61 = vpop.eup %11737 }
 0x427   :  { %v12487_v0 = vpop.eup %11739  ;;  %v1115_v4 = vsel %vm987_vm10, %v12485_v61, 0.0  ;;  %v12519_v40 = vpop.permute.xlu1 %538 }
 0x428   :  { %11749 = vpow2.f32 %v1083_v23  ;;  %v1112_v5 = vsel %vm991_vm11, %v12487_v0, 0.0 }
 0x429   :  { %1116 = vadd.xlane.f32.xlu0 %v1115_v4  ;;  %1113 = vadd.xlane.f32.xlu1 %v1112_v5  ;;  %v1177_v5 = vcombine.low %v12417_v15, %v12419_v18 }
 0x42a   :  { %v12493_v6 = vpop.eup %11741 }
 0x42b   :  { %v1118_v8 = vsel %vm991_vm11, %v12493_v6, 0.0 }
 0x42c   :  { %v12497_v9 = vpop.eup %11743 }
 0x42d   :  { %1119 = vadd.xlane.f32.xlu1 %v1118_v8  ;;  %v1121_v14 = vsel %vm987_vm10, %v12497_v9, 0.0 }
 0x42e   :  { %1122 = vadd.xlane.f32.xlu0 %v1121_v14 }
 0x430   :  { %v12501_v28 = vpop.eup %11745 }
 0x431   :  { %v12503_v13 = vpop.eup %11747  ;;  %v1127_v31 = vsel %vm987_vm10, %v12501_v28, 0.0 }
 0x432   :  { %1128 = vadd.xlane.f32.xlu0 %v1127_v31  ;;  %v1124_v33 = vsel %vm991_vm11, %v12503_v13, 0.0 }
 0x433   :  { %1125 = vadd.xlane.f32.xlu1 %v1124_v33 }
 0x435   :  { %v12509_v34 = vpop.eup %11749 }
 0x436   :  { %v1130_v17 = vsel %vm991_vm11, %v12509_v34, 0.0 }
 0x437   :  { %1131 = vadd.xlane.f32.xlu1 %v1130_v17  ;;  %v1193_v17 = vpack.c.bf16 %v11337_v60, %v1177_v5 }
 0x439   :  { %v1390_v15 = vsel %vm1200_vm9, %v1193_v17, 0 }
 0x448   :  { %11340 = vrot.lane.b32.xlu1 %v12243_v24, %s12063_s26  ;;  %540 = vrot.lane.b32.xlu0 %v12225_v12, %s12063_s26  ;;  %v1175_v24 = vcombine.low %v12411_v10, %v12413_v11  ;;  %v1176_v12 = vcombine.low %v12427_v27, %v12395_v58 }
 0x44a   :  { %v1191_v3 = vpack.c.bf16 %v11332_v36, %v1175_v24  ;;  %v1192_v53 = vpack.c.bf16 %v11333_v54, %v1176_v12  ;;  %v11338_v36 = vunpack.i.h.bf16 %v12421_v19 }
 0x44c   :  { %v1296_v10 = vsel %vm1200_vm9, %v1191_v3, 0  ;;  %v1343_v11 = vsel %vm1200_vm9, %v1192_v53, 0  ;;  %v1179_v3 = vcombine.low %v12401_v63, %v12517_v22 }
 0x453   :  { %v1087_v43 = vpop.xlane.xlu0 %1086 }
 0x454   :  { %11751 = vrcp.f32 %v1087_v43  ;;  %v1178_v43 = vcombine.low %v12425_v25, %v12389_v52 }
 0x456   :  { %v1194_v18 = vpack.c.bf16 %v11338_v36, %v1178_v43  ;;  %v11635_v36 = vld [vmem:[#allocation2 + $0x38] sm:$0xff]  }
 0x457   :  { %v1093_v44 = vpop.xlane.xlu0 %1092  ;;  %v1090_v38 = vpop.xlane.xlu1 %1089 }
 0x458   :  { %11753 = vrcp.f32 %v1090_v38 }
 0x459   :  { %11755 = vrcp.f32 %v1093_v44 }
 0x45b   :  { %v1096_v45 = vpop.xlane.xlu1 %1095 }
 0x45c   :  { %11757 = vrcp.f32 %v1096_v45 }
 0x461   :  { %v11752_v37 = vpop.eup %11751 }
 0x462   :  { %v1149_v29 = vmul.f32 %v11752_v37, %v12437_v16 }
 0x465   :  { %v11754_v41 = vpop.eup %11753 }
 0x466   :  { %v11756_v47 = vpop.eup %11755  ;;  %v1150_v48 = vmul.f32 %v11754_v41, %v12439_v49 }
 0x467   :  { %v1151_v56 = vmul.f32 %v11756_v47, %v12443_v62 }
 0x468   :  { %v1165_v51 = vpack.c.bf16 %v1150_v48, %v1149_v29  ;;  %v1437_v29 = vsel %vm1200_vm9, %v1194_v18, 0 }
 0x469   :  { %v11758_v7 = vpop.eup %11757 }
 0x46a   :  { %v1152_v21 = vmul.f32 %v11758_v7, %v12449_v50  ;;  %10472 = vmatmul.mubr.msk.bf16.vlgmr.msra.gmra.mxu1 %vm987_vm10, %v1165_v51 }
 0x46b   :  { %10482 = vmatpush3.bf16.msra.mxu1 %v1296_v10  ;;  %10483 = vmatprep.mubr.msk.bf16.mxu1 %vm12060_vm0, %v12059_v1 }
 0x46c   :  { %v1166_v58 = vpack.c.bf16 %v1152_v21, %v1151_v56  ;;  %10493 = vmatprep.subr.bf16.mxu1 %v12059_v1 }
 0x46e   :  { %10478 = vmatmul.mubr.msk.bf16.vlgmr.msra.gmra.mxu0 %vm987_vm10, %v1166_v58 }
 0x46f   :  { %10488 = vmatpush3.bf16.msra.mxu0 %v1343_v11  ;;  %10489 = vmatprep.mubr.msk.bf16.mxu0 %vm12060_vm0, %v12059_v1 }
 0x470   :  { %10499 = vmatprep.subr.bf16.mxu0 %v12059_v1 }
 0x4a5   :  { %v1099_v20 = vpop.xlane.xlu0 %1098 }
 0x4a6   :  { %11759 = vrcp.f32 %v1099_v20 }
 0x4a9   :  { %v1105_v27 = vpop.xlane.xlu0 %1104 }
 0x4aa   :  { %v1102_v16 = vpop.xlane.xlu1 %1101 }
 0x4ab   :  { %11761 = vrcp.f32 %v1102_v16 }
 0x4ac   :  { %11763 = vrcp.f32 %v1105_v27 }
 0x4ae   :  { %v1111_v49 = vpop.xlane.xlu0 %1110  ;;  %v1108_v62 = vpop.xlane.xlu1 %1107 }
 0x4af   :  { %11765 = vrcp.f32 %v1108_v62 }
 0x4b0   :  { %11767 = vrcp.f32 %v1111_v49 }
 0x4b2   :  { %v1117_v50 = vpop.xlane.xlu0 %1116  ;;  %v1114_v2 = vpop.xlane.xlu1 %1113 }
 0x4b3   :  { %11769 = vrcp.f32 %v1114_v2  ;;  %v11760_v23 = vpop.eup %11759 }
 0x4b4   :  { %11771 = vrcp.f32 %v1117_v50  ;;  %v1153_v31 = vmul.f32 %v11760_v23, %v12461_v26 }
 0x4b6   :  { %v1120_v4 = vpop.xlane.xlu1 %1119 }
 0x4b7   :  { %11773 = vrcp.f32 %v1120_v4  ;;  %v1123_v8 = vpop.xlane.xlu0 %1122 }
 0x4b8   :  { %v11762_v14 = vpop.eup %11761  ;;  %11775 = vrcp.f32 %v1123_v8 }
 0x4b9   :  { %v1154_v33 = vmul.f32 %v11762_v14, %v12468_v59  ;;  %v11764_v44 = vpop.eup %11763 }
 0x4ba   :  { %v1155_v26 = vmul.f32 %v11764_v44, %v12466_v46 }
 0x4bb   :  { %v1129_v38 = vpop.xlane.xlu0 %1128  ;;  %v1167_v45 = vpack.c.bf16 %v1154_v33, %v1153_v31 }
 0x4bc   :  { %v1126_v37 = vpop.xlane.xlu1 %1125  ;;  %v11766_v24 = vpop.eup %11765 }
 0x4bd   :  { %11777 = vrcp.f32 %v1126_v37  ;;  %10484 = vmatmul.mubr.msk.bf16.vlgmr.msra.gmra.mxu1 %vm987_vm10, %v1167_v45  ;;  %v1156_v59 = vmul.f32 %v11766_v24, %v12476_v55  ;;  %v11768_v52 = vpop.eup %11767 }
 0x4be   :  { %10494 = vmatpush3.bf16.msra.mxu1 %v1390_v15  ;;  %10495 = vmatprep.mubr.msk.bf16.mxu1 %vm12060_vm0, %v12059_v1  ;;  %11779 = vrcp.f32 %v1129_v38  ;;  %v1157_v46 = vmul.f32 %v11768_v52, %v12478_v57 }
 0x4bf   :  { %10505 = vmatprep.subr.bf16.mxu1 %v12059_v1  ;;  %v1168_v25 = vpack.c.bf16 %v1156_v59, %v1155_v26  ;;  %v541_v12 = vpop.permute.xlu0 %540  ;;  %v11636_v26 = vld [vmem:[#allocation2 + $0x30] sm:$0xff]  }
 0x4c0   :  { %v1132_v19 = vpop.xlane.xlu1 %1131  ;;  %v11770_v41 = vpop.eup %11769  ;;  %v1180_v54 = vcombine.low %v12519_v40, %v541_v12 }
 0x4c1   :  { %11781 = vrcp.f32 %v1132_v19  ;;  %v11772_v47 = vpop.eup %11771  ;;  %10490 = vmatmul.mubr.msk.bf16.vlgmr.msra.gmra.mxu0 %vm987_vm10, %v1168_v25  ;;  %v1158_v55 = vmul.f32 %v11770_v41, %v12487_v0 }
 0x4c2   :  { %10500 = vmatpush3.bf16.msra.mxu0 %v1437_v29  ;;  %10501 = vmatprep.mubr.msk.bf16.mxu0 %vm12060_vm0, %v12059_v1  ;;  %v1159_v57 = vmul.f32 %v11772_v47, %v12485_v61 }
 0x4c3   :  { %v1169_v51 = vpack.c.bf16 %v1158_v55, %v1157_v46  ;;  %10511 = vmatprep.subr.bf16.mxu0 %v12059_v1 }
 0x4c4   :  { %v11774_v48 = vpop.eup %11773  ;;  %v11341_v7 = vpop.permute.xlu1 %11340 }
 0x4c5   :  { %v11343_v53 = vunpack.i.h.bf16 %v11341_v7  ;;  %v11342_v56 = vunpack.i.l.bf16 %v11341_v7  ;;  %v1160_v0 = vmul.f32 %v11774_v48, %v12493_v6  ;;  %10496 = vmatmul.mubr.msk.bf16.vlgmr.msra.gmra.mxu1 %vm987_vm10, %v1169_v51  ;;  %v11776_v63 = vpop.eup %11775 }
 0x4c6   :  { %10507 = vmatprep.mubr.msk.bf16.mxu1 %vm12060_vm0, %v12059_v1  ;;  %v1161_v61 = vmul.f32 %v11776_v63, %v12497_v9 }
 0x4c7   :  { %v1170_v21 = vpack.c.bf16 %v1160_v0, %v1159_v57  ;;  %v1195_v10 = vpack.c.bf16 %v11342_v56, %v1179_v3  ;;  %v1196_v58 = vpack.c.bf16 %v11343_v53, %v1180_v54 }
 0x4c9   :  { %v1484_v22 = vsel %vm1200_vm9, %v1195_v10, 0  ;;  %v1531_v40 = vsel %vm1200_vm9, %v1196_v58, 0  ;;  %10502 = vmatmul.mubr.msk.bf16.vlgmr.msra.gmra.mxu0 %vm987_vm10, %v1170_v21 }
 0x4ca   :  { %v11778_v11 = vpop.eup %11777  ;;  %10506 = vmatpush3.bf16.msra.mxu1 %v1484_v22  ;;  %10512 = vmatpush3.bf16.msra.mxu0 %v1531_v40 }
 0x4cb   :  { %v1162_v6 = vmul.f32 %v11778_v11, %v12503_v13  ;;  %10513 = vmatprep.mubr.msk.bf16.mxu0 %vm12060_vm0, %v12059_v1  ;;  %v11780_v20 = vpop.eup %11779  ;;  %10517 = vmatprep.subr.bf16.mxu1 %v11635_v36 }
 0x4cc   :  { %v1163_v49 = vmul.f32 %v11780_v20, %v12501_v28 }
 0x4cd   :  { %v1171_v27 = vpack.c.bf16 %v1162_v6, %v1161_v61 }
 0x4ce   :  { %v11782_v16 = vpop.eup %11781 }
 0x4cf   :  { %10508 = vmatmul.mubr.msk.bf16.vlgmr.msra.gmra.mxu1 %vm987_vm10, %v1171_v27  ;;  %v1164_v62 = vmul.f32 %v11782_v16, %v12509_v34 }
 0x4d0   :  { %10518 = vmatpush3.bf16.msra.mxu1 %v11635_v36 }
 0x4d1   :  { %v1172_v50 = vpack.c.bf16 %v1164_v62, %v1163_v49  ;;  %10519 = vmatprep.subr.bf16.mxu1 %v11636_v26 }
 0x4d3   :  { %10514 = vmatmul.mubr.msk.bf16.vlgmr.msra.gmra.mxu0 %vm987_vm10, %v1172_v50 }
 0x4d4   :  { %10520 = vmatpush3.bf16.msra.mxu1 %v11636_v26 }
 0x52a   :  { %v12582_v2 = vpop.f32.mrf.mxu1 }
 0x52c   :  { %v10473_v9 = vpop.f32.mrf.mxu1 }
 0x52e   :  { %v12584_v60 = vpop.f32.mrf.mxu0  ;;  %v12586_v13 = vpop.f32.mrf.mxu1 }
 0x530   :  { %v10479_v23 = vpop.f32.mrf.mxu0  ;;  %v10474_v4 = vpop.f32.mrf.mxu1 }
 0x532   :  { %v12588_v5 = vpop.f32.mrf.mxu0 }
 0x534   :  { %v10480_v8 = vpop.f32.mrf.mxu0 }
 0x57d   :  { %v1332_v14 = vpop.f32.mrf.mxu1 }
 0x57e   :  { %1578 = vrot.lane.b32.xlu0 %v1332_v14, %s12064_s27 }
 0x57f   :  { %v10485_v28 = vpop.f32.mrf.mxu1 }
 0x581   :  { %v1335_v34 = vpop.f32.mrf.mxu1  ;;  %v1379_v31 = vpop.f32.mrf.mxu0 }
 0x582   :  { %1582 = vrot.lane.b32.xlu1 %v1379_v31, %s12064_s27 }
 0x583   :  { %v10486_v33 = vpop.f32.mrf.mxu1  ;;  %v10491_v17 = vpop.f32.mrf.mxu0 }
 0x585   :  { %v1382_v43 = vpop.f32.mrf.mxu0  ;;  %v1426_v44 = vpop.f32.mrf.mxu1 }
 0x586   :  { %1580 = vrot.lane.b32.xlu1 %v1335_v34, %s12064_s27  ;;  %1594 = vrot.lane.b32.xlu0 %v1426_v44, %s12065_s28 }
 0x587   :  { %v10492_v38 = vpop.f32.mrf.mxu0  ;;  %v10497_v45 = vpop.f32.mrf.mxu1 }
 0x589   :  { %v1429_v37 = vpop.f32.mrf.mxu1  ;;  %v1473_v24 = vpop.f32.mrf.mxu0 }
 0x58a   :  { %1584 = vrot.lane.b32.xlu0 %v1382_v43, %s12064_s27  ;;  %1596 = vrot.lane.b32.xlu1 %v1429_v37, %s12065_s28 }
 0x58b   :  { %v10498_v15 = vpop.f32.mrf.mxu1  ;;  %v10503_v18 = vpop.f32.mrf.mxu0 }
 0x58d   :  { %v1476_v59 = vpop.f32.mrf.mxu0 }
 0x58e   :  { %1598 = vrot.lane.b32.xlu0 %v1473_v24, %s12065_s28 }
 0x58f   :  { %v1520_v52 = vpop.f32.mrf.mxu1  ;;  %v10504_v19 = vpop.f32.mrf.mxu0 }
 0x590   :  { %1610 = vrot.lane.b32.xlu1 %v1520_v52, %s12066_s29 }
 0x591   :  { %v10509_v25 = vpop.f32.mrf.mxu1 }
 0x593   :  { %v1523_v41 = vpop.f32.mrf.mxu1  ;;  %v1567_v12 = vpop.f32.mrf.mxu0 }
 0x594   :  { %1614 = vrot.lane.b32.xlu0 %v1567_v12, %s12066_s29  ;;  %1600 = vrot.lane.b32.xlu1 %v1476_v59, %s12065_s28 }
 0x595   :  { %v10510_v47 = vpop.f32.mrf.mxu1  ;;  %v10515_v29 = vpop.f32.mrf.mxu0 }
 0x597   :  { %v1570_v46 = vpop.f32.mrf.mxu0 }
 0x598   :  { %1616 = vrot.lane.b32.xlu1 %v1570_v46, %s12066_s29  ;;  %1612 = vrot.lane.b32.xlu0 %v1523_v41, %s12066_s29 }
 0x599   :  { %v10516_v55 = vpop.f32.mrf.mxu0 }
 0x59a   :  { %v11637_v55 = vld [vmem:[#allocation2 + $0x48] sm:$0xff]  }
 0x59b   :  { %10525 = vmatprep.subr.bf16.mxu0 %v11637_v55 }
 0x59c   :  { %10526 = vmatpush3.bf16.msra.mxu0 %v11637_v55 }
 0x5f0   :  { %v1579_v48 = vpop.permute.xlu0 %1578 }
 0x5f1   :  { %v1622_v0 = vsel %vm594_vm8, %v12582_v2, %v1579_v48  ;;  %v11638_v48 = vld [vmem:[#allocation2 + $0x40] sm:$0xff]  }
 0x5f2   :  { %10527 = vmatprep.subr.bf16.mxu0 %v11638_v48 }
 0x5f3   :  { %10528 = vmatpush3.bf16.msra.mxu0 %v11638_v48 }
 0x5f4   :  { %v1583_v3 = vpop.permute.xlu1 %1582 }
 0x5f5   :  { %v1624_v10 = vsel %vm594_vm8, %v12584_v60, %v1583_v3  ;;  %v11639_v3 = vld [vmem:[#allocation2 + $0x88] sm:$0xff]  }
 0x5f6   :  { %10533 = vmatprep.subr.bf16.mxu1 %v11639_v3 }
 0x5f8   :  { %v1581_v54 = vpop.permute.xlu1 %1580  ;;  %v1595_v7 = vpop.permute.xlu0 %1594 }
 0x5f9   :  { %v1627_v21 = vsel %vm1626_vm12, %v1622_v0, %v1595_v7  ;;  %v1623_v6 = vsel %vm594_vm8, %v12586_v13, %v1581_v54  ;;  %v11640_v54 = vld [vmem:[#allocation2 + $0x80] sm:$0xff]   ;;  %v11641_v7 = vld [vmem:[#allocation2 + $0x78] sm:$0xff]  }
 0x5fc   :  { %v1585_v51 = vpop.permute.xlu0 %1584  ;;  %v1597_v53 = vpop.permute.xlu1 %1596 }
 0x5fd   :  { %v1625_v20 = vsel %vm594_vm8, %v12588_v5, %v1585_v51  ;;  %v1628_v27 = vsel %vm1626_vm12, %v1623_v6, %v1597_v53  ;;  %v9767_v5 = vld [vmem:[%s14294_s3 + $0x3] ss:$0 sm:$0xff]  ;;  %v11642_v51 = vld [vmem:[#allocation2 + $0x70] sm:$0xff]   ;;  %v11643_v53 = vld [vmem:[#allocation2 + $0x68] sm:$0xff]  }
 0x5fe   :  { %v9772_v6 = vld [vmem:[%s14294_s3 + $0x6] ss:$0 sm:$0xff] }
 0x600   :  { %v1599_v56 = vpop.permute.xlu0 %1598 }
 0x601   :  { %v1629_v63 = vsel %vm1626_vm12, %v1624_v10, %v1599_v56 }
 0x602   :  { %v1611_v57 = vpop.permute.xlu1 %1610 }
 0x603   :  { %v1632_v58 = vsel %vm1631_vm13, %v1627_v21, %v1611_v57 }
 0x604   :  { %v1640_v61 = vcombine.high %v1632_v58, %v1632_v58 }
 0x606   :  { %v1615_v22 = vpop.permute.xlu0 %1614  ;;  %v1601_v40 = vpop.permute.xlu1 %1600  ;;  %v1642_v60 = vcombine.low %v1632_v58, %v1640_v61 }
 0x607   :  { %v1634_v11 = vsel %vm1631_vm13, %v1629_v63, %v1615_v22  ;;  %v1630_v49 = vsel %vm1626_vm12, %v1625_v20, %v1601_v40 }
 0x608   :  { %v1641_v16 = vcombine.high %v1634_v11, %v1634_v11 }
 0x60a   :  { %v1617_v62 = vpop.permute.xlu1 %1616  ;;  %v1613_v50 = vpop.permute.xlu0 %1612 }
 0x60b   :  { %v1635_v2 = vsel %vm1631_vm13, %v1630_v49, %v1617_v62  ;;  %v1633_v9 = vsel %vm1631_vm13, %v1628_v27, %v1613_v50  ;;  %v9773_v50 = vld [vmem:[%s14294_s3 + $0x7] ss:$0 sm:$0xff] }
 0x60c   :  { %v1644_v23 = vcombine.low %v1641_v16, %v1635_v2  ;;  %v1643_v4 = vcombine.low %v1633_v9, %v1634_v11 }
 0x60e   :  { %v1649_v8 = vpack.c.bf16 %v1644_v23, %v1644_v23  ;;  %v1648_v14 = vpack.c.bf16 %v1643_v4, %v1642_v60 }
 0x610   :  { %10521 = vmatprep.mubr.msk.bf16.mxu1 %vm206_vm7, %v1648_v14 }
 0x611   :  { %10522 = vmatmul.mubr.msk.bf16.vlgmr.msra.gmra.mxu1 %vm206_vm7, %v1649_v8 }
 0x612   :  { %10534 = vmatpush3.bf16.msra.mxu1 %v11639_v3 }
 0x613   :  { %10535 = vmatprep.subr.bf16.mxu1 %v11640_v54 }
 0x616   :  { %10536 = vmatpush3.bf16.msra.mxu1 %v11640_v54 }
 0x617   :  { %10537 = vmatprep.subr.bf16.mxu1 %v11641_v7 }
 0x61a   :  { %10538 = vmatpush3.bf16.msra.mxu1 %v11641_v7 }
 0x61b   :  { %10539 = vmatprep.subr.bf16.mxu1 %v11642_v51 }
 0x61e   :  { %10540 = vmatpush3.bf16.msra.mxu1 %v11642_v51 }
 0x61f   :  { %10541 = vmatprep.subr.bf16.mxu1 %v11643_v53 }
 0x622   :  { %10542 = vmatpush3.bf16.msra.mxu1 %v11643_v53 }
 0x6d1   :  { %v10523_v13 = vpop.f32.mrf.mxu1 }
 0x6d2   :  { %v1720_v34 = vadd.f32 %v10523_v13, %v9767_v5  ;;  %v11644_v13 = vld [vmem:[#allocation2 + $0x60] sm:$0xff]  }
 0x6d3   :  { %v1711_v28 = vpop.f32.mrf.mxu1  ;;  %10543 = vmatprep.subr.bf16.mxu1 %v11644_v13 }
 0x6d4   :  { %v1712_v31 = vadd.f32 %v9767_v5, %v1711_v28  ;;  %v1727_v45 = vadd.f32 %v1720_v34, %v12172_v35  ;;  %10544 = vmatpush3.bf16.msra.mxu1 %v11644_v13  ;;  %v11646_v28 = vld [vmem:[#allocation2 + $0x50] sm:$0xff]  }
 0x6d5   :  { %v10524_v33 = vpop.f32.mrf.mxu1 }
 0x6d6   :  { %v1725_v17 = vadd.f32 %v1712_v31, %v12165_v30  ;;  %v1734_v24 = vsel %vm206_vm7, %v1727_v45, 0.0  ;;  %v9774_v31 = vld [vmem:[%s14294_s3 + $0x4] ss:$0 sm:$0xff] }
 0x6d7   :  { %v1714_v43 = vpop.f32.mrf.mxu1 }
 0x6d8   :  { %v1715_v44 = vadd.f32 %v9767_v5, %v1714_v43  ;;  %v1728_v38 = vsel %vm206_vm7, %v1725_v17, 0.0  ;;  %v11645_v5 = vld [vmem:[#allocation2 + $0x58] sm:$0xff]  }
 0x6d9   :  { %1729 = vadd.xlane.f32.xlu0 %v1728_v38  ;;  %10545 = vmatprep.subr.bf16.mxu1 %v11645_v5 }
 0x6da   :  { %v1726_v36 = vadd.f32 %v1715_v44, %v12167_v32  ;;  %10546 = vmatpush3.bf16.msra.mxu1 %v11645_v5 }
 0x6db   :  { %10547 = vmatprep.subr.bf16.mxu1 %v11646_v28 }
 0x6dc   :  { %v1731_v37 = vsel %vm206_vm7, %v1726_v36, 0.0 }
 0x6dd   :  { %1732 = vadd.xlane.f32.xlu1 %v1731_v37  ;;  %1735 = vadd.xlane.f32.xlu0 %v1734_v24 }
 0x6de   :  { %10548 = vmatpush3.bf16.msra.mxu1 %v11646_v28 }
 0x6df   :  { %10583 = vmatprep.subr.bf16.mxu1 %v12059_v1 }
 0x762   :  { %v1730_v15 = vpop.xlane.xlu0 %1729 }
 0x763   :  { %v1738_v18 = vmul.f32 0.03125, %v1730_v15 }
 0x765   :  { %v1741_v26 = vsub.f32 %v1725_v17, %v1738_v18 }
 0x766   :  { %v1733_v59 = vpop.xlane.xlu1 %1732  ;;  %v1736_v30 = vpop.xlane.xlu0 %1735 }
 0x767   :  { %v1739_v52 = vmul.f32 0.03125, %v1733_v59  ;;  %v1740_v19 = vmul.f32 0.03125, %v1736_v30  ;;  %v1744_v25 = vmul.f32 %v1741_v26, %v1741_v26  ;;  %v9779_v59 = vld [vmem:[%s14294_s3 + $0x5] ss:$0 sm:$0xff] }
 0x769   :  { %v1742_v41 = vsub.f32 %v1726_v36, %v1739_v52  ;;  %v1743_v12 = vsub.f32 %v1727_v45, %v1740_v19  ;;  %v1747_v35 = vsel %vm206_vm7, %v1744_v25, 0.0 }
 0x76a   :  { %1748 = vadd.xlane.f32.xlu0 %v1747_v35 }
 0x76b   :  { %v1745_v32 = vmul.f32 %v1742_v41, %v1742_v41  ;;  %v1746_v47 = vmul.f32 %v1743_v12, %v1743_v12 }
 0x76d   :  { %v1750_v29 = vsel %vm206_vm7, %v1745_v32, 0.0  ;;  %v1753_v46 = vsel %vm206_vm7, %v1746_v47, 0.0 }
 0x76e   :  { %1751 = vadd.xlane.f32.xlu1 %v1750_v29  ;;  %1754 = vadd.xlane.f32.xlu0 %v1753_v46 }
 0x7f3   :  { %v1749_v56 = vpop.xlane.xlu0 %1748 }
 0x7f4   :  { %v1756_v57 = vmul.f32 0.03125, %v1749_v56 }
 0x7f6   :  { %v1759_v0 = vadd.f32 1e-05, %v1756_v57 }
 0x7f7   :  { %v1752_v21 = vpop.xlane.xlu1 %1751  ;;  %v1755_v10 = vpop.xlane.xlu0 %1754 }
 0x7f8   :  { %11783 = vrsqrt.f32 %v1759_v0  ;;  %v1757_v58 = vmul.f32 0.03125, %v1752_v21  ;;  %v1758_v63 = vmul.f32 0.03125, %v1755_v10 }
 0x7fa   :  { %v1760_v22 = vadd.f32 1e-05, %v1757_v58  ;;  %v1761_v40 = vadd.f32 1e-05, %v1758_v63 }
 0x7fc   :  { %11785 = vrsqrt.f32 %v1760_v22 }
 0x7fd   :  { %11787 = vrsqrt.f32 %v1761_v40 }
 0x805   :  { %v11784_v11 = vpop.eup %11783 }
 0x806   :  { %v1765_v61 = vmul.f32 %v11784_v11, %v1741_v26  ;;  %v11647_v11 = vld [vmem:[#allocation2 + $0x98] sm:$0xff]  }
 0x807   :  { %10553 = vmatprep.subr.bf16.mxu0 %v11647_v11 }
 0x808   :  { %v1773_v49 = vmul.f32 %v9772_v6, %v1765_v61  ;;  %v11648_v61 = vld [vmem:[#allocation2 + $0x90] sm:$0xff]  }
 0x809   :  { %v11786_v20 = vpop.eup %11785 }
 0x80a   :  { %v11788_v27 = vpop.eup %11787  ;;  %v1766_v16 = vmul.f32 %v11786_v20, %v1742_v41  ;;  %v1781_v60 = vadd.f32 %v9773_v50, %v1773_v49 }
 0x80b   :  { %v1767_v62 = vmul.f32 %v11788_v27, %v1743_v12 }
 0x80c   :  { %v1774_v2 = vmul.f32 %v9772_v6, %v1766_v16 }
 0x80d   :  { %v1775_v9 = vmul.f32 %v9772_v6, %v1767_v62  ;;  %v11649_v6 = vld [vmem:[#allocation2 + $0xa8] sm:$0xff]  }
 0x80e   :  { %v1782_v23 = vadd.f32 %v9773_v50, %v1774_v2 }
 0x80f   :  { %v1783_v4 = vadd.f32 %v9773_v50, %v1775_v9 }
 0x810   :  { %v1784_v8 = vpack.c.bf16 %v1782_v23, %v1781_v60 }
 0x811   :  { %v1785_v14 = vpack.c.bf16 %v1783_v4, %v1783_v4 }
 0x812   :  { %10529 = vmatprep.mubr.msk.bf16.mxu0 %vm206_vm7, %v1784_v8  ;;  %v9788_v8 = vld [vmem:[%s14294_s3 + $0x8] ss:$0 sm:$0xff] }
 0x813   :  { %10530 = vmatmul.mubr.msk.bf16.vlgmr.msra.gmra.mxu0 %vm206_vm7, %v1785_v14 }
 0x814   :  { %10554 = vmatpush3.bf16.msra.mxu0 %v11647_v11 }
 0x815   :  { %10555 = vmatprep.subr.bf16.mxu0 %v11648_v61 }
 0x818   :  { %10556 = vmatpush3.bf16.msra.mxu0 %v11648_v61 }
 0x819   :  { %10561 = vmatprep.subr.bf16.mxu0 %v11649_v6 }
 0x8d3   :  { %v10531_v34 = vpop.f32.mrf.mxu0 }
 0x8d4   :  { %v1856_v17 = vadd.f32 %v10531_v34, %v9774_v31 }
 0x8d5   :  { %v1847_v33 = vpop.f32.mrf.mxu0 }
 0x8d6   :  { %v1848_v44 = vadd.f32 %v9774_v31, %v1847_v33  ;;  %v1863_v36 = vmax.f32 %v1856_v17, 0.0 }
 0x8d7   :  { %v10532_v43 = vpop.f32.mrf.mxu0 }
 0x8d8   :  { %v1861_v37 = vmax.f32 %v1848_v44, 0.0  ;;  %v1865_v18 = vpack.c.bf16 %v1863_v36, %v1863_v36 }
 0x8d9   :  { %v1850_v38 = vpop.f32.mrf.mxu0 }
 0x8da   :  { %v1851_v45 = vadd.f32 %v9774_v31, %v1850_v38  ;;  %v9789_v31 = vld [vmem:[%s14294_s3 + $0x9] ss:$0 sm:$0xff] }
 0x8dc   :  { %v1862_v24 = vmax.f32 %v1851_v45, 0.0 }
 0x8de   :  { %v1864_v15 = vpack.c.bf16 %v1862_v24, %v1861_v37  ;;  %v11650_v37 = vld [vmem:[#allocation2 + $0xa0] sm:$0xff]   ;;  %v11651_v24 = vld [vmem:[#allocation2 + $0xb8] sm:$0xff]  }
 0x8e0   :  { %10549 = vmatprep.mubr.bf16.mxu1 %v1864_v15  ;;  %v11652_v15 = vld [vmem:[#allocation2 + $0xb0] sm:$0xff]  }
 0x8e1   :  { %10550 = vmatmul.mubr.bf16.vlgmr.msra.gmra.mxu1 %v1865_v18  ;;  %v9790_v18 = vld [vmem:[%s14294_s3 + $0xa] ss:$0 sm:$0xff] }
 0x8e2   :  { %10585 = vmatprep.mubr.msk.bf16.mxu1 %vm12060_vm0, %v12059_v1 }
 0x9a1   :  { %v10551_v26 = vpop.f32.mrf.mxu1 }
 0x9a2   :  { %v1978_v52 = vadd.f32 %v10551_v26, %v9779_v59 }
 0x9a3   :  { %v1969_v30 = vpop.f32.mrf.mxu1 }
 0x9a4   :  { %v1970_v19 = vadd.f32 %v9779_v59, %v1969_v30  ;;  %v1985_v35 = vadd.f32 %v1978_v52, %v1783_v4 }
 0x9a5   :  { %v10552_v25 = vpop.f32.mrf.mxu1 }
 0x9a6   :  { %v1983_v41 = vadd.f32 %v1970_v19, %v1781_v60  ;;  %v1992_v55 = vsel %vm206_vm7, %v1985_v35, 0.0 }
 0x9a7   :  { %v1972_v12 = vpop.f32.mrf.mxu1 }
 0x9a8   :  { %v1973_v32 = vadd.f32 %v9779_v59, %v1972_v12  ;;  %v1986_v47 = vsel %vm206_vm7, %v1983_v41, 0.0 }
 0x9a9   :  { %1987 = vadd.xlane.f32.xlu1 %v1986_v47  ;;  %v9795_v47 = vld [vmem:[%s14294_s3 + $0xb] ss:$0 sm:$0xff] }
 0x9aa   :  { %v1984_v29 = vadd.f32 %v1973_v32, %v1782_v23 }
 0x9ac   :  { %v1989_v46 = vsel %vm206_vm7, %v1984_v29, 0.0 }
 0x9ad   :  { %1990 = vadd.xlane.f32.xlu0 %v1989_v46  ;;  %1993 = vadd.xlane.f32.xlu1 %v1992_v55 }
 0xa32   :  { %v1988_v48 = vpop.xlane.xlu1 %1987 }
 0xa33   :  { %v1995_v3 = vmul.f32 0.03125, %v1988_v48 }
 0xa35   :  { %v1998_v54 = vsub.f32 %v1983_v41, %v1995_v3 }
 0xa36   :  { %v1991_v7 = vpop.xlane.xlu0 %1990  ;;  %v1994_v51 = vpop.xlane.xlu1 %1993 }
 0xa37   :  { %v1996_v53 = vmul.f32 0.03125, %v1991_v7  ;;  %v1997_v56 = vmul.f32 0.03125, %v1994_v51  ;;  %v2001_v57 = vmul.f32 %v1998_v54, %v1998_v54 }
 0xa39   :  { %v1999_v0 = vsub.f32 %v1984_v29, %v1996_v53  ;;  %v2000_v21 = vsub.f32 %v1985_v35, %v1997_v56  ;;  %v2004_v10 = vsel %vm206_vm7, %v2001_v57, 0.0 }
 0xa3a   :  { %2005 = vadd.xlane.f32.xlu0 %v2004_v10 }
 0xa3b   :  { %v2002_v58 = vmul.f32 %v1999_v0, %v1999_v0  ;;  %v2003_v63 = vmul.f32 %v2000_v21, %v2000_v21 }
 0xa3d   :  { %v2007_v22 = vsel %vm206_vm7, %v2002_v58, 0.0  ;;  %v2010_v40 = vsel %vm206_vm7, %v2003_v63, 0.0 }
 0xa3e   :  { %2008 = vadd.xlane.f32.xlu1 %v2007_v22  ;;  %2011 = vadd.xlane.f32.xlu0 %v2010_v40 }
 0xac3   :  { %v2006_v20 = vpop.xlane.xlu0 %2005 }
 0xac4   :  { %v2013_v27 = vmul.f32 0.03125, %v2006_v20 }
 0xac6   :  { %v2016_v16 = vadd.f32 1e-05, %v2013_v27 }
 0xac7   :  { %v2012_v49 = vpop.xlane.xlu0 %2011  ;;  %v2009_v62 = vpop.xlane.xlu1 %2008 }
 0xac8   :  { %11789 = vrsqrt.f32 %v2016_v16  ;;  %v2015_v50 = vmul.f32 0.03125, %v2012_v49  ;;  %v2014_v2 = vmul.f32 0.03125, %v2009_v62 }
 0xaca   :  { %v2018_v9 = vadd.f32 1e-05, %v2015_v50  ;;  %v2017_v60 = vadd.f32 1e-05, %v2014_v2 }
 0xacc   :  { %11791 = vrsqrt.f32 %v2018_v9 }
 0xacd   :  { %11793 = vrsqrt.f32 %v2017_v60 }
 0xad5   :  { %v11790_v23 = vpop.eup %11789 }
 0xad6   :  { %v2022_v4 = vmul.f32 %v11790_v23, %v1998_v54 }
 0xad8   :  { %v2030_v34 = vmul.f32 %v9788_v8, %v2022_v4 }
 0xad9   :  { %v11792_v14 = vpop.eup %11791 }
 0xada   :  { %v11794_v13 = vpop.eup %11793  ;;  %v2024_v5 = vmul.f32 %v11792_v14, %v2000_v21  ;;  %v12663_v44 = vadd.f32 %v9789_v31, %v2030_v34 }
 0xadb   :  { %v2023_v28 = vmul.f32 %v11794_v13, %v1999_v0  ;;  %v9800_v0 = vld [vmem:[%s14294_s3 + $0xc] ss:$0 sm:$0xff] }
 0xadc   :  { %v2032_v33 = vmul.f32 %v9788_v8, %v2024_v5 }
 0xadd   :  { %v2031_v17 = vmul.f32 %v9788_v8, %v2023_v28 }
 0xade   :  { %v12661_v43 = vadd.f32 %v9789_v31, %v2032_v33 }
 0xadf   :  { %v12665_v38 = vadd.f32 %v9789_v31, %v2031_v17 }
 0xae0   :  { %v2042_v45 = vpack.c.bf16 %v12661_v43, %v12661_v43 }
 0xae1   :  { %v2041_v36 = vpack.c.bf16 %v12665_v38, %v12663_v44 }
 0xae3   :  { %10557 = vmatprep.mubr.msk.bf16.mxu0 %vm206_vm7, %v2041_v36 }
 0xae4   :  { %10558 = vmatmul.mubr.msk.bf16.vlgmr.msra.gmra.mxu0 %vm206_vm7, %v2042_v45 }
 0xae5   :  { %10562 = vmatpush3.bf16.msra.mxu0 %v11649_v6  ;;  %10565 = vmatprep.mubr.msk.bf16.mxu0 %vm206_vm7, %v2041_v36 }
 0xae6   :  { %10563 = vmatprep.subr.bf16.mxu0 %v11650_v37 }
 0xae9   :  { %10564 = vmatpush3.bf16.msra.mxu0 %v11650_v37 }
 0xaea   :  { %10569 = vmatprep.subr.bf16.mxu0 %v11651_v24 }
 0xaec   :  { %10566 = vmatmul.mubr.msk.bf16.vlgmr.msra.gmra.mxu0 %vm206_vm7, %v2042_v45 }
 0xaed   :  { %10570 = vmatpush3.bf16.msra.mxu0 %v11651_v24  ;;  %10573 = vmatprep.mubr.msk.bf16.mxu0 %vm206_vm7, %v2041_v36 }
 0xaee   :  { %10571 = vmatprep.subr.bf16.mxu0 %v11652_v15 }
 0xaf1   :  { %10572 = vmatpush3.bf16.msra.mxu0 %v11652_v15 }
 0xaf2   :  { %10577 = vmatprep.subr.bf16.mxu0 %v12059_v1 }
 0xaf4   :  { %10574 = vmatmul.mubr.msk.bf16.vlgmr.msra.gmra.mxu0 %vm206_vm7, %v2042_v45 }
 0xaf5   :  { %10579 = vmatprep.mubr.msk.bf16.mxu0 %vm12060_vm0, %v12059_v1 }
 0xba4   :  { %v10559_v26 = vpop.f32.mrf.mxu0 }
 0xba5   :  { %v12683_v59 = vadd.f32 %v10559_v26, %v9790_v18 }
 0xba6   :  { %v2104_v30 = vpop.f32.mrf.mxu0 }
 0xba7   :  { %v12685_v52 = vadd.f32 %v9790_v18, %v2104_v30  ;;  %2133 = vrot.lane.b32.xlu0 %v12683_v59, %s12061_s21  ;;  %v2123_v32 = vcombine.high %v12683_v59, %v12683_v59 }
 0xba8   :  { %v10560_v19 = vpop.f32.mrf.mxu0 }
 0xba9   :  { %2125 = vrot.lane.b32.xlu1 %v12685_v52, %s12061_s21  ;;  %v12693_v25 = vcombine.high %v12685_v52, %v12685_v52 }
 0xbaa   :  { %v2107_v41 = vpop.f32.mrf.mxu0 }
 0xbab   :  { %v2108_v12 = vadd.f32 %v9790_v18, %v2107_v41  ;;  %2127 = vrot.lane.b32.xlu0 %v12693_v25, %s12061_s21  ;;  %v2403_v27 = vcombine.low %v12685_v52, %v12693_v25 }
 0xbac   :  { %v10567_v35 = vpop.f32.mrf.mxu0 }
 0xbad   :  { %2139 = vrot.lane.b32.xlu1 %v12685_v52, %s12062_s22  ;;  %v12706_v55 = vpack.i.bf16 %v2123_v32, %v2108_v12  ;;  %v2231_v3 = vadd.f32 %v10567_v35, %v9795_v47  ;;  %v2122_v58 = vcombine.high %v2108_v12, %v2108_v12  ;;  %v2419_v60 = vpack.c.bf16 %v2108_v12, %v2403_v27 }
 0xbae   :  { %v2222_v29 = vpop.f32.mrf.mxu0 }
 0xbaf   :  { %v2223_v46 = vadd.f32 %v9795_v47, %v2222_v29  ;;  %2141 = vrot.lane.b32.xlu0 %v12693_v25, %s12062_s22  ;;  %v2241_v63 = vcombine.high %v2231_v3, %v2231_v3  ;;  %v2404_v23 = vcombine.low %v2122_v58, %v12683_v59 }
 0xbb0   :  { %v10568_v48 = vpop.f32.mrf.mxu0 }
 0xbb1   :  { %11345 = vrot.lane.b32.xlu1 %v12706_v55, %s12061_s21  ;;  %v2239_v54 = vcombine.high %v2223_v46, %v2223_v46  ;;  %v2420_v14 = vpack.c.bf16 %v2123_v32, %v2404_v23 }
 0xbb2   :  { %v2225_v7 = vpop.f32.mrf.mxu0 }
 0xbb3   :  { %v2226_v51 = vadd.f32 %v9795_v47, %v2225_v7  ;;  %2265 = vrot.lane.b32.xlu0 %v2231_v3, %s12062_s22  ;;  %v2427_v53 = vcombine.low %v2223_v46, %v2239_v54 }
 0xbb4   :  { %v10575_v56 = vpop.f32.mrf.mxu0 }
 0xbb5   :  { %v2240_v57 = vcombine.high %v2226_v51, %v2226_v51  ;;  %2251 = vrot.lane.b32.xlu1 %v2231_v3, %s12061_s21  ;;  %v2443_v21 = vpack.c.bf16 %v2226_v51, %v2427_v53  ;;  %v12717_v61 = vadd.f32 %v10575_v56, %v9800_v0  ;;  %v11349_v13 = vpack.i.bf16 %v2241_v63, %v2226_v51 }
 0xbb6   :  { %v2340_v10 = vpop.f32.mrf.mxu0 }
 0xbb7   :  { %v2341_v22 = vadd.f32 %v9800_v0, %v2340_v10  ;;  %2245 = vrot.lane.b32.xlu0 %v2239_v54, %s12061_s21  ;;  %v2455_v40 = vsel %vm594_vm8, %v2443_v21, 0  ;;  %v2428_v11 = vcombine.low %v2240_v57, %v2231_v3  ;;  %v12730_v9 = vcombine.high %v12717_v61, %v12717_v61 }
 0xbb8   :  { %v10576_v6 = vpop.f32.mrf.mxu0  ;;  %10578 = vmatpush3.bf16.xpose.msra.mxu0 %v2455_v40 }
 0xbb9   :  { %2131 = vrot.lane.b32.xlu1 %v2122_v58, %s12061_s21  ;;  %v2444_v20 = vpack.c.bf16 %v2241_v63, %v2428_v11  ;;  %v12722_v16 = vcombine.high %v2341_v22, %v2341_v22  ;;  %10589 = vmatprep.subr.bf16.mxu0 %v12059_v1 }
 0xbba   :  { %v2343_v49 = vpop.f32.mrf.mxu0 }
 0xbbb   :  { %v2344_v62 = vadd.f32 %v9800_v0, %v2343_v49  ;;  %2259 = vrot.lane.b32.xlu0 %v2239_v54, %s12062_s22  ;;  %v2502_v50 = vsel %vm594_vm8, %v2444_v20, 0  ;;  %v3027_v2 = vcombine.low %v2341_v22, %v12722_v16 }
 0xbbc   :  { %10584 = vmatpush3.bf16.xpose.msra.mxu1 %v2502_v50 }
 0xbbd   :  { %2243 = vrot.lane.b32.xlu1 %v2223_v46, %s12061_s21  ;;  %10595 = vmatprep.subr.bf16.mxu1 %v12059_v1  ;;  %v12735_v4 = vpack.c.bf16 %v2344_v62, %v3027_v2  ;;  %v12738_v8 = vpack.i.bf16 %v12730_v9, %v2344_v62  ;;  %v12785_v5 = vcombine.high %v2344_v62, %v2344_v62 }
 0xbbf   :  { %2273 = vrot.lane.b32.xlu0 %v2239_v54, %s12063_s26  ;;  %10580 = vmatmul.mubr.msk.bf16.vlgmr.msra.gmra.mxu0 %vm594_vm8, %v2419_v60 }
 0xbc0   :  { %10591 = vmatprep.mubr.msk.bf16.mxu0 %vm12060_vm0, %v12059_v1 }
 0xbc1   :  { %2257 = vrot.lane.b32.xlu1 %v2223_v46, %s12062_s22 }
 0xbc3   :  { %10586 = vmatmul.mubr.msk.bf16.vlgmr.msra.gmra.mxu1 %vm594_vm8, %v2420_v14  ;;  %11350 = vrot.lane.b32.xlu0 %v11349_v13, %s12061_s21 }
 0xbc4   :  { %10597 = vmatprep.mubr.msk.bf16.mxu1 %vm12060_vm0, %v12059_v1 }
 0xbc5   :  { %2271 = vrot.lane.b32.xlu1 %v2223_v46, %s12063_s26 }
 0xbc7   :  { %11355 = vrot.lane.b32.xlu0 %v11349_v13, %s12062_s22 }
 0xbc9   :  { %2249 = vrot.lane.b32.xlu1 %v2240_v57, %s12061_s21 }
 0xbcb   :  { %2147 = vrot.lane.b32.xlu0 %v12683_v59, %s12062_s22 }
 0xbcd   :  { %2145 = vrot.lane.b32.xlu1 %v2122_v58, %s12062_s22 }
 0xbcf   :  { %2279 = vrot.lane.b32.xlu0 %v2231_v3, %s12063_s26 }
 0xbd1   :  { %2263 = vrot.lane.b32.xlu1 %v2240_v57, %s12062_s22 }
 0xbd3   :  { %11365 = vrot.lane.b32.xlu0 %v11349_v13, %s12063_s26 }
 0xbd5   :  { %11360 = vrot.lane.b32.xlu1 %v12706_v55, %s12062_s22 }
 0xbd7   :  { %2155 = vrot.lane.b32.xlu0 %v12693_v25, %s12063_s26 }
 0xbd9   :  { %2277 = vrot.lane.b32.xlu1 %v2240_v57, %s12063_s26 }
 0xbdb   :  { %2161 = vrot.lane.b32.xlu0 %v12683_v59, %s12063_s26 }
 0xbdd   :  { %2153 = vrot.lane.b32.xlu1 %v12685_v52, %s12063_s26 }
 0xbdf   :  { %2383 = vrot.lane.b32.xlu0 %v12717_v61, %s12062_s22 }
 0xbe1   :  { %2159 = vrot.lane.b32.xlu1 %v2122_v58, %s12063_s26 }
 0xbe3   :  { %2389 = vrot.lane.b32.xlu0 %v2341_v22, %s12063_s26 }
 0xbe5   :  { %11370 = vrot.lane.b32.xlu1 %v12706_v55, %s12063_s26 }
 0xbe7   :  { %2363 = vrot.lane.b32.xlu0 %v12722_v16, %s12061_s21 }
 0xbe9   :  { %2369 = vrot.lane.b32.xlu1 %v12717_v61, %s12061_s21 }
 0xbeb   :  { %2377 = vrot.lane.b32.xlu0 %v12722_v16, %s12062_s22 }
 0xbed   :  { %2361 = vrot.lane.b32.xlu1 %v2341_v22, %s12061_s21 }
 0xbef   :  { %11375 = vrot.lane.b32.xlu0 %v12738_v8, %s12061_s21 }
 0xbf1   :  { %2375 = vrot.lane.b32.xlu1 %v2341_v22, %s12062_s22 }
 0xbf5   :  { %11380 = vrot.lane.b32.xlu1 %v12738_v8, %s12062_s22 }
 0xbf9   :  { %2367 = vrot.lane.b32.xlu1 %v12785_v5, %s12061_s21 }
 0xbfd   :  { %2381 = vrot.lane.b32.xlu1 %v12785_v5, %s12062_s22 }
 0xc19   :  { %v2134_v28 = vpop.permute.xlu0 %2133 }
 0xc1b   :  { %v2126_v34 = vpop.permute.xlu1 %2125 }
 0xc1d   :  { %v2128_v31 = vpop.permute.xlu0 %2127 }
 0xc1e   :  { %v2405_v7 = vcombine.low %v2126_v34, %v2128_v31 }
 0xc1f   :  { %v2140_v33 = vpop.permute.xlu1 %2139 }
 0xc21   :  { %v2142_v17 = vpop.permute.xlu0 %2141 }
 0xc22   :  { %v2407_v2 = vcombine.low %v2140_v33, %v2142_v17 }
 0xc23   :  { %v11346_v45 = vpop.permute.xlu1 %11345 }
 0xc24   :  { %v11347_v46 = vunpack.i.l.bf16 %v11346_v45  ;;  %v11348_v22 = vunpack.i.h.bf16 %v11346_v45 }
 0xc25   :  { %v2266_v36 = vpop.permute.xlu0 %2265 }
 0xc26   :  { %v2421_v57 = vpack.c.bf16 %v11347_v46, %v2405_v7 }
 0xc27   :  { %v2252_v37 = vpop.permute.xlu1 %2251 }
 0xc29   :  { %v2246_v24 = vpop.permute.xlu0 %2245 }
 0xc2b   :  { %v2132_v15 = vpop.permute.xlu1 %2131 }
 0xc2c   :  { %v2406_v10 = vcombine.low %v2132_v15, %v2134_v28 }
 0xc2d   :  { %v2260_v18 = vpop.permute.xlu0 %2259 }
 0xc2e   :  { %v2422_v20 = vpack.c.bf16 %v11348_v22, %v2406_v10 }
 0xc2f   :  { %v2244_v26 = vpop.permute.xlu1 %2243 }
 0xc30   :  { %v2429_v19 = vcombine.low %v2244_v26, %v2246_v24 }
 0xc31   :  { %v2274_v59 = vpop.permute.xlu0 %2273 }
 0xc33   :  { %v2258_v30 = vpop.permute.xlu1 %2257 }
 0xc34   :  { %v2431_v55 = vcombine.low %v2258_v30, %v2260_v18 }
 0xc35   :  { %v11351_v52 = vpop.permute.xlu0 %11350 }
 0xc36   :  { %v11352_v25 = vunpack.i.l.bf16 %v11351_v52  ;;  %v11353_v48 = vunpack.i.h.bf16 %v11351_v52 }
 0xc37   :  { %v2272_v41 = vpop.permute.xlu1 %2271 }
 0xc38   :  { %v2445_v12 = vpack.c.bf16 %v11352_v25, %v2429_v19  ;;  %v2433_v27 = vcombine.low %v2272_v41, %v2274_v59  ;;  %v3028_v59 = vcombine.low %v12785_v5, %v12717_v61 }
 0xc39   :  { %v11356_v35 = vpop.permute.xlu0 %11355 }
 0xc3a   :  { %v11357_v32 = vunpack.i.l.bf16 %v11356_v35  ;;  %v2549_v47 = vsel %vm594_vm8, %v2445_v12, 0  ;;  %v11358_v40 = vunpack.i.h.bf16 %v11356_v35  ;;  %v3044_v19 = vpack.c.bf16 %v12730_v9, %v3028_v59 }
 0xc3b   :  { %v2250_v29 = vpop.permute.xlu1 %2249  ;;  %10590 = vmatpush3.bf16.xpose.msra.mxu0 %v2549_v47 }
 0xc3c   :  { %v2430_v3 = vcombine.low %v2250_v29, %v2252_v37  ;;  %10601 = vmatprep.subr.bf16.mxu0 %v12059_v1  ;;  %v2447_v53 = vpack.c.bf16 %v11357_v32, %v2431_v55  ;;  %v3055_v29 = vsel %vm1200_vm9, %v12735_v4, 0  ;;  %v3102_v46 = vsel %vm1200_vm9, %v3044_v19, 0 }
 0xc3d   :  { %v2148_v54 = vpop.permute.xlu0 %2147 }
 0xc3e   :  { %v2446_v51 = vpack.c.bf16 %v11353_v48, %v2430_v3  ;;  %v2643_v58 = vsel %vm594_vm8, %v2447_v53, 0 }
 0xc3f   :  { %v2146_v56 = vpop.permute.xlu1 %2145 }
 0xc40   :  { %v2596_v0 = vsel %vm594_vm8, %v2446_v51, 0  ;;  %v2408_v45 = vcombine.low %v2146_v56, %v2148_v54 }
 0xc41   :  { %v2280_v21 = vpop.permute.xlu0 %2279  ;;  %10596 = vmatpush3.bf16.xpose.msra.mxu1 %v2596_v0 }
 0xc42   :  { %10592 = vmatmul.mubr.msk.bf16.vlgmr.msra.gmra.mxu0 %vm594_vm8, %v2421_v57  ;;  %10607 = vmatprep.subr.bf16.mxu1 %v12059_v1 }
 0xc43   :  { %v2264_v63 = vpop.permute.xlu1 %2263  ;;  %10602 = vmatpush3.bf16.xpose.msra.mxu0 %v2643_v58  ;;  %10603 = vmatprep.mubr.msk.bf16.mxu0 %vm12060_vm0, %v12059_v1 }
 0xc44   :  { %v2432_v11 = vcombine.low %v2264_v63, %v2266_v36  ;;  %10613 = vmatprep.subr.bf16.mxu0 %v12059_v1 }
 0xc45   :  { %v11366_v6 = vpop.permute.xlu0 %11365 }
 0xc46   :  { %v2448_v49 = vpack.c.bf16 %v11358_v40, %v2432_v11  ;;  %v11367_v62 = vunpack.i.l.bf16 %v11366_v6  ;;  %v11368_v36 = vunpack.i.h.bf16 %v11366_v6 }
 0xc47   :  { %v11361_v50 = vpop.permute.xlu1 %11360 }
 0xc48   :  { %v11362_v60 = vunpack.i.l.bf16 %v11361_v50  ;;  %10598 = vmatmul.mubr.msk.bf16.vlgmr.msra.gmra.mxu1 %vm594_vm8, %v2422_v20  ;;  %v2690_v23 = vsel %vm594_vm8, %v2448_v49, 0  ;;  %v2449_v14 = vpack.c.bf16 %v11367_v62, %v2433_v27  ;;  %v11363_v13 = vunpack.i.h.bf16 %v11361_v50 }
 0xc49   :  { %10608 = vmatpush3.bf16.xpose.msra.mxu1 %v2690_v23  ;;  %10609 = vmatprep.mubr.msk.bf16.mxu1 %vm12060_vm0, %v12059_v1  ;;  %v2156_v18 = vpop.permute.xlu0 %2155 }
 0xc4a   :  { %v2423_v28 = vpack.c.bf16 %v11362_v60, %v2407_v2  ;;  %v2737_v34 = vsel %vm594_vm8, %v2449_v14, 0  ;;  %10619 = vmatprep.subr.bf16.mxu1 %v12059_v1  ;;  %v2424_v17 = vpack.c.bf16 %v11363_v13, %v2408_v45 }
 0xc4b   :  { %v2278_v31 = vpop.permute.xlu1 %2277 }
 0xc4c   :  { %v2434_v33 = vcombine.low %v2278_v31, %v2280_v21  ;;  %10604 = vmatmul.mubr.msk.bf16.vlgmr.msra.gmra.mxu0 %vm594_vm8, %v2423_v28 }
 0xc4d   :  { %10614 = vmatpush3.bf16.xpose.msra.mxu0 %v2737_v34  ;;  %10615 = vmatprep.mubr.msk.bf16.mxu0 %vm12060_vm0, %v12059_v1  ;;  %v2162_v30 = vpop.permute.xlu0 %2161 }
 0xc4e   :  { %v2450_v37 = vpack.c.bf16 %v11368_v36, %v2434_v33  ;;  %10625 = vmatprep.subr.bf16.mxu0 %v12059_v1 }
 0xc4f   :  { %v2154_v24 = vpop.permute.xlu1 %2153 }
 0xc50   :  { %10610 = vmatmul.mubr.msk.bf16.vlgmr.msra.gmra.mxu1 %vm594_vm8, %v2424_v17  ;;  %v2784_v15 = vsel %vm594_vm8, %v2450_v37, 0  ;;  %v2409_v25 = vcombine.low %v2154_v24, %v2156_v18 }
 0xc51   :  { %10620 = vmatpush3.bf16.xpose.msra.mxu1 %v2784_v15  ;;  %10621 = vmatprep.mubr.msk.bf16.mxu1 %vm12060_vm0, %v12059_v1 }
 0xc52   :  { %10631 = vmatprep.subr.bf16.mxu1 %v12059_v1 }
 0xc53   :  { %v2160_v26 = vpop.permute.xlu1 %2159 }
 0xc54   :  { %v2410_v41 = vcombine.low %v2160_v26, %v2162_v30 }
 0xc57   :  { %v11371_v52 = vpop.permute.xlu1 %11370 }
 0xc58   :  { %v11373_v12 = vunpack.i.h.bf16 %v11371_v52  ;;  %v11372_v35 = vunpack.i.l.bf16 %v11371_v52 }
 0xc5a   :  { %v2425_v32 = vpack.c.bf16 %v11372_v35, %v2409_v25  ;;  %v2426_v47 = vpack.c.bf16 %v11373_v12, %v2410_v41 }
 0xc5c   :  { %10616 = vmatmul.mubr.msk.bf16.vlgmr.msra.gmra.mxu0 %vm594_vm8, %v2425_v32  ;;  %10622 = vmatmul.mubr.msk.bf16.vlgmr.msra.gmra.mxu1 %vm594_vm8, %v2426_v47  ;;  %v12877_v32 = vpop.permute.xlu0 %2383 }
 0xc5d   :  { %10626 = vmatpush3.bf16.msra.mxu0 %v3055_v29  ;;  %10632 = vmatpush3.bf16.msra.mxu1 %v3102_v46 }
 0xc5e   :  { %10627 = vmatprep.mubr.msk.bf16.mxu0 %vm12060_vm0, %v12059_v1  ;;  %10637 = vmatprep.subr.bf16.mxu0 %v12059_v1 }
 0xc5f   :  { %10633 = vmatprep.mubr.msk.bf16.mxu1 %vm12060_vm0, %v12059_v1  ;;  %10643 = vmatprep.subr.bf16.mxu1 %v12059_v1 }
 0xc7f   :  { %v2491_v9 = vpop.f32.mrf.mxu0 }
 0xc80   :  { %v12829_v55 = vmul.f32 0.35355338, %v2491_v9  ;;  %v12881_v9 = vpop.permute.xlu1 %2369 }
 0xc81   :  { %v10581_v48 = vpop.f32.mrf.mxu0 }
 0xc82   :  { %v2843_v4 = vsel %vm987_vm10, %v12829_v55, -inf }
 0xc83   :  { %v2538_v3 = vpop.f32.mrf.mxu1  ;;  %2844 = vmax.xlane.f32.xlu0 %v2843_v4  ;;  %v2494_v54 = vpop.f32.mrf.mxu0 }
 0xc84   :  { %v12833_v7 = vmul.f32 0.35355338, %v2538_v3  ;;  %v12835_v51 = vmul.f32 0.35355338, %v2494_v54 }
 0xc85   :  { %v10582_v53 = vpop.f32.mrf.mxu0  ;;  %v10587_v56 = vpop.f32.mrf.mxu1 }
 0xc86   :  { %v2849_v57 = vsel %vm987_vm10, %v12833_v7, -inf  ;;  %v2846_v0 = vsel %vm991_vm11, %v12835_v51, -inf }
 0xc87   :  { %v2541_v21 = vpop.f32.mrf.mxu1  ;;  %2850 = vmax.xlane.f32.xlu0 %v2849_v57  ;;  %2847 = vmax.xlane.f32.xlu1 %v2846_v0  ;;  %v12889_v0 = vpop.permute.xlu0 %2389 }
 0xc88   :  { %v12841_v10 = vmul.f32 0.35355338, %v2541_v21 }
 0xc89   :  { %v10588_v58 = vpop.f32.mrf.mxu1 }
 0xc8a   :  { %v2852_v63 = vsel %vm991_vm11, %v12841_v10, -inf }
 0xc8b   :  { %2853 = vmax.xlane.f32.xlu0 %v2852_v63 }
 0xd02   :  { %v2585_v22 = vpop.f32.mrf.mxu0 }
 0xd03   :  { %v12845_v40 = vmul.f32 0.35355338, %v2585_v22  ;;  %v12897_v22 = vpop.permute.xlu1 %2361 }
 0xd04   :  { %v10593_v11 = vpop.f32.mrf.mxu0 }
 0xd05   :  { %v2855_v6 = vsel %vm987_vm10, %v12845_v40, -inf }
 0xd06   :  { %2856 = vmax.xlane.f32.xlu1 %v2855_v6  ;;  %v2588_v20 = vpop.f32.mrf.mxu0  ;;  %v12901_v6 = vpop.permute.xlu0 %2363 }
 0xd07   :  { %v12849_v27 = vmul.f32 0.35355338, %v2588_v20  ;;  %v12903_v20 = vpop.permute.xlu1 %2375 }
 0xd08   :  { %v10594_v49 = vpop.f32.mrf.mxu0  ;;  %v2632_v62 = vpop.f32.mrf.mxu1 }
 0xd09   :  { %v12851_v50 = vmul.f32 0.35355338, %v2632_v62  ;;  %v2858_v2 = vsel %vm991_vm11, %v12849_v27, -inf }
 0xd0a   :  { %v10599_v60 = vpop.f32.mrf.mxu1  ;;  %2859 = vmax.xlane.f32.xlu0 %v2858_v2  ;;  %v12905_v49 = vpop.permute.xlu0 %2377 }
 0xd0b   :  { %v2861_v23 = vsel %vm987_vm10, %v12851_v50, -inf  ;;  %v12907_v62 = vpop.permute.xlu1 %11380 }
 0xd0c   :  { %v2635_v14 = vpop.f32.mrf.mxu1  ;;  %2862 = vmax.xlane.f32.xlu1 %v2861_v23  ;;  %v2679_v28 = vpop.f32.mrf.mxu0 }
 0xd0d   :  { %v12857_v13 = vmul.f32 0.35355338, %v2635_v14  ;;  %v12859_v34 = vmul.f32 0.35355338, %v2679_v28 }
 0xd0e   :  { %v10600_v31 = vpop.f32.mrf.mxu1  ;;  %v10605_v45 = vpop.f32.mrf.mxu0 }
 0xd0f   :  { %v2864_v36 = vsel %vm991_vm11, %v12857_v13, -inf  ;;  %v2867_v17 = vsel %vm987_vm10, %v12859_v34, -inf  ;;  %v12909_v2 = vpop.permute.xlu0 %11375  ;;  %v12913_v60 = vpop.permute.xlu1 %2367 }
 0xd10   :  { %v2726_v33 = vpop.f32.mrf.mxu1  ;;  %2865 = vmax.xlane.f32.xlu0 %v2864_v36  ;;  %2868 = vmax.xlane.f32.xlu1 %v2867_v17  ;;  %v2682_v24 = vpop.f32.mrf.mxu0 }
 0xd11   :  { %v12865_v37 = vmul.f32 0.35355338, %v2726_v33  ;;  %v12867_v15 = vmul.f32 0.35355338, %v2682_v24 }
 0xd12   :  { %v10611_v18 = vpop.f32.mrf.mxu1  ;;  %v10606_v26 = vpop.f32.mrf.mxu0 }
 0xd13   :  { %v2873_v59 = vsel %vm987_vm10, %v12865_v37, -inf  ;;  %v2870_v52 = vsel %vm991_vm11, %v12867_v15, -inf  ;;  %v2845_v23 = vpop.xlane.xlu0 %2844  ;;  %v12915_v14 = vpop.permute.xlu1 %2381 }
 0xd14   :  { %v2729_v30 = vpop.f32.mrf.mxu1  ;;  %2874 = vmax.xlane.f32.xlu1 %v2873_v59  ;;  %2871 = vmax.xlane.f32.xlu0 %v2870_v52  ;;  %v2891_v31 = vsub.f32 %v12829_v55, %v2845_v23 }
 0xd15   :  { %v12873_v19 = vmul.f32 0.35355338, %v2729_v30 }
 0xd16   :  { %v10612_v25 = vpop.f32.mrf.mxu1  ;;  %v2907_v33 = vmul.f32 1.442695, %v2891_v31 }
 0xd17   :  { %v2876_v41 = vsel %vm991_vm11, %v12873_v19, -inf  ;;  %v2851_v28 = vpop.xlane.xlu0 %2850  ;;  %v2848_v45 = vpop.xlane.xlu1 %2847 }
 0xd18   :  { %2877 = vmax.xlane.f32.xlu0 %v2876_v41  ;;  %v2893_v36 = vsub.f32 %v12833_v7, %v2851_v28  ;;  %v2892_v17 = vsub.f32 %v12835_v51, %v2848_v45  ;;  %11795 = vpow2.f32 %v2907_v33 }
 0xd1a   :  { %v2911_v18 = vmul.f32 1.442695, %v2893_v36 }
 0xd1b   :  { %v2854_v24 = vpop.xlane.xlu0 %2853 }
 0xd1c   :  { %v2773_v12 = vpop.f32.mrf.mxu0  ;;  %v2820_v35 = vpop.f32.mrf.mxu1  ;;  %v2894_v26 = vsub.f32 %v12841_v10, %v2854_v24  ;;  %11797 = vpow2.f32 %v2911_v18 }
 0xd1d   :  { %v12879_v47 = vmul.f32 0.35355338, %v2773_v12  ;;  %v12883_v48 = vmul.f32 0.35355338, %v2820_v35 }
 0xd1e   :  { %v10617_v29 = vpop.f32.mrf.mxu0  ;;  %v10623_v46 = vpop.f32.mrf.mxu1  ;;  %v2913_v59 = vmul.f32 1.442695, %v2894_v26 }
 0xd1f   :  { %v2879_v4 = vsel %vm987_vm10, %v12879_v47, -inf  ;;  %v2885_v58 = vsel %vm987_vm10, %v12883_v48, -inf }
 0xd20   :  { %v2823_v3 = vpop.f32.mrf.mxu1  ;;  %2880 = vmax.xlane.f32.xlu1 %v2879_v4  ;;  %v2776_v54 = vpop.f32.mrf.mxu0 }
 0xd21   :  { %v12887_v53 = vmul.f32 0.35355338, %v2776_v54  ;;  %v12891_v21 = vmul.f32 0.35355338, %v2823_v3 }
 0xd22   :  { %v10618_v56 = vpop.f32.mrf.mxu0  ;;  %v10624_v57 = vpop.f32.mrf.mxu1 }
 0xd23   :  { %v2882_v63 = vsel %vm991_vm11, %v12887_v53, -inf  ;;  %v2888_v11 = vsel %vm991_vm11, %v12891_v21, -inf }
 0xd24   :  { %2886 = vmax.xlane.f32.xlu1 %v2885_v58  ;;  %2883 = vmax.xlane.f32.xlu0 %v2882_v63 }
 0xd28   :  { %2889 = vmax.xlane.f32.xlu0 %v2888_v11 }
 0xd35   :  { %2391 = vrot.lane.b32.xlu1 %v12722_v16, %s12063_s26  ;;  %v2909_v16 = vmul.f32 1.442695, %v2892_v17 }
 0xd37   :  { %11799 = vpow2.f32 %v2909_v16 }
 0xd38   :  { %11801 = vpow2.f32 %v2913_v59 }
 0xd3e   :  { %2395 = vrot.lane.b32.xlu0 %v12785_v5, %s12063_s26  ;;  %v12923_v5 = vpop.eup %11795 }
 0xd3f   :  { %v12925_v30 = vpop.eup %11797  ;;  %v2939_v55 = vsel %vm987_vm10, %v12923_v5, 0.0 }
 0xd40   :  { %v2945_v51 = vsel %vm987_vm10, %v12925_v30, 0.0 }
 0xd44   :  { %v12929_v7 = vpop.eup %11799 }
 0xd45   :  { %v2942_v10 = vsel %vm991_vm11, %v12929_v7, 0.0  ;;  %v12935_v52 = vpop.eup %11801 }
 0xd46   :  { %v2948_v25 = vsel %vm991_vm11, %v12935_v52, 0.0 }
 0xd59   :  { %2940 = vadd.xlane.f32.xlu1 %v2939_v55 }
 0xd5d   :  { %2946 = vadd.xlane.f32.xlu1 %v2945_v51  ;;  %2943 = vadd.xlane.f32.xlu0 %v2942_v10 }
 0xd61   :  { %2949 = vadd.xlane.f32.xlu0 %v2948_v25 }
 0xd8f   :  { %v2857_v41 = vpop.xlane.xlu1 %2856 }
 0xd90   :  { %v2895_v12 = vsub.f32 %v12845_v40, %v2857_v41 }
 0xd92   :  { %v2915_v35 = vmul.f32 1.442695, %v2895_v12 }
 0xd93   :  { %v2860_v29 = vpop.xlane.xlu0 %2859 }
 0xd94   :  { %11803 = vpow2.f32 %v2915_v35  ;;  %v2896_v46 = vsub.f32 %v12849_v27, %v2860_v29 }
 0xd95   :  { %v2863_v4 = vpop.xlane.xlu1 %2862 }
 0xd96   :  { %v2917_v3 = vmul.f32 1.442695, %v2896_v46  ;;  %v2897_v54 = vsub.f32 %v12851_v50, %v2863_v4 }
 0xd98   :  { %11805 = vpow2.f32 %v2917_v3  ;;  %v2919_v56 = vmul.f32 1.442695, %v2897_v54 }
 0xd99   :  { %v2866_v57 = vpop.xlane.xlu0 %2865  ;;  %v2869_v63 = vpop.xlane.xlu1 %2868 }
 0xd9a   :  { %11807 = vpow2.f32 %v2919_v56  ;;  %v2898_v58 = vsub.f32 %v12857_v13, %v2866_v57  ;;  %v2899_v11 = vsub.f32 %v12859_v34, %v2869_v63 }
 0xd9c   :  { %v2921_v23 = vmul.f32 1.442695, %v2898_v58  ;;  %v2923_v40 = vmul.f32 1.442695, %v2899_v11 }
 0xd9d   :  { %v2875_v28 = vpop.xlane.xlu1 %2874  ;;  %v2872_v31 = vpop.xlane.xlu0 %2871 }
 0xd9e   :  { %11809 = vpow2.f32 %v2921_v23  ;;  %v2901_v27 = vsub.f32 %v12865_v37, %v2875_v28  ;;  %v2900_v45 = vsub.f32 %v12867_v15, %v2872_v31 }
 0xd9f   :  { %11811 = vpow2.f32 %v2923_v40 }
 0xda0   :  { %v2927_v36 = vmul.f32 1.442695, %v2901_v27  ;;  %v2925_v33 = vmul.f32 1.442695, %v2900_v45 }
 0xda1   :  { %v12946_v50 = vpop.eup %11803  ;;  %v2878_v17 = vpop.xlane.xlu0 %2877 }
 0xda2   :  { %v2951_v13 = vsel %vm987_vm10, %v12946_v50, 0.0  ;;  %11813 = vpow2.f32 %v2927_v36  ;;  %v2902_v34 = vsub.f32 %v12873_v19, %v2878_v17 }
 0xda3   :  { %2952 = vadd.xlane.f32.xlu1 %v2951_v13  ;;  %11815 = vpow2.f32 %v2925_v33 }
 0xda4   :  { %v2929_v18 = vmul.f32 1.442695, %v2902_v34 }
 0xda5   :  { %v12951_v24 = vpop.eup %11805 }
 0xda6   :  { %v2954_v37 = vsel %vm991_vm11, %v12951_v24, 0.0  ;;  %11817 = vpow2.f32 %v2929_v18 }
 0xda7   :  { %v12955_v15 = vpop.eup %11807  ;;  %2955 = vadd.xlane.f32.xlu0 %v2954_v37  ;;  %v11377_v37 = vunpack.i.l.bf16 %v12909_v2 }
 0xda8   :  { %v2957_v16 = vsel %vm987_vm10, %v12955_v15, 0.0 }
 0xda9   :  { %2958 = vadd.xlane.f32.xlu1 %v2957_v16  ;;  %v2881_v26 = vpop.xlane.xlu1 %2880 }
 0xdaa   :  { %v2903_v59 = vsub.f32 %v12879_v47, %v2881_v26 }
 0xdab   :  { %v12960_v19 = vpop.eup %11809 }
 0xdac   :  { %v12962_v55 = vpop.eup %11811  ;;  %v2931_v51 = vmul.f32 1.442695, %v2903_v59  ;;  %v2960_v10 = vsel %vm991_vm11, %v12960_v19, 0.0 }
 0xdad   :  { %v2963_v25 = vsel %vm987_vm10, %v12962_v55, 0.0  ;;  %v2887_v41 = vpop.xlane.xlu1 %2886  ;;  %2961 = vadd.xlane.f32.xlu0 %v2960_v10  ;;  %v2884_v12 = vpop.xlane.xlu0 %2883 }
 0xdae   :  { %11819 = vpow2.f32 %v2931_v51  ;;  %2964 = vadd.xlane.f32.xlu1 %v2963_v25  ;;  %v2905_v35 = vsub.f32 %v12883_v48, %v2887_v41  ;;  %v2904_v47 = vsub.f32 %v12887_v53, %v2884_v12  ;;  %v11378_v41 = vunpack.i.h.bf16 %v12909_v2 }
 0xdaf   :  { %v12970_v29 = vpop.eup %11813 }
 0xdb0   :  { %v2935_v46 = vmul.f32 1.442695, %v2905_v35  ;;  %v2933_v4 = vmul.f32 1.442695, %v2904_v47  ;;  %v12972_v3 = vpop.eup %11815  ;;  %v2969_v54 = vsel %vm987_vm10, %v12970_v29, 0.0 }
 0xdb1   :  { %v2890_v56 = vpop.xlane.xlu0 %2889  ;;  %v2966_v57 = vsel %vm991_vm11, %v12972_v3, 0.0  ;;  %v13003_v36 = vpop.permute.xlu1 %2391 }
 0xdb2   :  { %11821 = vpow2.f32 %v2935_v46  ;;  %2970 = vadd.xlane.f32.xlu1 %v2969_v54  ;;  %v2906_v58 = vsub.f32 %v12891_v21, %v2890_v56  ;;  %2967 = vadd.xlane.f32.xlu0 %v2966_v57 }
 0xdb3   :  { %11823 = vpow2.f32 %v2933_v4  ;;  %v12979_v48 = vpop.eup %11817 }
 0xdb4   :  { %v2937_v53 = vmul.f32 1.442695, %v2906_v58  ;;  %v2972_v63 = vsel %vm991_vm11, %v12979_v48, 0.0  ;;  %v3031_v58 = vcombine.low %v12903_v20, %v12905_v49 }
 0xdb5   :  { %v13005_v33 = vpop.permute.xlu0 %2395 }
 0xdb6   :  { %11825 = vpow2.f32 %v2937_v53  ;;  %2973 = vadd.xlane.f32.xlu0 %v2972_v63 }
 0xdbb   :  { %v12983_v11 = vpop.eup %11819 }
 0xdbc   :  { %v2975_v23 = vsel %vm987_vm10, %v12983_v11, 0.0 }
 0xdbd   :  { %2976 = vadd.xlane.f32.xlu1 %v2975_v23 }
 0xdbf   :  { %v12987_v40 = vpop.eup %11821 }
 0xdc0   :  { %v12989_v28 = vpop.eup %11823  ;;  %v2981_v21 = vsel %vm987_vm10, %v12987_v40, 0.0 }
 0xdc1   :  { %2982 = vadd.xlane.f32.xlu1 %v2981_v21  ;;  %v2978_v31 = vsel %vm991_vm11, %v12989_v28, 0.0 }
 0xdc2   :  { %2979 = vadd.xlane.f32.xlu0 %v2978_v31 }
 0xdc3   :  { %v12995_v27 = vpop.eup %11825 }
 0xdc4   :  { %v2984_v45 = vsel %vm991_vm11, %v12995_v27, 0.0 }
 0xdc6   :  { %2985 = vadd.xlane.f32.xlu0 %v2984_v45  ;;  %v3032_v45 = vcombine.low %v12915_v14, %v12877_v32 }
 0xdd2   :  { %2397 = vrot.lane.b32.xlu1 %v12717_v61, %s12063_s26  ;;  %v3029_v61 = vcombine.low %v12897_v22, %v12901_v6 }
 0xdd4   :  { %v3045_v25 = vpack.c.bf16 %v11377_v37, %v3029_v61 }
 0xdd6   :  { %v3149_v22 = vsel %vm1200_vm9, %v3045_v25, 0 }
 0xddc   :  { %11385 = vrot.lane.b32.xlu0 %v12738_v8, %s12063_s26  ;;  %v3030_v8 = vcombine.low %v12913_v60, %v12881_v9 }
 0xdde   :  { %v3046_v47 = vpack.c.bf16 %v11378_v41, %v3030_v8 }
 0xde0   :  { %v3196_v6 = vsel %vm1200_vm9, %v3046_v47, 0 }
 0xde2   :  { %v2941_v17 = vpop.xlane.xlu1 %2940 }
 0xde3   :  { %11827 = vrcp.f32 %v2941_v17 }
 0xde6   :  { %v2947_v13 = vpop.xlane.xlu1 %2946  ;;  %v2944_v34 = vpop.xlane.xlu0 %2943 }
 0xde7   :  { %11829 = vrcp.f32 %v2944_v34  ;;  %v11383_v34 = vunpack.i.h.bf16 %v12907_v62 }
 0xde8   :  { %11831 = vrcp.f32 %v2947_v13 }
 0xdea   :  { %v2950_v18 = vpop.xlane.xlu0 %2949 }
 0xdeb   :  { %11833 = vrcp.f32 %v2950_v18 }
 0xdf0   :  { %v11828_v16 = vpop.eup %11827 }
 0xdf1   :  { %v3003_v51 = vmul.f32 %v11828_v16, %v12923_v5 }
 0xdf4   :  { %v11830_v26 = vpop.eup %11829 }
 0xdf5   :  { %v11832_v59 = vpop.eup %11831  ;;  %v3004_v10 = vmul.f32 %v11830_v26, %v12929_v7 }
 0xdf6   :  { %v3005_v46 = vmul.f32 %v11832_v59, %v12925_v30 }
 0xdf7   :  { %v3019_v35 = vpack.c.bf16 %v3004_v10, %v3003_v51 }
 0xdf8   :  { %v11834_v12 = vpop.eup %11833 }
 0xdf9   :  { %v3006_v4 = vmul.f32 %v11834_v12, %v12935_v52  ;;  %10628 = vmatmul.mubr.msk.bf16.vlgmr.msra.gmra.mxu0 %vm987_vm10, %v3019_v35  ;;  %v11382_v52 = vunpack.i.l.bf16 %v12907_v62  ;;  %v3033_v35 = vcombine.low %v12889_v0, %v13003_v36 }
 0xdfa   :  { %10638 = vmatpush3.bf16.msra.mxu0 %v3149_v22  ;;  %10639 = vmatprep.mubr.msk.bf16.mxu0 %vm12060_vm0, %v12059_v1 }
 0xdfb   :  { %v3020_v9 = vpack.c.bf16 %v3006_v4, %v3005_v46  ;;  %10649 = vmatprep.subr.bf16.mxu0 %v12059_v1  ;;  %v3047_v21 = vpack.c.bf16 %v11382_v52, %v3031_v58 }
 0xdfd   :  { %10634 = vmatmul.mubr.msk.bf16.vlgmr.msra.gmra.mxu1 %vm987_vm10, %v3020_v9  ;;  %v3243_v20 = vsel %vm1200_vm9, %v3047_v21, 0 }
 0xdfe   :  { %10644 = vmatpush3.bf16.msra.mxu1 %v3196_v6  ;;  %10645 = vmatprep.mubr.msk.bf16.mxu1 %vm12060_vm0, %v12059_v1 }
 0xdff   :  { %10655 = vmatprep.subr.bf16.mxu1 %v12059_v1 }
 0xe2c   :  { %v2953_v2 = vpop.xlane.xlu1 %2952 }
 0xe2d   :  { %11835 = vrcp.f32 %v2953_v2 }
 0xe30   :  { %v2956_v60 = vpop.xlane.xlu0 %2955 }
 0xe31   :  { %11837 = vrcp.f32 %v2956_v60 }
 0xe32   :  { %v2959_v5 = vpop.xlane.xlu1 %2958 }
 0xe33   :  { %11839 = vrcp.f32 %v2959_v5 }
 0xe36   :  { %v2962_v30 = vpop.xlane.xlu0 %2961 }
 0xe37   :  { %v2965_v7 = vpop.xlane.xlu1 %2964  ;;  %11841 = vrcp.f32 %v2962_v30 }
 0xe38   :  { %11843 = vrcp.f32 %v2965_v7 }
 0xe3a   :  { %v11836_v54 = vpop.eup %11835 }
 0xe3b   :  { %v2971_v56 = vpop.xlane.xlu1 %2970  ;;  %v2968_v57 = vpop.xlane.xlu0 %2967  ;;  %v3007_v63 = vmul.f32 %v11836_v54, %v12946_v50  ;;  %v3048_v50 = vpack.c.bf16 %v11383_v34, %v3032_v45 }
 0xe3c   :  { %11845 = vrcp.f32 %v2968_v57 }
 0xe3d   :  { %11847 = vrcp.f32 %v2971_v56  ;;  %v3290_v62 = vsel %vm1200_vm9, %v3048_v50, 0 }
 0xe3e   :  { %v11838_v53 = vpop.eup %11837 }
 0xe3f   :  { %v3008_v23 = vmul.f32 %v11838_v53, %v12951_v24  ;;  %v2974_v31 = vpop.xlane.xlu0 %2973 }
 0xe40   :  { %11849 = vrcp.f32 %v2974_v31  ;;  %v11840_v13 = vpop.eup %11839 }
 0xe41   :  { %v3021_v17 = vpack.c.bf16 %v3008_v23, %v3007_v63  ;;  %v3009_v24 = vmul.f32 %v11840_v13, %v12955_v15 }
 0xe43   :  { %10640 = vmatmul.mubr.msk.bf16.vlgmr.msra.gmra.mxu0 %vm987_vm10, %v3021_v17 }
 0xe44   :  { %v11842_v49 = vpop.eup %11841  ;;  %10650 = vmatpush3.bf16.msra.mxu0 %v3243_v20  ;;  %10651 = vmatprep.mubr.msk.bf16.mxu0 %vm12060_vm0, %v12059_v1 }
 0xe45   :  { %v3010_v18 = vmul.f32 %v11842_v49, %v12960_v19  ;;  %10661 = vmatprep.subr.bf16.mxu0 %v12059_v1  ;;  %v11844_v37 = vpop.eup %11843 }
 0xe46   :  { %v2977_v32 = vpop.xlane.xlu1 %2976  ;;  %v3011_v15 = vmul.f32 %v11844_v37, %v12962_v55 }
 0xe47   :  { %v3022_v14 = vpack.c.bf16 %v3010_v18, %v3009_v24  ;;  %11851 = vrcp.f32 %v2977_v32 }
 0xe49   :  { %10646 = vmatmul.mubr.msk.bf16.vlgmr.msra.gmra.mxu1 %vm987_vm10, %v3022_v14  ;;  %v11846_v16 = vpop.eup %11845  ;;  %v11653_v14 = vld [vmem:[#allocation2 + $0xc8] sm:$0xff]  }
 0xe4a   :  { %10656 = vmatpush3.bf16.msra.mxu1 %v3290_v62  ;;  %10657 = vmatprep.mubr.msk.bf16.mxu1 %vm12060_vm0, %v12059_v1  ;;  %v2983_v61 = vpop.xlane.xlu1 %2982  ;;  %v3012_v19 = vmul.f32 %v11846_v16, %v12972_v3  ;;  %v11848_v8 = vpop.eup %11847  ;;  %v11654_v62 = vld [vmem:[#allocation2 + $0xc0] sm:$0xff]  }
 0xe4b   :  { %v2980_v26 = vpop.xlane.xlu0 %2979  ;;  %10667 = vmatprep.subr.bf16.mxu1 %v12059_v1  ;;  %v3013_v25 = vmul.f32 %v11848_v8, %v12970_v29 }
 0xe4c   :  { %11853 = vrcp.f32 %v2980_v26  ;;  %v3023_v59 = vpack.c.bf16 %v3012_v19, %v3011_v15 }
 0xe4d   :  { %v11850_v51 = vpop.eup %11849  ;;  %11855 = vrcp.f32 %v2983_v61 }
 0xe4e   :  { %10652 = vmatmul.mubr.msk.bf16.vlgmr.msra.gmra.mxu0 %vm987_vm10, %v3023_v59  ;;  %v3014_v41 = vmul.f32 %v11850_v51, %v12979_v48  ;;  %v2398_v55 = vpop.permute.xlu1 %2397 }
 0xe4f   :  { %v2986_v10 = vpop.xlane.xlu0 %2985  ;;  %10663 = vmatprep.mubr.msk.bf16.mxu0 %vm12060_vm0, %v12059_v1  ;;  %v3034_v47 = vcombine.low %v13005_v33, %v2398_v55 }
 0xe50   :  { %11857 = vrcp.f32 %v2986_v10  ;;  %v3024_v3 = vpack.c.bf16 %v3014_v41, %v3013_v25 }
 0xe52   :  { %10658 = vmatmul.mubr.msk.bf16.vlgmr.msra.gmra.mxu1 %vm987_vm10, %v3024_v3 }
 0xe53   :  { %v11386_v12 = vpop.permute.xlu0 %11385  ;;  %10669 = vmatprep.mubr.msk.bf16.mxu1 %vm12060_vm0, %v12059_v1 }
 0xe54   :  { %v11388_v46 = vunpack.i.h.bf16 %v11386_v12  ;;  %v11387_v4 = vunpack.i.l.bf16 %v11386_v12  ;;  %v11852_v22 = vpop.eup %11851 }
 0xe55   :  { %v3015_v60 = vmul.f32 %v11852_v22, %v12983_v11 }
 0xe56   :  { %v3049_v29 = vpack.c.bf16 %v11387_v4, %v3033_v35  ;;  %v3050_v48 = vpack.c.bf16 %v11388_v46, %v3034_v47 }
 0xe58   :  { %v3337_v9 = vsel %vm1200_vm9, %v3049_v29, 0  ;;  %v3384_v6 = vsel %vm1200_vm9, %v3050_v48, 0 }
 0xe59   :  { %v11854_v2 = vpop.eup %11853  ;;  %10662 = vmatpush3.bf16.msra.mxu0 %v3337_v9  ;;  %10668 = vmatpush3.bf16.msra.mxu1 %v3384_v6 }
 0xe5a   :  { %v3016_v0 = vmul.f32 %v11854_v2, %v12989_v28  ;;  %v11856_v36 = vpop.eup %11855  ;;  %10673 = vmatprep.subr.bf16.mxu0 %v11653_v14 }
 0xe5b   :  { %v3017_v30 = vmul.f32 %v11856_v36, %v12987_v40 }
 0xe5c   :  { %v3025_v33 = vpack.c.bf16 %v3016_v0, %v3015_v60 }
 0xe5d   :  { %v11858_v5 = vpop.eup %11857 }
 0xe5e   :  { %10664 = vmatmul.mubr.msk.bf16.vlgmr.msra.gmra.mxu0 %vm987_vm10, %v3025_v33  ;;  %v3018_v7 = vmul.f32 %v11858_v5, %v12995_v27 }
 0xe5f   :  { %10674 = vmatpush3.bf16.msra.mxu0 %v11653_v14 }
 0xe60   :  { %v3026_v52 = vpack.c.bf16 %v3018_v7, %v3017_v30  ;;  %10675 = vmatprep.subr.bf16.mxu0 %v11654_v62 }
 0xe62   :  { %10670 = vmatmul.mubr.msk.bf16.vlgmr.msra.gmra.mxu1 %vm987_vm10, %v3026_v52 }
 0xe63   :  { %10676 = vmatpush3.bf16.msra.mxu0 %v11654_v62 }
 0xeb9   :  { %v3091_v54 = vpop.f32.mrf.mxu0 }
 0xebb   :  { %v10629_v56 = vpop.f32.mrf.mxu0 }
 0xebd   :  { %v3138_v57 = vpop.f32.mrf.mxu1  ;;  %v13068_v58 = vpop.f32.mrf.mxu0 }
 0xebf   :  { %v10635_v11 = vpop.f32.mrf.mxu1  ;;  %v10630_v53 = vpop.f32.mrf.mxu0 }
 0xec1   :  { %v13070_v28 = vpop.f32.mrf.mxu1 }
 0xec3   :  { %v10636_v63 = vpop.f32.mrf.mxu1 }
 0xf03   :  { %v3185_v23 = vpop.f32.mrf.mxu0 }
 0xf04   :  { %3431 = vrot.lane.b32.xlu1 %v3185_v23, %s12064_s27 }
 0xf05   :  { %v10641_v21 = vpop.f32.mrf.mxu0 }
 0xf07   :  { %v3188_v40 = vpop.f32.mrf.mxu0 }
 0xf09   :  { %v10642_v31 = vpop.f32.mrf.mxu0  ;;  %v3232_v27 = vpop.f32.mrf.mxu1 }
 0xf0a   :  { %3435 = vrot.lane.b32.xlu0 %v3232_v27, %s12064_s27 }
 0xf0b   :  { %v10647_v45 = vpop.f32.mrf.mxu1 }
 0xf0d   :  { %v3235_v17 = vpop.f32.mrf.mxu1 }
 0xf0e   :  { %3433 = vrot.lane.b32.xlu0 %v3188_v40, %s12064_s27  ;;  %v3279_v13 = vpop.f32.mrf.mxu0 }
 0xf0f   :  { %v10648_v34 = vpop.f32.mrf.mxu1  ;;  %3447 = vrot.lane.b32.xlu1 %v3279_v13, %s12065_s28 }
 0xf10   :  { %v10653_v20 = vpop.f32.mrf.mxu0 }
 0xf12   :  { %v3282_v49 = vpop.f32.mrf.mxu0  ;;  %v3326_v50 = vpop.f32.mrf.mxu1 }
 0xf13   :  { %3437 = vrot.lane.b32.xlu1 %v3235_v17, %s12064_s27  ;;  %3449 = vrot.lane.b32.xlu0 %v3282_v49, %s12065_s28 }
 0xf14   :  { %v10654_v24 = vpop.f32.mrf.mxu0  ;;  %v10659_v18 = vpop.f32.mrf.mxu1 }
 0xf16   :  { %v3329_v32 = vpop.f32.mrf.mxu1 }
 0xf17   :  { %3451 = vrot.lane.b32.xlu1 %v3326_v50, %s12065_s28 }
 0xf18   :  { %v10660_v37 = vpop.f32.mrf.mxu1 }
 0xf1e   :  { %v3373_v16 = vpop.f32.mrf.mxu0 }
 0xf1f   :  { %3463 = vrot.lane.b32.xlu0 %v3373_v16, %s12066_s29 }
 0xf20   :  { %v10665_v61 = vpop.f32.mrf.mxu0 }
 0xf22   :  { %v3376_v26 = vpop.f32.mrf.mxu0  ;;  %v3420_v15 = vpop.f32.mrf.mxu1 }
 0xf23   :  { %3467 = vrot.lane.b32.xlu1 %v3420_v15, %s12066_s29  ;;  %3453 = vrot.lane.b32.xlu0 %v3329_v32, %s12065_s28 }
 0xf24   :  { %v10666_v19 = vpop.f32.mrf.mxu0  ;;  %v10671_v8 = vpop.f32.mrf.mxu1 }
 0xf26   :  { %v3423_v59 = vpop.f32.mrf.mxu1 }
 0xf27   :  { %3469 = vrot.lane.b32.xlu0 %v3423_v59, %s12066_s29  ;;  %3465 = vrot.lane.b32.xlu1 %v3376_v26, %s12066_s29 }
 0xf28   :  { %v10672_v51 = vpop.f32.mrf.mxu1 }
 0xf29   :  { %v11655_v51 = vld [vmem:[#allocation2 + $0xd8] sm:$0xff]  }
 0xf2a   :  { %10681 = vmatprep.subr.bf16.mxu1 %v11655_v51 }
 0xf2b   :  { %10682 = vmatpush3.bf16.msra.mxu1 %v11655_v51 }
 0xf76   :  { %v3432_v10 = vpop.permute.xlu1 %3431 }
 0xf77   :  { %v3475_v46 = vsel %vm594_vm8, %v3091_v54, %v3432_v10  ;;  %v11656_v10 = vld [vmem:[#allocation2 + $0xd0] sm:$0xff]  }
 0xf78   :  { %10683 = vmatprep.subr.bf16.mxu1 %v11656_v10 }
 0xf79   :  { %10684 = vmatpush3.bf16.msra.mxu1 %v11656_v10  ;;  %v9850_v10 = vld [vmem:[%s14294_s3 + $0x15] ss:$0 sm:$0xff] }
 0xf7a   :  { %10709 = vmatprep.subr.bf16.mxu1 %v12059_v1 }
 0xf7c   :  { %v3436_v25 = vpop.permute.xlu0 %3435 }
 0xf7d   :  { %v3477_v29 = vsel %vm594_vm8, %v3138_v57, %v3436_v25  ;;  %v11663_v25 = vld [vmem:[#allocation2 + $0x118] sm:$0xff]  }
 0xf7e   :  { %10689 = vmatprep.subr.bf16.mxu0 %v11663_v25 }
 0xf80   :  { %v3434_v55 = vpop.permute.xlu0 %3433 }
 0xf81   :  { %v3448_v41 = vpop.permute.xlu1 %3447  ;;  %v3476_v0 = vsel %vm594_vm8, %v13068_v58, %v3434_v55  ;;  %v11665_v55 = vld [vmem:[#allocation2 + $0x108] sm:$0xff]  }
 0xf82   :  { %v3479_v4 = vsel %vm1626_vm12, %v3475_v46, %v3448_v41  ;;  %v11664_v41 = vld [vmem:[#allocation2 + $0x110] sm:$0xff]  }
 0xf85   :  { %v3438_v3 = vpop.permute.xlu1 %3437  ;;  %v3450_v12 = vpop.permute.xlu0 %3449 }
 0xf86   :  { %v3478_v36 = vsel %vm594_vm8, %v13070_v28, %v3438_v3  ;;  %v3480_v33 = vsel %vm1626_vm12, %v3476_v0, %v3450_v12  ;;  %v9821_v28 = vld [vmem:[%s14294_s3 + $0xd] ss:$0 sm:$0xff]  ;;  %v11666_v3 = vld [vmem:[#allocation2 + $0x100] sm:$0xff]   ;;  %v11667_v12 = vld [vmem:[#allocation2 + $0xf8] sm:$0xff]  }
 0xf87   :  { %v9826_v0 = vld [vmem:[%s14294_s3 + $0x10] ss:$0 sm:$0xff] }
 0xf89   :  { %v3452_v35 = vpop.permute.xlu1 %3451 }
 0xf8a   :  { %v3481_v22 = vsel %vm1626_vm12, %v3477_v29, %v3452_v35 }
 0xf91   :  { %v3464_v47 = vpop.permute.xlu0 %3463 }
 0xf92   :  { %v3483_v48 = vsel %vm1631_vm13, %v3479_v4, %v3464_v47 }
 0xf93   :  { %v3491_v60 = vcombine.high %v3483_v48, %v3483_v48 }
 0xf95   :  { %v3468_v9 = vpop.permute.xlu1 %3467  ;;  %v3454_v6 = vpop.permute.xlu0 %3453  ;;  %v3493_v57 = vcombine.low %v3483_v48, %v3491_v60 }
 0xf96   :  { %v3485_v2 = vsel %vm1631_vm13, %v3481_v22, %v3468_v9  ;;  %v3482_v30 = vsel %vm1626_vm12, %v3478_v36, %v3454_v6 }
 0xf97   :  { %v3492_v5 = vcombine.high %v3485_v2, %v3485_v2 }
 0xf99   :  { %v3470_v7 = vpop.permute.xlu0 %3469  ;;  %v3466_v52 = vpop.permute.xlu1 %3465 }
 0xf9a   :  { %v3486_v54 = vsel %vm1631_vm13, %v3482_v30, %v3470_v7  ;;  %v3484_v56 = vsel %vm1631_vm13, %v3480_v33, %v3466_v52  ;;  %v9827_v30 = vld [vmem:[%s14294_s3 + $0x11] ss:$0 sm:$0xff] }
 0xf9b   :  { %v3495_v11 = vcombine.low %v3492_v5, %v3486_v54  ;;  %v3494_v53 = vcombine.low %v3484_v56, %v3485_v2 }
 0xf9d   :  { %v3500_v63 = vpack.c.bf16 %v3495_v11, %v3495_v11  ;;  %v3499_v23 = vpack.c.bf16 %v3494_v53, %v3493_v57 }
 0xf9f   :  { %10677 = vmatprep.mubr.msk.bf16.mxu0 %vm206_vm7, %v3499_v23  ;;  %v11657_v23 = vld [vmem:[#allocation2 + $0x128] sm:$0xff]  }
 0xfa0   :  { %10678 = vmatmul.mubr.msk.bf16.vlgmr.msra.gmra.mxu0 %vm206_vm7, %v3500_v63 }
 0xfa1   :  { %10690 = vmatpush3.bf16.msra.mxu0 %v11663_v25 }
 0xfa2   :  { %10691 = vmatprep.subr.bf16.mxu0 %v11664_v41 }
 0xfa5   :  { %10692 = vmatpush3.bf16.msra.mxu0 %v11664_v41 }
 0xfa6   :  { %10693 = vmatprep.subr.bf16.mxu0 %v11665_v55 }
 0xfa9   :  { %10694 = vmatpush3.bf16.msra.mxu0 %v11665_v55 }
 0xfaa   :  { %10695 = vmatprep.subr.bf16.mxu0 %v11666_v3 }
 0xfad   :  { %10696 = vmatpush3.bf16.msra.mxu0 %v11666_v3 }
 0xfae   :  { %10697 = vmatprep.subr.bf16.mxu0 %v11667_v12 }
 0xfb1   :  { %10698 = vmatpush3.bf16.msra.mxu0 %v11667_v12 }
0x1060   :  { %v10679_v58 = vpop.f32.mrf.mxu0 }
0x1061   :  { %v3571_v17 = vadd.f32 %v10679_v58, %v9821_v28 }
0x1062   :  { %v3562_v21 = vpop.f32.mrf.mxu0 }
0x1063   :  { %v3563_v40 = vadd.f32 %v9821_v28, %v3562_v21  ;;  %v3578_v49 = vadd.f32 %v3571_v17, %v12661_v43  ;;  %v11659_v21 = vld [vmem:[#allocation2 + $0x138] sm:$0xff]   ;;  %v11668_v17 = vld [vmem:[#allocation2 + $0xf0] sm:$0xff]  }
0x1064   :  { %v10680_v31 = vpop.f32.mrf.mxu0  ;;  %10699 = vmatprep.subr.bf16.mxu0 %v11668_v17 }
0x1065   :  { %v3576_v27 = vadd.f32 %v3563_v40, %v12663_v44  ;;  %v3585_v24 = vsel %vm206_vm7, %v3578_v49, 0.0  ;;  %v3946_v40 = vpack.c.bf16 %v12180_v42, %v12177_v39  ;;  %v11660_v31 = vld [vmem:[#allocation2 + $0x130] sm:$0xff]   ;;  %10700 = vmatpush3.bf16.msra.mxu0 %v11668_v17 }
0x1066   :  { %v3565_v45 = vpop.f32.mrf.mxu0 }
0x1067   :  { %v3566_v13 = vadd.f32 %v9821_v28, %v3565_v45  ;;  %v3579_v34 = vsel %vm206_vm7, %v3576_v27, 0.0  ;;  %v11658_v28 = vld [vmem:[#allocation2 + $0x120] sm:$0xff]  }
0x1068   :  { %3580 = vadd.xlane.f32.xlu1 %v3579_v34  ;;  %v11662_v45 = vld [vmem:[#allocation2 + $0x140] sm:$0xff]  }
0x1069   :  { %v3577_v20 = vadd.f32 %v3566_v13, %v12665_v38  ;;  %v11669_v13 = vld [vmem:[#allocation2 + $0xe8] sm:$0xff]   ;;  %v11670_v34 = vld [vmem:[#allocation2 + $0xe0] sm:$0xff]  }
0x106a   :  { %10701 = vmatprep.subr.bf16.mxu0 %v11669_v13 }
0x106b   :  { %v3582_v50 = vsel %vm206_vm7, %v3577_v20, 0.0  ;;  %10702 = vmatpush3.bf16.msra.mxu0 %v11669_v13 }
0x106c   :  { %3583 = vadd.xlane.f32.xlu0 %v3582_v50  ;;  %10703 = vmatprep.subr.bf16.mxu0 %v11670_v34 }
0x106f   :  { %10704 = vmatpush3.bf16.msra.mxu0 %v11670_v34 }
0x1070   :  { %3586 = vadd.xlane.f32.xlu0 %v3585_v24  ;;  %10739 = vmatprep.subr.bf16.mxu0 %v12059_v1 }
0x10f1   :  { %v3581_v18 = vpop.xlane.xlu1 %3580 }
0x10f2   :  { %v3588_v32 = vmul.f32 0.03125, %v3581_v18 }
0x10f4   :  { %v3591_v14 = vsub.f32 %v3576_v27, %v3588_v32  ;;  %v11661_v27 = vld [vmem:[#allocation2 + $0x148] sm:$0xff]  }
0x10f5   :  { %v3584_v44 = vpop.xlane.xlu0 %3583 }
0x10f6   :  { %v3589_v37 = vmul.f32 0.03125, %v3584_v44  ;;  %v3594_v62 = vmul.f32 %v3591_v14, %v3591_v14 }
0x10f8   :  { %v3592_v16 = vsub.f32 %v3577_v20, %v3589_v37  ;;  %v3597_v61 = vsel %vm206_vm7, %v3594_v62, 0.0 }
0x10f9   :  { %v3587_v26 = vpop.xlane.xlu0 %3586  ;;  %3598 = vadd.xlane.f32.xlu1 %v3597_v61 }
0x10fa   :  { %v3590_v38 = vmul.f32 0.03125, %v3587_v26  ;;  %v3595_v15 = vmul.f32 %v3592_v16, %v3592_v16  ;;  %v9846_v26 = vld [vmem:[%s14294_s3 + $0x14] ss:$0 sm:$0xff] }
0x10fc   :  { %v3593_v43 = vsub.f32 %v3578_v49, %v3590_v38  ;;  %v3600_v19 = vsel %vm206_vm7, %v3595_v15, 0.0  ;;  %v9828_v49 = vld [vmem:[%s14294_s3 + $0xe] ss:$0 sm:$0xff] }
0x10fd   :  { %3601 = vadd.xlane.f32.xlu0 %v3600_v19 }
0x10fe   :  { %v3596_v8 = vmul.f32 %v3593_v43, %v3593_v43 }
0x1100   :  { %v3603_v59 = vsel %vm206_vm7, %v3596_v8, 0.0 }
0x1101   :  { %3604 = vadd.xlane.f32.xlu1 %v3603_v59 }
0x1182   :  { %v3599_v35 = vpop.xlane.xlu1 %3598 }
0x1183   :  { %v3606_v47 = vmul.f32 0.03125, %v3599_v35 }
0x1185   :  { %v3609_v46 = vadd.f32 1e-05, %v3606_v47 }
0x1186   :  { %v3602_v4 = vpop.xlane.xlu0 %3601 }
0x1187   :  { %11859 = vrsqrt.f32 %v3609_v46  ;;  %v3607_v29 = vmul.f32 0.03125, %v3602_v4 }
0x1189   :  { %v3610_v48 = vadd.f32 1e-05, %v3607_v29 }
0x118a   :  { %v3605_v22 = vpop.xlane.xlu1 %3604 }
0x118b   :  { %11861 = vrsqrt.f32 %v3610_v48  ;;  %v3608_v9 = vmul.f32 0.03125, %v3605_v22 }
0x118d   :  { %v3611_v6 = vadd.f32 1e-05, %v3608_v9 }
0x118f   :  { %11863 = vrsqrt.f32 %v3611_v6  ;;  %v9854_v6 = vld [vmem:[%s14294_s3 + $0x16] ss:$0 sm:$0xff] }
0x1194   :  { %v11860_v2 = vpop.eup %11859 }
0x1195   :  { %v3615_v60 = vmul.f32 %v11860_v2, %v3591_v14 }
0x1197   :  { %v3623_v5 = vmul.f32 %v9826_v0, %v3615_v60 }
0x1198   :  { %v11862_v36 = vpop.eup %11861 }
0x1199   :  { %v3616_v33 = vmul.f32 %v11862_v36, %v3592_v16  ;;  %v13119_v56 = vadd.f32 %v9827_v30, %v3623_v5 }
0x119b   :  { %v3624_v7 = vmul.f32 %v9826_v0, %v3616_v33 }
0x119c   :  { %v11864_v52 = vpop.eup %11863 }
0x119d   :  { %v3617_v54 = vmul.f32 %v11864_v52, %v3593_v43  ;;  %v13121_v57 = vadd.f32 %v9827_v30, %v3624_v7 }
0x119f   :  { %v3634_v11 = vpack.c.bf16 %v13121_v57, %v13119_v56  ;;  %v3625_v53 = vmul.f32 %v9826_v0, %v3617_v54 }
0x11a1   :  { %10685 = vmatprep.mubr.msk.bf16.mxu1 %vm206_vm7, %v3634_v11  ;;  %v13126_v63 = vadd.f32 %v9827_v30, %v3625_v53 }
0x11a3   :  { %v3635_v58 = vpack.c.bf16 %v13126_v63, %v13126_v63 }
0x11a5   :  { %10686 = vmatmul.mubr.msk.bf16.vlgmr.msra.gmra.mxu1 %vm206_vm7, %v3635_v58 }
0x11a6   :  { %10710 = vmatpush3.bf16.msra.mxu1 %v11657_v23  ;;  %10713 = vmatprep.mubr.msk.bf16.mxu1 %vm12060_vm0, %v12059_v1 }
0x11a7   :  { %10711 = vmatprep.subr.bf16.mxu1 %v12059_v1 }
0x11aa   :  { %10712 = vmatpush3.bf16.msra.mxu1 %v11658_v28 }
0x11ab   :  { %10717 = vmatprep.subr.bf16.mxu1 %v12059_v1 }
0x11ad   :  { %10714 = vmatmul.mubr.msk.bf16.vlgmr.msra.gmra.mxu1 %vm206_vm7, %v3946_v40 }
0x11ae   :  { %10718 = vmatpush3.bf16.msra.mxu1 %v11659_v21  ;;  %10721 = vmatprep.mubr.msk.bf16.mxu1 %vm12060_vm0, %v12059_v1 }
0x11af   :  { %10719 = vmatprep.subr.bf16.mxu1 %v12059_v1 }
0x11b2   :  { %10720 = vmatpush3.bf16.msra.mxu1 %v11660_v31 }
0x11b3   :  { %10725 = vmatprep.subr.bf16.mxu1 %v12059_v1 }
0x11b5   :  { %10722 = vmatmul.mubr.msk.bf16.vlgmr.msra.gmra.mxu1 %vm206_vm7, %v3946_v40 }
0x11b6   :  { %10726 = vmatpush3.bf16.msra.mxu1 %v11661_v27  ;;  %10729 = vmatprep.mubr.msk.bf16.mxu1 %vm12060_vm0, %v12059_v1 }
0x11b7   :  { %10727 = vmatprep.subr.bf16.mxu1 %v12059_v1 }
0x11ba   :  { %10728 = vmatpush3.bf16.msra.mxu1 %v11662_v45 }
0x11bb   :  { %10733 = vmatprep.subr.bf16.mxu1 %v12059_v1 }
0x11bd   :  { %10730 = vmatmul.mubr.msk.bf16.vlgmr.msra.gmra.mxu1 %vm206_vm7, %v3946_v40 }
0x11be   :  { %10735 = vmatprep.mubr.msk.bf16.mxu1 %vm12060_vm0, %v12059_v1 }
0x1265   :  { %v10687_v20 = vpop.f32.mrf.mxu1 }
0x1266   :  { %v3706_v24 = vadd.f32 %v10687_v20, %v9828_v49 }
0x1267   :  { %v3697_v50 = vpop.f32.mrf.mxu1 }
0x1268   :  { %v3698_v32 = vadd.f32 %v9828_v49, %v3697_v50  ;;  %v3713_v37 = vmax.f32 %v3706_v24, 0.0 }
0x1269   :  { %v10688_v18 = vpop.f32.mrf.mxu1 }
0x126a   :  { %v3711_v16 = vmax.f32 %v3698_v32, 0.0  ;;  %v3715_v43 = vpack.c.bf16 %v3713_v37, %v3713_v37 }
0x126b   :  { %v3700_v14 = vpop.f32.mrf.mxu1 }
0x126c   :  { %v3701_v44 = vadd.f32 %v9828_v49, %v3700_v14 }
0x126d   :  { %v4005_v62 = vpop.f32.mrf.mxu1 }
0x126e   :  { %v3712_v61 = vmax.f32 %v3701_v44, 0.0  ;;  %v4006_v8 = vadd.f32 %v9846_v26, %v4005_v62 }
0x126f   :  { %v10715_v38 = vpop.f32.mrf.mxu1 }
0x1270   :  { %v3714_v15 = vpack.c.bf16 %v3712_v61, %v3711_v16  ;;  %v4196_v60 = vpack.c.bf16 %v4006_v8, %v4006_v8 }
0x1271   :  { %v4008_v19 = vpop.f32.mrf.mxu1 }
0x1272   :  { %v4009_v59 = vadd.f32 %v9846_v26, %v4008_v19  ;;  %10705 = vmatprep.mubr.bf16.mxu0 %v3714_v15 }
0x1273   :  { %10706 = vmatmul.mubr.bf16.vlgmr.msra.gmra.mxu0 %v3715_v43  ;;  %v10716_v51 = vpop.f32.mrf.mxu1 }
0x1274   :  { %v11394_v25 = vpack.i.bf16 %v4009_v59, %v4006_v8  ;;  %10741 = vmatprep.mubr.msk.bf16.mxu0 %vm12060_vm0, %v12059_v1  ;;  %v4197_v30 = vpack.c.bf16 %v4009_v59, %v4009_v59 }
0x1275   :  { %v4087_v41 = vpop.f32.mrf.mxu1 }
0x1276   :  { %v4088_v55 = vadd.f32 %v9850_v10, %v4087_v41  ;;  %11395 = vrot.lane.b32.xlu1 %v11394_v25, %s12061_s21 }
0x1277   :  { %v10723_v3 = vpop.f32.mrf.mxu1 }
0x1278   :  { %v4204_v12 = vpack.c.bf16 %v4088_v55, %v4088_v55 }
0x1279   :  { %v4090_v35 = vpop.f32.mrf.mxu1 }
0x127a   :  { %v4091_v47 = vadd.f32 %v9850_v10, %v4090_v35  ;;  %v4216_v46 = vsel %vm594_vm8, %v4204_v12, 0 }
0x127b   :  { %v10724_v4 = vpop.f32.mrf.mxu1  ;;  %10734 = vmatpush3.bf16.xpose.msra.mxu1 %v4216_v46 }
0x127c   :  { %v11399_v29 = vpack.i.bf16 %v4091_v47, %v4088_v55  ;;  %v4205_v48 = vpack.c.bf16 %v4091_v47, %v4091_v47  ;;  %10745 = vmatprep.subr.bf16.mxu1 %v12059_v1 }
0x127d   :  { %v4169_v22 = vpop.f32.mrf.mxu1 }
0x127e   :  { %11400 = vrot.lane.b32.xlu1 %v11399_v29, %s12062_s22  ;;  %11390 = vrot.lane.b32.xlu0 %v11399_v29, %s12061_s21  ;;  %v4262_v9 = vsel %vm594_vm8, %v4205_v48, 0  ;;  %v13172_v36 = vadd.f32 %v9854_v6, %v4169_v22 }
0x127f   :  { %v10731_v2 = vpop.f32.mrf.mxu1  ;;  %10740 = vmatpush3.bf16.xpose.msra.mxu0 %v4262_v9 }
0x1280   :  { %10751 = vmatprep.subr.bf16.mxu0 %v12059_v1  ;;  %v4684_v51 = vpack.c.bf16 %v13172_v36, %v13172_v36 }
0x1281   :  { %v4172_v0 = vpop.f32.mrf.mxu1 }
0x1282   :  { %v13174_v33 = vadd.f32 %v9854_v6, %v4172_v0  ;;  %10736 = vmatmul.mubr.msk.bf16.vlgmr.msra.gmra.mxu1 %vm594_vm8, %v4196_v60  ;;  %11410 = vrot.lane.b32.xlu1 %v11399_v29, %s12063_s26  ;;  %v4697_v55 = vsel %vm4695_vm14, %v4684_v51, 0 }
0x1283   :  { %11405 = vrot.lane.b32.xlu0 %v11394_v25, %s12062_s22  ;;  %v10732_v5 = vpop.f32.mrf.mxu1  ;;  %10747 = vmatprep.mubr.msk.bf16.mxu1 %vm12060_vm0, %v12059_v1 }
0x1284   :  { %v13183_v7 = vpack.i.bf16 %v13174_v33, %v13172_v36  ;;  %v4685_v10 = vpack.c.bf16 %v13174_v33, %v13174_v33 }
0x1286   :  { %10742 = vmatmul.mubr.msk.bf16.vlgmr.msra.gmra.mxu0 %vm594_vm8, %v4197_v30  ;;  %v4743_v3 = vsel %vm4695_vm14, %v4685_v10, 0 }
0x1287   :  { %11415 = vrot.lane.b32.xlu0 %v11394_v25, %s12063_s26  ;;  %10753 = vmatprep.mubr.msk.bf16.mxu0 %vm12060_vm0, %v12059_v1 }
0x12e8   :  { %v11396_v52 = vpop.permute.xlu1 %11395 }
0x12e9   :  { %v11398_v45 = vunpack.i.h.bf16 %v11396_v52  ;;  %v11397_v17 = vunpack.i.l.bf16 %v11396_v52 }
0x12eb   :  { %v4199_v49 = vpack.c.bf16 %v11398_v45, %v11398_v45  ;;  %v4198_v50 = vpack.c.bf16 %v11397_v17, %v11397_v17 }
0x12f0   :  { %v11391_v54 = vpop.permute.xlu0 %11390  ;;  %v11401_v23 = vpop.permute.xlu1 %11400 }
0x12f1   :  { %v11393_v11 = vunpack.i.h.bf16 %v11391_v54  ;;  %v11392_v53 = vunpack.i.l.bf16 %v11391_v54  ;;  %v11403_v21 = vunpack.i.h.bf16 %v11401_v23  ;;  %v11402_v40 = vunpack.i.l.bf16 %v11401_v23 }
0x12f3   :  { %v4207_v58 = vpack.c.bf16 %v11393_v11, %v11393_v11  ;;  %v4206_v28 = vpack.c.bf16 %v11392_v53, %v11392_v53  ;;  %v4209_v13 = vpack.c.bf16 %v11403_v21, %v11403_v21  ;;  %v4208_v34 = vpack.c.bf16 %v11402_v40, %v11402_v40 }
0x12f4   :  { %v11411_v20 = vpop.permute.xlu1 %11410 }
0x12f5   :  { %v4308_v31 = vsel %vm594_vm8, %v4206_v28, 0  ;;  %v4354_v27 = vsel %vm594_vm8, %v4207_v58, 0  ;;  %v11406_v24 = vpop.permute.xlu0 %11405  ;;  %v11413_v18 = vunpack.i.h.bf16 %v11411_v20  ;;  %v11412_v32 = vunpack.i.l.bf16 %v11411_v20 }
0x12f6   :  { %10746 = vmatpush3.bf16.xpose.msra.mxu1 %v4308_v31  ;;  %10752 = vmatpush3.bf16.xpose.msra.mxu0 %v4354_v27  ;;  %v4400_v14 = vsel %vm594_vm8, %v4208_v34, 0  ;;  %v4446_v44 = vsel %vm594_vm8, %v4209_v13, 0  ;;  %v11408_v37 = vunpack.i.h.bf16 %v11406_v24  ;;  %v11407_v62 = vunpack.i.l.bf16 %v11406_v24 }
0x12f7   :  { %10757 = vmatprep.subr.bf16.mxu1 %v12059_v1  ;;  %10763 = vmatprep.subr.bf16.mxu0 %v12059_v1  ;;  %v4211_v16 = vpack.c.bf16 %v11413_v18, %v11413_v18  ;;  %v4210_v61 = vpack.c.bf16 %v11412_v32, %v11412_v32 }
0x12f8   :  { %v4201_v26 = vpack.c.bf16 %v11408_v37, %v11408_v37  ;;  %v4200_v38 = vpack.c.bf16 %v11407_v62, %v11407_v62 }
0x12f9   :  { %v11416_v15 = vpop.permute.xlu0 %11415  ;;  %v4492_v43 = vsel %vm594_vm8, %v4210_v61, 0  ;;  %v4538_v19 = vsel %vm594_vm8, %v4211_v16, 0 }
0x12fa   :  { %v11418_v8 = vunpack.i.h.bf16 %v11416_v15  ;;  %v11417_v59 = vunpack.i.l.bf16 %v11416_v15 }
0x12fc   :  { %v4203_v25 = vpack.c.bf16 %v11418_v8, %v11418_v8  ;;  %v4202_v41 = vpack.c.bf16 %v11417_v59, %v11417_v59 }
0x12fd   :  { %10748 = vmatmul.mubr.msk.bf16.vlgmr.msra.gmra.mxu1 %vm594_vm8, %v4198_v50  ;;  %10754 = vmatmul.mubr.msk.bf16.vlgmr.msra.gmra.mxu0 %vm594_vm8, %v4199_v49 }
0x12fe   :  { %10758 = vmatpush3.bf16.xpose.msra.mxu1 %v4400_v14  ;;  %10764 = vmatpush3.bf16.xpose.msra.mxu0 %v4446_v44 }
0x12ff   :  { %10759 = vmatprep.mubr.msk.bf16.mxu1 %vm12060_vm0, %v12059_v1  ;;  %10765 = vmatprep.mubr.msk.bf16.mxu0 %vm12060_vm0, %v12059_v1 }
0x1300   :  { %10769 = vmatprep.subr.bf16.mxu1 %v12059_v1  ;;  %10775 = vmatprep.subr.bf16.mxu0 %v12059_v1 }
0x1305   :  { %10760 = vmatmul.mubr.msk.bf16.vlgmr.msra.gmra.mxu1 %vm594_vm8, %v4200_v38  ;;  %10766 = vmatmul.mubr.msk.bf16.vlgmr.msra.gmra.mxu0 %vm594_vm8, %v4201_v26 }
0x1306   :  { %10770 = vmatpush3.bf16.xpose.msra.mxu1 %v4492_v43  ;;  %10776 = vmatpush3.bf16.xpose.msra.mxu0 %v4538_v19 }
0x1307   :  { %10771 = vmatprep.mubr.msk.bf16.mxu1 %vm12060_vm0, %v12059_v1  ;;  %10777 = vmatprep.mubr.msk.bf16.mxu0 %vm12060_vm0, %v12059_v1 }
0x1308   :  { %10781 = vmatprep.subr.bf16.mxu1 %v12059_v1  ;;  %10787 = vmatprep.subr.bf16.mxu0 %v12059_v1 }
0x130d   :  { %10772 = vmatmul.mubr.msk.bf16.vlgmr.msra.gmra.mxu1 %vm594_vm8, %v4202_v41  ;;  %10778 = vmatmul.mubr.msk.bf16.vlgmr.msra.gmra.mxu0 %vm594_vm8, %v4203_v25 }
0x130e   :  { %10782 = vmatpush3.bf16.msra.mxu1 %v4697_v55  ;;  %10788 = vmatpush3.bf16.msra.mxu0 %v4743_v3 }
0x130f   :  { %10783 = vmatprep.mubr.msk.bf16.mxu1 %vm12060_vm0, %v12059_v1  ;;  %10789 = vmatprep.mubr.msk.bf16.mxu0 %vm12060_vm0, %v12059_v1 }
0x1310   :  { %10793 = vmatprep.subr.bf16.mxu1 %v12059_v1  ;;  %10799 = vmatprep.subr.bf16.mxu0 %v12059_v1 }
0x1333   :  { %v13227_v12 = vpop.f32.mrf.mxu0 }
0x1335   :  { %v13229_v35 = vpop.f32.mrf.mxu0 }
0x1337   :  { %v10708_v47 = vpop.f32.mrf.mxu0 }
0x1339   :  { %v13231_v29 = vpop.f32.mrf.mxu0 }
0x1342   :  { %v4252_v46 = vpop.f32.mrf.mxu1 }
0x1343   :  { %v4580_v4 = vmul.f32 0.35355338, %v4252_v46 }
0x1344   :  { %v10737_v48 = vpop.f32.mrf.mxu1 }
0x1345   :  { %v4588_v22 = vsel %vm594_vm8, %v4580_v4, -inf }
0x1346   :  { %4589 = vmax.xlane.f32.xlu1 %v4588_v22  ;;  %v4255_v9 = vpop.f32.mrf.mxu1  ;;  %v4298_v6 = vpop.f32.mrf.mxu0 }
0x1347   :  { %v4581_v2 = vmul.f32 0.35355338, %v4298_v6 }
0x1348   :  { %v10738_v60 = vpop.f32.mrf.mxu1  ;;  %v10743_v0 = vpop.f32.mrf.mxu0 }
0x1349   :  { %v4591_v36 = vsel %vm594_vm8, %v4581_v2, -inf }
0x134a   :  { %4592 = vmax.xlane.f32.xlu0 %v4591_v36  ;;  %v4301_v33 = vpop.f32.mrf.mxu0 }
0x134c   :  { %v10744_v5 = vpop.f32.mrf.mxu0 }
0x13bd   :  { %v4344_v30 = vpop.f32.mrf.mxu1  ;;  %v4390_v52 = vpop.f32.mrf.mxu0 }
0x13be   :  { %v4582_v54 = vmul.f32 0.35355338, %v4344_v30  ;;  %v4583_v11 = vmul.f32 0.35355338, %v4390_v52 }
0x13bf   :  { %v10749_v53 = vpop.f32.mrf.mxu1  ;;  %v10755_v23 = vpop.f32.mrf.mxu0 }
0x13c0   :  { %v4594_v58 = vsel %vm594_vm8, %v4582_v54, -inf  ;;  %v4597_v28 = vsel %vm594_vm8, %v4583_v11, -inf }
0x13c1   :  { %v4347_v21 = vpop.f32.mrf.mxu1  ;;  %4595 = vmax.xlane.f32.xlu0 %v4594_v58  ;;  %4598 = vmax.xlane.f32.xlu1 %v4597_v28  ;;  %v4393_v40 = vpop.f32.mrf.mxu0 }
0x13c3   :  { %v10750_v31 = vpop.f32.mrf.mxu1  ;;  %v10756_v27 = vpop.f32.mrf.mxu0 }
0x13c5   :  { %v4436_v45 = vpop.f32.mrf.mxu1  ;;  %v4482_v17 = vpop.f32.mrf.mxu0 }
0x13c6   :  { %v4584_v13 = vmul.f32 0.35355338, %v4436_v45  ;;  %v4585_v34 = vmul.f32 0.35355338, %v4482_v17 }
0x13c7   :  { %v10761_v20 = vpop.f32.mrf.mxu1  ;;  %v10767_v49 = vpop.f32.mrf.mxu0 }
0x13c8   :  { %v4600_v50 = vsel %vm594_vm8, %v4584_v13, -inf  ;;  %v4603_v24 = vsel %vm594_vm8, %v4585_v34, -inf }
0x13c9   :  { %v4439_v18 = vpop.f32.mrf.mxu1  ;;  %4601 = vmax.xlane.f32.xlu0 %v4600_v50  ;;  %4604 = vmax.xlane.f32.xlu1 %v4603_v24  ;;  %v4485_v32 = vpop.f32.mrf.mxu0 }
0x13cb   :  { %v10762_v14 = vpop.f32.mrf.mxu1  ;;  %v10768_v44 = vpop.f32.mrf.mxu0 }
0x13cd   :  { %v4528_v37 = vpop.f32.mrf.mxu1  ;;  %v4574_v62 = vpop.f32.mrf.mxu0 }
0x13ce   :  { %v4586_v16 = vmul.f32 0.35355338, %v4528_v37  ;;  %v13239_v61 = vmul.f32 0.35355338, %v4574_v62 }
0x13cf   :  { %v4590_v26 = vpop.xlane.xlu1 %4589  ;;  %v10773_v38 = vpop.f32.mrf.mxu1 }
0x13d0   :  { %v4612_v15 = vsub.f32 %v4580_v4, %v4590_v26  ;;  %v10779_v43 = vpop.f32.mrf.mxu0  ;;  %v4606_v19 = vsel %vm594_vm8, %v4586_v16, -inf  ;;  %v4609_v8 = vsel %vm594_vm8, %v13239_v61, -inf }
0x13d1   :  { %v4531_v59 = vpop.f32.mrf.mxu1  ;;  %4607 = vmax.xlane.f32.xlu0 %v4606_v19  ;;  %4610 = vmax.xlane.f32.xlu1 %v4609_v8 }
0x13d2   :  { %v4620_v51 = vmul.f32 1.442695, %v4612_v15  ;;  %v4577_v10 = vpop.f32.mrf.mxu0 }
0x13d3   :  { %v10774_v25 = vpop.f32.mrf.mxu1  ;;  %v4593_v41 = vpop.xlane.xlu0 %4592 }
0x13d4   :  { %11865 = vpow2.f32 %v4620_v51  ;;  %v4613_v55 = vsub.f32 %v4581_v2, %v4593_v41  ;;  %v10780_v3 = vpop.f32.mrf.mxu0 }
0x13d6   :  { %v4622_v47 = vmul.f32 1.442695, %v4613_v55 }
0x13d8   :  { %11867 = vpow2.f32 %v4622_v47 }
0x13e1   :  { %v11866_v46 = vpop.eup %11865 }
0x13e2   :  { %v4636_v4 = vsel %vm594_vm8, %v11866_v46, 0.0 }
0x13e3   :  { %4637 = vadd.xlane.f32.xlu0 %v4636_v4 }
0x13e5   :  { %v11868_v48 = vpop.eup %11867 }
0x13e6   :  { %v4639_v22 = vsel %vm594_vm8, %v11868_v48, 0.0 }
0x13e7   :  { %4640 = vadd.xlane.f32.xlu1 %v4639_v22 }
0x144a   :  { %v4596_v9 = vpop.xlane.xlu0 %4595  ;;  %v4599_v6 = vpop.xlane.xlu1 %4598 }
0x144b   :  { %v4614_v60 = vsub.f32 %v4582_v54, %v4596_v9  ;;  %v4615_v0 = vsub.f32 %v4583_v11, %v4599_v6 }
0x144d   :  { %v4624_v36 = vmul.f32 1.442695, %v4614_v60  ;;  %v4626_v33 = vmul.f32 1.442695, %v4615_v0 }
0x144f   :  { %11869 = vpow2.f32 %v4624_v36 }
0x1450   :  { %11871 = vpow2.f32 %v4626_v33 }
0x1452   :  { %v4602_v2 = vpop.xlane.xlu0 %4601  ;;  %v4605_v5 = vpop.xlane.xlu1 %4604 }
0x1453   :  { %v4616_v30 = vsub.f32 %v4584_v13, %v4602_v2  ;;  %v4617_v52 = vsub.f32 %v4585_v34, %v4605_v5 }
0x1455   :  { %v4628_v53 = vmul.f32 1.442695, %v4616_v30  ;;  %v4630_v23 = vmul.f32 1.442695, %v4617_v52 }
0x1457   :  { %11873 = vpow2.f32 %v4628_v53 }
0x1458   :  { %11875 = vpow2.f32 %v4630_v23 }
0x145a   :  { %v4608_v58 = vpop.xlane.xlu0 %4607  ;;  %v4611_v20 = vpop.xlane.xlu1 %4610 }
0x145b   :  { %v4618_v28 = vsub.f32 %v4586_v16, %v4608_v58  ;;  %v4619_v16 = vsub.f32 %v13239_v61, %v4611_v20 }
0x145c   :  { %v11870_v21 = vpop.eup %11869 }
0x145d   :  { %v11872_v40 = vpop.eup %11871  ;;  %v4632_v31 = vmul.f32 1.442695, %v4618_v28  ;;  %v4642_v54 = vsel %vm594_vm8, %v11870_v21, 0.0  ;;  %v4634_v26 = vmul.f32 1.442695, %v4619_v16 }
0x145e   :  { %4643 = vadd.xlane.f32.xlu0 %v4642_v54  ;;  %v4645_v11 = vsel %vm594_vm8, %v11872_v40, 0.0 }
0x145f   :  { %11877 = vpow2.f32 %v4632_v31  ;;  %4646 = vadd.xlane.f32.xlu1 %v4645_v11 }
0x1464   :  { %v13248_v27 = vpop.eup %11873 }
0x1465   :  { %v13250_v45 = vpop.eup %11875  ;;  %v4648_v17 = vsel %vm594_vm8, %v13248_v27, 0.0 }
0x1466   :  { %4649 = vadd.xlane.f32.xlu0 %v4648_v17  ;;  %v4651_v13 = vsel %vm594_vm8, %v13250_v45, 0.0 }
0x1467   :  { %4652 = vadd.xlane.f32.xlu1 %v4651_v13 }
0x146c   :  { %v13256_v34 = vpop.eup %11877  ;;  %v4638_v49 = vpop.xlane.xlu0 %4637 }
0x146d   :  { %11879 = vrcp.f32 %v4638_v49  ;;  %v4654_v50 = vsel %vm594_vm8, %v13256_v34, 0.0 }
0x146e   :  { %4655 = vadd.xlane.f32.xlu0 %v4654_v50 }
0x1470   :  { %v4641_v24 = vpop.xlane.xlu1 %4640 }
0x1471   :  { %11881 = vrcp.f32 %v4641_v24 }
0x1472   :  { %11883 = vpow2.f32 %v4634_v26 }
0x1478   :  { %11425 = vrot.lane.b32.xlu1 %v13183_v7, %s12062_s22 }
0x147a   :  { %v11880_v18 = vpop.eup %11879 }
0x147b   :  { %v4668_v32 = vmul.f32 %v11880_v18, %v11866_v46 }
0x147d   :  { %v4676_v14 = vpack.c.bf16 %v4668_v32, %v4668_v32 }
0x147e   :  { %v11882_v44 = vpop.eup %11881 }
0x147f   :  { %v4669_v37 = vmul.f32 %v11882_v44, %v11868_v48  ;;  %10784 = vmatmul.mubr.msk.bf16.vlgmr.msra.gmra.mxu1 %vm594_vm8, %v4676_v14  ;;  %v13271_v38 = vpop.eup %11883 }
0x1480   :  { %10795 = vmatprep.mubr.msk.bf16.mxu1 %vm12060_vm0, %v12059_v1  ;;  %v4657_v15 = vsel %vm594_vm8, %v13271_v38, 0.0 }
0x1481   :  { %v4677_v62 = vpack.c.bf16 %v4669_v37, %v4669_v37 }
0x1483   :  { %10790 = vmatmul.mubr.msk.bf16.vlgmr.msra.gmra.mxu0 %vm594_vm8, %v4677_v62 }
0x1484   :  { %11420 = vrot.lane.b32.xlu0 %v13183_v7, %s12061_s21  ;;  %10801 = vmatprep.mubr.msk.bf16.mxu0 %vm12060_vm0, %v12059_v1 }
0x149c   :  { %4658 = vadd.xlane.f32.xlu1 %v4657_v15 }
0x14ad   :  { %11430 = vrot.lane.b32.xlu1 %v13183_v7, %s12063_s26 }
0x14e7   :  { %v4644_v61 = vpop.xlane.xlu0 %4643 }
0x14e8   :  { %v4647_v43 = vpop.xlane.xlu1 %4646  ;;  %11885 = vrcp.f32 %v4644_v61 }
0x14e9   :  { %11887 = vrcp.f32 %v4647_v43  ;;  %v11671_v43 = vld [vmem:[#allocation2 + $0x158] sm:$0xff]  }
0x14ef   :  { %v4650_v19 = vpop.xlane.xlu0 %4649 }
0x14f0   :  { %v4653_v8 = vpop.xlane.xlu1 %4652  ;;  %11889 = vrcp.f32 %v4650_v19 }
0x14f1   :  { %11891 = vrcp.f32 %v4653_v8 }
0x14f4   :  { %v11426_v51 = vpop.permute.xlu1 %11425 }
0x14f5   :  { %v11886_v10 = vpop.eup %11885  ;;  %v11428_v55 = vunpack.i.h.bf16 %v11426_v51  ;;  %v11427_v3 = vunpack.i.l.bf16 %v11426_v51 }
0x14f6   :  { %v11888_v25 = vpop.eup %11887  ;;  %v4670_v4 = vmul.f32 %v11886_v10, %v11870_v21 }
0x14f7   :  { %v4656_v59 = vpop.xlane.xlu0 %4655  ;;  %v4671_v48 = vmul.f32 %v11888_v25, %v11872_v40  ;;  %v4689_v9 = vpack.c.bf16 %v11428_v55, %v11428_v55  ;;  %v4688_v6 = vpack.c.bf16 %v11427_v3, %v11427_v3 }
0x14f8   :  { %v4678_v33 = vpack.c.bf16 %v4670_v4, %v4670_v4  ;;  %11893 = vrcp.f32 %v4656_v59 }
0x14f9   :  { %v4679_v2 = vpack.c.bf16 %v4671_v48, %v4671_v48  ;;  %v4881_v30 = vsel %vm4695_vm14, %v4688_v6, 0  ;;  %v4927_v52 = vsel %vm4695_vm14, %v4689_v9, 0  ;;  %v9833_v9 = vld [vmem:[%s14294_s3 + $0xf] ss:$0 sm:$0xff] }
0x14fa   :  { %v3820_v6 = vadd.f32 %v9833_v9, %v13229_v35  ;;  %v3823_v35 = vadd.f32 %v9833_v9, %v13231_v29 }
0x14fb   :  { %v11421_v41 = vpop.permute.xlu0 %11420 }
0x14fc   :  { %v11423_v47 = vunpack.i.h.bf16 %v11421_v41  ;;  %v11422_v46 = vunpack.i.l.bf16 %v11421_v41 }
0x14fd   :  { %v11890_v36 = vpop.eup %11889 }
0x14fe   :  { %v4687_v7 = vpack.c.bf16 %v11423_v47, %v11423_v47  ;;  %v4686_v22 = vpack.c.bf16 %v11422_v46, %v11422_v46  ;;  %v11892_v5 = vpop.eup %11891  ;;  %v4672_v53 = vmul.f32 %v11890_v36, %v13248_v27 }
0x14ff   :  { %v4673_v23 = vmul.f32 %v11892_v5, %v13250_v45 }
0x1500   :  { %v4789_v60 = vsel %vm4695_vm14, %v4686_v22, 0  ;;  %v4835_v0 = vsel %vm4695_vm14, %v4687_v7, 0  ;;  %v4680_v58 = vpack.c.bf16 %v4672_v53, %v4672_v53 }
0x1501   :  { %10794 = vmatpush3.bf16.msra.mxu1 %v4789_v60  ;;  %10800 = vmatpush3.bf16.msra.mxu0 %v4835_v0  ;;  %v4681_v28 = vpack.c.bf16 %v4673_v23, %v4673_v23  ;;  %v3833_v60 = vadd.f32 %v3820_v6, %v13119_v56  ;;  %v11672_v0 = vld [vmem:[#allocation2 + $0x150] sm:$0xff]   ;;  %v3828_v56 = vadd.f32 %v13227_v12, %v9833_v9 }
0x1502   :  { %10805 = vmatprep.subr.bf16.mxu1 %v12059_v1  ;;  %10811 = vmatprep.subr.bf16.mxu0 %v12059_v1 }
0x1504   :  { %10796 = vmatmul.mubr.msk.bf16.vlgmr.msra.gmra.mxu1 %vm594_vm8, %v4678_v33  ;;  %10802 = vmatmul.mubr.msk.bf16.vlgmr.msra.gmra.mxu0 %vm594_vm8, %v4679_v2  ;;  %v3836_v33 = vsel %vm206_vm7, %v3833_v60, 0.0 }
0x1505   :  { %10806 = vmatpush3.bf16.msra.mxu1 %v4881_v30  ;;  %10812 = vmatpush3.bf16.msra.mxu0 %v4927_v52  ;;  %v11894_v40 = vpop.eup %11893 }
0x1506   :  { %10807 = vmatprep.mubr.msk.bf16.mxu1 %vm12060_vm0, %v12059_v1  ;;  %10813 = vmatprep.mubr.msk.bf16.mxu0 %vm12060_vm0, %v12059_v1  ;;  %v4674_v27 = vmul.f32 %v11894_v40, %v13256_v34  ;;  %v3835_v40 = vadd.f32 %v3828_v56, %v13126_v63 }
0x1507   :  { %10817 = vmatprep.subr.bf16.mxu1 %v12059_v1  ;;  %10823 = vmatprep.subr.bf16.mxu0 %v12059_v1 }
0x1508   :  { %v4682_v49 = vpack.c.bf16 %v4674_v27, %v4674_v27 }
0x150c   :  { %10808 = vmatmul.mubr.msk.bf16.vlgmr.msra.gmra.mxu1 %vm594_vm8, %v4680_v58  ;;  %10814 = vmatmul.mubr.msk.bf16.vlgmr.msra.gmra.mxu0 %vm594_vm8, %v4681_v28 }
0x150d   :  { %10819 = vmatprep.mubr.msk.bf16.mxu1 %vm12060_vm0, %v12059_v1  ;;  %10825 = vmatprep.mubr.msk.bf16.mxu0 %vm12060_vm0, %v12059_v1 }
0x1525   :  { %v4659_v21 = vpop.xlane.xlu1 %4658 }
0x1526   :  { %11895 = vrcp.f32 %v4659_v21  ;;  %v3834_v21 = vadd.f32 %v3823_v35, %v13121_v57 }
0x1529   :  { %v11431_v31 = vpop.permute.xlu1 %11430 }
0x152a   :  { %v11433_v54 = vunpack.i.h.bf16 %v11431_v31  ;;  %v11432_v11 = vunpack.i.l.bf16 %v11431_v31  ;;  %v3839_v31 = vsel %vm206_vm7, %v3834_v21, 0.0 }
0x152c   :  { %v4691_v45 = vpack.c.bf16 %v11433_v54, %v11433_v54  ;;  %v4690_v17 = vpack.c.bf16 %v11432_v11, %v11432_v11  ;;  %v3842_v54 = vsel %vm206_vm7, %v3835_v40, 0.0 }
0x152e   :  { %v4973_v13 = vsel %vm4695_vm14, %v4690_v17, 0  ;;  %v5019_v20 = vsel %vm4695_vm14, %v4691_v45, 0 }
0x152f   :  { %10818 = vmatpush3.bf16.msra.mxu1 %v4973_v13  ;;  %10824 = vmatpush3.bf16.msra.mxu0 %v5019_v20 }
0x1530   :  { %10829 = vmatprep.subr.bf16.mxu1 %v12059_v1  ;;  %10837 = vmatprep.subr.bf16.mxu0 %v12059_v1 }
0x1532   :  { %10820 = vmatmul.mubr.msk.bf16.vlgmr.msra.gmra.mxu1 %vm594_vm8, %v4682_v49 }
0x1533   :  { %v11896_v50 = vpop.eup %11895  ;;  %10833 = vmatprep.mubr.msk.bf16.mxu1 %vm12060_vm0, %v12059_v1  ;;  %10830 = vmatpush3.bf16.msra.mxu1 %v11671_v43 }
0x1534   :  { %v4675_v34 = vmul.f32 %v11896_v50, %v13271_v38  ;;  %10831 = vmatprep.subr.bf16.mxu1 %v12059_v1 }
0x1536   :  { %v4683_v24 = vpack.c.bf16 %v4675_v34, %v4675_v34 }
0x1537   :  { %10832 = vmatpush3.bf16.msra.mxu1 %v11672_v0 }
0x1538   :  { %10826 = vmatmul.mubr.msk.bf16.vlgmr.msra.gmra.mxu0 %vm594_vm8, %v4683_v24 }
0x1539   :  { %10841 = vmatprep.mubr.msk.bf16.mxu0 %vm12060_vm0, %v12059_v1 }
0x153f   :  { %v13311_v18 = vpop.f32.mrf.mxu1 }
0x1541   :  { %v10785_v32 = vpop.f32.mrf.mxu1 }
0x1543   :  { %v4736_v14 = vpop.f32.mrf.mxu1  ;;  %v4779_v44 = vpop.f32.mrf.mxu0 }
0x1545   :  { %v10786_v37 = vpop.f32.mrf.mxu1  ;;  %v10791_v62 = vpop.f32.mrf.mxu0 }
0x1547   :  { %v4782_v16 = vpop.f32.mrf.mxu0 }
0x1549   :  { %v10792_v26 = vpop.f32.mrf.mxu0 }
0x15c4   :  { %v4825_v15 = vpop.f32.mrf.mxu1  ;;  %v4871_v61 = vpop.f32.mrf.mxu0 }
0x15c5   :  { %v11434_v19 = vpack.i.bf16 %v4871_v61, %v4825_v15 }
0x15c6   :  { %v10797_v38 = vpop.f32.mrf.mxu1  ;;  %v10803_v8 = vpop.f32.mrf.mxu0 }
0x15c7   :  { %11435 = vrot.lane.b32.xlu0 %v11434_v19, %s12064_s27 }
0x15c8   :  { %v4828_v59 = vpop.f32.mrf.mxu1  ;;  %v4874_v51 = vpop.f32.mrf.mxu0 }
0x15ca   :  { %v10798_v10 = vpop.f32.mrf.mxu1  ;;  %v10804_v25 = vpop.f32.mrf.mxu0 }
0x15cc   :  { %v4917_v41 = vpop.f32.mrf.mxu1  ;;  %v4963_v55 = vpop.f32.mrf.mxu0 }
0x15cd   :  { %v11439_v3 = vpack.i.bf16 %v4963_v55, %v4917_v41 }
0x15ce   :  { %v10809_v47 = vpop.f32.mrf.mxu1  ;;  %v10815_v46 = vpop.f32.mrf.mxu0 }
0x15cf   :  { %11440 = vrot.lane.b32.xlu1 %v11439_v3, %s12065_s28  ;;  %v9842_v47 = vld [vmem:[%s14294_s3 + $0x12] ss:$0 sm:$0xff] }
0x15d0   :  { %v4920_v4 = vpop.f32.mrf.mxu1  ;;  %v4966_v48 = vpop.f32.mrf.mxu0 }
0x15d1   :  { %v9843_v4 = vld [vmem:[%s14294_s3 + $0x13] ss:$0 sm:$0xff] }
0x15d2   :  { %v10810_v7 = vpop.f32.mrf.mxu1  ;;  %v10816_v22 = vpop.f32.mrf.mxu0 }
0x15f2   :  { %v5009_v36 = vpop.f32.mrf.mxu1 }
0x15f3   :  { %3837 = vadd.xlane.f32.xlu1 %v3836_v33 }
0x15f4   :  { %v10821_v2 = vpop.f32.mrf.mxu1 }
0x15f6   :  { %v5012_v5 = vpop.f32.mrf.mxu1 }
0x15f8   :  { %v10822_v30 = vpop.f32.mrf.mxu1  ;;  %v5055_v52 = vpop.f32.mrf.mxu0 }
0x15f9   :  { %v11444_v53 = vpack.i.bf16 %v5055_v52, %v5009_v36 }
0x15fa   :  { %v10827_v23 = vpop.f32.mrf.mxu0 }
0x15fb   :  { %11445 = vrot.lane.b32.xlu0 %v11444_v53, %s12066_s29  ;;  %v9874_v23 = vld [vmem:[%s14294_s3 + $0x17] ss:$0 sm:$0xff] }
0x15fc   :  { %v5058_v58 = vpop.f32.mrf.mxu0 }
0x15fe   :  { %v10828_v28 = vpop.f32.mrf.mxu0 }
0x161a   :  { %3840 = vadd.xlane.f32.xlu0 %v3839_v31 }
0x161e   :  { %3843 = vadd.xlane.f32.xlu0 %v3842_v54 }
0x1639   :  { %v11436_v11 = vpop.permute.xlu0 %11435 }
0x163a   :  { %v11438_v45 = vunpack.i.h.bf16 %v11436_v11  ;;  %v11437_v17 = vunpack.i.l.bf16 %v11436_v11 }
0x163c   :  { %v5086_v29 = vsel %vm594_vm8, %v4779_v44, %v11438_v45  ;;  %v5085_v57 = vsel %vm594_vm8, %v13311_v18, %v11437_v17 }
0x1641   :  { %v11441_v27 = vpop.permute.xlu1 %11440 }
0x1642   :  { %v11443_v13 = vunpack.i.h.bf16 %v11441_v27  ;;  %v11442_v20 = vunpack.i.l.bf16 %v11441_v27 }
0x1644   :  { %v5088_v50 = vsel %vm1626_vm12, %v5086_v29, %v11443_v13  ;;  %v5087_v34 = vsel %vm1626_vm12, %v5085_v57, %v11442_v20 }
0x166d   :  { %v11446_v49 = vpop.permute.xlu0 %11445 }
0x166e   :  { %v11448_v12 = vunpack.i.h.bf16 %v11446_v49  ;;  %v11447_v63 = vunpack.i.l.bf16 %v11446_v49 }
0x1670   :  { %v5090_v24 = vsel %vm1631_vm13, %v5088_v50, %v11448_v12  ;;  %v5089_v32 = vsel %vm1631_vm13, %v5087_v34, %v11447_v63 }
0x1671   :  { %v5091_v14 = vpack.c.bf16 %v5090_v24, %v5089_v32 }
0x1673   :  { %10834 = vmatmul.mubr.msk.bf16.vlgmr.msra.gmra.mxu1 %vm206_vm7, %v5091_v14 }
0x167c   :  { %v3838_v37 = vpop.xlane.xlu1 %3837 }
0x167d   :  { %v3845_v62 = vmul.f32 0.03125, %v3838_v37 }
0x167f   :  { %v3848_v16 = vsub.f32 %v3833_v60, %v3845_v62 }
0x1681   :  { %v3851_v44 = vmul.f32 %v3848_v16, %v3848_v16 }
0x1683   :  { %v3854_v26 = vsel %vm206_vm7, %v3851_v44, 0.0 }
0x1684   :  { %3855 = vadd.xlane.f32.xlu1 %v3854_v26 }
0x16a3   :  { %v3841_v18 = vpop.xlane.xlu0 %3840 }
0x16a4   :  { %v3846_v15 = vmul.f32 0.03125, %v3841_v18 }
0x16a6   :  { %v3849_v61 = vsub.f32 %v3834_v21, %v3846_v15 }
0x16a7   :  { %v3844_v43 = vpop.xlane.xlu0 %3843 }
0x16a8   :  { %v3847_v19 = vmul.f32 0.03125, %v3844_v43  ;;  %v3852_v38 = vmul.f32 %v3849_v61, %v3849_v61 }
0x16aa   :  { %v3850_v8 = vsub.f32 %v3835_v40, %v3847_v19  ;;  %v3857_v59 = vsel %vm206_vm7, %v3852_v38, 0.0 }
0x16ab   :  { %3858 = vadd.xlane.f32.xlu0 %v3857_v59 }
0x16ac   :  { %v3853_v51 = vmul.f32 %v3850_v8, %v3850_v8 }
0x16ae   :  { %v3860_v10 = vsel %vm206_vm7, %v3853_v51, 0.0 }
0x16af   :  { %3861 = vadd.xlane.f32.xlu1 %v3860_v10  ;;  %v11673_v10 = vld [vmem:[#allocation2 + $0x178] sm:$0xff]  }
0x16b0   :  { %10845 = vmatprep.subr.bf16.mxu1 %v11673_v10 }
0x16b1   :  { %10846 = vmatpush3.bf16.msra.mxu1 %v11673_v10 }
0x170d   :  { %v3856_v25 = vpop.xlane.xlu1 %3855 }
0x170e   :  { %v3863_v41 = vmul.f32 0.03125, %v3856_v25  ;;  %v11674_v25 = vld [vmem:[#allocation2 + $0x170] sm:$0xff]  }
0x170f   :  { %10847 = vmatprep.subr.bf16.mxu1 %v11674_v25 }
0x1710   :  { %v3866_v55 = vadd.f32 1e-05, %v3863_v41  ;;  %v11675_v41 = vld [vmem:[#allocation2 + $0x168] sm:$0xff]   ;;  %10848 = vmatpush3.bf16.msra.mxu1 %v11674_v25  ;;  %v9880_v25 = vld [vmem:[%s14294_s3 + $0x18] ss:$0 sm:$0xff] }
0x1711   :  { %10838 = vmatpush3.bf16.msra.mxu0 %v11675_v41  ;;  %10861 = vmatprep.subr.bf16.mxu1 %v12059_v1 }
0x1712   :  { %11897 = vrsqrt.f32 %v3866_v55  ;;  %10839 = vmatprep.subr.bf16.mxu0 %v12059_v1  ;;  %v11676_v55 = vld [vmem:[#allocation2 + $0x160] sm:$0xff]  }
0x1715   :  { %10840 = vmatpush3.bf16.msra.mxu0 %v11676_v55 }
0x171f   :  { %v11898_v3 = vpop.eup %11897 }
0x1720   :  { %v3872_v46 = vmul.f32 %v11898_v3, %v3848_v16  ;;  %v11677_v3 = vld [vmem:[#allocation2 + $0x188] sm:$0xff]  }
0x1721   :  { %10853 = vmatprep.subr.bf16.mxu0 %v11677_v3 }
0x1722   :  { %v3880_v48 = vmul.f32 %v9842_v47, %v3872_v46 }
0x1724   :  { %v3888_v7 = vadd.f32 %v9843_v4, %v3880_v48 }
0x1726   :  { %v3891_v22 = vsel %vm206_vm7, %v3888_v7, 0.0 }
0x1727   :  { %3892 = vadd.xlane.f32.xlu0 %v3891_v22 }
0x1733   :  { %v5150_v9 = vpop.f32.mrf.mxu1 }
0x1734   :  { %v3859_v6 = vpop.xlane.xlu0 %3858  ;;  %v5151_v28 = vadd.f32 %v9874_v23, %v5150_v9 }
0x1735   :  { %v3864_v60 = vmul.f32 0.03125, %v3859_v6  ;;  %v10835_v0 = vpop.f32.mrf.mxu1 }
0x1736   :  { %v5157_v31 = vadd.f32 %v5151_v28, %v12177_v39 }
0x1737   :  { %v3867_v36 = vadd.f32 1e-05, %v3864_v60  ;;  %v5153_v33 = vpop.f32.mrf.mxu1 }
0x1738   :  { %v3862_v2 = vpop.xlane.xlu1 %3861  ;;  %v5154_v54 = vadd.f32 %v9874_v23, %v5153_v33  ;;  %v5159_v13 = vsel %vm206_vm7, %v5157_v31, 0.0  ;;  %v9844_v23 = vld [vmem:[%s14294_s3 + $0x34] ss:$0 sm:$0xff] }
0x1739   :  { %11899 = vrsqrt.f32 %v3867_v36  ;;  %v3865_v5 = vmul.f32 0.03125, %v3862_v2  ;;  %v10836_v30 = vpop.f32.mrf.mxu1 }
0x173a   :  { %v5158_v17 = vadd.f32 %v5154_v54, %v12180_v42 }
0x173b   :  { %v3868_v52 = vadd.f32 1e-05, %v3865_v5 }
0x173c   :  { %v5162_v49 = vsel %vm206_vm7, %v5158_v17, 0.0 }
0x173d   :  { %11901 = vrsqrt.f32 %v3868_v52 }
0x1746   :  { %v11900_v53 = vpop.eup %11899 }
0x1747   :  { %v3873_v58 = vmul.f32 %v11900_v53, %v3849_v61 }
0x1749   :  { %v3881_v35 = vmul.f32 %v9842_v47, %v3873_v58 }
0x174a   :  { %v11902_v56 = vpop.eup %11901 }
0x174b   :  { %v3889_v21 = vadd.f32 %v9843_v4, %v3881_v35  ;;  %v3874_v40 = vmul.f32 %v11902_v56, %v3850_v8  ;;  %v9845_v56 = vld [vmem:[%s14294_s3 + $0x35] ss:$0 sm:$0xff] }
0x174d   :  { %v3894_v11 = vsel %vm206_vm7, %v3889_v21, 0.0  ;;  %v3882_v27 = vmul.f32 %v9842_v47, %v3874_v40 }
0x174e   :  { %3895 = vadd.xlane.f32.xlu1 %v3894_v11 }
0x174f   :  { %v3890_v45 = vadd.f32 %v9843_v4, %v3882_v27 }
0x1751   :  { %v3897_v20 = vsel %vm206_vm7, %v3890_v45, 0.0 }
0x1752   :  { %5160 = vadd.xlane.f32.xlu1 %v5159_v13  ;;  %3898 = vadd.xlane.f32.xlu0 %v3897_v20 }
0x1756   :  { %5163 = vadd.xlane.f32.xlu0 %v5162_v49 }
0x17b0   :  { %v3893_v29 = vpop.xlane.xlu0 %3892 }
0x17b1   :  { %v3900_v57 = vmul.f32 0.03125, %v3893_v29 }
0x17b3   :  { %v13356_v39 = vsub.f32 %v3888_v7, %v3900_v57 }
0x17b5   :  { %v3906_v12 = vmul.f32 %v13356_v39, %v13356_v39 }
0x17b7   :  { %v3909_v63 = vsel %vm206_vm7, %v3906_v12, 0.0  ;;  %v9879_v12 = vld [vmem:[%s14294_s3 + $0x1f] ss:$0 sm:$0xff] }
0x17b8   :  { %3910 = vadd.xlane.f32.xlu1 %v3909_v63 }
0x17d7   :  { %v3896_v42 = vpop.xlane.xlu1 %3895 }
0x17d8   :  { %v3901_v50 = vmul.f32 0.03125, %v3896_v42 }
0x17da   :  { %v3904_v34 = vsub.f32 %v3889_v21, %v3901_v50 }
0x17db   :  { %v3899_v24 = vpop.xlane.xlu0 %3898  ;;  %v5161_v32 = vpop.xlane.xlu1 %5160 }
0x17dc   :  { %v3902_v14 = vmul.f32 0.03125, %v3899_v24  ;;  %v5165_v37 = vmul.f32 0.03125, %v5161_v32  ;;  %v3907_v62 = vmul.f32 %v3904_v34, %v3904_v34  ;;  %v11678_v32 = vld [vmem:[#allocation2 + $0x180] sm:$0xff]  }
0x17de   :  { %v13361_v16 = vsub.f32 %v3890_v45, %v3902_v14  ;;  %v5167_v44 = vsub.f32 %v5157_v31, %v5165_v37  ;;  %v3912_v26 = vsel %vm206_vm7, %v3907_v62, 0.0  ;;  %v9878_v45 = vld [vmem:[%s14294_s3 + $0x1e] ss:$0 sm:$0xff]  ;;  %v9884_v37 = vld [vmem:[%s14294_s3 + $0x19] ss:$0 sm:$0xff] }
0x17df   :  { %v5164_v18 = vpop.xlane.xlu0 %5163  ;;  %3913 = vadd.xlane.f32.xlu0 %v3912_v26 }
0x17e0   :  { %v5166_v15 = vmul.f32 0.03125, %v5164_v18  ;;  %v3908_v61 = vmul.f32 %v13361_v16, %v13361_v16  ;;  %v5169_v43 = vmul.f32 %v5167_v44, %v5167_v44 }
0x17e2   :  { %v5168_v19 = vsub.f32 %v5158_v17, %v5166_v15  ;;  %v3915_v38 = vsel %vm206_vm7, %v3908_v61, 0.0  ;;  %v5171_v8 = vsel %vm206_vm7, %v5169_v43, 0.0 }
0x17e3   :  { %3916 = vadd.xlane.f32.xlu1 %v3915_v38  ;;  %5172 = vadd.xlane.f32.xlu0 %v5171_v8 }
0x17e4   :  { %v5170_v59 = vmul.f32 %v5168_v19, %v5168_v19 }
0x17e6   :  { %v5174_v51 = vsel %vm206_vm7, %v5170_v59, 0.0 }
0x17e7   :  { %5175 = vadd.xlane.f32.xlu1 %v5174_v51 }
0x1841   :  { %v3911_v47 = vpop.xlane.xlu1 %3910 }
0x1842   :  { %v3918_v46 = vmul.f32 0.03125, %v3911_v47 }
0x1844   :  { %v3921_v4 = vadd.f32 1e-05, %v3918_v46 }
0x1846   :  { %11903 = vrsqrt.f32 %v3921_v4 }
0x1853   :  { %v11904_v52 = vpop.eup %11903 }
0x1854   :  { %v3927_v53 = vmul.f32 %v11904_v52, %v13356_v39 }
0x1856   :  { %v3935_v35 = vmul.f32 %v9844_v23, %v3927_v53 }
0x1858   :  { %v3943_v11 = vadd.f32 %v9845_v56, %v3935_v35 }
0x1868   :  { %v3914_v48 = vpop.xlane.xlu0 %3913 }
0x1869   :  { %v3919_v7 = vmul.f32 0.03125, %v3914_v48 }
0x186b   :  { %v3922_v22 = vadd.f32 1e-05, %v3919_v7 }
0x186c   :  { %v5173_v9 = vpop.xlane.xlu0 %5172  ;;  %v3917_v6 = vpop.xlane.xlu1 %3916 }
0x186d   :  { %11905 = vrsqrt.f32 %v3922_v22  ;;  %v5177_v60 = vmul.f32 0.03125, %v5173_v9  ;;  %v3920_v0 = vmul.f32 0.03125, %v3917_v6 }
0x186f   :  { %v5179_v36 = vadd.f32 1e-05, %v5177_v60  ;;  %v3923_v33 = vadd.f32 1e-05, %v3920_v0 }
0x1870   :  { %v5176_v2 = vpop.xlane.xlu1 %5175 }
0x1871   :  { %11907 = vrsqrt.f32 %v5179_v36  ;;  %v5178_v5 = vmul.f32 0.03125, %v5176_v2 }
0x1872   :  { %11909 = vrsqrt.f32 %v3923_v33 }
0x1873   :  { %v5180_v30 = vadd.f32 1e-05, %v5178_v5 }
0x1875   :  { %11911 = vrsqrt.f32 %v5180_v30 }
0x187a   :  { %v11906_v58 = vpop.eup %11905 }
0x187b   :  { %v3928_v28 = vmul.f32 %v11906_v58, %v3904_v34 }
0x187d   :  { %v3936_v21 = vmul.f32 %v9844_v23, %v3928_v28 }
0x187e   :  { %v11908_v40 = vpop.eup %11907 }
0x187f   :  { %v11910_v31 = vpop.eup %11909  ;;  %v5183_v54 = vmul.f32 %v11908_v40, %v5167_v44  ;;  %v3944_v27 = vadd.f32 %v9845_v56, %v3936_v21 }
0x1880   :  { %v3929_v17 = vmul.f32 %v11910_v31, %v13361_v16 }
0x1881   :  { %v13382_v13 = vpack.c.bf16 %v3944_v27, %v3943_v11  ;;  %v5190_v29 = vmul.f32 %v9878_v45, %v5183_v54 }
0x1882   :  { %v11912_v20 = vpop.eup %11911  ;;  %v3937_v49 = vmul.f32 %v9844_v23, %v3929_v17 }
0x1883   :  { %v5184_v57 = vmul.f32 %v11912_v20, %v5168_v19  ;;  %10849 = vmatprep.mubr.msk.bf16.mxu1 %vm206_vm7, %v13382_v13  ;;  %v13391_v50 = vadd.f32 %v9879_v12, %v5190_v29 }
0x1884   :  { %v3945_v39 = vadd.f32 %v9845_v56, %v3937_v49 }
0x1885   :  { %v5191_v63 = vmul.f32 %v9878_v45, %v5184_v57 }
0x1886   :  { %v13389_v42 = vpack.c.bf16 %v3945_v39, %v3945_v39 }
0x1887   :  { %v13393_v34 = vadd.f32 %v9879_v12, %v5191_v63 }
0x1888   :  { %10850 = vmatmul.mubr.msk.bf16.vlgmr.msra.gmra.mxu1 %vm206_vm7, %v13389_v42 }
0x1889   :  { %v5199_v24 = vpack.c.bf16 %v13393_v34, %v13391_v50  ;;  %10863 = vmatprep.mubr.msk.bf16.mxu1 %vm12060_vm0, %v12059_v1 }
0x188b   :  { %10842 = vmatmul.mubr.msk.bf16.vlgmr.msra.gmra.mxu0 %vm206_vm7, %v5199_v24 }
0x188c   :  { %10854 = vmatpush3.bf16.msra.mxu0 %v11677_v3  ;;  %10857 = vmatprep.mubr.msk.bf16.mxu0 %vm206_vm7, %v13382_v13  ;;  %v9889_v3 = vld [vmem:[%s14294_s3 + $0x1a] ss:$0 sm:$0xff] }
0x188d   :  { %10855 = vmatprep.subr.bf16.mxu0 %v11678_v32 }
0x1890   :  { %10856 = vmatpush3.bf16.msra.mxu0 %v11678_v32 }
0x1891   :  { %10867 = vmatprep.subr.bf16.mxu0 %v12059_v1 }
0x1893   :  { %10858 = vmatmul.mubr.msk.bf16.vlgmr.msra.gmra.mxu0 %vm206_vm7, %v13389_v42 }
0x1894   :  { %10869 = vmatprep.mubr.msk.bf16.mxu0 %vm12060_vm0, %v12059_v1 }
0x1948   :  { %v10851_v14 = vpop.f32.mrf.mxu1 }
0x1949   :  { %v5357_v43 = vadd.f32 %v10851_v14, %v9884_v37 }
0x194a   :  { %v5348_v62 = vpop.f32.mrf.mxu1 }
0x194b   :  { %v5349_v16 = vadd.f32 %v9884_v37, %v5348_v62  ;;  %v5258_v44 = vpop.f32.mrf.mxu0  ;;  %v5367_v41 = vcombine.high %v5357_v43, %v5357_v43 }
0x194c   :  { %v10852_v26 = vpop.f32.mrf.mxu1  ;;  %v5259_v4 = vadd.f32 %v9880_v25, %v5258_v44 }
0x194d   :  { %5369 = vrot.lane.b32.xlu0 %v5349_v16, %s12061_s21  ;;  %v10843_v18 = vpop.f32.mrf.mxu0  ;;  %v5365_v15 = vcombine.high %v5349_v16, %v5349_v16 }
0x194e   :  { %v5351_v61 = vpop.f32.mrf.mxu1  ;;  %v5529_v0 = vpack.c.bf16 %v5259_v4, %v5259_v4 }
0x194f   :  { %v5352_v19 = vadd.f32 %v9884_v37, %v5351_v61  ;;  %5371 = vrot.lane.b32.xlu1 %v5365_v15, %s12061_s21  ;;  %v5261_v38 = vpop.f32.mrf.mxu0  ;;  %v5537_v8 = vcombine.low %v5349_v16, %v5365_v15 }
0x1950   :  { %v5262_v36 = vadd.f32 %v9880_v25, %v5261_v38 }
0x1951   :  { %5377 = vrot.lane.b32.xlu0 %v5357_v43, %s12061_s21  ;;  %v10844_v59 = vpop.f32.mrf.mxu0  ;;  %v5366_v51 = vcombine.high %v5352_v19, %v5352_v19  ;;  %v5553_v10 = vpack.c.bf16 %v5352_v19, %v5537_v8  ;;  %v11449_v7 = vpack.i.bf16 %v5367_v41, %v5352_v19 }
0x1952   :  { %v5530_v52 = vpack.c.bf16 %v5262_v36, %v5262_v36  ;;  %v11459_v53 = vpack.i.bf16 %v5262_v36, %v5259_v4 }
0x1953   :  { %5375 = vrot.lane.b32.xlu1 %v5366_v51, %s12061_s21  ;;  %v10859_v55 = vpop.f32.mrf.mxu0  ;;  %v5565_v47 = vsel %vm594_vm8, %v5553_v10, 0  ;;  %v5538_v46 = vcombine.low %v5366_v51, %v5357_v43 }
0x1954   :  { %10862 = vmatpush3.bf16.xpose.msra.mxu1 %v5565_v47  ;;  %v13425_v9 = vadd.f32 %v10859_v55, %v9889_v3 }
0x1955   :  { %5383 = vrot.lane.b32.xlu0 %v5349_v16, %s12062_s22  ;;  %v5466_v48 = vpop.f32.mrf.mxu0  ;;  %v5554_v22 = vpack.c.bf16 %v5367_v41, %v5538_v46  ;;  %10873 = vmatprep.subr.bf16.mxu1 %v12059_v1 }
0x1956   :  { %v13433_v2 = vcombine.high %v13425_v9, %v13425_v9  ;;  %v13456_v23 = vadd.f32 %v9889_v3, %v5466_v48 }
0x1957   :  { %11450 = vrot.lane.b32.xlu1 %v11449_v7, %s12061_s21  ;;  %v10860_v6 = vpop.f32.mrf.mxu0  ;;  %v5611_v60 = vsel %vm594_vm8, %v5554_v22, 0 }
0x1958   :  { %10868 = vmatpush3.bf16.xpose.msra.mxu0 %v5611_v60  ;;  %v13464_v58 = vcombine.high %v13456_v23, %v13456_v23 }
0x1959   :  { %5389 = vrot.lane.b32.xlu0 %v5366_v51, %s12062_s22  ;;  %v5469_v33 = vpop.f32.mrf.mxu0  ;;  %10879 = vmatprep.subr.bf16.mxu0 %v12059_v1 }
0x195a   :  { %v13435_v5 = vadd.f32 %v9889_v3, %v5469_v33 }
0x195b   :  { %5385 = vrot.lane.b32.xlu1 %v5365_v15, %s12062_s22  ;;  %10864 = vmatmul.mubr.msk.bf16.vlgmr.msra.gmra.mxu1 %vm594_vm8, %v5529_v0 }
0x195c   :  { %10875 = vmatprep.mubr.msk.bf16.mxu1 %vm12060_vm0, %v12059_v1  ;;  %v13443_v30 = vpack.i.bf16 %v13433_v2, %v13435_v5  ;;  %v13472_v28 = vcombine.high %v13435_v5, %v13435_v5 }
0x195d   :  { %5397 = vrot.lane.b32.xlu0 %v5349_v16, %s12063_s26 }
0x195f   :  { %5391 = vrot.lane.b32.xlu1 %v5357_v43, %s12062_s22  ;;  %10870 = vmatmul.mubr.msk.bf16.vlgmr.msra.gmra.mxu0 %vm594_vm8, %v5530_v52  ;;  %v6033_v52 = vcombine.low %v13456_v23, %v13464_v58 }
0x1960   :  { %10881 = vmatprep.mubr.msk.bf16.mxu0 %vm12060_vm0, %v12059_v1 }
0x1961   :  { %11460 = vrot.lane.b32.xlu0 %v11459_v53, %s12061_s21 }
0x1963   :  { %11455 = vrot.lane.b32.xlu1 %v11449_v7, %s12062_s22 }
0x1965   :  { %5403 = vrot.lane.b32.xlu0 %v5366_v51, %s12063_s26 }
0x1967   :  { %5399 = vrot.lane.b32.xlu1 %v5365_v15, %s12063_s26 }
0x1969   :  { %11465 = vrot.lane.b32.xlu0 %v11459_v53, %s12062_s22 }
0x196b   :  { %5405 = vrot.lane.b32.xlu1 %v5357_v43, %s12063_s26 }
0x196d   :  { %11475 = vrot.lane.b32.xlu0 %v11459_v53, %s12063_s26  ;;  %v6034_v53 = vcombine.low %v13472_v28, %v13425_v9 }
0x196f   :  { %11470 = vrot.lane.b32.xlu1 %v11449_v7, %s12063_s26 }
0x1971   :  { %5495 = vrot.lane.b32.xlu0 %v13425_v9, %s12061_s21 }
0x1973   :  { %5489 = vrot.lane.b32.xlu1 %v13464_v58, %s12061_s21 }
0x1975   :  { %5487 = vrot.lane.b32.xlu0 %v13456_v23, %s12061_s21 }
0x1977   :  { %5493 = vrot.lane.b32.xlu1 %v13472_v28, %s12061_s21 }
0x19bf   :  { %v5370_v35 = vpop.permute.xlu0 %5369 }
0x19c1   :  { %v5372_v56 = vpop.permute.xlu1 %5371 }
0x19c2   :  { %v5539_v11 = vcombine.low %v5370_v35, %v5372_v56 }
0x19c3   :  { %v5378_v21 = vpop.permute.xlu0 %5377 }
0x19c5   :  { %v5376_v40 = vpop.permute.xlu1 %5375 }
0x19c6   :  { %v5540_v27 = vcombine.low %v5376_v40, %v5378_v21  ;;  %v6049_v21 = vpack.c.bf16 %v13435_v5, %v6033_v52  ;;  %v6050_v40 = vpack.c.bf16 %v13433_v2, %v6034_v53 }
0x19c7   :  { %v5384_v31 = vpop.permute.xlu0 %5383 }
0x19c9   :  { %v11451_v54 = vpop.permute.xlu1 %11450 }
0x19ca   :  { %v11453_v45 = vunpack.i.h.bf16 %v11451_v54  ;;  %v11452_v17 = vunpack.i.l.bf16 %v11451_v54 }
0x19cb   :  { %v5390_v20 = vpop.permute.xlu0 %5389 }
0x19cc   :  { %v5555_v49 = vpack.c.bf16 %v11452_v17, %v5539_v11  ;;  %v5556_v29 = vpack.c.bf16 %v11453_v45, %v5540_v27  ;;  %v6061_v11 = vsel %vm1200_vm9, %v6049_v21, 0  ;;  %v6107_v27 = vsel %vm1200_vm9, %v6050_v40, 0 }
0x19cd   :  { %v5386_v57 = vpop.permute.xlu1 %5385 }
0x19ce   :  { %v5657_v39 = vsel %vm594_vm8, %v5555_v49, 0  ;;  %v5703_v12 = vsel %vm594_vm8, %v5556_v29, 0  ;;  %v5541_v62 = vcombine.low %v5384_v31, %v5386_v57 }
0x19cf   :  { %v5398_v63 = vpop.permute.xlu0 %5397  ;;  %10874 = vmatpush3.bf16.xpose.msra.mxu1 %v5657_v39  ;;  %10880 = vmatpush3.bf16.xpose.msra.mxu0 %v5703_v12 }
0x19d0   :  { %10885 = vmatprep.subr.bf16.mxu1 %v12059_v1  ;;  %10891 = vmatprep.subr.bf16.mxu0 %v12059_v1 }
0x19d1   :  { %v5392_v24 = vpop.permute.xlu1 %5391 }
0x19d2   :  { %v5542_v16 = vcombine.low %v5390_v20, %v5392_v24 }
0x19d3   :  { %v11461_v32 = vpop.permute.xlu0 %11460 }
0x19d4   :  { %v11463_v14 = vunpack.i.h.bf16 %v11461_v32  ;;  %v11462_v37 = vunpack.i.l.bf16 %v11461_v32 }
0x19d5   :  { %v11456_v44 = vpop.permute.xlu1 %11455 }
0x19d6   :  { %v5532_v26 = vpack.c.bf16 %v11463_v14, %v11463_v14  ;;  %v5531_v18 = vpack.c.bf16 %v11462_v37, %v11462_v37  ;;  %v11458_v15 = vunpack.i.h.bf16 %v11456_v44  ;;  %v11457_v61 = vunpack.i.l.bf16 %v11456_v44 }
0x19d7   :  { %v5404_v43 = vpop.permute.xlu0 %5403 }
0x19d8   :  { %10876 = vmatmul.mubr.msk.bf16.vlgmr.msra.gmra.mxu1 %vm594_vm8, %v5531_v18  ;;  %10882 = vmatmul.mubr.msk.bf16.vlgmr.msra.gmra.mxu0 %vm594_vm8, %v5532_v26  ;;  %v5557_v19 = vpack.c.bf16 %v11457_v61, %v5541_v62  ;;  %v5558_v38 = vpack.c.bf16 %v11458_v15, %v5542_v16 }
0x19d9   :  { %v5400_v8 = vpop.permute.xlu1 %5399  ;;  %10887 = vmatprep.mubr.msk.bf16.mxu1 %vm12060_vm0, %v12059_v1  ;;  %10893 = vmatprep.mubr.msk.bf16.mxu0 %vm12060_vm0, %v12059_v1 }
0x19da   :  { %v5749_v59 = vsel %vm594_vm8, %v5557_v19, 0  ;;  %v5795_v51 = vsel %vm594_vm8, %v5558_v38, 0  ;;  %v5543_v4 = vcombine.low %v5398_v63, %v5400_v8 }
0x19db   :  { %v11466_v10 = vpop.permute.xlu0 %11465  ;;  %10886 = vmatpush3.bf16.xpose.msra.mxu1 %v5749_v59  ;;  %10892 = vmatpush3.bf16.xpose.msra.mxu0 %v5795_v51 }
0x19dc   :  { %v11468_v25 = vunpack.i.h.bf16 %v11466_v10  ;;  %v11467_v41 = vunpack.i.l.bf16 %v11466_v10  ;;  %10897 = vmatprep.subr.bf16.mxu1 %v12059_v1  ;;  %10903 = vmatprep.subr.bf16.mxu0 %v12059_v1 }
0x19dd   :  { %v5406_v55 = vpop.permute.xlu1 %5405 }
0x19de   :  { %v5534_v3 = vpack.c.bf16 %v11468_v25, %v11468_v25  ;;  %v5533_v47 = vpack.c.bf16 %v11467_v41, %v11467_v41  ;;  %v5544_v48 = vcombine.low %v5404_v43, %v5406_v55 }
0x19df   :  { %v11476_v0 = vpop.permute.xlu0 %11475 }
0x19e0   :  { %v11478_v35 = vunpack.i.h.bf16 %v11476_v0  ;;  %v11477_v56 = vunpack.i.l.bf16 %v11476_v0 }
0x19e1   :  { %v11471_v46 = vpop.permute.xlu1 %11470 }
0x19e2   :  { %v11473_v7 = vunpack.i.h.bf16 %v11471_v46  ;;  %v11472_v22 = vunpack.i.l.bf16 %v11471_v46  ;;  %10888 = vmatmul.mubr.msk.bf16.vlgmr.msra.gmra.mxu1 %vm594_vm8, %v5533_v47  ;;  %10894 = vmatmul.mubr.msk.bf16.vlgmr.msra.gmra.mxu0 %vm594_vm8, %v5534_v3  ;;  %v5536_v31 = vpack.c.bf16 %v11478_v35, %v11478_v35  ;;  %v5535_v54 = vpack.c.bf16 %v11477_v56, %v11477_v56 }
0x19e3   :  { %10899 = vmatprep.mubr.msk.bf16.mxu1 %vm12060_vm0, %v12059_v1  ;;  %10905 = vmatprep.mubr.msk.bf16.mxu0 %vm12060_vm0, %v12059_v1 }
0x19e4   :  { %v5559_v6 = vpack.c.bf16 %v11472_v22, %v5543_v4  ;;  %v5560_v60 = vpack.c.bf16 %v11473_v7, %v5544_v48 }
0x19e5   :  { %v13551_v21 = vpop.permute.xlu1 %5489 }
0x19e6   :  { %v5841_v36 = vsel %vm594_vm8, %v5559_v6, 0  ;;  %v5887_v33 = vsel %vm594_vm8, %v5560_v60, 0 }
0x19e7   :  { %10898 = vmatpush3.bf16.xpose.msra.mxu1 %v5841_v36  ;;  %10904 = vmatpush3.bf16.xpose.msra.mxu0 %v5887_v33 }
0x19e8   :  { %10909 = vmatprep.subr.bf16.mxu1 %v12059_v1  ;;  %10915 = vmatprep.subr.bf16.mxu0 %v12059_v1 }
0x19e9   :  { %v13557_v40 = vpop.permute.xlu1 %5493 }
0x19ee   :  { %10900 = vmatmul.mubr.msk.bf16.vlgmr.msra.gmra.mxu1 %vm594_vm8, %v5535_v54  ;;  %10906 = vmatmul.mubr.msk.bf16.vlgmr.msra.gmra.mxu0 %vm594_vm8, %v5536_v31  ;;  %v13563_v31 = vpop.permute.xlu0 %5495 }
0x19ef   :  { %10910 = vmatpush3.bf16.msra.mxu1 %v6061_v11  ;;  %10916 = vmatpush3.bf16.msra.mxu0 %v6107_v27 }
0x19f0   :  { %10911 = vmatprep.mubr.msk.bf16.mxu1 %vm12060_vm0, %v12059_v1  ;;  %10921 = vmatprep.subr.bf16.mxu1 %v12059_v1 }
0x19f1   :  { %10917 = vmatprep.mubr.msk.bf16.mxu0 %vm12060_vm0, %v12059_v1  ;;  %10927 = vmatprep.subr.bf16.mxu0 %v12059_v1 }
0x19f2   :  { %v13568_v27 = vpop.permute.xlu0 %5487 }
0x1a1b   :  { %v5601_v2 = vpop.f32.mrf.mxu1 }
0x1a1c   :  { %v13516_v5 = vmul.f32 0.35355338, %v5601_v2 }
0x1a1d   :  { %v10865_v45 = vpop.f32.mrf.mxu1 }
0x1a1e   :  { %v5937_v17 = vsel %vm987_vm10, %v13516_v5, -inf }
0x1a1f   :  { %v5604_v20 = vpop.f32.mrf.mxu1  ;;  %v5647_v49 = vpop.f32.mrf.mxu0  ;;  %5938 = vmax.xlane.f32.xlu1 %v5937_v17 }
0x1a20   :  { %v13520_v29 = vmul.f32 0.35355338, %v5647_v49 }
0x1a21   :  { %v10866_v57 = vpop.f32.mrf.mxu1  ;;  %v10871_v39 = vpop.f32.mrf.mxu0 }
0x1a22   :  { %v5940_v12 = vsel %vm987_vm10, %v13520_v29, -inf }
0x1a23   :  { %v5650_v63 = vpop.f32.mrf.mxu0  ;;  %5941 = vmax.xlane.f32.xlu0 %v5940_v12 }
0x1a25   :  { %v10872_v24 = vpop.f32.mrf.mxu0 }
0x1a98   :  { %v5693_v32 = vpop.f32.mrf.mxu1  ;;  %v5739_v14 = vpop.f32.mrf.mxu0 }
0x1a99   :  { %v13524_v37 = vmul.f32 0.35355338, %v5693_v32  ;;  %v13526_v62 = vmul.f32 0.35355338, %v5739_v14 }
0x1a9a   :  { %v10877_v16 = vpop.f32.mrf.mxu1  ;;  %v10883_v44 = vpop.f32.mrf.mxu0 }
0x1a9b   :  { %v5946_v26 = vsel %vm987_vm10, %v13526_v62, -inf  ;;  %v5943_v18 = vsel %vm987_vm10, %v13524_v37, -inf }
0x1a9c   :  { %5947 = vmax.xlane.f32.xlu1 %v5946_v26  ;;  %v5742_v15 = vpop.f32.mrf.mxu0  ;;  %5944 = vmax.xlane.f32.xlu0 %v5943_v18  ;;  %v5696_v61 = vpop.f32.mrf.mxu1 }
0x1a9e   :  { %v10878_v43 = vpop.f32.mrf.mxu1  ;;  %v10884_v19 = vpop.f32.mrf.mxu0 }
0x1aa2   :  { %v5785_v38 = vpop.f32.mrf.mxu1  ;;  %v5831_v8 = vpop.f32.mrf.mxu0 }
0x1aa3   :  { %v13532_v59 = vmul.f32 0.35355338, %v5785_v38  ;;  %v5934_v51 = vmul.f32 0.35355338, %v5831_v8 }
0x1aa4   :  { %v10889_v10 = vpop.f32.mrf.mxu1  ;;  %v10895_v25 = vpop.f32.mrf.mxu0 }
0x1aa5   :  { %v5952_v41 = vsel %vm987_vm10, %v5934_v51, -inf  ;;  %v5949_v55 = vsel %vm987_vm10, %v13532_v59, -inf }
0x1aa6   :  { %5953 = vmax.xlane.f32.xlu1 %v5952_v41  ;;  %v5834_v3 = vpop.f32.mrf.mxu0  ;;  %5950 = vmax.xlane.f32.xlu0 %v5949_v55  ;;  %v5788_v47 = vpop.f32.mrf.mxu1 }
0x1aa8   :  { %v10890_v46 = vpop.f32.mrf.mxu1  ;;  %v10896_v4 = vpop.f32.mrf.mxu0 }
0x1aa9   :  { %v5939_v54 = vpop.xlane.xlu1 %5938 }
0x1aaa   :  { %v5961_v11 = vsub.f32 %v13516_v5, %v5939_v54 }
0x1aac   :  { %v5969_v2 = vmul.f32 1.442695, %v5961_v11  ;;  %v5942_v45 = vpop.xlane.xlu0 %5941 }
0x1aad   :  { %v5962_v17 = vsub.f32 %v13520_v29, %v5942_v45  ;;  %v6036_v45 = vcombine.low %v13557_v40, %v13563_v31 }
0x1aae   :  { %v5877_v48 = vpop.f32.mrf.mxu1  ;;  %v5923_v7 = vpop.f32.mrf.mxu0  ;;  %11913 = vpow2.f32 %v5969_v2 }
0x1aaf   :  { %v13541_v52 = vmul.f32 0.35355338, %v5877_v48  ;;  %v13543_v53 = vmul.f32 0.35355338, %v5923_v7  ;;  %v5971_v20 = vmul.f32 1.442695, %v5962_v17 }
0x1ab0   :  { %v10901_v22 = vpop.f32.mrf.mxu1  ;;  %v10907_v6 = vpop.f32.mrf.mxu0 }
0x1ab1   :  { %v5958_v35 = vsel %vm987_vm10, %v13543_v53, -inf  ;;  %v5955_v56 = vsel %vm987_vm10, %v13541_v52, -inf  ;;  %11915 = vpow2.f32 %v5971_v20 }
0x1ab2   :  { %v5880_v60 = vpop.f32.mrf.mxu1  ;;  %v5926_v0 = vpop.f32.mrf.mxu0 }
0x1ab4   :  { %v10902_v36 = vpop.f32.mrf.mxu1  ;;  %v10908_v33 = vpop.f32.mrf.mxu0 }
0x1ab7   :  { %11480 = vrot.lane.b32.xlu1 %v13443_v30, %s12061_s21 }
0x1abc   :  { %5501 = vrot.lane.b32.xlu0 %v13456_v23, %s12062_s22 }
0x1adb   :  { %5959 = vmax.xlane.f32.xlu1 %v5958_v35  ;;  %5956 = vmax.xlane.f32.xlu0 %v5955_v56 }
0x1aec   :  { %5503 = vrot.lane.b32.xlu1 %v13464_v58, %s12062_s22 }
0x1af0   :  { %5509 = vrot.lane.b32.xlu1 %v13425_v9, %s12062_s22 }
0x1af1   :  { %5507 = vrot.lane.b32.xlu0 %v13472_v28, %s12062_s22 }
0x1af4   :  { %5515 = vrot.lane.b32.xlu1 %v13456_v23, %s12063_s26  ;;  %v13571_v23 = vpop.eup %11913 }
0x1af5   :  { %11485 = vrot.lane.b32.xlu0 %v13443_v30, %s12062_s22  ;;  %v5985_v49 = vsel %vm987_vm10, %v13571_v23, 0.0  ;;  %v13575_v57 = vpop.eup %11915 }
0x1af8   :  { %5521 = vrot.lane.b32.xlu1 %v13472_v28, %s12063_s26  ;;  %v5988_v28 = vsel %vm987_vm10, %v13575_v57, 0.0 }
0x1b14   :  { %5986 = vadd.xlane.f32.xlu0 %v5985_v49 }
0x1b1c   :  { %5989 = vadd.xlane.f32.xlu1 %v5988_v28 }
0x1b25   :  { %v5948_v5 = vpop.xlane.xlu1 %5947  ;;  %v5945_v29 = vpop.xlane.xlu0 %5944 }
0x1b26   :  { %v5964_v39 = vsub.f32 %v13526_v62, %v5948_v5  ;;  %v5963_v24 = vsub.f32 %v13524_v37, %v5945_v29 }
0x1b28   :  { %v5975_v12 = vmul.f32 1.442695, %v5964_v39  ;;  %v5973_v44 = vmul.f32 1.442695, %v5963_v24 }
0x1b2a   :  { %11917 = vpow2.f32 %v5975_v12  ;;  %5517 = vrot.lane.b32.xlu0 %v13464_v58, %s12063_s26 }
0x1b2f   :  { %v5954_v63 = vpop.xlane.xlu1 %5953  ;;  %v5951_v14 = vpop.xlane.xlu0 %5950 }
0x1b30   :  { %v5966_v32 = vsub.f32 %v5934_v51, %v5954_v63  ;;  %v5965_v26 = vsub.f32 %v13532_v59, %v5951_v14 }
0x1b32   :  { %v5979_v16 = vmul.f32 1.442695, %v5966_v32  ;;  %v5977_v62 = vmul.f32 1.442695, %v5965_v26 }
0x1b33   :  { %v11481_v8 = vpop.permute.xlu1 %11480  ;;  %v13600_v59 = vpop.permute.xlu0 %5501 }
0x1b34   :  { %11919 = vpow2.f32 %v5979_v16  ;;  %v11483_v11 = vunpack.i.h.bf16 %v11481_v8 }
0x1b35   :  { %11921 = vpow2.f32 %v5973_v44 }
0x1b36   :  { %11923 = vpow2.f32 %v5977_v62  ;;  %v6052_v17 = vpack.c.bf16 %v11483_v11, %v6036_v45 }
0x1b37   :  { %v13584_v18 = vpop.eup %11917 }
0x1b38   :  { %v5994_v15 = vsel %vm987_vm10, %v13584_v18, 0.0 }
0x1b39   :  { %5995 = vadd.xlane.f32.xlu1 %v5994_v15 }
0x1b41   :  { %v13588_v58 = vpop.eup %11919 }
0x1b42   :  { %v6000_v37 = vsel %vm987_vm10, %v13588_v58, 0.0  ;;  %v13592_v61 = vpop.eup %11921 }
0x1b43   :  { %6001 = vadd.xlane.f32.xlu1 %v6000_v37  ;;  %v5991_v43 = vsel %vm987_vm10, %v13592_v61, 0.0  ;;  %v13596_v19 = vpop.eup %11923 }
0x1b44   :  { %v5997_v38 = vsel %vm987_vm10, %v13596_v19, 0.0 }
0x1b49   :  { %5992 = vadd.xlane.f32.xlu0 %v5991_v43 }
0x1b4d   :  { %5998 = vadd.xlane.f32.xlu0 %v5997_v38 }
0x1b64   :  { %v5960_v51 = vpop.xlane.xlu1 %5959  ;;  %v5957_v10 = vpop.xlane.xlu0 %5956 }
0x1b65   :  { %v5968_v25 = vsub.f32 %v13543_v53, %v5960_v51  ;;  %v5967_v41 = vsub.f32 %v13541_v52, %v5957_v10  ;;  %v11482_v53 = vunpack.i.l.bf16 %v11481_v8 }
0x1b67   :  { %v5983_v55 = vmul.f32 1.442695, %v5968_v25  ;;  %v5981_v3 = vmul.f32 1.442695, %v5967_v41 }
0x1b68   :  { %v13614_v7 = vpop.permute.xlu1 %5503  ;;  %v5508_v22 = vpop.permute.xlu0 %5507 }
0x1b69   :  { %11925 = vpow2.f32 %v5983_v55 }
0x1b6a   :  { %11927 = vpow2.f32 %v5981_v3 }
0x1b6c   :  { %v5510_v6 = vpop.permute.xlu1 %5509  ;;  %v11486_v60 = vpop.permute.xlu0 %11485 }
0x1b6d   :  { %v6038_v31 = vcombine.low %v5508_v22, %v5510_v6  ;;  %v11488_v28 = vunpack.i.h.bf16 %v11486_v60  ;;  %v11487_v44 = vunpack.i.l.bf16 %v11486_v60 }
0x1b6f   :  { %v6054_v12 = vpack.c.bf16 %v11488_v28, %v6038_v31 }
0x1b70   :  { %v13618_v0 = vpop.permute.xlu1 %5515 }
0x1b71   :  { %v6291_v24 = vsel %vm1200_vm9, %v6054_v12, 0 }
0x1b74   :  { %v13620_v33 = vpop.permute.xlu1 %5521 }
0x1b76   :  { %v13604_v47 = vpop.eup %11925 }
0x1b77   :  { %v13606_v46 = vpop.eup %11927  ;;  %v6006_v4 = vsel %vm987_vm10, %v13604_v47, 0.0 }
0x1b78   :  { %6007 = vadd.xlane.f32.xlu1 %v6006_v4  ;;  %v6003_v48 = vsel %vm987_vm10, %v13606_v46, 0.0 }
0x1b79   :  { %6004 = vadd.xlane.f32.xlu0 %v6003_v48 }
0x1b89   :  { %11490 = vrot.lane.b32.xlu1 %v13443_v30, %s12063_s26  ;;  %v6035_v30 = vcombine.low %v13568_v27, %v13551_v21 }
0x1b8b   :  { %v6051_v54 = vpack.c.bf16 %v11482_v53, %v6035_v30 }
0x1b8d   :  { %v6153_v2 = vsel %vm1200_vm9, %v6051_v54, 0 }
0x1b8f   :  { %5523 = vrot.lane.b32.xlu0 %v13425_v9, %s12063_s26 }
0x1b9d   :  { %v5987_v36 = vpop.xlane.xlu0 %5986 }
0x1b9e   :  { %11929 = vrcp.f32 %v5987_v36 }
0x1ba1   :  { %v5518_v5 = vpop.permute.xlu0 %5517 }
0x1ba2   :  { %v6039_v25 = vcombine.low %v13618_v0, %v5518_v5 }
0x1ba5   :  { %v5990_v52 = vpop.xlane.xlu1 %5989 }
0x1ba6   :  { %11931 = vrcp.f32 %v5990_v52 }
0x1bab   :  { %v11930_v35 = vpop.eup %11929 }
0x1bac   :  { %v6017_v56 = vmul.f32 %v11930_v35, %v13571_v23  ;;  %v6199_v23 = vsel %vm1200_vm9, %v6052_v17, 0 }
0x1bae   :  { %v6025_v9 = vpack.c.bf16 %v6017_v56, %v6017_v56 }
0x1bb0   :  { %10912 = vmatmul.mubr.msk.bf16.vlgmr.msra.gmra.mxu1 %vm987_vm10, %v6025_v9 }
0x1bb1   :  { %10922 = vmatpush3.bf16.msra.mxu1 %v6153_v2  ;;  %10923 = vmatprep.mubr.msk.bf16.mxu1 %vm12060_vm0, %v12059_v1 }
0x1bb2   :  { %10933 = vmatprep.subr.bf16.mxu1 %v12059_v1 }
0x1bb3   :  { %v11932_v21 = vpop.eup %11931 }
0x1bb4   :  { %v6018_v27 = vmul.f32 %v11932_v21, %v13575_v57 }
0x1bb6   :  { %v6026_v20 = vpack.c.bf16 %v6018_v27, %v6018_v27 }
0x1bb8   :  { %10918 = vmatmul.mubr.msk.bf16.vlgmr.msra.gmra.mxu0 %vm987_vm10, %v6026_v20 }
0x1bb9   :  { %10928 = vmatpush3.bf16.msra.mxu0 %v6199_v23  ;;  %10929 = vmatprep.mubr.msk.bf16.mxu0 %vm12060_vm0, %v12059_v1 }
0x1bba   :  { %10939 = vmatprep.subr.bf16.mxu0 %v12059_v1 }
0x1bc2   :  { %v5996_v49 = vpop.xlane.xlu1 %5995 }
0x1bc3   :  { %11933 = vrcp.f32 %v5996_v49 }
0x1bcc   :  { %v6002_v40 = vpop.xlane.xlu1 %6001 }
0x1bcd   :  { %11935 = vrcp.f32 %v6002_v40  ;;  %v11679_v40 = vld [vmem:[#allocation2 + $0x198] sm:$0xff]  }
0x1bd0   :  { %v11934_v57 = vpop.eup %11933 }
0x1bd1   :  { %v6020_v39 = vmul.f32 %v11934_v57, %v13584_v18  ;;  %v6037_v18 = vcombine.low %v13600_v59, %v13614_v7 }
0x1bd2   :  { %v5993_v29 = vpop.xlane.xlu0 %5992 }
0x1bd3   :  { %v6028_v63 = vpack.c.bf16 %v6020_v39, %v6020_v39  ;;  %11937 = vrcp.f32 %v5993_v29  ;;  %v6053_v37 = vpack.c.bf16 %v11487_v44, %v6037_v18 }
0x1bd5   :  { %10930 = vmatmul.mubr.msk.bf16.vlgmr.msra.gmra.mxu0 %vm987_vm10, %v6028_v63 }
0x1bd6   :  { %10940 = vmatpush3.bf16.msra.mxu0 %v6291_v24  ;;  %v5999_v32 = vpop.xlane.xlu0 %5998  ;;  %10941 = vmatprep.mubr.msk.bf16.mxu0 %vm12060_vm0, %v12059_v1 }
0x1bd7   :  { %11939 = vrcp.f32 %v5999_v32  ;;  %10951 = vmatprep.subr.bf16.mxu0 %v12059_v1  ;;  %v11680_v32 = vld [vmem:[#allocation2 + $0x190] sm:$0xff]  }
0x1bda   :  { %v11936_v14 = vpop.eup %11935 }
0x1bdb   :  { %v6022_v16 = vmul.f32 %v11936_v14, %v13588_v58  ;;  %v6245_v58 = vsel %vm1200_vm9, %v6053_v37, 0 }
0x1bdd   :  { %v6030_v26 = vpack.c.bf16 %v6022_v16, %v6022_v16 }
0x1bdf   :  { %10942 = vmatmul.mubr.msk.bf16.vlgmr.msra.gmra.mxu0 %vm987_vm10, %v6030_v26 }
0x1be0   :  { %v11938_v62 = vpop.eup %11937  ;;  %10953 = vmatprep.mubr.msk.bf16.mxu0 %vm12060_vm0, %v12059_v1 }
0x1be1   :  { %v6019_v15 = vmul.f32 %v11938_v62, %v13592_v61 }
0x1be3   :  { %v6027_v43 = vpack.c.bf16 %v6019_v15, %v6019_v15 }
0x1be4   :  { %v11940_v38 = vpop.eup %11939 }
0x1be5   :  { %10924 = vmatmul.mubr.msk.bf16.vlgmr.msra.gmra.mxu1 %vm987_vm10, %v6027_v43  ;;  %v6021_v8 = vmul.f32 %v11940_v38, %v13596_v19 }
0x1be6   :  { %10934 = vmatpush3.bf16.msra.mxu1 %v6245_v58  ;;  %10935 = vmatprep.mubr.msk.bf16.mxu1 %vm12060_vm0, %v12059_v1 }
0x1be7   :  { %10945 = vmatprep.subr.bf16.mxu1 %v12059_v1  ;;  %v6029_v59 = vpack.c.bf16 %v6021_v8, %v6021_v8 }
0x1bed   :  { %10936 = vmatmul.mubr.msk.bf16.vlgmr.msra.gmra.mxu1 %vm987_vm10, %v6029_v59 }
0x1bee   :  { %10947 = vmatprep.mubr.msk.bf16.mxu1 %vm12060_vm0, %v12059_v1 }
0x1c01   :  { %v6008_v61 = vpop.xlane.xlu1 %6007 }
0x1c02   :  { %11941 = vrcp.f32 %v6008_v61  ;;  %v6005_v51 = vpop.xlane.xlu0 %6004 }
0x1c03   :  { %11943 = vrcp.f32 %v6005_v51 }
0x1c05   :  { %v11491_v10 = vpop.permute.xlu1 %11490 }
0x1c06   :  { %v11493_v41 = vunpack.i.h.bf16 %v11491_v10  ;;  %v11492_v55 = vunpack.i.l.bf16 %v11491_v10  ;;  %v5524_v3 = vpop.permute.xlu0 %5523 }
0x1c07   :  { %v6040_v19 = vcombine.low %v13620_v33, %v5524_v3 }
0x1c08   :  { %v6055_v4 = vpack.c.bf16 %v11492_v55, %v6039_v25 }
0x1c09   :  { %v6056_v48 = vpack.c.bf16 %v11493_v41, %v6040_v19 }
0x1c0a   :  { %v6337_v7 = vsel %vm1200_vm9, %v6055_v4, 0 }
0x1c0b   :  { %10946 = vmatpush3.bf16.msra.mxu1 %v6337_v7  ;;  %v6383_v22 = vsel %vm1200_vm9, %v6056_v48, 0 }
0x1c0c   :  { %10952 = vmatpush3.bf16.msra.mxu0 %v6383_v22  ;;  %10957 = vmatprep.subr.bf16.mxu1 %v12059_v1 }
0x1c0d   :  { %10965 = vmatprep.subr.bf16.mxu0 %v12059_v1 }
0x1c0f   :  { %v11942_v6 = vpop.eup %11941 }
0x1c10   :  { %v11944_v60 = vpop.eup %11943  ;;  %v6024_v0 = vmul.f32 %v11942_v6, %v13604_v47  ;;  %v9910_v6 = vld [vmem:[%s14294_s3 + $0x1b] ss:$0 sm:$0xff] }
0x1c11   :  { %v6023_v36 = vmul.f32 %v11944_v60, %v13606_v46 }
0x1c12   :  { %v6032_v52 = vpack.c.bf16 %v6024_v0, %v6024_v0 }
0x1c13   :  { %v6031_v33 = vpack.c.bf16 %v6023_v36, %v6023_v36 }
0x1c14   :  { %10954 = vmatmul.mubr.msk.bf16.vlgmr.msra.gmra.mxu0 %vm987_vm10, %v6032_v52 }
0x1c15   :  { %10948 = vmatmul.mubr.msk.bf16.vlgmr.msra.gmra.mxu1 %vm987_vm10, %v6031_v33  ;;  %10969 = vmatprep.mubr.msk.bf16.mxu0 %vm12060_vm0, %v12059_v1 }
0x1c16   :  { %10961 = vmatprep.mubr.msk.bf16.mxu1 %vm12060_vm0, %v12059_v1  ;;  %10958 = vmatpush3.bf16.msra.mxu1 %v11679_v40  ;;  %v11685_v40 = vld [vmem:[#allocation2 + $0x1d8] sm:$0xff]  }
0x1c17   :  { %10959 = vmatprep.subr.bf16.mxu1 %v12059_v1 }
0x1c1a   :  { %10960 = vmatpush3.bf16.msra.mxu1 %v11680_v32 }
0x1c1b   :  { %10973 = vmatprep.subr.bf16.mxu1 %v12059_v1 }
0x1c70   :  { %v6097_v53 = vpop.f32.mrf.mxu1 }
0x1c72   :  { %v10913_v30 = vpop.f32.mrf.mxu1 }
0x1c74   :  { %v6100_v35 = vpop.f32.mrf.mxu1 }
0x1c76   :  { %v10914_v56 = vpop.f32.mrf.mxu1 }
0x1c78   :  { %v6143_v54 = vpop.f32.mrf.mxu0 }
0x1c7a   :  { %v10919_v47 = vpop.f32.mrf.mxu0 }
0x1c7c   :  { %v6146_v9 = vpop.f32.mrf.mxu0 }
0x1c7e   :  { %v10920_v46 = vpop.f32.mrf.mxu0 }
0x1c95   :  { %v6235_v11 = vpop.f32.mrf.mxu0 }
0x1c97   :  { %v10931_v2 = vpop.f32.mrf.mxu0 }
0x1c99   :  { %v6238_v45 = vpop.f32.mrf.mxu0 }
0x1c9b   :  { %v10932_v21 = vpop.f32.mrf.mxu0 }
0x1c9f   :  { %v6327_v27 = vpop.f32.mrf.mxu0 }
0x1ca1   :  { %v10943_v17 = vpop.f32.mrf.mxu0 }
0x1ca3   :  { %v6330_v20 = vpop.f32.mrf.mxu0 }
0x1ca4   :  { %v11681_v20 = vld [vmem:[#allocation2 + $0x1a8] sm:$0xff]  }
0x1ca5   :  { %v6189_v23 = vpop.f32.mrf.mxu1  ;;  %v10944_v49 = vpop.f32.mrf.mxu0  ;;  %10966 = vmatpush3.bf16.msra.mxu0 %v11681_v20 }
0x1ca6   :  { %v11494_v31 = vpack.i.bf16 %v6235_v11, %v6189_v23  ;;  %10967 = vmatprep.subr.bf16.mxu0 %v12059_v1  ;;  %v11683_v23 = vld [vmem:[#allocation2 + $0x1e8] sm:$0xff]   ;;  %v11684_v49 = vld [vmem:[#allocation2 + $0x1e0] sm:$0xff]  }
0x1ca7   :  { %v10925_v28 = vpop.f32.mrf.mxu1 }
0x1ca8   :  { %11495 = vrot.lane.b32.xlu0 %v11494_v31, %s12064_s27  ;;  %v11686_v31 = vld [vmem:[#allocation2 + $0x1d0] sm:$0xff]   ;;  %v11687_v28 = vld [vmem:[#allocation2 + $0x1c8] sm:$0xff]  }
0x1ca9   :  { %v6192_v5 = vpop.f32.mrf.mxu1 }
0x1cab   :  { %v10926_v57 = vpop.f32.mrf.mxu1 }
0x1cad   :  { %v6281_v39 = vpop.f32.mrf.mxu1 }
0x1cae   :  { %v11499_v12 = vpack.i.bf16 %v6327_v27, %v6281_v39 }
0x1caf   :  { %v10937_v29 = vpop.f32.mrf.mxu1 }
0x1cb0   :  { %11500 = vrot.lane.b32.xlu1 %v11499_v12, %s12065_s28 }
0x1cb1   :  { %v6284_v63 = vpop.f32.mrf.mxu1 }
0x1cb3   :  { %v10938_v24 = vpop.f32.mrf.mxu1 }
0x1cd4   :  { %v6419_v14 = vpop.f32.mrf.mxu0 }
0x1cd5   :  { %v6373_v16 = vpop.f32.mrf.mxu1 }
0x1cd6   :  { %v11504_v44 = vpack.i.bf16 %v6419_v14, %v6373_v16  ;;  %v10955_v26 = vpop.f32.mrf.mxu0  ;;  %v9914_v14 = vld [vmem:[%s14294_s3 + $0x20] ss:$0 sm:$0xff] }
0x1cd7   :  { %v10949_v18 = vpop.f32.mrf.mxu1 }
0x1cd8   :  { %11505 = vrot.lane.b32.xlu0 %v11504_v44, %s12066_s29  ;;  %v6422_v62 = vpop.f32.mrf.mxu0  ;;  %v9915_v18 = vld [vmem:[%s14294_s3 + $0x21] ss:$0 sm:$0xff] }
0x1cd9   :  { %v6376_v15 = vpop.f32.mrf.mxu1 }
0x1cda   :  { %v10956_v37 = vpop.f32.mrf.mxu0 }
0x1cdb   :  { %v10950_v43 = vpop.f32.mrf.mxu1 }
0x1d1a   :  { %v11496_v38 = vpop.permute.xlu0 %11495 }
0x1d1b   :  { %v11498_v8 = vunpack.i.h.bf16 %v11496_v38  ;;  %v11497_v59 = vunpack.i.l.bf16 %v11496_v38  ;;  %v11688_v38 = vld [vmem:[#allocation2 + $0x1c0] sm:$0xff]  }
0x1d1d   :  { %v6450_v25 = vsel %vm594_vm8, %v6143_v54, %v11498_v8  ;;  %v6449_v41 = vsel %vm594_vm8, %v6097_v53, %v11497_v59  ;;  %v11690_v8 = vld [vmem:[#allocation2 + $0x1b0] sm:$0xff]   ;;  %v9916_v59 = vld [vmem:[%s14294_s3 + $0x1c] ss:$0 sm:$0xff] }
0x1d22   :  { %v11501_v58 = vpop.permute.xlu1 %11500 }
0x1d23   :  { %v11503_v61 = vunpack.i.h.bf16 %v11501_v58  ;;  %v11502_v51 = vunpack.i.l.bf16 %v11501_v58  ;;  %v11689_v58 = vld [vmem:[#allocation2 + $0x1b8] sm:$0xff]  }
0x1d25   :  { %v6452_v19 = vsel %vm1626_vm12, %v6450_v25, %v11503_v61  ;;  %v6451_v4 = vsel %vm1626_vm12, %v6449_v41, %v11502_v51 }
0x1d4a   :  { %v11506_v10 = vpop.permute.xlu0 %11505 }
0x1d4b   :  { %v11508_v55 = vunpack.i.h.bf16 %v11506_v10  ;;  %v11507_v3 = vunpack.i.l.bf16 %v11506_v10 }
0x1d4d   :  { %v6454_v48 = vsel %vm1631_vm13, %v6452_v19, %v11508_v55  ;;  %v6453_v7 = vsel %vm1631_vm13, %v6451_v4, %v11507_v3 }
0x1d4e   :  { %v6455_v22 = vpack.c.bf16 %v6454_v48, %v6453_v7  ;;  %v9920_v48 = vld [vmem:[%s14294_s3 + $0x1d] ss:$0 sm:$0xff] }
0x1d50   :  { %10962 = vmatmul.mubr.msk.bf16.vlgmr.msra.gmra.mxu1 %vm206_vm7, %v6455_v22 }
0x1d51   :  { %10989 = vmatprep.mubr.msk.bf16.mxu1 %vm12060_vm0, %v12059_v1  ;;  %10974 = vmatpush3.bf16.msra.mxu1 %v11683_v23 }
0x1d52   :  { %10975 = vmatprep.subr.bf16.mxu1 %v12059_v1 }
0x1d55   :  { %10976 = vmatpush3.bf16.msra.mxu1 %v11684_v49 }
0x1d56   :  { %10977 = vmatprep.subr.bf16.mxu1 %v12059_v1 }
0x1d59   :  { %10978 = vmatpush3.bf16.msra.mxu1 %v11685_v40 }
0x1d5a   :  { %10979 = vmatprep.subr.bf16.mxu1 %v12059_v1 }
0x1d5d   :  { %10980 = vmatpush3.bf16.msra.mxu1 %v11686_v31 }
0x1d5e   :  { %10981 = vmatprep.subr.bf16.mxu1 %v12059_v1 }
0x1d61   :  { %10982 = vmatpush3.bf16.msra.mxu1 %v11687_v28 }
0x1d62   :  { %10983 = vmatprep.subr.bf16.mxu1 %v12059_v1 }
0x1d65   :  { %10984 = vmatpush3.bf16.msra.mxu1 %v11688_v38 }
0x1d66   :  { %10985 = vmatprep.subr.bf16.mxu1 %v12059_v1 }
0x1d69   :  { %10986 = vmatpush3.bf16.msra.mxu1 %v11689_v58 }
0x1d6a   :  { %10987 = vmatprep.subr.bf16.mxu1 %v12059_v1 }
0x1d6d   :  { %10988 = vmatpush3.bf16.msra.mxu1 %v11690_v8 }
0x1d6e   :  { %11023 = vmatprep.subr.bf16.mxu1 %v12059_v1 }
0x1e10   :  { %v6514_v60 = vpop.f32.mrf.mxu1 }
0x1e11   :  { %v6515_v0 = vadd.f32 %v9910_v6, %v6514_v60 }
0x1e12   :  { %v10963_v36 = vpop.f32.mrf.mxu1 }
0x1e13   :  { %v6521_v52 = vadd.f32 %v6515_v0, %v13391_v50 }
0x1e14   :  { %v6517_v33 = vpop.f32.mrf.mxu1 }
0x1e15   :  { %v6518_v53 = vadd.f32 %v9910_v6, %v6517_v33  ;;  %v6523_v30 = vsel %vm206_vm7, %v6521_v52, 0.0 }
0x1e16   :  { %6524 = vadd.xlane.f32.xlu1 %v6523_v30  ;;  %v10964_v35 = vpop.f32.mrf.mxu1 }
0x1e17   :  { %v6522_v56 = vadd.f32 %v6518_v53, %v13393_v34  ;;  %v11682_v34 = vld [vmem:[#allocation2 + $0x1a0] sm:$0xff]  }
0x1e18   :  { %10968 = vmatpush3.bf16.msra.mxu0 %v11682_v34 }
0x1e19   :  { %v6526_v54 = vsel %vm206_vm7, %v6522_v56, 0.0  ;;  %10993 = vmatprep.subr.bf16.mxu0 %v12059_v1 }
0x1e1a   :  { %6527 = vadd.xlane.f32.xlu0 %v6526_v54 }
0x1e9f   :  { %v6525_v47 = vpop.xlane.xlu1 %6524 }
0x1ea0   :  { %v6529_v9 = vmul.f32 0.03125, %v6525_v47 }
0x1ea2   :  { %v6531_v46 = vsub.f32 %v6521_v52, %v6529_v9 }
0x1ea3   :  { %v6528_v11 = vpop.xlane.xlu0 %6527 }
0x1ea4   :  { %v6530_v2 = vmul.f32 0.03125, %v6528_v11  ;;  %v6533_v45 = vmul.f32 %v6531_v46, %v6531_v46 }
0x1ea6   :  { %v6532_v21 = vsub.f32 %v6522_v56, %v6530_v2  ;;  %v6535_v50 = vsel %vm206_vm7, %v6533_v45, 0.0 }
0x1ea7   :  { %6536 = vadd.xlane.f32.xlu0 %v6535_v50  ;;  %v11691_v50 = vld [vmem:[#allocation2 + $0x1f8] sm:$0xff]  }
0x1ea8   :  { %v6534_v27 = vmul.f32 %v6532_v21, %v6532_v21 }
0x1eaa   :  { %v6538_v17 = vsel %vm206_vm7, %v6534_v27, 0.0  ;;  %v11692_v27 = vld [vmem:[#allocation2 + $0x1f0] sm:$0xff]  }
0x1eab   :  { %6539 = vadd.xlane.f32.xlu1 %v6538_v17 }
0x1f30   :  { %v6537_v5 = vpop.xlane.xlu0 %6536 }
0x1f31   :  { %v6541_v57 = vmul.f32 0.03125, %v6537_v5  ;;  %v9929_v5 = vld [vmem:[%s14294_s3 + $0x22] ss:$0 sm:$0xff] }
0x1f33   :  { %v6543_v39 = vadd.f32 1e-05, %v6541_v57 }
0x1f34   :  { %v6540_v12 = vpop.xlane.xlu1 %6539 }
0x1f35   :  { %11945 = vrsqrt.f32 %v6543_v39  ;;  %v6542_v29 = vmul.f32 0.03125, %v6540_v12 }
0x1f37   :  { %v6544_v63 = vadd.f32 1e-05, %v6542_v29  ;;  %v9930_v29 = vld [vmem:[%s14294_s3 + $0x23] ss:$0 sm:$0xff] }
0x1f39   :  { %11947 = vrsqrt.f32 %v6544_v63 }
0x1f42   :  { %v11946_v24 = vpop.eup %11945 }
0x1f43   :  { %v6547_v32 = vmul.f32 %v11946_v24, %v6531_v46 }
0x1f45   :  { %v6554_v44 = vmul.f32 %v9914_v14, %v6547_v32 }
0x1f46   :  { %v11948_v16 = vpop.eup %11947 }
0x1f47   :  { %v6548_v26 = vmul.f32 %v11948_v16, %v6532_v21  ;;  %v6561_v15 = vadd.f32 %v9915_v18, %v6554_v44  ;;  %v11694_v44 = vld [vmem:[#allocation2 + $0x200] sm:$0xff]  }
0x1f49   :  { %v6555_v62 = vmul.f32 %v9914_v14, %v6548_v26  ;;  %v11693_v14 = vld [vmem:[#allocation2 + $0x208] sm:$0xff]   ;;  %v11695_v26 = vld [vmem:[#allocation2 + $0x218] sm:$0xff]  }
0x1f4b   :  { %v6562_v37 = vadd.f32 %v9915_v18, %v6555_v62  ;;  %v11696_v18 = vld [vmem:[#allocation2 + $0x210] sm:$0xff]  }
0x1f4d   :  { %v6563_v43 = vpack.c.bf16 %v6562_v37, %v6561_v15 }
0x1f4f   :  { %10970 = vmatmul.mubr.msk.bf16.vlgmr.msra.gmra.mxu0 %vm206_vm7, %v6563_v43 }
0x1f50   :  { %10997 = vmatprep.mubr.msk.bf16.mxu0 %vm12060_vm0, %v12059_v1  ;;  %10994 = vmatpush3.bf16.msra.mxu0 %v11691_v50 }
0x1f51   :  { %10995 = vmatprep.subr.bf16.mxu0 %v12059_v1 }
0x1f54   :  { %10996 = vmatpush3.bf16.msra.mxu0 %v11692_v27 }
0x1f55   :  { %11001 = vmatprep.subr.bf16.mxu0 %v12059_v1 }
0x200f   :  { %v6622_v61 = vpop.f32.mrf.mxu0 }
0x2010   :  { %v6623_v10 = vadd.f32 %v9916_v59, %v6622_v61 }
0x2011   :  { %v10971_v51 = vpop.f32.mrf.mxu0 }
0x2012   :  { %v6629_v3 = vmax.f32 %v6623_v10, 0.0 }
0x2013   :  { %v6625_v25 = vpop.f32.mrf.mxu0 }
0x2014   :  { %v6626_v41 = vadd.f32 %v9916_v59, %v6625_v25  ;;  %v9935_v59 = vld [vmem:[%s14294_s3 + $0x25] ss:$0 sm:$0xff] }
0x2015   :  { %v10972_v55 = vpop.f32.mrf.mxu0 }
0x2016   :  { %v6630_v19 = vmax.f32 %v6626_v41, 0.0 }
0x2018   :  { %v6631_v4 = vpack.c.bf16 %v6630_v19, %v6629_v3 }
0x201a   :  { %10990 = vmatmul.mubr.bf16.vlgmr.msra.gmra.mxu1 %v6631_v4 }
0x201b   :  { %11025 = vmatprep.mubr.msk.bf16.mxu1 %vm12060_vm0, %v12059_v1 }
0x20da   :  { %v6735_v7 = vpop.f32.mrf.mxu1 }
0x20db   :  { %v6736_v22 = vadd.f32 %v9920_v48, %v6735_v7 }
0x20dc   :  { %v10991_v6 = vpop.f32.mrf.mxu1 }
0x20dd   :  { %v6742_v60 = vadd.f32 %v6736_v22, %v6561_v15  ;;  %v9931_v15 = vld [vmem:[%s14294_s3 + $0x24] ss:$0 sm:$0xff] }
0x20de   :  { %v6738_v0 = vpop.f32.mrf.mxu1 }
0x20df   :  { %v6739_v36 = vadd.f32 %v9920_v48, %v6738_v0  ;;  %v6744_v52 = vsel %vm206_vm7, %v6742_v60, 0.0 }
0x20e0   :  { %6745 = vadd.xlane.f32.xlu0 %v6744_v52  ;;  %v10992_v33 = vpop.f32.mrf.mxu1 }
0x20e1   :  { %v6743_v53 = vadd.f32 %v6739_v36, %v6562_v37 }
0x20e3   :  { %v6747_v30 = vsel %vm206_vm7, %v6743_v53, 0.0 }
0x20e4   :  { %6748 = vadd.xlane.f32.xlu1 %v6747_v30 }
0x2169   :  { %v6746_v35 = vpop.xlane.xlu0 %6745 }
0x216a   :  { %v6750_v56 = vmul.f32 0.03125, %v6746_v35 }
0x216c   :  { %v6752_v54 = vsub.f32 %v6742_v60, %v6750_v56  ;;  %v9939_v60 = vld [vmem:[%s14294_s3 + $0x26] ss:$0 sm:$0xff] }
0x216d   :  { %v6749_v47 = vpop.xlane.xlu1 %6748 }
0x216e   :  { %v6751_v9 = vmul.f32 0.03125, %v6749_v47  ;;  %v6754_v46 = vmul.f32 %v6752_v54, %v6752_v54 }
0x2170   :  { %v6753_v11 = vsub.f32 %v6743_v53, %v6751_v9  ;;  %v6756_v2 = vsel %vm206_vm7, %v6754_v46, 0.0 }
0x2171   :  { %6757 = vadd.xlane.f32.xlu0 %v6756_v2 }
0x2172   :  { %v6755_v45 = vmul.f32 %v6753_v11, %v6753_v11 }
0x2174   :  { %v6759_v21 = vsel %vm206_vm7, %v6755_v45, 0.0 }
0x2175   :  { %6760 = vadd.xlane.f32.xlu1 %v6759_v21 }
0x21fa   :  { %v6758_v17 = vpop.xlane.xlu0 %6757 }
0x21fb   :  { %v6762_v20 = vmul.f32 0.03125, %v6758_v17 }
0x21fd   :  { %v6764_v34 = vadd.f32 1e-05, %v6762_v20 }
0x21fe   :  { %v6761_v23 = vpop.xlane.xlu1 %6760 }
0x21ff   :  { %11949 = vrsqrt.f32 %v6764_v34  ;;  %v6763_v49 = vmul.f32 0.03125, %v6761_v23 }
0x2201   :  { %v6765_v40 = vadd.f32 1e-05, %v6763_v49 }
0x2203   :  { %11951 = vrsqrt.f32 %v6765_v40 }
0x220c   :  { %v11950_v31 = vpop.eup %11949 }
0x220d   :  { %v6768_v28 = vmul.f32 %v11950_v31, %v6752_v54 }
0x220f   :  { %v6775_v39 = vmul.f32 %v9929_v5, %v6768_v28 }
0x2210   :  { %v11952_v57 = vpop.eup %11951 }
0x2211   :  { %v6769_v12 = vmul.f32 %v11952_v57, %v6753_v11  ;;  %v13736_v24 = vadd.f32 %v9930_v29, %v6775_v39 }
0x2213   :  { %v6776_v63 = vmul.f32 %v9929_v5, %v6769_v12 }
0x2215   :  { %v13738_v32 = vadd.f32 %v9930_v29, %v6776_v63 }
0x2217   :  { %v6784_v16 = vpack.c.bf16 %v13738_v32, %v13736_v24 }
0x2219   :  { %10998 = vmatmul.mubr.msk.bf16.vlgmr.msra.gmra.mxu0 %vm206_vm7, %v6784_v16 }
0x221a   :  { %11002 = vmatpush3.bf16.msra.mxu0 %v11693_v14  ;;  %11005 = vmatprep.mubr.msk.bf16.mxu0 %vm12060_vm0, %v12059_v1 }
0x221b   :  { %11003 = vmatprep.subr.bf16.mxu0 %v12059_v1 }
0x221e   :  { %11004 = vmatpush3.bf16.msra.mxu0 %v11694_v44 }
0x221f   :  { %11009 = vmatprep.subr.bf16.mxu0 %v12059_v1 }
0x2221   :  { %11006 = vmatmul.mubr.msk.bf16.vlgmr.msra.gmra.mxu0 %vm206_vm7, %v6784_v16 }
0x2222   :  { %11010 = vmatpush3.bf16.msra.mxu0 %v11695_v26  ;;  %11013 = vmatprep.mubr.msk.bf16.mxu0 %vm12060_vm0, %v12059_v1 }
0x2223   :  { %11011 = vmatprep.subr.bf16.mxu0 %v12059_v1 }
0x2226   :  { %11012 = vmatpush3.bf16.msra.mxu0 %v11696_v18 }
0x2227   :  { %11017 = vmatprep.subr.bf16.mxu0 %v12059_v1 }
0x2229   :  { %11014 = vmatmul.mubr.msk.bf16.vlgmr.msra.gmra.mxu0 %vm206_vm7, %v6784_v16 }
0x222a   :  { %11019 = vmatprep.mubr.msk.bf16.mxu0 %vm12060_vm0, %v12059_v1 }
0x22d9   :  { %v6843_v62 = vpop.f32.mrf.mxu0 }
0x22da   :  { %v6844_v38 = vadd.f32 %v9931_v15, %v6843_v62 }
0x22db   :  { %v10999_v37 = vpop.f32.mrf.mxu0 }
0x22dc   :  { %v7034_v36 = vpack.c.bf16 %v6844_v38, %v6844_v38 }
0x22dd   :  { %v6846_v43 = vpop.f32.mrf.mxu0 }
0x22de   :  { %v6847_v58 = vadd.f32 %v9931_v15, %v6846_v43 }
0x22df   :  { %v11000_v8 = vpop.f32.mrf.mxu0 }
0x22e0   :  { %v11514_v61 = vpack.i.bf16 %v6847_v58, %v6844_v38  ;;  %v7035_v35 = vpack.c.bf16 %v6847_v58, %v6847_v58 }
0x22e1   :  { %v6925_v51 = vpop.f32.mrf.mxu0 }
0x22e2   :  { %v6926_v10 = vadd.f32 %v9935_v59, %v6925_v51  ;;  %11515 = vrot.lane.b32.xlu1 %v11514_v61, %s12061_s21 }
0x22e3   :  { %v11007_v25 = vpop.f32.mrf.mxu0 }
0x22e4   :  { %v7042_v41 = vpack.c.bf16 %v6926_v10, %v6926_v10 }
0x22e5   :  { %v6928_v55 = vpop.f32.mrf.mxu0 }
0x22e6   :  { %v6929_v3 = vadd.f32 %v9935_v59, %v6928_v55  ;;  %v7054_v19 = vsel %vm594_vm8, %v7042_v41, 0 }
0x22e7   :  { %v11008_v4 = vpop.f32.mrf.mxu0  ;;  %11018 = vmatpush3.bf16.xpose.msra.mxu0 %v7054_v19 }
0x22e8   :  { %v11519_v48 = vpack.i.bf16 %v6929_v3, %v6926_v10  ;;  %v7043_v7 = vpack.c.bf16 %v6929_v3, %v6929_v3  ;;  %11029 = vmatprep.subr.bf16.mxu0 %v12059_v1 }
0x22e9   :  { %v7007_v22 = vpop.f32.mrf.mxu0 }
0x22ea   :  { %11520 = vrot.lane.b32.xlu1 %v11519_v48, %s12062_s22  ;;  %11510 = vrot.lane.b32.xlu0 %v11519_v48, %s12061_s21  ;;  %v7100_v6 = vsel %vm594_vm8, %v7043_v7, 0  ;;  %v13771_v33 = vadd.f32 %v9939_v60, %v7007_v22 }
0x22eb   :  { %v11015_v0 = vpop.f32.mrf.mxu0  ;;  %11024 = vmatpush3.bf16.xpose.msra.mxu1 %v7100_v6 }
0x22ec   :  { %11035 = vmatprep.subr.bf16.mxu1 %v12059_v1  ;;  %v7522_v58 = vpack.c.bf16 %v13771_v33, %v13771_v33 }
0x22ed   :  { %v7010_v52 = vpop.f32.mrf.mxu0 }
0x22ee   :  { %v13773_v53 = vadd.f32 %v9939_v60, %v7010_v52  ;;  %11020 = vmatmul.mubr.msk.bf16.vlgmr.msra.gmra.mxu0 %vm594_vm8, %v7034_v36  ;;  %11530 = vrot.lane.b32.xlu1 %v11519_v48, %s12063_s26  ;;  %v7534_v51 = vsel %vm4695_vm14, %v7522_v58, 0 }
0x22ef   :  { %11525 = vrot.lane.b32.xlu0 %v11514_v61, %s12062_s22  ;;  %v11016_v30 = vpop.f32.mrf.mxu0  ;;  %11031 = vmatprep.mubr.msk.bf16.mxu0 %vm12060_vm0, %v12059_v1 }
0x22f0   :  { %v13782_v56 = vpack.i.bf16 %v13773_v53, %v13771_v33  ;;  %v7523_v8 = vpack.c.bf16 %v13773_v53, %v13773_v53 }
0x22f2   :  { %11026 = vmatmul.mubr.msk.bf16.vlgmr.msra.gmra.mxu1 %vm594_vm8, %v7035_v35  ;;  %v7580_v10 = vsel %vm4695_vm14, %v7523_v8, 0 }
0x22f3   :  { %11535 = vrot.lane.b32.xlu0 %v11514_v61, %s12063_s26  ;;  %11037 = vmatprep.mubr.msk.bf16.mxu1 %vm12060_vm0, %v12059_v1 }
0x2354   :  { %v11516_v54 = vpop.permute.xlu1 %11515 }
0x2355   :  { %v11518_v20 = vunpack.i.h.bf16 %v11516_v54  ;;  %v11517_v34 = vunpack.i.l.bf16 %v11516_v54 }
0x2357   :  { %v7037_v31 = vpack.c.bf16 %v11518_v20, %v11518_v20  ;;  %v7036_v28 = vpack.c.bf16 %v11517_v34, %v11517_v34 }
0x235c   :  { %v11511_v47 = vpop.permute.xlu0 %11510  ;;  %v11521_v11 = vpop.permute.xlu1 %11520 }
0x235d   :  { %v11513_v9 = vunpack.i.h.bf16 %v11511_v47  ;;  %v11512_v46 = vunpack.i.l.bf16 %v11511_v47  ;;  %v11523_v21 = vunpack.i.h.bf16 %v11521_v11  ;;  %v11522_v50 = vunpack.i.l.bf16 %v11521_v11 }
0x235f   :  { %v7045_v2 = vpack.c.bf16 %v11513_v9, %v11513_v9  ;;  %v7044_v45 = vpack.c.bf16 %v11512_v46, %v11512_v46  ;;  %v7047_v23 = vpack.c.bf16 %v11523_v21, %v11523_v21  ;;  %v7046_v49 = vpack.c.bf16 %v11522_v50, %v11522_v50 }
0x2360   :  { %v11531_v40 = vpop.permute.xlu1 %11530 }
0x2361   :  { %v7146_v27 = vsel %vm594_vm8, %v7044_v45, 0  ;;  %v7192_v17 = vsel %vm594_vm8, %v7045_v2, 0  ;;  %v11526_v5 = vpop.permute.xlu0 %11525  ;;  %v11533_v57 = vunpack.i.h.bf16 %v11531_v40  ;;  %v11532_v39 = vunpack.i.l.bf16 %v11531_v40 }
0x2362   :  { %11030 = vmatpush3.bf16.xpose.msra.mxu0 %v7146_v27  ;;  %11036 = vmatpush3.bf16.xpose.msra.mxu1 %v7192_v17  ;;  %v7238_v12 = vsel %vm594_vm8, %v7046_v49, 0  ;;  %v7284_v29 = vsel %vm594_vm8, %v7047_v23, 0  ;;  %v11528_v63 = vunpack.i.h.bf16 %v11526_v5  ;;  %v11527_v14 = vunpack.i.l.bf16 %v11526_v5 }
0x2363   :  { %11041 = vmatprep.subr.bf16.mxu0 %v12059_v1  ;;  %11047 = vmatprep.subr.bf16.mxu1 %v12059_v1  ;;  %v7049_v16 = vpack.c.bf16 %v11533_v57, %v11533_v57  ;;  %v7048_v44 = vpack.c.bf16 %v11532_v39, %v11532_v39 }
0x2364   :  { %v7039_v26 = vpack.c.bf16 %v11528_v63, %v11528_v63  ;;  %v7038_v18 = vpack.c.bf16 %v11527_v14, %v11527_v14 }
0x2365   :  { %v11536_v62 = vpop.permute.xlu0 %11535  ;;  %v7330_v15 = vsel %vm594_vm8, %v7048_v44, 0  ;;  %v7376_v37 = vsel %vm594_vm8, %v7049_v16, 0 }
0x2366   :  { %v11538_v43 = vunpack.i.h.bf16 %v11536_v62  ;;  %v11537_v38 = vunpack.i.l.bf16 %v11536_v62 }
0x2368   :  { %v7041_v59 = vpack.c.bf16 %v11538_v43, %v11538_v43  ;;  %v7040_v61 = vpack.c.bf16 %v11537_v38, %v11537_v38 }
0x2369   :  { %11032 = vmatmul.mubr.msk.bf16.vlgmr.msra.gmra.mxu0 %vm594_vm8, %v7036_v28  ;;  %11038 = vmatmul.mubr.msk.bf16.vlgmr.msra.gmra.mxu1 %vm594_vm8, %v7037_v31 }
0x236a   :  { %11042 = vmatpush3.bf16.xpose.msra.mxu0 %v7238_v12  ;;  %11048 = vmatpush3.bf16.xpose.msra.mxu1 %v7284_v29 }
0x236b   :  { %11043 = vmatprep.mubr.msk.bf16.mxu0 %vm12060_vm0, %v12059_v1  ;;  %11049 = vmatprep.mubr.msk.bf16.mxu1 %vm12060_vm0, %v12059_v1 }
0x236c   :  { %11053 = vmatprep.subr.bf16.mxu0 %v12059_v1  ;;  %11059 = vmatprep.subr.bf16.mxu1 %v12059_v1 }
0x2371   :  { %11044 = vmatmul.mubr.msk.bf16.vlgmr.msra.gmra.mxu0 %vm594_vm8, %v7038_v18  ;;  %11050 = vmatmul.mubr.msk.bf16.vlgmr.msra.gmra.mxu1 %vm594_vm8, %v7039_v26 }
0x2372   :  { %11054 = vmatpush3.bf16.xpose.msra.mxu0 %v7330_v15  ;;  %11060 = vmatpush3.bf16.xpose.msra.mxu1 %v7376_v37 }
0x2373   :  { %11055 = vmatprep.mubr.msk.bf16.mxu0 %vm12060_vm0, %v12059_v1  ;;  %11061 = vmatprep.mubr.msk.bf16.mxu1 %vm12060_vm0, %v12059_v1 }
0x2374   :  { %11065 = vmatprep.subr.bf16.mxu0 %v12059_v1  ;;  %11071 = vmatprep.subr.bf16.mxu1 %v12059_v1 }
0x2379   :  { %11056 = vmatmul.mubr.msk.bf16.vlgmr.msra.gmra.mxu0 %vm594_vm8, %v7040_v61  ;;  %11062 = vmatmul.mubr.msk.bf16.vlgmr.msra.gmra.mxu1 %vm594_vm8, %v7041_v59 }
0x237a   :  { %11066 = vmatpush3.bf16.msra.mxu0 %v7534_v51  ;;  %11072 = vmatpush3.bf16.msra.mxu1 %v7580_v10 }
0x237b   :  { %11067 = vmatprep.mubr.msk.bf16.mxu0 %vm12060_vm0, %v12059_v1  ;;  %11073 = vmatprep.mubr.msk.bf16.mxu1 %vm12060_vm0, %v12059_v1 }
0x237c   :  { %11077 = vmatprep.subr.bf16.mxu0 %v12059_v1  ;;  %11083 = vmatprep.subr.bf16.mxu1 %v12059_v1 }
0x23ae   :  { %v7090_v25 = vpop.f32.mrf.mxu0 }
0x23af   :  { %v7418_v41 = vmul.f32 0.35355338, %v7090_v25 }
0x23b0   :  { %v11021_v55 = vpop.f32.mrf.mxu0 }
0x23b1   :  { %v7426_v3 = vsel %vm594_vm8, %v7418_v41, -inf }
0x23b2   :  { %7427 = vmax.xlane.f32.xlu1 %v7426_v3  ;;  %v7093_v19 = vpop.f32.mrf.mxu0  ;;  %v7136_v4 = vpop.f32.mrf.mxu1 }
0x23b3   :  { %v7419_v48 = vmul.f32 0.35355338, %v7136_v4 }
0x23b4   :  { %v11022_v7 = vpop.f32.mrf.mxu0  ;;  %v11027_v22 = vpop.f32.mrf.mxu1 }
0x23b5   :  { %v7429_v6 = vsel %vm594_vm8, %v7419_v48, -inf }
0x23b6   :  { %7430 = vmax.xlane.f32.xlu0 %v7429_v6  ;;  %v7139_v60 = vpop.f32.mrf.mxu1 }
0x23b8   :  { %v11028_v0 = vpop.f32.mrf.mxu1 }
0x2429   :  { %v7182_v36 = vpop.f32.mrf.mxu0  ;;  %v7228_v52 = vpop.f32.mrf.mxu1 }
0x242a   :  { %v7420_v33 = vmul.f32 0.35355338, %v7182_v36  ;;  %v7421_v53 = vmul.f32 0.35355338, %v7228_v52 }
0x242b   :  { %v11033_v30 = vpop.f32.mrf.mxu0  ;;  %v11039_v35 = vpop.f32.mrf.mxu1 }
0x242c   :  { %v7432_v54 = vsel %vm594_vm8, %v7420_v33, -inf  ;;  %v7435_v47 = vsel %vm594_vm8, %v7421_v53, -inf }
0x242d   :  { %v7185_v9 = vpop.f32.mrf.mxu0  ;;  %7433 = vmax.xlane.f32.xlu0 %v7432_v54  ;;  %7436 = vmax.xlane.f32.xlu1 %v7435_v47  ;;  %v7231_v46 = vpop.f32.mrf.mxu1 }
0x242f   :  { %v11034_v11 = vpop.f32.mrf.mxu0  ;;  %v11040_v2 = vpop.f32.mrf.mxu1 }
0x2431   :  { %v7274_v45 = vpop.f32.mrf.mxu0  ;;  %v7320_v21 = vpop.f32.mrf.mxu1 }
0x2432   :  { %v7422_v50 = vmul.f32 0.35355338, %v7274_v45  ;;  %v7423_v27 = vmul.f32 0.35355338, %v7320_v21 }
0x2433   :  { %v11045_v17 = vpop.f32.mrf.mxu0  ;;  %v11051_v20 = vpop.f32.mrf.mxu1 }
0x2434   :  { %v7438_v34 = vsel %vm594_vm8, %v7422_v50, -inf  ;;  %v7441_v23 = vsel %vm594_vm8, %v7423_v27, -inf }
0x2435   :  { %v7277_v49 = vpop.f32.mrf.mxu0  ;;  %7439 = vmax.xlane.f32.xlu0 %v7438_v34  ;;  %7442 = vmax.xlane.f32.xlu1 %v7441_v23  ;;  %v7323_v40 = vpop.f32.mrf.mxu1 }
0x2437   :  { %v11046_v31 = vpop.f32.mrf.mxu0  ;;  %v11052_v28 = vpop.f32.mrf.mxu1 }
0x2439   :  { %v7366_v5 = vpop.f32.mrf.mxu0  ;;  %v7412_v57 = vpop.f32.mrf.mxu1 }
0x243a   :  { %v7424_v39 = vmul.f32 0.35355338, %v7366_v5  ;;  %v13832_v12 = vmul.f32 0.35355338, %v7412_v57 }
0x243b   :  { %v7428_v29 = vpop.xlane.xlu1 %7427  ;;  %v11057_v63 = vpop.f32.mrf.mxu0 }
0x243c   :  { %v7450_v14 = vsub.f32 %v7418_v41, %v7428_v29  ;;  %v11063_v16 = vpop.f32.mrf.mxu1  ;;  %v7444_v44 = vsel %vm594_vm8, %v7424_v39, -inf  ;;  %v7447_v26 = vsel %vm594_vm8, %v13832_v12, -inf }
0x243d   :  { %v7369_v18 = vpop.f32.mrf.mxu0  ;;  %7445 = vmax.xlane.f32.xlu0 %v7444_v44  ;;  %7448 = vmax.xlane.f32.xlu1 %v7447_v26 }
0x243e   :  { %v7458_v62 = vmul.f32 1.442695, %v7450_v14  ;;  %v7415_v15 = vpop.f32.mrf.mxu1 }
0x243f   :  { %v11058_v37 = vpop.f32.mrf.mxu0  ;;  %v7431_v43 = vpop.xlane.xlu0 %7430 }
0x2440   :  { %11953 = vpow2.f32 %v7458_v62  ;;  %v7451_v38 = vsub.f32 %v7419_v48, %v7431_v43  ;;  %v11064_v58 = vpop.f32.mrf.mxu1 }
0x2442   :  { %v7460_v8 = vmul.f32 1.442695, %v7451_v38 }
0x2444   :  { %11955 = vpow2.f32 %v7460_v8 }
0x244d   :  { %v11954_v59 = vpop.eup %11953 }
0x244e   :  { %v7474_v61 = vsel %vm594_vm8, %v11954_v59, 0.0 }
0x244f   :  { %7475 = vadd.xlane.f32.xlu0 %v7474_v61 }
0x2451   :  { %v11956_v51 = vpop.eup %11955 }
0x2452   :  { %v7477_v10 = vsel %vm594_vm8, %v11956_v51, 0.0 }
0x2453   :  { %7478 = vadd.xlane.f32.xlu1 %v7477_v10 }
0x24b6   :  { %v7434_v25 = vpop.xlane.xlu0 %7433  ;;  %v7437_v41 = vpop.xlane.xlu1 %7436 }
0x24b7   :  { %v7452_v55 = vsub.f32 %v7420_v33, %v7434_v25  ;;  %v7453_v3 = vsub.f32 %v7421_v53, %v7437_v41 }
0x24b9   :  { %v7462_v19 = vmul.f32 1.442695, %v7452_v55  ;;  %v7464_v4 = vmul.f32 1.442695, %v7453_v3 }
0x24bb   :  { %11957 = vpow2.f32 %v7462_v19 }
0x24bc   :  { %11959 = vpow2.f32 %v7464_v4 }
0x24be   :  { %v7440_v48 = vpop.xlane.xlu0 %7439  ;;  %v7443_v7 = vpop.xlane.xlu1 %7442 }
0x24bf   :  { %v7454_v22 = vsub.f32 %v7422_v50, %v7440_v48  ;;  %v7455_v6 = vsub.f32 %v7423_v27, %v7443_v7 }
0x24c1   :  { %v7466_v60 = vmul.f32 1.442695, %v7454_v22  ;;  %v7468_v0 = vmul.f32 1.442695, %v7455_v6 }
0x24c3   :  { %11961 = vpow2.f32 %v7466_v60 }
0x24c4   :  { %11963 = vpow2.f32 %v7468_v0 }
0x24c6   :  { %v7446_v36 = vpop.xlane.xlu0 %7445  ;;  %v7449_v45 = vpop.xlane.xlu1 %7448 }
0x24c7   :  { %v7456_v52 = vsub.f32 %v7424_v39, %v7446_v36  ;;  %v7457_v31 = vsub.f32 %v13832_v12, %v7449_v45 }
0x24c8   :  { %v11958_v30 = vpop.eup %11957 }
0x24c9   :  { %v11960_v35 = vpop.eup %11959  ;;  %v7470_v54 = vmul.f32 1.442695, %v7456_v52  ;;  %v7480_v33 = vsel %vm594_vm8, %v11958_v30, 0.0  ;;  %v7472_v28 = vmul.f32 1.442695, %v7457_v31  ;;  %v11697_v31 = vld [vmem:[#allocation2 + $0x228] sm:$0xff]  }
0x24ca   :  { %7481 = vadd.xlane.f32.xlu0 %v7480_v33  ;;  %v7483_v53 = vsel %vm594_vm8, %v11960_v35, 0.0 }
0x24cb   :  { %11965 = vpow2.f32 %v7470_v54  ;;  %7484 = vadd.xlane.f32.xlu1 %v7483_v53 }
0x24d0   :  { %v13841_v47 = vpop.eup %11961 }
0x24d1   :  { %v13843_v9 = vpop.eup %11963  ;;  %v7486_v46 = vsel %vm594_vm8, %v13841_v47, 0.0 }
0x24d2   :  { %7487 = vadd.xlane.f32.xlu0 %v7486_v46  ;;  %v7489_v11 = vsel %vm594_vm8, %v13843_v9, 0.0 }
0x24d3   :  { %7490 = vadd.xlane.f32.xlu1 %v7489_v11 }
0x24d8   :  { %v13849_v2 = vpop.eup %11965  ;;  %v7476_v21 = vpop.xlane.xlu0 %7475 }
0x24d9   :  { %11967 = vrcp.f32 %v7476_v21  ;;  %v7492_v50 = vsel %vm594_vm8, %v13849_v2, 0.0 }
0x24da   :  { %7493 = vadd.xlane.f32.xlu0 %v7492_v50 }
0x24dc   :  { %v7479_v27 = vpop.xlane.xlu1 %7478 }
0x24dd   :  { %11969 = vrcp.f32 %v7479_v27 }
0x24de   :  { %11971 = vpow2.f32 %v7472_v28 }
0x24e4   :  { %11545 = vrot.lane.b32.xlu1 %v13782_v56, %s12062_s22 }
0x24e6   :  { %v11968_v17 = vpop.eup %11967 }
0x24e7   :  { %v7506_v20 = vmul.f32 %v11968_v17, %v11954_v59 }
0x24e9   :  { %v7514_v34 = vpack.c.bf16 %v7506_v20, %v7506_v20 }
0x24ea   :  { %v11970_v23 = vpop.eup %11969 }
0x24eb   :  { %v7507_v49 = vmul.f32 %v11970_v23, %v11956_v51  ;;  %11068 = vmatmul.mubr.msk.bf16.vlgmr.msra.gmra.mxu0 %vm594_vm8, %v7514_v34  ;;  %v13864_v5 = vpop.eup %11971 }
0x24ec   :  { %11079 = vmatprep.mubr.msk.bf16.mxu0 %vm12060_vm0, %v12059_v1  ;;  %v7495_v57 = vsel %vm594_vm8, %v13864_v5, 0.0 }
0x24ed   :  { %v7515_v40 = vpack.c.bf16 %v7507_v49, %v7507_v49 }
0x24ef   :  { %11074 = vmatmul.mubr.msk.bf16.vlgmr.msra.gmra.mxu1 %vm594_vm8, %v7515_v40 }
0x24f0   :  { %11540 = vrot.lane.b32.xlu0 %v13782_v56, %s12061_s21  ;;  %11085 = vmatprep.mubr.msk.bf16.mxu1 %vm12060_vm0, %v12059_v1 }
0x2508   :  { %7496 = vadd.xlane.f32.xlu1 %v7495_v57 }
0x2519   :  { %11550 = vrot.lane.b32.xlu1 %v13782_v56, %s12063_s26 }
0x2553   :  { %v7482_v39 = vpop.xlane.xlu0 %7481 }
0x2554   :  { %v7485_v12 = vpop.xlane.xlu1 %7484  ;;  %11973 = vrcp.f32 %v7482_v39 }
0x2555   :  { %11975 = vrcp.f32 %v7485_v12 }
0x255b   :  { %v7488_v29 = vpop.xlane.xlu0 %7487 }
0x255c   :  { %v7491_v63 = vpop.xlane.xlu1 %7490  ;;  %11977 = vrcp.f32 %v7488_v29 }
0x255d   :  { %11979 = vrcp.f32 %v7491_v63 }
0x2560   :  { %v11546_v16 = vpop.permute.xlu1 %11545 }
0x2561   :  { %v11974_v44 = vpop.eup %11973  ;;  %v11548_v62 = vunpack.i.h.bf16 %v11546_v16  ;;  %v11547_v15 = vunpack.i.l.bf16 %v11546_v16 }
0x2562   :  { %v11976_v26 = vpop.eup %11975  ;;  %v7508_v38 = vmul.f32 %v11974_v44, %v11958_v30 }
0x2563   :  { %v7494_v14 = vpop.xlane.xlu0 %7493  ;;  %v7509_v58 = vmul.f32 %v11976_v26, %v11960_v35  ;;  %v7527_v59 = vpack.c.bf16 %v11548_v62, %v11548_v62  ;;  %v7526_v61 = vpack.c.bf16 %v11547_v15, %v11547_v15 }
0x2564   :  { %v7516_v41 = vpack.c.bf16 %v7508_v38, %v7508_v38  ;;  %11981 = vrcp.f32 %v7494_v14  ;;  %v11698_v38 = vld [vmem:[#allocation2 + $0x220] sm:$0xff]  }
0x2565   :  { %v7517_v55 = vpack.c.bf16 %v7509_v58, %v7509_v58  ;;  %v7718_v19 = vsel %vm4695_vm14, %v7526_v61, 0  ;;  %v7764_v4 = vsel %vm4695_vm14, %v7527_v59, 0  ;;  %v11699_v58 = vld [vmem:[#allocation2 + $0x248] sm:$0xff]  }
0x2567   :  { %v11541_v18 = vpop.permute.xlu0 %11540 }
0x2568   :  { %v11543_v37 = vunpack.i.h.bf16 %v11541_v18  ;;  %v11542_v43 = vunpack.i.l.bf16 %v11541_v18 }
0x2569   :  { %v11978_v25 = vpop.eup %11977 }
0x256a   :  { %v7525_v56 = vpack.c.bf16 %v11543_v37, %v11543_v37  ;;  %v7524_v8 = vpack.c.bf16 %v11542_v43, %v11542_v43  ;;  %v11980_v3 = vpop.eup %11979  ;;  %v7510_v48 = vmul.f32 %v11978_v25, %v13841_v47 }
0x256b   :  { %v7511_v7 = vmul.f32 %v11980_v3, %v13843_v9 }
0x256c   :  { %v7626_v51 = vsel %vm4695_vm14, %v7524_v8, 0  ;;  %v7672_v10 = vsel %vm4695_vm14, %v7525_v56, 0  ;;  %v7518_v22 = vpack.c.bf16 %v7510_v48, %v7510_v48 }
0x256d   :  { %11078 = vmatpush3.bf16.msra.mxu0 %v7626_v51  ;;  %11084 = vmatpush3.bf16.msra.mxu1 %v7672_v10  ;;  %v7519_v6 = vpack.c.bf16 %v7511_v7, %v7511_v7 }
0x256e   :  { %11089 = vmatprep.subr.bf16.mxu0 %v12059_v1  ;;  %11095 = vmatprep.subr.bf16.mxu1 %v12059_v1 }
0x2570   :  { %11080 = vmatmul.mubr.msk.bf16.vlgmr.msra.gmra.mxu0 %vm594_vm8, %v7516_v41  ;;  %11086 = vmatmul.mubr.msk.bf16.vlgmr.msra.gmra.mxu1 %vm594_vm8, %v7517_v55 }
0x2571   :  { %11090 = vmatpush3.bf16.msra.mxu0 %v7718_v19  ;;  %11096 = vmatpush3.bf16.msra.mxu1 %v7764_v4  ;;  %v11982_v0 = vpop.eup %11981 }
0x2572   :  { %11091 = vmatprep.mubr.msk.bf16.mxu0 %vm12060_vm0, %v12059_v1  ;;  %11097 = vmatprep.mubr.msk.bf16.mxu1 %vm12060_vm0, %v12059_v1  ;;  %v7512_v35 = vmul.f32 %v11982_v0, %v13849_v2 }
0x2573   :  { %11101 = vmatprep.subr.bf16.mxu0 %v12059_v1  ;;  %11107 = vmatprep.subr.bf16.mxu1 %v12059_v1 }
0x2574   :  { %v7520_v9 = vpack.c.bf16 %v7512_v35, %v7512_v35 }
0x2578   :  { %11092 = vmatmul.mubr.msk.bf16.vlgmr.msra.gmra.mxu0 %vm594_vm8, %v7518_v22  ;;  %11098 = vmatmul.mubr.msk.bf16.vlgmr.msra.gmra.mxu1 %vm594_vm8, %v7519_v6 }
0x2579   :  { %11103 = vmatprep.mubr.msk.bf16.mxu0 %vm12060_vm0, %v12059_v1  ;;  %11109 = vmatprep.mubr.msk.bf16.mxu1 %vm12060_vm0, %v12059_v1 }
0x2591   :  { %v7497_v60 = vpop.xlane.xlu1 %7496 }
0x2592   :  { %11983 = vrcp.f32 %v7497_v60 }
0x2595   :  { %v11551_v36 = vpop.permute.xlu1 %11550 }
0x2596   :  { %v11553_v52 = vunpack.i.h.bf16 %v11551_v36  ;;  %v11552_v30 = vunpack.i.l.bf16 %v11551_v36 }
0x2598   :  { %v7529_v54 = vpack.c.bf16 %v11553_v52, %v11553_v52  ;;  %v7528_v33 = vpack.c.bf16 %v11552_v30, %v11552_v30 }
0x259a   :  { %v7810_v53 = vsel %vm4695_vm14, %v7528_v33, 0  ;;  %v7856_v47 = vsel %vm4695_vm14, %v7529_v54, 0 }
0x259b   :  { %11102 = vmatpush3.bf16.msra.mxu0 %v7810_v53  ;;  %11108 = vmatpush3.bf16.msra.mxu1 %v7856_v47  ;;  %v11700_v47 = vld [vmem:[#allocation2 + $0x240] sm:$0xff]  }
0x259c   :  { %11113 = vmatprep.subr.bf16.mxu0 %v12059_v1  ;;  %11121 = vmatprep.subr.bf16.mxu1 %v12059_v1 }
0x259e   :  { %11104 = vmatmul.mubr.msk.bf16.vlgmr.msra.gmra.mxu0 %vm594_vm8, %v7520_v9  ;;  %v9959_v9 = vld [vmem:[%s14294_s3 + $0x27] ss:$0 sm:$0xff] }
0x259f   :  { %v11984_v46 = vpop.eup %11983  ;;  %11117 = vmatprep.mubr.msk.bf16.mxu0 %vm12060_vm0, %v12059_v1  ;;  %11114 = vmatpush3.bf16.msra.mxu0 %v11697_v31 }
0x25a0   :  { %v7513_v11 = vmul.f32 %v11984_v46, %v13864_v5  ;;  %11115 = vmatprep.subr.bf16.mxu0 %v12059_v1 }
0x25a2   :  { %v7521_v2 = vpack.c.bf16 %v7513_v11, %v7513_v11 }
0x25a3   :  { %11116 = vmatpush3.bf16.msra.mxu0 %v11698_v38 }
0x25a4   :  { %11110 = vmatmul.mubr.msk.bf16.vlgmr.msra.gmra.mxu1 %vm594_vm8, %v7521_v2  ;;  %11129 = vmatprep.subr.bf16.mxu0 %v11699_v58 }
0x25a5   :  { %11125 = vmatprep.mubr.msk.bf16.mxu1 %vm12060_vm0, %v12059_v1 }
0x25ab   :  { %v7570_v45 = vpop.f32.mrf.mxu0 }
0x25ad   :  { %v11069_v21 = vpop.f32.mrf.mxu0 }
0x25af   :  { %v7573_v50 = vpop.f32.mrf.mxu0  ;;  %v7616_v27 = vpop.f32.mrf.mxu1 }
0x25b1   :  { %v11070_v17 = vpop.f32.mrf.mxu0  ;;  %v11075_v20 = vpop.f32.mrf.mxu1 }
0x25b2   :  { %v9969_v20 = vld [vmem:[%s14294_s3 + $0x29] ss:$0 sm:$0xff] }
0x25b3   :  { %v7619_v34 = vpop.f32.mrf.mxu1 }
0x25b5   :  { %v11076_v23 = vpop.f32.mrf.mxu1 }
0x2630   :  { %v7662_v49 = vpop.f32.mrf.mxu0  ;;  %v7708_v40 = vpop.f32.mrf.mxu1 }
0x2631   :  { %v11554_v28 = vpack.i.bf16 %v7708_v40, %v7662_v49 }
0x2632   :  { %v11081_v57 = vpop.f32.mrf.mxu0  ;;  %v11087_v5 = vpop.f32.mrf.mxu1 }
0x2633   :  { %11555 = vrot.lane.b32.xlu0 %v11554_v28, %s12064_s27 }
0x2634   :  { %v7665_v39 = vpop.f32.mrf.mxu0  ;;  %v7711_v12 = vpop.f32.mrf.mxu1 }
0x2636   :  { %v11082_v29 = vpop.f32.mrf.mxu0  ;;  %v11088_v63 = vpop.f32.mrf.mxu1 }
0x2638   :  { %v7754_v14 = vpop.f32.mrf.mxu0  ;;  %v7800_v16 = vpop.f32.mrf.mxu1 }
0x2639   :  { %v11559_v44 = vpack.i.bf16 %v7800_v16, %v7754_v14 }
0x263a   :  { %v11093_v26 = vpop.f32.mrf.mxu0  ;;  %v11099_v18 = vpop.f32.mrf.mxu1 }
0x263b   :  { %11560 = vrot.lane.b32.xlu1 %v11559_v44, %s12065_s28 }
0x263c   :  { %v7757_v62 = vpop.f32.mrf.mxu0  ;;  %v7803_v15 = vpop.f32.mrf.mxu1 }
0x263e   :  { %v11094_v37 = vpop.f32.mrf.mxu0  ;;  %v11100_v43 = vpop.f32.mrf.mxu1 }
0x265e   :  { %v7846_v56 = vpop.f32.mrf.mxu0 }
0x2660   :  { %v11105_v8 = vpop.f32.mrf.mxu0 }
0x2661   :  { %v11701_v8 = vld [vmem:[#allocation2 + $0x238] sm:$0xff]  }
0x2662   :  { %v7849_v59 = vpop.f32.mrf.mxu0  ;;  %11122 = vmatpush3.bf16.msra.mxu1 %v11701_v8 }
0x2663   :  { %11123 = vmatprep.subr.bf16.mxu1 %v12059_v1  ;;  %v11702_v59 = vld [vmem:[#allocation2 + $0x230] sm:$0xff]  }
0x2664   :  { %v11106_v61 = vpop.f32.mrf.mxu0  ;;  %v7892_v51 = vpop.f32.mrf.mxu1 }
0x2665   :  { %v11564_v10 = vpack.i.bf16 %v7892_v51, %v7846_v56  ;;  %v11703_v61 = vld [vmem:[#allocation2 + $0x258] sm:$0xff]  }
0x2666   :  { %v11111_v25 = vpop.f32.mrf.mxu1  ;;  %11124 = vmatpush3.bf16.msra.mxu1 %v11702_v59 }
0x2667   :  { %11565 = vrot.lane.b32.xlu0 %v11564_v10, %s12066_s29  ;;  %11137 = vmatprep.subr.bf16.mxu1 %v11703_v61 }
0x2668   :  { %v7895_v41 = vpop.f32.mrf.mxu1 }
0x266a   :  { %v11112_v55 = vpop.f32.mrf.mxu1 }
0x26a5   :  { %v11556_v3 = vpop.permute.xlu0 %11555 }
0x26a6   :  { %v11558_v4 = vunpack.i.h.bf16 %v11556_v3  ;;  %v11557_v48 = vunpack.i.l.bf16 %v11556_v3 }
0x26a8   :  { %v7923_v60 = vsel %vm594_vm8, %v7616_v27, %v11558_v4  ;;  %v7922_v0 = vsel %vm594_vm8, %v7570_v45, %v11557_v48  ;;  %v9963_v48 = vld [vmem:[%s14294_s3 + $0x2e] ss:$0 sm:$0xff] }
0x26ad   :  { %v11561_v19 = vpop.permute.xlu1 %11560 }
0x26ae   :  { %v11563_v7 = vunpack.i.h.bf16 %v11561_v19  ;;  %v11562_v22 = vunpack.i.l.bf16 %v11561_v19 }
0x26b0   :  { %v7925_v30 = vsel %vm1626_vm12, %v7923_v60, %v11563_v7  ;;  %v7924_v35 = vsel %vm1626_vm12, %v7922_v0, %v11562_v22  ;;  %v9964_v60 = vld [vmem:[%s14294_s3 + $0x2f] ss:$0 sm:$0xff] }
0x26d9   :  { %v11566_v6 = vpop.permute.xlu0 %11565 }
0x26da   :  { %v11568_v36 = vunpack.i.h.bf16 %v11566_v6  ;;  %v11567_v52 = vunpack.i.l.bf16 %v11566_v6 }
0x26dc   :  { %v7927_v54 = vsel %vm1631_vm13, %v7925_v30, %v11568_v36  ;;  %v7926_v33 = vsel %vm1631_vm13, %v7924_v35, %v11567_v52  ;;  %v11704_v35 = vld [vmem:[#allocation2 + $0x250] sm:$0xff]  }
0x26dd   :  { %v7928_v53 = vpack.c.bf16 %v7927_v54, %v7926_v33 }
0x26df   :  { %11118 = vmatmul.mubr.msk.bf16.vlgmr.msra.gmra.mxu0 %vm206_vm7, %v7928_v53 }
0x26e0   :  { %11130 = vmatpush3.bf16.msra.mxu0 %v11699_v58  ;;  %11133 = vmatprep.mubr.msk.bf16.mxu0 %vm206_vm7, %v13382_v13 }
0x26e1   :  { %11131 = vmatprep.subr.bf16.mxu0 %v11700_v47 }
0x26e4   :  { %11132 = vmatpush3.bf16.msra.mxu0 %v11700_v47 }
0x26e5   :  { %11145 = vmatprep.subr.bf16.mxu0 %v12059_v1 }
0x26e7   :  { %11134 = vmatmul.mubr.msk.bf16.vlgmr.msra.gmra.mxu0 %vm206_vm7, %v13389_v42 }
0x26e8   :  { %11147 = vmatprep.mubr.msk.bf16.mxu0 %vm12060_vm0, %v12059_v1 }
0x279f   :  { %v7987_v46 = vpop.f32.mrf.mxu0 }
0x27a0   :  { %v7988_v11 = vadd.f32 %v9959_v9, %v7987_v46 }
0x27a1   :  { %v11119_v2 = vpop.f32.mrf.mxu0 }
0x27a2   :  { %v7994_v45 = vadd.f32 %v7988_v11, %v13736_v24  ;;  %v9965_v2 = vld [vmem:[%s14294_s3 + $0x28] ss:$0 sm:$0xff] }
0x27a3   :  { %v7990_v21 = vpop.f32.mrf.mxu0 }
0x27a4   :  { %v7991_v50 = vadd.f32 %v9959_v9, %v7990_v21  ;;  %v7996_v27 = vsel %vm206_vm7, %v7994_v45, 0.0 }
0x27a5   :  { %7997 = vadd.xlane.f32.xlu1 %v7996_v27  ;;  %v11120_v17 = vpop.f32.mrf.mxu0 }
0x27a6   :  { %v7995_v34 = vadd.f32 %v7991_v50, %v13738_v32 }
0x27a7   :  { %v11135_v23 = vpop.f32.mrf.mxu0 }
0x27a8   :  { %v13931_v49 = vadd.f32 %v11135_v23, %v9969_v20  ;;  %v7999_v40 = vsel %vm206_vm7, %v7995_v34, 0.0 }
0x27a9   :  { %8000 = vadd.xlane.f32.xlu0 %v7999_v40  ;;  %v8177_v31 = vpop.f32.mrf.mxu0 }
0x27aa   :  { %v8178_v24 = vadd.f32 %v9969_v20, %v8177_v31  ;;  %v8196_v58 = vcombine.high %v13931_v49, %v13931_v49 }
0x27ab   :  { %v11136_v28 = vpop.f32.mrf.mxu0 }
0x27ac   :  { %v8194_v57 = vcombine.high %v8178_v24, %v8178_v24 }
0x27ad   :  { %v8180_v5 = vpop.f32.mrf.mxu0 }
0x27ae   :  { %v8181_v39 = vadd.f32 %v9969_v20, %v8180_v5  ;;  %v8366_v12 = vcombine.low %v8178_v24, %v8194_v57 }
0x27b0   :  { %v8382_v29 = vpack.c.bf16 %v8181_v39, %v8366_v12  ;;  %v13940_v38 = vcombine.high %v8181_v39, %v8181_v39  ;;  %v11569_v56 = vpack.i.bf16 %v8196_v58, %v8181_v39  ;;  %v9974_v12 = vld [vmem:[%s14294_s3 + $0x2a] ss:$0 sm:$0xff] }
0x27b2   :  { %v8394_v63 = vsel %vm594_vm8, %v8382_v29, 0  ;;  %v8367_v54 = vcombine.low %v13940_v38, %v13931_v49 }
0x27b3   :  { %11146 = vmatpush3.bf16.xpose.msra.mxu0 %v8394_v63 }
0x27b4   :  { %11157 = vmatprep.subr.bf16.mxu0 %v12059_v1  ;;  %v8383_v33 = vpack.c.bf16 %v8196_v58, %v8367_v54 }
0x27b6   :  { %v8440_v53 = vsel %vm594_vm8, %v8383_v33, 0 }
0x282e   :  { %v7998_v32 = vpop.xlane.xlu1 %7997 }
0x282f   :  { %v8002_v14 = vmul.f32 0.03125, %v7998_v32 }
0x2831   :  { %v8004_v16 = vsub.f32 %v7994_v45, %v8002_v14 }
0x2832   :  { %v8001_v44 = vpop.xlane.xlu0 %8000 }
0x2833   :  { %v8003_v26 = vmul.f32 0.03125, %v8001_v44  ;;  %v8006_v18 = vmul.f32 %v8004_v16, %v8004_v16 }
0x2835   :  { %v8005_v62 = vsub.f32 %v7995_v34, %v8003_v26  ;;  %v8008_v15 = vsel %vm206_vm7, %v8006_v18, 0.0 }
0x2836   :  { %8009 = vadd.xlane.f32.xlu0 %v8008_v15 }
0x2837   :  { %v8007_v37 = vmul.f32 %v8005_v62, %v8005_v62 }
0x2839   :  { %v8011_v43 = vsel %vm206_vm7, %v8007_v37, 0.0 }
0x283a   :  { %8012 = vadd.xlane.f32.xlu1 %v8011_v43 }
0x284b   :  { %8200 = vrot.lane.b32.xlu1 %v8194_v57, %s12061_s21 }
0x284c   :  { %8198 = vrot.lane.b32.xlu0 %v8178_v24, %s12061_s21 }
0x284f   :  { %8204 = vrot.lane.b32.xlu1 %v13940_v38, %s12061_s21 }
0x2850   :  { %8206 = vrot.lane.b32.xlu0 %v13931_v49, %s12061_s21 }
0x2853   :  { %11570 = vrot.lane.b32.xlu1 %v11569_v56, %s12061_s21 }
0x2854   :  { %8212 = vrot.lane.b32.xlu0 %v8178_v24, %s12062_s22 }
0x2857   :  { %8214 = vrot.lane.b32.xlu1 %v8194_v57, %s12062_s22 }
0x2858   :  { %8218 = vrot.lane.b32.xlu0 %v13940_v38, %s12062_s22 }
0x285b   :  { %8220 = vrot.lane.b32.xlu1 %v13931_v49, %s12062_s22 }
0x285c   :  { %8226 = vrot.lane.b32.xlu0 %v8178_v24, %s12063_s26 }
0x285f   :  { %11575 = vrot.lane.b32.xlu1 %v11569_v56, %s12062_s22 }
0x2863   :  { %8228 = vrot.lane.b32.xlu1 %v8194_v57, %s12063_s26 }
0x2867   :  { %8234 = vrot.lane.b32.xlu1 %v13931_v49, %s12063_s26 }
0x286b   :  { %11590 = vrot.lane.b32.xlu1 %v11569_v56, %s12063_s26 }
0x28bf   :  { %v8010_v51 = vpop.xlane.xlu0 %8009 }
0x28c0   :  { %v8014_v10 = vmul.f32 0.03125, %v8010_v51 }
0x28c2   :  { %v8016_v25 = vadd.f32 1e-05, %v8014_v10 }
0x28c3   :  { %v8013_v41 = vpop.xlane.xlu1 %8012 }
0x28c4   :  { %11985 = vrsqrt.f32 %v8016_v25  ;;  %v8015_v55 = vmul.f32 0.03125, %v8013_v41 }
0x28c6   :  { %v8017_v3 = vadd.f32 1e-05, %v8015_v55 }
0x28c7   :  { %v8201_v47 = vpop.permute.xlu1 %8200 }
0x28c8   :  { %11987 = vrsqrt.f32 %v8017_v3 }
0x28cb   :  { %v8205_v9 = vpop.permute.xlu1 %8204 }
0x28cf   :  { %v11571_v46 = vpop.permute.xlu1 %11570 }
0x28d0   :  { %v11572_v11 = vunpack.i.l.bf16 %v11571_v46 }
0x28d1   :  { %v11986_v19 = vpop.eup %11985 }
0x28d2   :  { %v8020_v4 = vmul.f32 %v11986_v19, %v8004_v16 }
0x28d3   :  { %v8215_v43 = vpop.permute.xlu1 %8214 }
0x28d4   :  { %v8027_v22 = vmul.f32 %v9963_v48, %v8020_v4 }
0x28d5   :  { %v11988_v7 = vpop.eup %11987 }
0x28d6   :  { %v8021_v6 = vmul.f32 %v11988_v7, %v8005_v62  ;;  %v13968_v36 = vadd.f32 %v9964_v60, %v8027_v22 }
0x28d8   :  { %v8028_v0 = vmul.f32 %v9963_v48, %v8021_v6 }
0x28da   :  { %v13970_v52 = vadd.f32 %v9964_v60, %v8028_v0 }
0x28dc   :  { %v8036_v30 = vpack.c.bf16 %v13970_v52, %v13968_v36 }
0x28de   :  { %11126 = vmatmul.mubr.msk.bf16.vlgmr.msra.gmra.mxu1 %vm206_vm7, %v8036_v30 }
0x28df   :  { %11138 = vmatpush3.bf16.msra.mxu1 %v11703_v61  ;;  %11141 = vmatprep.mubr.msk.bf16.mxu1 %vm206_vm7, %v13382_v13  ;;  %v8199_v13 = vpop.permute.xlu0 %8198 }
0x28e0   :  { %11139 = vmatprep.subr.bf16.mxu1 %v11704_v35  ;;  %v8368_v45 = vcombine.low %v8199_v13, %v8201_v47 }
0x28e2   :  { %v8384_v50 = vpack.c.bf16 %v11572_v11, %v8368_v45 }
0x28e3   :  { %11140 = vmatpush3.bf16.msra.mxu1 %v11704_v35  ;;  %v8207_v17 = vpop.permute.xlu0 %8206 }
0x28e4   :  { %11151 = vmatprep.subr.bf16.mxu1 %v12059_v1  ;;  %v8369_v34 = vcombine.low %v8205_v9, %v8207_v17  ;;  %v8486_v24 = vsel %vm594_vm8, %v8384_v50, 0 }
0x28e6   :  { %11142 = vmatmul.mubr.msk.bf16.vlgmr.msra.gmra.mxu1 %vm206_vm7, %v13389_v42  ;;  %v11573_v42 = vunpack.i.h.bf16 %v11571_v46 }
0x28e7   :  { %11152 = vmatpush3.bf16.xpose.msra.mxu1 %v8440_v53  ;;  %11153 = vmatprep.mubr.msk.bf16.mxu1 %vm12060_vm0, %v12059_v1  ;;  %v8213_v58 = vpop.permute.xlu0 %8212 }
0x28e8   :  { %11163 = vmatprep.subr.bf16.mxu1 %v12059_v1  ;;  %v8385_v40 = vpack.c.bf16 %v11573_v42, %v8369_v34  ;;  %v8370_v41 = vcombine.low %v8213_v58, %v8215_v43 }
0x28ea   :  { %v8532_v29 = vsel %vm594_vm8, %v8385_v40, 0 }
0x28eb   :  { %v8219_v8 = vpop.permute.xlu0 %8218 }
0x28ef   :  { %v8227_v61 = vpop.permute.xlu0 %8226 }
0x299e   :  { %v8095_v21 = vpop.f32.mrf.mxu1 }
0x299f   :  { %v8096_v27 = vadd.f32 %v9965_v2, %v8095_v21 }
0x29a0   :  { %v11127_v20 = vpop.f32.mrf.mxu1 }
0x29a1   :  { %v8358_v23 = vpack.c.bf16 %v8096_v27, %v8096_v27 }
0x29a2   :  { %v8098_v49 = vpop.f32.mrf.mxu1 }
0x29a3   :  { %v8099_v31 = vadd.f32 %v9965_v2, %v8098_v49  ;;  %11148 = vmatmul.mubr.msk.bf16.vlgmr.msra.gmra.mxu0 %vm594_vm8, %v8358_v23 }
0x29a4   :  { %11158 = vmatpush3.bf16.xpose.msra.mxu0 %v8486_v24  ;;  %v11128_v28 = vpop.f32.mrf.mxu1  ;;  %11159 = vmatprep.mubr.msk.bf16.mxu0 %vm12060_vm0, %v12059_v1 }
0x29a5   :  { %v8359_v57 = vpack.c.bf16 %v8099_v31, %v8099_v31  ;;  %v11579_v5 = vpack.i.bf16 %v8099_v31, %v8096_v27  ;;  %11169 = vmatprep.subr.bf16.mxu0 %v12059_v1 }
0x29a6   :  { %v11143_v39 = vpop.f32.mrf.mxu1 }
0x29a7   :  { %11580 = vrot.lane.b32.xlu0 %v11579_v5, %s12061_s21  ;;  %11154 = vmatmul.mubr.msk.bf16.vlgmr.msra.gmra.mxu1 %vm594_vm8, %v8359_v57  ;;  %v14002_v32 = vadd.f32 %v11143_v39, %v9974_v12 }
0x29a8   :  { %11164 = vmatpush3.bf16.xpose.msra.mxu1 %v8532_v29  ;;  %v8295_v63 = vpop.f32.mrf.mxu1  ;;  %11165 = vmatprep.mubr.msk.bf16.mxu1 %vm12060_vm0, %v12059_v1 }
0x29a9   :  { %v14004_v14 = vadd.f32 %v9974_v12, %v8295_v63  ;;  %11175 = vmatprep.subr.bf16.mxu1 %v12059_v1  ;;  %v14015_v18 = vcombine.high %v14002_v32, %v14002_v32 }
0x29aa   :  { %v11144_v16 = vpop.f32.mrf.mxu1 }
0x29ab   :  { %8232 = vrot.lane.b32.xlu0 %v13940_v38, %s12063_s26  ;;  %v14011_v44 = vcombine.high %v14004_v14, %v14004_v14  ;;  %v8221_v38 = vpop.permute.xlu1 %8220 }
0x29ac   :  { %v8298_v26 = vpop.f32.mrf.mxu1  ;;  %v8371_v55 = vcombine.low %v8219_v8, %v8221_v38 }
0x29ad   :  { %v14017_v62 = vadd.f32 %v9974_v12, %v8298_v26  ;;  %8318 = vrot.lane.b32.xlu1 %v14011_v44, %s12061_s21  ;;  %v8862_v17 = vcombine.low %v14004_v14, %v14011_v44 }
0x29af   :  { %11585 = vrot.lane.b32.xlu0 %v11579_v5, %s12062_s22  ;;  %v14024_v15 = vcombine.high %v14017_v62, %v14017_v62  ;;  %v14028_v37 = vpack.i.bf16 %v14015_v18, %v14017_v62  ;;  %v11576_v56 = vpop.permute.xlu1 %11575  ;;  %v8878_v49 = vpack.c.bf16 %v14017_v62, %v8862_v17 }
0x29b0   :  { %v11578_v10 = vunpack.i.h.bf16 %v11576_v56  ;;  %v11577_v25 = vunpack.i.l.bf16 %v11576_v56 }
0x29b1   :  { %8322 = vrot.lane.b32.xlu1 %v14024_v15, %s12061_s21  ;;  %v8863_v20 = vcombine.low %v14024_v15, %v14002_v32  ;;  %v8890_v28 = vsel %vm1200_vm9, %v8878_v49, 0 }
0x29b2   :  { %v8387_v19 = vpack.c.bf16 %v11578_v10, %v8371_v55  ;;  %v8386_v4 = vpack.c.bf16 %v11577_v25, %v8370_v41 }
0x29b3   :  { %11595 = vrot.lane.b32.xlu0 %v11579_v5, %s12063_s26  ;;  %v8229_v59 = vpop.permute.xlu1 %8228  ;;  %v8879_v40 = vpack.c.bf16 %v14015_v18, %v8863_v20 }
0x29b4   :  { %v8578_v54 = vsel %vm594_vm8, %v8386_v4, 0  ;;  %v8624_v33 = vsel %vm594_vm8, %v8387_v19, 0  ;;  %v8372_v53 = vcombine.low %v8227_v61, %v8229_v59 }
0x29b5   :  { %v8936_v57 = vsel %vm1200_vm9, %v8879_v40, 0 }
0x29b7   :  { %8324 = vrot.lane.b32.xlu0 %v14002_v32, %s12061_s21  ;;  %v8235_v51 = vpop.permute.xlu1 %8234 }
0x29bb   :  { %8316 = vrot.lane.b32.xlu0 %v14004_v14, %s12061_s21  ;;  %v11591_v22 = vpop.permute.xlu1 %11590 }
0x29bc   :  { %v11592_v30 = vunpack.i.l.bf16 %v11591_v22  ;;  %v11593_v47 = vunpack.i.h.bf16 %v11591_v22 }
0x29be   :  { %v8388_v46 = vpack.c.bf16 %v11592_v30, %v8372_v53 }
0x29c0   :  { %v8670_v50 = vsel %vm594_vm8, %v8388_v46, 0 }
0x2a19   :  { %v11581_v3 = vpop.permute.xlu0 %11580 }
0x2a1a   :  { %v11583_v48 = vunpack.i.h.bf16 %v11581_v3  ;;  %v11582_v7 = vunpack.i.l.bf16 %v11581_v3 }
0x2a1c   :  { %v8361_v6 = vpack.c.bf16 %v11583_v48, %v11583_v48  ;;  %v8360_v60 = vpack.c.bf16 %v11582_v7, %v11582_v7 }
0x2a1d   :  { %v8233_v0 = vpop.permute.xlu0 %8232 }
0x2a1e   :  { %v8373_v35 = vcombine.low %v8233_v0, %v8235_v51  ;;  %11160 = vmatmul.mubr.msk.bf16.vlgmr.msra.gmra.mxu0 %vm594_vm8, %v8360_v60  ;;  %11166 = vmatmul.mubr.msk.bf16.vlgmr.msra.gmra.mxu1 %vm594_vm8, %v8361_v6 }
0x2a1f   :  { %11170 = vmatpush3.bf16.xpose.msra.mxu0 %v8578_v54  ;;  %11176 = vmatpush3.bf16.xpose.msra.mxu1 %v8624_v33 }
0x2a20   :  { %11171 = vmatprep.mubr.msk.bf16.mxu0 %vm12060_vm0, %v12059_v1  ;;  %11177 = vmatprep.mubr.msk.bf16.mxu1 %vm12060_vm0, %v12059_v1  ;;  %v8389_v13 = vpack.c.bf16 %v11593_v47, %v8373_v35 }
0x2a21   :  { %v11586_v9 = vpop.permute.xlu0 %11585  ;;  %11181 = vmatprep.subr.bf16.mxu0 %v12059_v1  ;;  %11187 = vmatprep.subr.bf16.mxu1 %v12059_v1 }
0x2a22   :  { %v11588_v11 = vunpack.i.h.bf16 %v11586_v9  ;;  %v11587_v2 = vunpack.i.l.bf16 %v11586_v9  ;;  %v8716_v27 = vsel %vm594_vm8, %v8389_v13, 0 }
0x2a24   :  { %v8363_v45 = vpack.c.bf16 %v11588_v11, %v11588_v11  ;;  %v8362_v21 = vpack.c.bf16 %v11587_v2, %v11587_v2 }
0x2a25   :  { %v11596_v42 = vpop.permute.xlu0 %11595 }
0x2a26   :  { %11172 = vmatmul.mubr.msk.bf16.vlgmr.msra.gmra.mxu0 %vm594_vm8, %v8362_v21  ;;  %11178 = vmatmul.mubr.msk.bf16.vlgmr.msra.gmra.mxu1 %vm594_vm8, %v8363_v45  ;;  %v11598_v34 = vunpack.i.h.bf16 %v11596_v42  ;;  %v11597_v23 = vunpack.i.l.bf16 %v11596_v42 }
0x2a27   :  { %11182 = vmatpush3.bf16.xpose.msra.mxu0 %v8670_v50  ;;  %11188 = vmatpush3.bf16.xpose.msra.mxu1 %v8716_v27 }
0x2a28   :  { %11183 = vmatprep.mubr.msk.bf16.mxu0 %vm12060_vm0, %v12059_v1  ;;  %11189 = vmatprep.mubr.msk.bf16.mxu1 %vm12060_vm0, %v12059_v1  ;;  %v8365_v31 = vpack.c.bf16 %v11598_v34, %v11598_v34  ;;  %v8364_v24 = vpack.c.bf16 %v11597_v23, %v11597_v23  ;;  %v8319_v34 = vpop.permute.xlu1 %8318 }
0x2a29   :  { %11193 = vmatprep.subr.bf16.mxu0 %v12059_v1  ;;  %11199 = vmatprep.subr.bf16.mxu1 %v12059_v1  ;;  %v8325_v49 = vpop.permute.xlu0 %8324 }
0x2a2c   :  { %v8323_v23 = vpop.permute.xlu1 %8322 }
0x2a2e   :  { %11184 = vmatmul.mubr.msk.bf16.vlgmr.msra.gmra.mxu0 %vm594_vm8, %v8364_v24  ;;  %11190 = vmatmul.mubr.msk.bf16.vlgmr.msra.gmra.mxu1 %vm594_vm8, %v8365_v31  ;;  %v8317_v24 = vpop.permute.xlu0 %8316 }
0x2a2f   :  { %11194 = vmatpush3.bf16.msra.mxu0 %v8890_v28  ;;  %11200 = vmatpush3.bf16.msra.mxu1 %v8936_v57 }
0x2a30   :  { %11195 = vmatprep.mubr.msk.bf16.mxu0 %vm12060_vm0, %v12059_v1  ;;  %11205 = vmatprep.subr.bf16.mxu0 %v12059_v1 }
0x2a31   :  { %11201 = vmatprep.mubr.msk.bf16.mxu1 %vm12060_vm0, %v12059_v1  ;;  %11211 = vmatprep.subr.bf16.mxu1 %v12059_v1 }
0x2a63   :  { %v8430_v5 = vpop.f32.mrf.mxu0 }
0x2a64   :  { %v14073_v39 = vmul.f32 0.35355338, %v8430_v5 }
0x2a65   :  { %v11149_v12 = vpop.f32.mrf.mxu0 }
0x2a66   :  { %v8766_v29 = vsel %vm987_vm10, %v14073_v39, -inf }
0x2a67   :  { %v8433_v63 = vpop.f32.mrf.mxu0  ;;  %v8476_v16 = vpop.f32.mrf.mxu1  ;;  %8767 = vmax.xlane.f32.xlu1 %v8766_v29 }
0x2a68   :  { %v14077_v26 = vmul.f32 0.35355338, %v8476_v16 }
0x2a69   :  { %v11150_v18 = vpop.f32.mrf.mxu0  ;;  %v11155_v62 = vpop.f32.mrf.mxu1 }
0x2a6a   :  { %v8769_v43 = vsel %vm987_vm10, %v14077_v26, -inf }
0x2a6b   :  { %v8479_v38 = vpop.f32.mrf.mxu1  ;;  %8770 = vmax.xlane.f32.xlu0 %v8769_v43 }
0x2a6d   :  { %v11156_v58 = vpop.f32.mrf.mxu1 }
0x2ade   :  { %v8522_v56 = vpop.f32.mrf.mxu0  ;;  %v8568_v8 = vpop.f32.mrf.mxu1 }
0x2adf   :  { %v14081_v59 = vmul.f32 0.35355338, %v8522_v56  ;;  %v14083_v61 = vmul.f32 0.35355338, %v8568_v8  ;;  %v8865_v8 = vcombine.low %v8323_v23, %v8325_v49 }
0x2ae0   :  { %v11161_v51 = vpop.f32.mrf.mxu0  ;;  %v11167_v10 = vpop.f32.mrf.mxu1 }
0x2ae1   :  { %v8772_v25 = vsel %vm987_vm10, %v14081_v59, -inf  ;;  %v8775_v41 = vsel %vm987_vm10, %v14083_v61, -inf  ;;  %v8864_v51 = vcombine.low %v8317_v24, %v8319_v34 }
0x2ae2   :  { %v8525_v55 = vpop.f32.mrf.mxu0  ;;  %v8571_v3 = vpop.f32.mrf.mxu1  ;;  %8773 = vmax.xlane.f32.xlu0 %v8772_v25  ;;  %8776 = vmax.xlane.f32.xlu1 %v8775_v41 }
0x2ae4   :  { %v11162_v19 = vpop.f32.mrf.mxu0  ;;  %v11168_v4 = vpop.f32.mrf.mxu1 }
0x2ae6   :  { %v8614_v48 = vpop.f32.mrf.mxu0  ;;  %v8660_v7 = vpop.f32.mrf.mxu1 }
0x2ae7   :  { %v14089_v22 = vmul.f32 0.35355338, %v8614_v48  ;;  %v8763_v6 = vmul.f32 0.35355338, %v8660_v7 }
0x2ae8   :  { %v11173_v60 = vpop.f32.mrf.mxu0  ;;  %v11179_v0 = vpop.f32.mrf.mxu1 }
0x2ae9   :  { %v8778_v30 = vsel %vm987_vm10, %v14089_v22, -inf  ;;  %v8781_v35 = vsel %vm987_vm10, %v8763_v6, -inf }
0x2aea   :  { %v8617_v54 = vpop.f32.mrf.mxu0  ;;  %v8663_v33 = vpop.f32.mrf.mxu1  ;;  %8779 = vmax.xlane.f32.xlu0 %v8778_v30  ;;  %8782 = vmax.xlane.f32.xlu1 %v8781_v35 }
0x2aec   :  { %v11174_v53 = vpop.f32.mrf.mxu0  ;;  %v11180_v47 = vpop.f32.mrf.mxu1 }
0x2aee   :  { %v8706_v9 = vpop.f32.mrf.mxu0  ;;  %v8752_v46 = vpop.f32.mrf.mxu1 }
0x2aef   :  { %v14098_v50 = vmul.f32 0.35355338, %v8706_v9  ;;  %v14100_v27 = vmul.f32 0.35355338, %v8752_v46 }
0x2af0   :  { %v11185_v13 = vpop.f32.mrf.mxu0  ;;  %v11191_v11 = vpop.f32.mrf.mxu1 }
0x2af1   :  { %v8784_v17 = vsel %vm987_vm10, %v14098_v50, -inf  ;;  %v8787_v20 = vsel %vm987_vm10, %v14100_v27, -inf  ;;  %v8768_v40 = vpop.xlane.xlu1 %8767 }
0x2af2   :  { %v8709_v2 = vpop.f32.mrf.mxu0  ;;  %v8755_v45 = vpop.f32.mrf.mxu1  ;;  %v8790_v31 = vsub.f32 %v14073_v39, %v8768_v40 }
0x2af4   :  { %v11186_v21 = vpop.f32.mrf.mxu0  ;;  %v11192_v42 = vpop.f32.mrf.mxu1  ;;  %v8798_v28 = vmul.f32 1.442695, %v8790_v31 }
0x2af5   :  { %v8771_v57 = vpop.xlane.xlu0 %8770 }
0x2af6   :  { %11989 = vpow2.f32 %v8798_v28  ;;  %v8791_v5 = vsub.f32 %v14077_v26, %v8771_v57 }
0x2af8   :  { %v8800_v12 = vmul.f32 1.442695, %v8791_v5 }
0x2afa   :  { %11991 = vpow2.f32 %v8800_v12 }
0x2afb   :  { %11600 = vrot.lane.b32.xlu1 %v14028_v37, %s12061_s21 }
0x2b00   :  { %8330 = vrot.lane.b32.xlu0 %v14004_v14, %s12062_s22 }
0x2b03   :  { %v14120_v29 = vpop.eup %11989 }
0x2b07   :  { %v14124_v63 = vpop.eup %11991 }
0x2b1f   :  { %8785 = vmax.xlane.f32.xlu0 %v8784_v17  ;;  %8788 = vmax.xlane.f32.xlu1 %v8787_v20 }
0x2b30   :  { %8332 = vrot.lane.b32.xlu1 %v14011_v44, %s12062_s22 }
0x2b34   :  { %8338 = vrot.lane.b32.xlu1 %v14002_v32, %s12062_s22 }
0x2b35   :  { %8336 = vrot.lane.b32.xlu0 %v14024_v15, %s12062_s22 }
0x2b38   :  { %8344 = vrot.lane.b32.xlu1 %v14004_v14, %s12063_s26  ;;  %v8814_v14 = vsel %vm987_vm10, %v14120_v29, 0.0 }
0x2b39   :  { %11605 = vrot.lane.b32.xlu0 %v14028_v37, %s12062_s22 }
0x2b3c   :  { %8350 = vrot.lane.b32.xlu1 %v14024_v15, %s12063_s26  ;;  %v8817_v15 = vsel %vm987_vm10, %v14124_v63, 0.0 }
0x2b58   :  { %8815 = vadd.xlane.f32.xlu0 %v8814_v14 }
0x2b60   :  { %8818 = vadd.xlane.f32.xlu1 %v8817_v15 }
0x2b6b   :  { %v8777_v39 = vpop.xlane.xlu1 %8776  ;;  %v8774_v26 = vpop.xlane.xlu0 %8773 }
0x2b6c   :  { %v8793_v16 = vsub.f32 %v14083_v61, %v8777_v39  ;;  %v8792_v43 = vsub.f32 %v14081_v59, %v8774_v26 }
0x2b6e   :  { %v8804_v18 = vmul.f32 1.442695, %v8793_v16  ;;  %8346 = vrot.lane.b32.xlu0 %v14011_v44, %s12063_s26  ;;  %v8802_v25 = vmul.f32 1.442695, %v8792_v43 }
0x2b70   :  { %11993 = vpow2.f32 %v8804_v18 }
0x2b73   :  { %v8783_v62 = vpop.xlane.xlu1 %8782  ;;  %v8780_v58 = vpop.xlane.xlu0 %8779 }
0x2b74   :  { %v8795_v38 = vsub.f32 %v8763_v6, %v8783_v62  ;;  %v8794_v41 = vsub.f32 %v14089_v22, %v8780_v58 }
0x2b76   :  { %v8808_v56 = vmul.f32 1.442695, %v8795_v38  ;;  %v8806_v44 = vmul.f32 1.442695, %v8794_v41 }
0x2b77   :  { %v11601_v10 = vpop.permute.xlu1 %11600  ;;  %v8331_v30 = vpop.permute.xlu0 %8330 }
0x2b78   :  { %v11603_v55 = vunpack.i.h.bf16 %v11601_v10  ;;  %v11602_v61 = vunpack.i.l.bf16 %v11601_v10  ;;  %11995 = vpow2.f32 %v8808_v56 }
0x2b79   :  { %11997 = vpow2.f32 %v8802_v25 }
0x2b7a   :  { %v8881_v3 = vpack.c.bf16 %v11603_v55, %v8865_v8  ;;  %v8880_v19 = vpack.c.bf16 %v11602_v61, %v8864_v51  ;;  %11999 = vpow2.f32 %v8806_v44 }
0x2b7c   :  { %v9028_v12 = vsel %vm1200_vm9, %v8881_v3, 0 }
0x2b7d   :  { %v14133_v4 = vpop.eup %11993 }
0x2b7e   :  { %v8823_v59 = vsel %vm987_vm10, %v14133_v4, 0.0 }
0x2b7f   :  { %8824 = vadd.xlane.f32.xlu1 %v8823_v59 }
0x2b85   :  { %v14137_v48 = vpop.eup %11995 }
0x2b86   :  { %v8829_v7 = vsel %vm987_vm10, %v14137_v48, 0.0  ;;  %v14141_v22 = vpop.eup %11997 }
0x2b87   :  { %8830 = vadd.xlane.f32.xlu1 %v8829_v7  ;;  %v8820_v6 = vsel %vm987_vm10, %v14141_v22, 0.0  ;;  %v14145_v60 = vpop.eup %11999 }
0x2b88   :  { %v8826_v0 = vsel %vm987_vm10, %v14145_v60, 0.0 }
0x2b8d   :  { %8821 = vadd.xlane.f32.xlu0 %v8820_v6 }
0x2b91   :  { %8827 = vadd.xlane.f32.xlu0 %v8826_v0 }
0x2ba8   :  { %v8786_v35 = vpop.xlane.xlu0 %8785  ;;  %v8789_v54 = vpop.xlane.xlu1 %8788 }
0x2ba9   :  { %v8796_v33 = vsub.f32 %v14098_v50, %v8786_v35  ;;  %v8797_v53 = vsub.f32 %v14100_v27, %v8789_v54 }
0x2bab   :  { %v8810_v47 = vmul.f32 1.442695, %v8796_v33  ;;  %v8812_v9 = vmul.f32 1.442695, %v8797_v53 }
0x2bac   :  { %v8337_v46 = vpop.permute.xlu0 %8336  ;;  %v8333_v13 = vpop.permute.xlu1 %8332 }
0x2bad   :  { %12001 = vpow2.f32 %v8810_v47  ;;  %v8866_v11 = vcombine.low %v8331_v30, %v8333_v13 }
0x2bae   :  { %12003 = vpow2.f32 %v8812_v9 }
0x2bb0   :  { %v11606_v2 = vpop.permute.xlu0 %11605  ;;  %v8339_v27 = vpop.permute.xlu1 %8338 }
0x2bb1   :  { %v11607_v45 = vunpack.i.l.bf16 %v11606_v2  ;;  %v11608_v39 = vunpack.i.h.bf16 %v11606_v2  ;;  %v8867_v16 = vcombine.low %v8337_v46, %v8339_v27 }
0x2bb3   :  { %v8882_v21 = vpack.c.bf16 %v11607_v45, %v8866_v11  ;;  %v8883_v26 = vpack.c.bf16 %v11608_v39, %v8867_v16 }
0x2bb4   :  { %v14163_v34 = vpop.permute.xlu1 %8344 }
0x2bb5   :  { %v9120_v58 = vsel %vm1200_vm9, %v8883_v26, 0  ;;  %v9074_v61 = vsel %vm1200_vm9, %v8882_v21, 0 }
0x2bb8   :  { %v14165_v49 = vpop.permute.xlu1 %8350 }
0x2bba   :  { %v14151_v42 = vpop.eup %12001 }
0x2bbb   :  { %v14153_v17 = vpop.eup %12003  ;;  %v8832_v20 = vsel %vm987_vm10, %v14151_v42, 0.0 }
0x2bbc   :  { %8833 = vadd.xlane.f32.xlu0 %v8832_v20  ;;  %v8835_v50 = vsel %vm987_vm10, %v14153_v17, 0.0 }
0x2bbd   :  { %8836 = vadd.xlane.f32.xlu1 %v8835_v50 }
0x2bce   :  { %11610 = vrot.lane.b32.xlu1 %v14028_v37, %s12063_s26  ;;  %v8982_v37 = vsel %vm1200_vm9, %v8880_v19, 0 }
0x2bd2   :  { %8352 = vrot.lane.b32.xlu0 %v14002_v32, %s12063_s26 }
0x2be1   :  { %v8816_v23 = vpop.xlane.xlu0 %8815 }
0x2be2   :  { %12005 = vrcp.f32 %v8816_v23 }
0x2be5   :  { %v8347_v15 = vpop.permute.xlu0 %8346 }
0x2be9   :  { %v8819_v40 = vpop.xlane.xlu1 %8818 }
0x2bea   :  { %12007 = vrcp.f32 %v8819_v40 }
0x2bef   :  { %v12006_v31 = vpop.eup %12005 }
0x2bf0   :  { %v8846_v24 = vmul.f32 %v12006_v31, %v14120_v29 }
0x2bf2   :  { %v8854_v28 = vpack.c.bf16 %v8846_v24, %v8846_v24 }
0x2bf4   :  { %11196 = vmatmul.mubr.msk.bf16.vlgmr.msra.gmra.mxu0 %vm987_vm10, %v8854_v28 }
0x2bf5   :  { %11206 = vmatpush3.bf16.msra.mxu0 %v8982_v37  ;;  %11207 = vmatprep.mubr.msk.bf16.mxu0 %vm12060_vm0, %v12059_v1  ;;  %v11705_v37 = vld [vmem:[#allocation2 + $0x268] sm:$0xff]  }
0x2bf6   :  { %11217 = vmatprep.subr.bf16.mxu0 %v12059_v1 }
0x2bf7   :  { %v12008_v32 = vpop.eup %12007 }
0x2bf8   :  { %v8847_v57 = vmul.f32 %v12008_v32, %v14124_v63 }
0x2bfa   :  { %v8855_v5 = vpack.c.bf16 %v8847_v57, %v8847_v57 }
0x2bfc   :  { %11202 = vmatmul.mubr.msk.bf16.vlgmr.msra.gmra.mxu1 %vm987_vm10, %v8855_v5 }
0x2bfd   :  { %11212 = vmatpush3.bf16.msra.mxu1 %v9028_v12  ;;  %11213 = vmatprep.mubr.msk.bf16.mxu1 %vm12060_vm0, %v12059_v1 }
0x2bfe   :  { %11223 = vmatprep.subr.bf16.mxu1 %v12059_v1 }
0x2c08   :  { %v8825_v29 = vpop.xlane.xlu1 %8824 }
0x2c09   :  { %12009 = vrcp.f32 %v8825_v29 }
0x2c10   :  { %v8831_v14 = vpop.xlane.xlu1 %8830 }
0x2c11   :  { %12011 = vrcp.f32 %v8831_v14 }
0x2c16   :  { %v8822_v18 = vpop.xlane.xlu0 %8821  ;;  %v12010_v63 = vpop.eup %12009 }
0x2c17   :  { %12013 = vrcp.f32 %v8822_v18  ;;  %v8849_v62 = vmul.f32 %v12010_v63, %v14133_v4  ;;  %v11706_v63 = vld [vmem:[#allocation2 + $0x260] sm:$0xff]  }
0x2c19   :  { %v8857_v43 = vpack.c.bf16 %v8849_v62, %v8849_v62 }
0x2c1a   :  { %v8828_v38 = vpop.xlane.xlu0 %8827 }
0x2c1b   :  { %12015 = vrcp.f32 %v8828_v38  ;;  %11214 = vmatmul.mubr.msk.bf16.vlgmr.msra.gmra.mxu1 %vm987_vm10, %v8857_v43 }
0x2c1c   :  { %11224 = vmatpush3.bf16.msra.mxu1 %v9120_v58  ;;  %11225 = vmatprep.mubr.msk.bf16.mxu1 %vm12060_vm0, %v12059_v1 }
0x2c1d   :  { %11235 = vmatprep.subr.bf16.mxu1 %v12059_v1 }
0x2c1e   :  { %v12012_v56 = vpop.eup %12011 }
0x2c1f   :  { %v8851_v8 = vmul.f32 %v12012_v56, %v14137_v48 }
0x2c21   :  { %v8859_v51 = vpack.c.bf16 %v8851_v8, %v8851_v8 }
0x2c23   :  { %11226 = vmatmul.mubr.msk.bf16.vlgmr.msra.gmra.mxu1 %vm987_vm10, %v8859_v51 }
0x2c24   :  { %v12014_v10 = vpop.eup %12013  ;;  %11237 = vmatprep.mubr.msk.bf16.mxu1 %vm12060_vm0, %v12059_v1 }
0x2c25   :  { %v8848_v25 = vmul.f32 %v12014_v10, %v14141_v22  ;;  %v8868_v22 = vcombine.low %v14163_v34, %v8347_v15 }
0x2c27   :  { %v8856_v41 = vpack.c.bf16 %v8848_v25, %v8848_v25 }
0x2c28   :  { %v12016_v55 = vpop.eup %12015 }
0x2c29   :  { %11208 = vmatmul.mubr.msk.bf16.vlgmr.msra.gmra.mxu0 %vm987_vm10, %v8856_v41  ;;  %v8850_v3 = vmul.f32 %v12016_v55, %v14145_v60 }
0x2c2a   :  { %11218 = vmatpush3.bf16.msra.mxu0 %v9074_v61  ;;  %11219 = vmatprep.mubr.msk.bf16.mxu0 %vm12060_vm0, %v12059_v1 }
0x2c2b   :  { %11229 = vmatprep.subr.bf16.mxu0 %v12059_v1  ;;  %v8858_v19 = vpack.c.bf16 %v8850_v3, %v8850_v3 }
0x2c31   :  { %11220 = vmatmul.mubr.msk.bf16.vlgmr.msra.gmra.mxu0 %vm987_vm10, %v8858_v19 }
0x2c32   :  { %11231 = vmatprep.mubr.msk.bf16.mxu0 %vm12060_vm0, %v12059_v1 }
0x2c45   :  { %v8834_v44 = vpop.xlane.xlu0 %8833 }
0x2c46   :  { %12017 = vrcp.f32 %v8834_v44  ;;  %v8837_v4 = vpop.xlane.xlu1 %8836 }
0x2c47   :  { %12019 = vrcp.f32 %v8837_v4 }
0x2c49   :  { %v8353_v59 = vpop.permute.xlu0 %8352 }
0x2c4a   :  { %v8869_v48 = vcombine.low %v14165_v49, %v8353_v59  ;;  %v11611_v7 = vpop.permute.xlu1 %11610 }
0x2c4b   :  { %v11613_v6 = vunpack.i.h.bf16 %v11611_v7  ;;  %v11612_v60 = vunpack.i.l.bf16 %v11611_v7 }
0x2c4d   :  { %v8885_v0 = vpack.c.bf16 %v11613_v6, %v8869_v48  ;;  %v8884_v30 = vpack.c.bf16 %v11612_v60, %v8868_v22 }
0x2c4f   :  { %v9166_v35 = vsel %vm1200_vm9, %v8884_v30, 0  ;;  %v9212_v54 = vsel %vm1200_vm9, %v8885_v0, 0 }
0x2c50   :  { %11230 = vmatpush3.bf16.msra.mxu0 %v9166_v35  ;;  %11236 = vmatpush3.bf16.msra.mxu1 %v9212_v54  ;;  %v9995_v35 = vld [vmem:[%s14294_s3 + $0x2b] ss:$0 sm:$0xff] }
0x2c51   :  { %11241 = vmatprep.subr.bf16.mxu0 %v12059_v1  ;;  %11249 = vmatprep.subr.bf16.mxu1 %v12059_v1 }
0x2c53   :  { %v12018_v33 = vpop.eup %12017 }
0x2c54   :  { %v12020_v53 = vpop.eup %12019  ;;  %v8852_v47 = vmul.f32 %v12018_v33, %v14151_v42 }
0x2c55   :  { %v8853_v9 = vmul.f32 %v12020_v53, %v14153_v17 }
0x2c56   :  { %v8860_v46 = vpack.c.bf16 %v8852_v47, %v8852_v47 }
0x2c57   :  { %v8861_v13 = vpack.c.bf16 %v8853_v9, %v8853_v9 }
0x2c58   :  { %11232 = vmatmul.mubr.msk.bf16.vlgmr.msra.gmra.mxu0 %vm987_vm10, %v8860_v46 }
0x2c59   :  { %11238 = vmatmul.mubr.msk.bf16.vlgmr.msra.gmra.mxu1 %vm987_vm10, %v8861_v13  ;;  %11245 = vmatprep.mubr.msk.bf16.mxu0 %vm12060_vm0, %v12059_v1 }
0x2c5a   :  { %11253 = vmatprep.mubr.msk.bf16.mxu1 %vm12060_vm0, %v12059_v1  ;;  %11242 = vmatpush3.bf16.msra.mxu0 %v11705_v37  ;;  %v11712_v37 = vld [vmem:[#allocation2 + $0x2a0] sm:$0xff]  }
0x2c5b   :  { %11243 = vmatprep.subr.bf16.mxu0 %v12059_v1 }
0x2c5e   :  { %11244 = vmatpush3.bf16.msra.mxu0 %v11706_v63 }
0x2c5f   :  { %11257 = vmatprep.subr.bf16.mxu0 %v12059_v1 }
0x2cb4   :  { %v8926_v11 = vpop.f32.mrf.mxu0 }
0x2cb6   :  { %v11197_v2 = vpop.f32.mrf.mxu0 }
0x2cb8   :  { %v8929_v45 = vpop.f32.mrf.mxu0 }
0x2cba   :  { %v11198_v21 = vpop.f32.mrf.mxu0 }
0x2cbc   :  { %v8972_v20 = vpop.f32.mrf.mxu1 }
0x2cbe   :  { %v11203_v42 = vpop.f32.mrf.mxu1 }
0x2cc0   :  { %v8975_v50 = vpop.f32.mrf.mxu1 }
0x2cc2   :  { %v11204_v17 = vpop.f32.mrf.mxu1 }
0x2cdb   :  { %v9064_v27 = vpop.f32.mrf.mxu1 }
0x2cdd   :  { %v11215_v34 = vpop.f32.mrf.mxu1 }
0x2cdf   :  { %v9067_v23 = vpop.f32.mrf.mxu1 }
0x2ce1   :  { %v11216_v49 = vpop.f32.mrf.mxu1 }
0x2ce3   :  { %v9156_v40 = vpop.f32.mrf.mxu1 }
0x2ce5   :  { %v11227_v31 = vpop.f32.mrf.mxu1 }
0x2ce6   :  { %v11709_v31 = vld [vmem:[#allocation2 + $0x2b8] sm:$0xff]  }
0x2ce7   :  { %v9159_v24 = vpop.f32.mrf.mxu1 }
0x2ce8   :  { %v11710_v24 = vld [vmem:[#allocation2 + $0x2b0] sm:$0xff]  }
0x2ce9   :  { %v9018_v28 = vpop.f32.mrf.mxu0  ;;  %v11228_v57 = vpop.f32.mrf.mxu1 }
0x2cea   :  { %v11614_v32 = vpack.i.bf16 %v9064_v27, %v9018_v28  ;;  %v11711_v28 = vld [vmem:[#allocation2 + $0x2a8] sm:$0xff]  }
0x2ceb   :  { %v11209_v5 = vpop.f32.mrf.mxu0 }
0x2cec   :  { %11615 = vrot.lane.b32.xlu0 %v11614_v32, %s12064_s27  ;;  %v11713_v32 = vld [vmem:[#allocation2 + $0x298] sm:$0xff]  }
0x2ced   :  { %v9021_v12 = vpop.f32.mrf.mxu0 }
0x2cef   :  { %v11210_v29 = vpop.f32.mrf.mxu0 }
0x2cf1   :  { %v9110_v14 = vpop.f32.mrf.mxu0 }
0x2cf2   :  { %v11619_v15 = vpack.i.bf16 %v9156_v40, %v9110_v14  ;;  %v11707_v40 = vld [vmem:[#allocation2 + $0x278] sm:$0xff]  }
0x2cf3   :  { %v11221_v39 = vpop.f32.mrf.mxu0  ;;  %11250 = vmatpush3.bf16.msra.mxu1 %v11707_v40 }
0x2cf4   :  { %11620 = vrot.lane.b32.xlu1 %v11619_v15, %s12065_s28  ;;  %11251 = vmatprep.subr.bf16.mxu1 %v12059_v1 }
0x2cf5   :  { %v9113_v16 = vpop.f32.mrf.mxu0 }
0x2cf7   :  { %v11222_v18 = vpop.f32.mrf.mxu0 }
0x2cf8   :  { %v9999_v18 = vld [vmem:[%s14294_s3 + $0x30] ss:$0 sm:$0xff] }
0x2d18   :  { %v9202_v26 = vpop.f32.mrf.mxu0 }
0x2d19   :  { %v9248_v62 = vpop.f32.mrf.mxu1 }
0x2d1a   :  { %v11624_v43 = vpack.i.bf16 %v9248_v62, %v9202_v26  ;;  %v11233_v38 = vpop.f32.mrf.mxu0 }
0x2d1b   :  { %v11239_v58 = vpop.f32.mrf.mxu1 }
0x2d1c   :  { %11625 = vrot.lane.b32.xlu0 %v11624_v43, %s12066_s29  ;;  %v9205_v56 = vpop.f32.mrf.mxu0  ;;  %v10000_v43 = vld [vmem:[%s14294_s3 + $0x31] ss:$0 sm:$0xff] }
0x2d1d   :  { %v9251_v8 = vpop.f32.mrf.mxu1 }
0x2d1e   :  { %v11234_v51 = vpop.f32.mrf.mxu0 }
0x2d1f   :  { %v11240_v10 = vpop.f32.mrf.mxu1  ;;  %v11714_v51 = vld [vmem:[#allocation2 + $0x290] sm:$0xff]  }
0x2d20   :  { %v11715_v10 = vld [vmem:[#allocation2 + $0x288] sm:$0xff]  }
0x2d5e   :  { %v11616_v25 = vpop.permute.xlu0 %11615 }
0x2d5f   :  { %v11618_v55 = vunpack.i.h.bf16 %v11616_v25  ;;  %v11617_v61 = vunpack.i.l.bf16 %v11616_v25  ;;  %v11716_v25 = vld [vmem:[#allocation2 + $0x280] sm:$0xff]  }
0x2d61   :  { %v9279_v4 = vsel %vm594_vm8, %v8972_v20, %v11618_v55  ;;  %v9278_v59 = vsel %vm594_vm8, %v8926_v11, %v11617_v61 }
0x2d66   :  { %v11621_v41 = vpop.permute.xlu1 %11620 }
0x2d67   :  { %v11623_v3 = vunpack.i.h.bf16 %v11621_v41  ;;  %v11622_v19 = vunpack.i.l.bf16 %v11621_v41  ;;  %v10001_v41 = vld [vmem:[%s14294_s3 + $0x2c] ss:$0 sm:$0xff] }
0x2d69   :  { %v9281_v22 = vsel %vm1626_vm12, %v9279_v4, %v11623_v3  ;;  %v9280_v6 = vsel %vm1626_vm12, %v9278_v59, %v11622_v19 }
0x2d8e   :  { %v11626_v44 = vpop.permute.xlu0 %11625 }
0x2d8f   :  { %v11628_v48 = vunpack.i.h.bf16 %v11626_v44  ;;  %v11627_v7 = vunpack.i.l.bf16 %v11626_v44 }
0x2d91   :  { %v9283_v60 = vsel %vm1631_vm13, %v9281_v22, %v11628_v48  ;;  %v9282_v0 = vsel %vm1631_vm13, %v9280_v6, %v11627_v7  ;;  %v10005_v22 = vld [vmem:[%s14294_s3 + $0x2d] ss:$0 sm:$0xff] }
0x2d92   :  { %v9284_v30 = vpack.c.bf16 %v9283_v60, %v9282_v0 }
0x2d94   :  { %11246 = vmatmul.mubr.msk.bf16.vlgmr.msra.gmra.mxu0 %vm206_vm7, %v9284_v30 }
0x2d95   :  { %11273 = vmatprep.mubr.msk.bf16.mxu0 %vm12060_vm0, %v12059_v1  ;;  %11258 = vmatpush3.bf16.msra.mxu0 %v11709_v31  ;;  %v10014_v31 = vld [vmem:[%s14294_s3 + $0x32] ss:$0 sm:$0xff] }
0x2d96   :  { %11259 = vmatprep.subr.bf16.mxu0 %v12059_v1 }
0x2d99   :  { %11260 = vmatpush3.bf16.msra.mxu0 %v11710_v24 }
0x2d9a   :  { %11261 = vmatprep.subr.bf16.mxu0 %v12059_v1 }
0x2d9d   :  { %11262 = vmatpush3.bf16.msra.mxu0 %v11711_v28  ;;  %v10015_v28 = vld [vmem:[%s14294_s3 + $0x33] ss:$0 sm:$0xff] }
0x2d9e   :  { %11263 = vmatprep.subr.bf16.mxu0 %v12059_v1 }
0x2da1   :  { %11264 = vmatpush3.bf16.msra.mxu0 %v11712_v37 }
0x2da2   :  { %11265 = vmatprep.subr.bf16.mxu0 %v12059_v1 }
0x2da5   :  { %11266 = vmatpush3.bf16.msra.mxu0 %v11713_v32 }
0x2da6   :  { %11267 = vmatprep.subr.bf16.mxu0 %v12059_v1 }
0x2da9   :  { %11268 = vmatpush3.bf16.msra.mxu0 %v11714_v51  ;;  %v11718_v51 = vld [vmem:[#allocation2 + $0x2c0] sm:$0xff]  }
0x2daa   :  { %11269 = vmatprep.subr.bf16.mxu0 %v12059_v1 }
0x2dad   :  { %11270 = vmatpush3.bf16.msra.mxu0 %v11715_v10 }
0x2dae   :  { %11271 = vmatprep.subr.bf16.mxu0 %v12059_v1 }
0x2db1   :  { %11272 = vmatpush3.bf16.msra.mxu0 %v11716_v25 }
0x2e54   :  { %v9343_v54 = vpop.f32.mrf.mxu0 }
0x2e55   :  { %v9344_v33 = vadd.f32 %v9995_v35, %v9343_v54 }
0x2e56   :  { %v11247_v53 = vpop.f32.mrf.mxu0 }
0x2e57   :  { %v9350_v47 = vadd.f32 %v9344_v33, %v13968_v36 }
0x2e58   :  { %v9346_v9 = vpop.f32.mrf.mxu0 }
0x2e59   :  { %v9347_v46 = vadd.f32 %v9995_v35, %v9346_v9  ;;  %v9352_v13 = vsel %vm206_vm7, %v9350_v47, 0.0 }
0x2e5a   :  { %9353 = vadd.xlane.f32.xlu1 %v9352_v13  ;;  %v11248_v11 = vpop.f32.mrf.mxu0 }
0x2e5b   :  { %v9351_v2 = vadd.f32 %v9347_v46, %v13970_v52  ;;  %v11708_v52 = vld [vmem:[#allocation2 + $0x270] sm:$0xff]  }
0x2e5c   :  { %11252 = vmatpush3.bf16.msra.mxu1 %v11708_v52 }
0x2e5d   :  { %v9355_v45 = vsel %vm206_vm7, %v9351_v2, 0.0  ;;  %11277 = vmatprep.subr.bf16.mxu1 %v12059_v1 }
0x2e5e   :  { %9356 = vadd.xlane.f32.xlu0 %v9355_v45 }
0x2ee3   :  { %v9354_v21 = vpop.xlane.xlu1 %9353 }
0x2ee4   :  { %v9358_v20 = vmul.f32 0.03125, %v9354_v21 }
0x2ee6   :  { %v9360_v42 = vsub.f32 %v9350_v47, %v9358_v20 }
0x2ee7   :  { %v9357_v50 = vpop.xlane.xlu0 %9356 }
0x2ee8   :  { %v9359_v17 = vmul.f32 0.03125, %v9357_v50  ;;  %v9362_v27 = vmul.f32 %v9360_v42, %v9360_v42 }
0x2eea   :  { %v9361_v34 = vsub.f32 %v9351_v2, %v9359_v17  ;;  %v9364_v36 = vsel %vm206_vm7, %v9362_v27, 0.0 }
0x2eeb   :  { %9365 = vadd.xlane.f32.xlu0 %v9364_v36 }
0x2eec   :  { %v9363_v23 = vmul.f32 %v9361_v34, %v9361_v34 }
0x2eee   :  { %v9367_v49 = vsel %vm206_vm7, %v9363_v23, 0.0 }
0x2eef   :  { %9368 = vadd.xlane.f32.xlu1 %v9367_v49 }
0x2f74   :  { %v9366_v57 = vpop.xlane.xlu0 %9365 }
0x2f75   :  { %v9370_v5 = vmul.f32 0.03125, %v9366_v57 }
0x2f77   :  { %v9372_v12 = vadd.f32 1e-05, %v9370_v5 }
0x2f78   :  { %v9369_v29 = vpop.xlane.xlu1 %9368 }
0x2f79   :  { %12021 = vrsqrt.f32 %v9372_v12  ;;  %v9371_v14 = vmul.f32 0.03125, %v9369_v29 }
0x2f7b   :  { %v9373_v15 = vadd.f32 1e-05, %v9371_v14 }
0x2f7d   :  { %12023 = vrsqrt.f32 %v9373_v15 }
0x2f86   :  { %v12022_v39 = vpop.eup %12021 }
0x2f87   :  { %v9376_v16 = vmul.f32 %v12022_v39, %v9360_v42 }
0x2f89   :  { %v9383_v26 = vmul.f32 %v9999_v18, %v9376_v16 }
0x2f8a   :  { %v12024_v63 = vpop.eup %12023 }
0x2f8b   :  { %v9377_v62 = vmul.f32 %v12024_v63, %v9361_v34  ;;  %v9390_v58 = vadd.f32 %v10000_v43, %v9383_v26 }
0x2f8d   :  { %v9384_v38 = vmul.f32 %v9999_v18, %v9377_v62 }
0x2f8f   :  { %v9391_v56 = vadd.f32 %v10000_v43, %v9384_v38 }
0x2f91   :  { %v9392_v8 = vpack.c.bf16 %v9391_v56, %v9390_v58 }
0x2f93   :  { %11254 = vmatmul.mubr.msk.bf16.vlgmr.msra.gmra.mxu1 %vm206_vm7, %v9392_v8  ;;  %v11717_v8 = vld [vmem:[#allocation2 + $0x2c8] sm:$0xff]  }
0x2f94   :  { %11281 = vmatprep.mubr.msk.bf16.mxu1 %vm12060_vm0, %v12059_v1  ;;  %11278 = vmatpush3.bf16.msra.mxu1 %v11717_v8 }
0x2f95   :  { %11279 = vmatprep.subr.bf16.mxu1 %v12059_v1  ;;  %v10017_v1 = vld [vmem:[%s14294_s3 + $0x37] ss:$0 sm:$0xff] }
0x2f98   :  { %11280 = vmatpush3.bf16.msra.mxu1 %v11718_v51 }
0x3053   :  { %v9451_v55 = vpop.f32.mrf.mxu1 }
0x3054   :  { %v9452_v3 = vadd.f32 %v10001_v41, %v9451_v55 }
0x3055   :  { %v11255_v61 = vpop.f32.mrf.mxu1 }
0x3056   :  { %v9458_v59 = vmax.f32 %v9452_v3, 0.0 }
0x3057   :  { %v9454_v19 = vpop.f32.mrf.mxu1 }
0x3058   :  { %v9455_v44 = vadd.f32 %v10001_v41, %v9454_v19 }
0x3059   :  { %v11256_v4 = vpop.f32.mrf.mxu1 }
0x305a   :  { %v9459_v48 = vmax.f32 %v9455_v44, 0.0  ;;  %v10016_v4 = vld [vmem:[%s14294_s3 + $0x36] ss:$0 sm:$0xff] }
0x305c   :  { %v9460_v7 = vpack.c.bf16 %v9459_v48, %v9458_v59 }
0x305e   :  { %11274 = vmatmul.mubr.bf16.vlgmr.msra.gmra.mxu0 %v9460_v7 }
0x311e   :  { %v9564_v6 = vpop.f32.mrf.mxu0 }
0x311f   :  { %v9565_v60 = vadd.f32 %v10005_v22, %v9564_v6 }
0x3120   :  { %v11275_v0 = vpop.f32.mrf.mxu0 }
0x3121   :  { %v9571_v30 = vadd.f32 %v9565_v60, %v9390_v58 }
0x3122   :  { %v9567_v35 = vpop.f32.mrf.mxu0 }
0x3123   :  { %v9568_v54 = vadd.f32 %v10005_v22, %v9567_v35  ;;  %v9573_v33 = vsel %vm206_vm7, %v9571_v30, 0.0 }
0x3124   :  { %9574 = vadd.xlane.f32.xlu0 %v9573_v33  ;;  %v11276_v53 = vpop.f32.mrf.mxu0 }
0x3125   :  { %v9572_v47 = vadd.f32 %v9568_v54, %v9391_v56 }
0x3127   :  { %v9576_v9 = vsel %vm206_vm7, %v9572_v47, 0.0 }
0x3128   :  { %9577 = vadd.xlane.f32.xlu1 %v9576_v9 }
0x31ad   :  { %v9575_v46 = vpop.xlane.xlu0 %9574 }
0x31ae   :  { %v9579_v13 = vmul.f32 0.03125, %v9575_v46 }
0x31b0   :  { %v9581_v11 = vsub.f32 %v9571_v30, %v9579_v13  ;;  %v10018_v30 = vld [vmem:[%s14294_s3 + $0x38] ss:$0 sm:$0xff] }
0x31b1   :  { %v9578_v2 = vpop.xlane.xlu1 %9577 }
0x31b2   :  { %v9580_v45 = vmul.f32 0.03125, %v9578_v2  ;;  %v9583_v21 = vmul.f32 %v9581_v11, %v9581_v11 }
0x31b4   :  { %v9582_v20 = vsub.f32 %v9572_v47, %v9580_v45  ;;  %v9585_v42 = vsel %vm206_vm7, %v9583_v21, 0.0 }
0x31b5   :  { %9586 = vadd.xlane.f32.xlu0 %v9585_v42 }
0x31b6   :  { %v9584_v50 = vmul.f32 %v9582_v20, %v9582_v20 }
0x31b8   :  { %v9588_v17 = vsel %vm206_vm7, %v9584_v50, 0.0 }
0x31b9   :  { %9589 = vadd.xlane.f32.xlu1 %v9588_v17 }
0x323e   :  { %v9587_v27 = vpop.xlane.xlu0 %9586 }
0x323f   :  { %v9591_v34 = vmul.f32 0.03125, %v9587_v27 }
0x3241   :  { %v9593_v36 = vadd.f32 1e-05, %v9591_v34 }
0x3242   :  { %v9590_v23 = vpop.xlane.xlu1 %9589 }
0x3243   :  { %12025 = vrsqrt.f32 %v9593_v36  ;;  %v9592_v49 = vmul.f32 0.03125, %v9590_v23 }
0x3245   :  { %v9594_v40 = vadd.f32 1e-05, %v9592_v49 }
0x3247   :  { %12027 = vrsqrt.f32 %v9594_v40 }
0x3250   :  { %v12026_v52 = vpop.eup %12025 }
0x3251   :  { %v9597_v24 = vmul.f32 %v12026_v52, %v9581_v11 }
0x3253   :  { %v9604_v37 = vmul.f32 %v10014_v31, %v9597_v24 }
0x3254   :  { %v12028_v32 = vpop.eup %12027 }
0x3255   :  { %v9611_v57 = vadd.f32 %v10015_v28, %v9604_v37  ;;  %v9598_v5 = vmul.f32 %v12028_v32, %v9582_v20 }
0x3257   :  { %v9613_v12 = vsel %vm206_vm7, %v9611_v57, 0.0  ;;  %v9605_v29 = vmul.f32 %v10014_v31, %v9598_v5 }
0x3258   :  { %9614 = vadd.xlane.f32.xlu0 %v9613_v12 }
0x3259   :  { %v9612_v14 = vadd.f32 %v10015_v28, %v9605_v29 }
0x325b   :  { %v9616_v15 = vsel %vm206_vm7, %v9612_v14, 0.0 }
0x325c   :  { %9617 = vadd.xlane.f32.xlu1 %v9616_v15 }
0x32e1   :  { %v9615_v39 = vpop.xlane.xlu0 %9614 }
0x32e2   :  { %v9619_v16 = vmul.f32 0.03125, %v9615_v39 }
0x32e4   :  { %v9621_v18 = vsub.f32 %v9611_v57, %v9619_v16 }
0x32e5   :  { %v9618_v63 = vpop.xlane.xlu1 %9617 }
0x32e6   :  { %v9620_v26 = vmul.f32 0.03125, %v9618_v63  ;;  %v9623_v62 = vmul.f32 %v9621_v18, %v9621_v18 }
0x32e8   :  { %v9622_v43 = vsub.f32 %v9612_v14, %v9620_v26  ;;  %v9625_v38 = vsel %vm206_vm7, %v9623_v62, 0.0 }
0x32e9   :  { %9626 = vadd.xlane.f32.xlu0 %v9625_v38 }
0x32ea   :  { %v9624_v58 = vmul.f32 %v9622_v43, %v9622_v43 }
0x32ec   :  { %v9628_v56 = vsel %vm206_vm7, %v9624_v58, 0.0 }
0x32ed   :  { %9629 = vadd.xlane.f32.xlu1 %v9628_v56 }
0x3372   :  { %v9627_v10 = vpop.xlane.xlu0 %9626 }
0x3373   :  { %v9631_v25 = vmul.f32 0.03125, %v9627_v10 }
0x3375   :  { %v9633_v41 = vadd.f32 1e-05, %v9631_v25 }
0x3376   :  { %v9630_v55 = vpop.xlane.xlu1 %9629 }
0x3377   :  { %12029 = vrsqrt.f32 %v9633_v41  ;;  %v9632_v61 = vmul.f32 0.03125, %v9630_v55 }
0x3379   :  { %v9634_v3 = vadd.f32 1e-05, %v9632_v61 }
0x337b   :  { %12031 = vrsqrt.f32 %v9634_v3 }
0x3384   :  { %v12030_v19 = vpop.eup %12029 }
0x3385   :  { %v9637_v44 = vmul.f32 %v12030_v19, %v9621_v18 }
0x3387   :  { %v9644_v48 = vmul.f32 %v10016_v4, %v9637_v44 }
0x3388   :  { %v12032_v59 = vpop.eup %12031 }
0x3389   :  { %v9638_v7 = vmul.f32 %v12032_v59, %v9622_v43  ;;  %v9651_v6 = vadd.f32 %v10017_v1, %v9644_v48 }
0x338b   :  { %v9645_v22 = vmul.f32 %v10016_v4, %v9638_v7 }
0x338d   :  { %v9652_v60 = vadd.f32 %v10017_v1, %v9645_v22 }
0x338f   :  { %v9653_v0 = vpack.c.bf16 %v9652_v60, %v9651_v6 }
0x3391   :  { %11282 = vmatmul.mubr.msk.bf16.vlgmr.msra.gmra.mxu1 %vm206_vm7, %v9653_v0 }
0x3451   :  { %v9712_v35 = vpop.f32.mrf.mxu1 }
0x3452   :  { %v9713_v54 = vadd.f32 %v10018_v30, %v9712_v35 }
0x3453   :  { %v11283_v33 = vpop.f32.mrf.mxu1 }
0x3454   :  { %9719 = vst [vmem:[%s14295_s4] sm:$0xff] %v9713_v54 }
0x3455   :  { %v9715_v53 = vpop.f32.mrf.mxu1 }
0x3456   :  { %v9716_v47 = vadd.f32 %v10018_v30, %v9715_v53 }
0x3457   :  { %v11284_v9 = vpop.f32.mrf.mxu1 }
0x3458   :  { %9720 = vst [vmem:[%s14295_s4 + $0x8] sm:$0xff] %v9716_v47 }
0x3459   :  { %9725 = vsyncpa [#allocation3], 1 }

</bundles_post_ra>
